<compile_context>
chip_gen: v7x
topology: tpu7x:2x2x1
jax: 0.10.0
libtpu: 0.0.40
codegen_flags: <defaults>
</compile_context>

<pallas_src>
import functools

import jax
import jax.numpy as jnp
from jax.experimental import pallas as pl
from jax.experimental.pallas import tpu as pltpu

NUM_CAPSULE = 5
ROUTINGS = 4
NUM_HIDDENS = 16          # small for the example; torch default was 128
BIDIRECTIONAL = True
FEAT = NUM_HIDDENS * (2 if BIDIRECTIONAL else 1)   # input feature dim
DIM_CAPSULE = FEAT        # required for the torch .view() to be legal

_TARGET_MXU_ROWS = 256    # 256 fills the v6e/v7x MXU row dim; v5e needs only 128


def capsule_kernel(x_ref, w_ref, out_ref, *, num_capsule, routings):
    """One batch-block per grid step.

    x_ref  : (R, F)   with R = BB*T rows (row r = batch b = r//T, time t = r%T)
    w_ref  : (F, E)   torch weight layout, E = NC*D
    out_ref: (BB, E)  routed capsule outputs, lane-dense
    """
    R, _F = x_ref.shape
    E = w_ref.shape[1]
    BB = out_ref.shape[0]
    NC = num_capsule
    D = E // NC
    T = R // BB

    # --- fused projection: a single MXU matmul for all capsules -------------
    u = jnp.dot(x_ref[...], w_ref[...],
                preferred_element_type=jnp.float32)            # (R, E)

    # --- 0/1 selection matrices (built once per block from iotas) -----------
    # P  (NC, E): P[n, n*D+d] = 1  -> capsule-segment broadcast (c @ P)
    # Pt (E, NC): transpose of P   -> capsule-segment reduce   (v @ Pt)
    # S  (BB, R): S[b, b*T+t] = 1  -> per-batch-element time-sum (S @ v)
    # St (R, BB): transpose of S   -> broadcast back over time   (St @ v)
    def seg_onehot(shape, seg_axis, elem_axis, seg_len):
        seg = jax.lax.broadcasted_iota(jnp.int32, shape, seg_axis)
        elem = jax.lax.broadcasted_iota(jnp.int32, shape, elem_axis)
        lo = seg * seg_len
        mask = (elem >= lo) & (elem < lo + seg_len)
        return jnp.where(mask, 1.0, 0.0).astype(jnp.float32)

    P = seg_onehot((NC, E), 0, 1, D)
    Pt = seg_onehot((E, NC), 1, 0, D)
    S = seg_onehot((BB, R), 0, 1, T)
    St = seg_onehot((R, BB), 1, 0, T)

    # --- dynamic routing, vectorized over batch x capsules ------------------
    b_log = jnp.zeros((R, NC), jnp.float32)   # routing logits (row r, capsule n)
    o = jnp.zeros((BB, E), jnp.float32)
    for i in range(routings):
        # softmax over the capsule axis (torch: softmax(b, dim=1))
        m = jnp.max(b_log, axis=-1, keepdims=True)
        e = jnp.exp(b_log - m)
        c = e * pl.reciprocal(jnp.sum(e, axis=-1, keepdims=True),
                              approx=True)                      # (R, NC)

        c_lanes = jnp.dot(c, P, preferred_element_type=jnp.float32)       # (R, E)
        # s[b, n*D+d] = sum_t c[b,t,n] * u_hat[b,t,n,d]
        s = jnp.dot(S, c_lanes * u, preferred_element_type=jnp.float32)   # (BB, E)

        # squash: s * rsqrt(||s||^2 + 1e-7), norm per capsule (D lanes)
        norm2 = jnp.dot(s * s, Pt, preferred_element_type=jnp.float32)    # (BB, NC)
        inv = jax.lax.rsqrt(norm2 + 1e-7)
        o = s * jnp.dot(inv, P, preferred_element_type=jnp.float32)       # (BB, E)

        if i < routings - 1:
            # b[b,t,n] = sum_d o[b,n,d] * u_hat[b,t,n,d]
            o_rows = jnp.dot(St, o, preferred_element_type=jnp.float32)   # (R, E)
            b_log = jnp.dot(o_rows * u, Pt,
                            preferred_element_type=jnp.float32)           # (R, NC)

    out_ref[...] = o   # lane-dense (BB, E) slab


@functools.partial(jax.jit,
                   static_argnames=("num_capsule", "routings", "block_batch"))
def capsule_forward(x, w, *, num_capsule=NUM_CAPSULE, routings=ROUTINGS,
                    block_batch=None):
    """x: (B, T, F) f32, w: (1, F, num_capsule * D) f32 (torch parameter shape)."""
    B, T, F = x.shape
    E = w.shape[-1]
    D = E // num_capsule
    # The torch forward's .view is only legal when dim_capsule == F.
    assert D == F, "Capsule forward requires dim_capsule == input feature dim"
    assert w.shape == (1, F, E)

    # Batch several examples per block so the fused matmul fills the MXU rows,
    # while keeping >= 2 grid blocks when possible (v7x megacore).
    if block_batch is None:
        target = max(1, _TARGET_MXU_ROWS // max(T, 1))
        block_batch = B
        for cand in range(min(target, B), 0, -1):
            if B % cand == 0 and (cand == B or cand % 8 == 0):
                block_batch = cand
                break
    BB = block_batch
    assert B % BB == 0

    x2 = x.reshape(B * T, F)     # contiguous rows; row r = (b = r//T, t = r%T)
    w2 = w.reshape(F, E)         # torch layout straight into the kernel

    kernel = functools.partial(capsule_kernel,
                               num_capsule=num_capsule, routings=routings)

    out = pl.pallas_call(
        kernel,
        out_shape=jax.ShapeDtypeStruct((B, E), jnp.float32),
        grid_spec=pltpu.PrefetchScalarGridSpec(
            num_scalar_prefetch=0,
            grid=(B // BB,),
            in_specs=[
                pl.BlockSpec((BB * T, F), lambda i: (i, 0)),
                pl.BlockSpec((F, E), lambda i: (0, 0)),
            ],
            out_specs=pl.BlockSpec((BB, E), lambda i: (i, 0)),
        ),
        compiler_params=pltpu.CompilerParams(
            dimension_semantics=("parallel",)),
    )(x2, w2)
    return out.reshape(B, num_capsule, D)


def capsule_ref(x, w, num_capsule, dim_capsule, routings):
    """Pure-JAX transcription of the torch forward (for verification)."""
    B, T, _ = x.shape
    u_hat = jnp.matmul(x, w)                                       # (B, T, NC*D)
    u_hat = u_hat.reshape(B, T, num_capsule, dim_capsule)
    u_hat = jnp.transpose(u_hat, (0, 2, 1, 3))                     # (B, NC, T, D)
    b = jnp.zeros(u_hat.shape[:3], jnp.float32)
    outputs = None
    for i in range(routings):
        c = jax.nn.softmax(b, axis=1)
        s = jnp.sum(c[..., None] * u_hat, axis=2)                  # (B, NC, D)
        outputs = s / jnp.sqrt(jnp.sum(s * s, axis=-1, keepdims=True) + 1e-7)
        if i < routings - 1:
            b = jnp.sum(outputs[:, :, None, :] * u_hat, axis=-1)
    return outputs


if __name__ == "__main__":
    key = jax.random.PRNGKey(0)
    kx, kw = jax.random.split(key)

    B, T = 64, 8
    x = jax.random.normal(kx, (B, T, FEAT), dtype=jnp.float32)

    # Deterministic xavier_normal_-style init for W of shape (1, F, NC*D):
    # fan_in = F * (NC*D), fan_out = 1 * (NC*D)  (torch convention for 3-D tensors)
    ncd = NUM_CAPSULE * DIM_CAPSULE
    fan_in, fan_out = FEAT * ncd, 1 * ncd
    std = (2.0 / (fan_in + fan_out)) ** 0.5
    w = std * jax.random.normal(kw, (1, FEAT, ncd), dtype=jnp.float32)

    out = capsule_forward(x, w)
    out = jax.block_until_ready(out)

    ref = capsule_ref(x, w, NUM_CAPSULE, DIM_CAPSULE, ROUTINGS)
    assert out.shape == (B, NUM_CAPSULE, DIM_CAPSULE)
    err = float(jnp.max(jnp.abs(out - ref)))
    # pl.reciprocal(approx=True) (EUP vrcp) introduces small (~1e-4-level)
    # numeric drift vs. the exact-divide reference; tolerance sized for that.
    assert err < 3e-3, err

    print("KERNEL_OK")
</pallas_src>

<mosaic_0001>
module attributes {stable_mosaic.version = 11 : i64} {
  func.func @capsule_kernel(%arg0: i32, %arg1: memref<256x32xf32, #tpu.memory_space<vmem>>, %arg2: memref<32x160xf32, #tpu.memory_space<vmem>>, %arg3: memref<32x160xf32, #tpu.memory_space<vmem>>) attributes {dimension_semantics = [#tpu.dimension_semantics<parallel>], iteration_bounds = array<i64: 2>, scalar_prefetch = 0 : i64, scratch_operands = 0 : i64, tpu.core_type = #tpu.core_type<tc>, window_params = [{transform_indices = @transform_0, window_bounds = array<i64: 256, 32>}, {pipeline_mode = #tpu.pipeline_mode<synchronous>, transform_indices = @transform_1, window_bounds = array<i64: 32, 160>}, {transform_indices = @transform_2, window_bounds = array<i64: 32, 160>}]} {
    %c0 = arith.constant 0 : index
    %c0_0 = arith.constant 0 : index
    %0 = vector.load %arg1[%c0, %c0_0] : memref<256x32xf32, #tpu.memory_space<vmem>>, vector<256x32xf32>
    %c0_1 = arith.constant 0 : index
    %c0_2 = arith.constant 0 : index
    %1 = vector.load %arg2[%c0_1, %c0_2] : memref<32x160xf32, #tpu.memory_space<vmem>>, vector<32x160xf32>
    %cst = arith.constant dense<0.000000e+00> : vector<256x160xf32>
    %2 = tpu.matmul %0, %1, %cst {dimension_numbers = #tpu.dot_dimension_numbers<[1], [0], [0], [1], [0, 0, 1, 1], [], []>} : vector<256x32xf32>, vector<32x160xf32>, vector<256x160xf32> -> vector<256x160xf32>
    %3 = tpu.iota {dimensions = array<i32: 0>} : vector<5x160xi32>
    %4 = tpu.iota {dimensions = array<i32: 1>} : vector<5x160xi32>
    %c32_i32 = arith.constant 32 : i32
    %5 = vector.broadcast %c32_i32 : i32 to vector<5x160xi32>
    %6 = arith.muli %3, %5 : vector<5x160xi32>
    %7 = arith.cmpi sge, %4, %6 : vector<5x160xi32>
    %c32_i32_3 = arith.constant 32 : i32
    %8 = vector.broadcast %c32_i32_3 : i32 to vector<5x160xi32>
    %9 = arith.addi %6, %8 : vector<5x160xi32>
    %10 = arith.cmpi slt, %4, %9 : vector<5x160xi32>
    %11 = arith.andi %7, %10 : vector<5x160xi1>
    %cst_4 = arith.constant 1.000000e+00 : f32
    %cst_5 = arith.constant 0.000000e+00 : f32
    %12 = vector.broadcast %cst_4 : f32 to vector<5x160xf32>
    %13 = vector.broadcast %cst_5 : f32 to vector<5x160xf32>
    %14 = arith.select %11, %12, %13 : vector<5x160xi1>, vector<5x160xf32>
    %15 = tpu.iota {dimensions = array<i32: 1>} : vector<160x5xi32>
    %16 = tpu.iota {dimensions = array<i32: 0>} : vector<160x5xi32>
    %c32_i32_6 = arith.constant 32 : i32
    %17 = vector.broadcast %c32_i32_6 : i32 to vector<160x5xi32>
    %18 = arith.muli %15, %17 : vector<160x5xi32>
    %19 = arith.cmpi sge, %16, %18 : vector<160x5xi32>
    %c32_i32_7 = arith.constant 32 : i32
    %20 = vector.broadcast %c32_i32_7 : i32 to vector<160x5xi32>
    %21 = arith.addi %18, %20 : vector<160x5xi32>
    %22 = arith.cmpi slt, %16, %21 : vector<160x5xi32>
    %23 = arith.andi %19, %22 : vector<160x5xi1>
    %cst_8 = arith.constant 1.000000e+00 : f32
    %cst_9 = arith.constant 0.000000e+00 : f32
    %24 = vector.broadcast %cst_8 : f32 to vector<160x5xf32>
    %25 = vector.broadcast %cst_9 : f32 to vector<160x5xf32>
    %26 = arith.select %23, %24, %25 : vector<160x5xi1>, vector<160x5xf32>
    %27 = tpu.iota {dimensions = array<i32: 0>} : vector<32x256xi32>
    %28 = tpu.iota {dimensions = array<i32: 1>} : vector<32x256xi32>
    %c8_i32 = arith.constant 8 : i32
    %29 = vector.broadcast %c8_i32 : i32 to vector<32x256xi32>
    %30 = arith.muli %27, %29 : vector<32x256xi32>
    %31 = arith.cmpi sge, %28, %30 : vector<32x256xi32>
    %c8_i32_10 = arith.constant 8 : i32
    %32 = vector.broadcast %c8_i32_10 : i32 to vector<32x256xi32>
    %33 = arith.addi %30, %32 : vector<32x256xi32>
    %34 = arith.cmpi slt, %28, %33 : vector<32x256xi32>
    %35 = arith.andi %31, %34 : vector<32x256xi1>
    %cst_11 = arith.constant 1.000000e+00 : f32
    %cst_12 = arith.constant 0.000000e+00 : f32
    %36 = vector.broadcast %cst_11 : f32 to vector<32x256xf32>
    %37 = vector.broadcast %cst_12 : f32 to vector<32x256xf32>
    %38 = arith.select %35, %36, %37 : vector<32x256xi1>, vector<32x256xf32>
    %39 = tpu.iota {dimensions = array<i32: 1>} : vector<256x32xi32>
    %40 = tpu.iota {dimensions = array<i32: 0>} : vector<256x32xi32>
    %c8_i32_13 = arith.constant 8 : i32
    %41 = vector.broadcast %c8_i32_13 : i32 to vector<256x32xi32>
    %42 = arith.muli %39, %41 : vector<256x32xi32>
    %43 = arith.cmpi sge, %40, %42 : vector<256x32xi32>
    %c8_i32_14 = arith.constant 8 : i32
    %44 = vector.broadcast %c8_i32_14 : i32 to vector<256x32xi32>
    %45 = arith.addi %42, %44 : vector<256x32xi32>
    %46 = arith.cmpi slt, %40, %45 : vector<256x32xi32>
    %47 = arith.andi %43, %46 : vector<256x32xi1>
    %cst_15 = arith.constant 1.000000e+00 : f32
    %cst_16 = arith.constant 0.000000e+00 : f32
    %48 = vector.broadcast %cst_15 : f32 to vector<256x32xf32>
    %49 = vector.broadcast %cst_16 : f32 to vector<256x32xf32>
    %50 = arith.select %47, %48, %49 : vector<256x32xi1>, vector<256x32xf32>
    %cst_17 = arith.constant 0.000000e+00 : f32
    %51 = vector.broadcast %cst_17 : f32 to vector<256x5xf32>
    %cst_18 = arith.constant dense<0xFF800000> : vector<256xf32>
    %52 = vector.multi_reduction <maximumf>, %51, %cst_18 [1] : vector<256x5xf32> to vector<256xf32>
    %53 = vector.shape_cast %52 : vector<256xf32> to vector<256x1xf32>
    %54 = vector.broadcast %53 : vector<256x1xf32> to vector<256x5xf32>
    %55 = arith.subf %51, %54 : vector<256x5xf32>
    %56 = math.exp %55 : vector<256x5xf32>
    %cst_19 = arith.constant dense<0.000000e+00> : vector<256xf32>
    %57 = vector.multi_reduction <add>, %56, %cst_19 [1] : vector<256x5xf32> to vector<256xf32>
    %58 = vector.shape_cast %57 : vector<256xf32> to vector<256x1xf32>
    %59 = tpu.reciprocal %58 {approx = true} : vector<256x1xf32> -> vector<256x1xf32>
    %60 = vector.broadcast %59 : vector<256x1xf32> to vector<256x5xf32>
    %61 = arith.mulf %56, %60 : vector<256x5xf32>
    %cst_20 = arith.constant dense<0.000000e+00> : vector<256x160xf32>
    %62 = tpu.matmul %61, %14, %cst_20 {dimension_numbers = #tpu.dot_dimension_numbers<[1], [0], [0], [1], [0, 0, 1, 1], [], []>} : vector<256x5xf32>, vector<5x160xf32>, vector<256x160xf32> -> vector<256x160xf32>
    %63 = arith.mulf %62, %2 : vector<256x160xf32>
    %cst_21 = arith.constant dense<0.000000e+00> : vector<32x160xf32>
    %64 = tpu.matmul %38, %63, %cst_21 {dimension_numbers = #tpu.dot_dimension_numbers<[1], [0], [0], [1], [0, 0, 1, 1], [], []>} : vector<32x256xf32>, vector<256x160xf32>, vector<32x160xf32> -> vector<32x160xf32>
    %65 = arith.mulf %64, %64 : vector<32x160xf32>
    %cst_22 = arith.constant dense<0.000000e+00> : vector<32x5xf32>
    %66 = tpu.matmul %65, %26, %cst_22 {dimension_numbers = #tpu.dot_dimension_numbers<[1], [0], [0], [1], [0, 0, 1, 1], [], []>} : vector<32x160xf32>, vector<160x5xf32>, vector<32x5xf32> -> vector<32x5xf32>
    %cst_23 = arith.constant 1.000000e-07 : f32
    %67 = vector.broadcast %cst_23 : f32 to vector<32x5xf32>
    %68 = arith.addf %66, %67 : vector<32x5xf32>
    %69 = math.rsqrt %68 : vector<32x5xf32>
    %cst_24 = arith.constant dense<0.000000e+00> : vector<32x160xf32>
    %70 = tpu.matmul %69, %14, %cst_24 {dimension_numbers = #tpu.dot_dimension_numbers<[1], [0], [0], [1], [0, 0, 1, 1], [], []>} : vector<32x5xf32>, vector<5x160xf32>, vector<32x160xf32> -> vector<32x160xf32>
    %71 = arith.mulf %64, %70 : vector<32x160xf32>
    %cst_25 = arith.constant dense<0.000000e+00> : vector<256x160xf32>
    %72 = tpu.matmul %50, %71, %cst_25 {dimension_numbers = #tpu.dot_dimension_numbers<[1], [0], [0], [1], [0, 0, 1, 1], [], []>} : vector<256x32xf32>, vector<32x160xf32>, vector<256x160xf32> -> vector<256x160xf32>
    %73 = arith.mulf %72, %2 : vector<256x160xf32>
    %cst_26 = arith.constant dense<0.000000e+00> : vector<256x5xf32>
    %74 = tpu.matmul %73, %26, %cst_26 {dimension_numbers = #tpu.dot_dimension_numbers<[1], [0], [0], [1], [0, 0, 1, 1], [], []>} : vector<256x160xf32>, vector<160x5xf32>, vector<256x5xf32> -> vector<256x5xf32>
    %cst_27 = arith.constant dense<0xFF800000> : vector<256xf32>
    %75 = vector.multi_reduction <maximumf>, %74, %cst_27 [1] : vector<256x5xf32> to vector<256xf32>
    %76 = vector.shape_cast %75 : vector<256xf32> to vector<256x1xf32>
    %77 = vector.broadcast %76 : vector<256x1xf32> to vector<256x5xf32>
    %78 = arith.subf %74, %77 : vector<256x5xf32>
    %79 = math.exp %78 : vector<256x5xf32>
    %cst_28 = arith.constant dense<0.000000e+00> : vector<256xf32>
    %80 = vector.multi_reduction <add>, %79, %cst_28 [1] : vector<256x5xf32> to vector<256xf32>
    %81 = vector.shape_cast %80 : vector<256xf32> to vector<256x1xf32>
    %82 = tpu.reciprocal %81 {approx = true} : vector<256x1xf32> -> vector<256x1xf32>
    %83 = vector.broadcast %82 : vector<256x1xf32> to vector<256x5xf32>
    %84 = arith.mulf %79, %83 : vector<256x5xf32>
    %cst_29 = arith.constant dense<0.000000e+00> : vector<256x160xf32>
    %85 = tpu.matmul %84, %14, %cst_29 {dimension_numbers = #tpu.dot_dimension_numbers<[1], [0], [0], [1], [0, 0, 1, 1], [], []>} : vector<256x5xf32>, vector<5x160xf32>, vector<256x160xf32> -> vector<256x160xf32>
    %86 = arith.mulf %85, %2 : vector<256x160xf32>
    %cst_30 = arith.constant dense<0.000000e+00> : vector<32x160xf32>
    %87 = tpu.matmul %38, %86, %cst_30 {dimension_numbers = #tpu.dot_dimension_numbers<[1], [0], [0], [1], [0, 0, 1, 1], [], []>} : vector<32x256xf32>, vector<256x160xf32>, vector<32x160xf32> -> vector<32x160xf32>
    %88 = arith.mulf %87, %87 : vector<32x160xf32>
    %cst_31 = arith.constant dense<0.000000e+00> : vector<32x5xf32>
    %89 = tpu.matmul %88, %26, %cst_31 {dimension_numbers = #tpu.dot_dimension_numbers<[1], [0], [0], [1], [0, 0, 1, 1], [], []>} : vector<32x160xf32>, vector<160x5xf32>, vector<32x5xf32> -> vector<32x5xf32>
    %cst_32 = arith.constant 1.000000e-07 : f32
    %90 = vector.broadcast %cst_32 : f32 to vector<32x5xf32>
    %91 = arith.addf %89, %90 : vector<32x5xf32>
    %92 = math.rsqrt %91 : vector<32x5xf32>
    %cst_33 = arith.constant dense<0.000000e+00> : vector<32x160xf32>
    %93 = tpu.matmul %92, %14, %cst_33 {dimension_numbers = #tpu.dot_dimension_numbers<[1], [0], [0], [1], [0, 0, 1, 1], [], []>} : vector<32x5xf32>, vector<5x160xf32>, vector<32x160xf32> -> vector<32x160xf32>
    %94 = arith.mulf %87, %93 : vector<32x160xf32>
    %cst_34 = arith.constant dense<0.000000e+00> : vector<256x160xf32>
    %95 = tpu.matmul %50, %94, %cst_34 {dimension_numbers = #tpu.dot_dimension_numbers<[1], [0], [0], [1], [0, 0, 1, 1], [], []>} : vector<256x32xf32>, vector<32x160xf32>, vector<256x160xf32> -> vector<256x160xf32>
    %96 = arith.mulf %95, %2 : vector<256x160xf32>
    %cst_35 = arith.constant dense<0.000000e+00> : vector<256x5xf32>
    %97 = tpu.matmul %96, %26, %cst_35 {dimension_numbers = #tpu.dot_dimension_numbers<[1], [0], [0], [1], [0, 0, 1, 1], [], []>} : vector<256x160xf32>, vector<160x5xf32>, vector<256x5xf32> -> vector<256x5xf32>
    %cst_36 = arith.constant dense<0xFF800000> : vector<256xf32>
    %98 = vector.multi_reduction <maximumf>, %97, %cst_36 [1] : vector<256x5xf32> to vector<256xf32>
    %99 = vector.shape_cast %98 : vector<256xf32> to vector<256x1xf32>
    %100 = vector.broadcast %99 : vector<256x1xf32> to vector<256x5xf32>
    %101 = arith.subf %97, %100 : vector<256x5xf32>
    %102 = math.exp %101 : vector<256x5xf32>
    %cst_37 = arith.constant dense<0.000000e+00> : vector<256xf32>
    %103 = vector.multi_reduction <add>, %102, %cst_37 [1] : vector<256x5xf32> to vector<256xf32>
    %104 = vector.shape_cast %103 : vector<256xf32> to vector<256x1xf32>
    %105 = tpu.reciprocal %104 {approx = true} : vector<256x1xf32> -> vector<256x1xf32>
    %106 = vector.broadcast %105 : vector<256x1xf32> to vector<256x5xf32>
    %107 = arith.mulf %102, %106 : vector<256x5xf32>
    %cst_38 = arith.constant dense<0.000000e+00> : vector<256x160xf32>
    %108 = tpu.matmul %107, %14, %cst_38 {dimension_numbers = #tpu.dot_dimension_numbers<[1], [0], [0], [1], [0, 0, 1, 1], [], []>} : vector<256x5xf32>, vector<5x160xf32>, vector<256x160xf32> -> vector<256x160xf32>
    %109 = arith.mulf %108, %2 : vector<256x160xf32>
    %cst_39 = arith.constant dense<0.000000e+00> : vector<32x160xf32>
    %110 = tpu.matmul %38, %109, %cst_39 {dimension_numbers = #tpu.dot_dimension_numbers<[1], [0], [0], [1], [0, 0, 1, 1], [], []>} : vector<32x256xf32>, vector<256x160xf32>, vector<32x160xf32> -> vector<32x160xf32>
    %111 = arith.mulf %110, %110 : vector<32x160xf32>
    %cst_40 = arith.constant dense<0.000000e+00> : vector<32x5xf32>
    %112 = tpu.matmul %111, %26, %cst_40 {dimension_numbers = #tpu.dot_dimension_numbers<[1], [0], [0], [1], [0, 0, 1, 1], [], []>} : vector<32x160xf32>, vector<160x5xf32>, vector<32x5xf32> -> vector<32x5xf32>
    %cst_41 = arith.constant 1.000000e-07 : f32
    %113 = vector.broadcast %cst_41 : f32 to vector<32x5xf32>
    %114 = arith.addf %112, %113 : vector<32x5xf32>
    %115 = math.rsqrt %114 : vector<32x5xf32>
    %cst_42 = arith.constant dense<0.000000e+00> : vector<32x160xf32>
    %116 = tpu.matmul %115, %14, %cst_42 {dimension_numbers = #tpu.dot_dimension_numbers<[1], [0], [0], [1], [0, 0, 1, 1], [], []>} : vector<32x5xf32>, vector<5x160xf32>, vector<32x160xf32> -> vector<32x160xf32>
    %117 = arith.mulf %110, %116 : vector<32x160xf32>
    %cst_43 = arith.constant dense<0.000000e+00> : vector<256x160xf32>
    %118 = tpu.matmul %50, %117, %cst_43 {dimension_numbers = #tpu.dot_dimension_numbers<[1], [0], [0], [1], [0, 0, 1, 1], [], []>} : vector<256x32xf32>, vector<32x160xf32>, vector<256x160xf32> -> vector<256x160xf32>
    %119 = arith.mulf %118, %2 : vector<256x160xf32>
    %cst_44 = arith.constant dense<0.000000e+00> : vector<256x5xf32>
    %120 = tpu.matmul %119, %26, %cst_44 {dimension_numbers = #tpu.dot_dimension_numbers<[1], [0], [0], [1], [0, 0, 1, 1], [], []>} : vector<256x160xf32>, vector<160x5xf32>, vector<256x5xf32> -> vector<256x5xf32>
    %cst_45 = arith.constant dense<0xFF800000> : vector<256xf32>
    %121 = vector.multi_reduction <maximumf>, %120, %cst_45 [1] : vector<256x5xf32> to vector<256xf32>
    %122 = vector.shape_cast %121 : vector<256xf32> to vector<256x1xf32>
    %123 = vector.broadcast %122 : vector<256x1xf32> to vector<256x5xf32>
    %124 = arith.subf %120, %123 : vector<256x5xf32>
    %125 = math.exp %124 : vector<256x5xf32>
    %cst_46 = arith.constant dense<0.000000e+00> : vector<256xf32>
    %126 = vector.multi_reduction <add>, %125, %cst_46 [1] : vector<256x5xf32> to vector<256xf32>
    %127 = vector.shape_cast %126 : vector<256xf32> to vector<256x1xf32>
    %128 = tpu.reciprocal %127 {approx = true} : vector<256x1xf32> -> vector<256x1xf32>
    %129 = vector.broadcast %128 : vector<256x1xf32> to vector<256x5xf32>
    %130 = arith.mulf %125, %129 : vector<256x5xf32>
    %cst_47 = arith.constant dense<0.000000e+00> : vector<256x160xf32>
    %131 = tpu.matmul %130, %14, %cst_47 {dimension_numbers = #tpu.dot_dimension_numbers<[1], [0], [0], [1], [0, 0, 1, 1], [], []>} : vector<256x5xf32>, vector<5x160xf32>, vector<256x160xf32> -> vector<256x160xf32>
    %132 = arith.mulf %131, %2 : vector<256x160xf32>
    %cst_48 = arith.constant dense<0.000000e+00> : vector<32x160xf32>
    %133 = tpu.matmul %38, %132, %cst_48 {dimension_numbers = #tpu.dot_dimension_numbers<[1], [0], [0], [1], [0, 0, 1, 1], [], []>} : vector<32x256xf32>, vector<256x160xf32>, vector<32x160xf32> -> vector<32x160xf32>
    %134 = arith.mulf %133, %133 : vector<32x160xf32>
    %cst_49 = arith.constant dense<0.000000e+00> : vector<32x5xf32>
    %135 = tpu.matmul %134, %26, %cst_49 {dimension_numbers = #tpu.dot_dimension_numbers<[1], [0], [0], [1], [0, 0, 1, 1], [], []>} : vector<32x160xf32>, vector<160x5xf32>, vector<32x5xf32> -> vector<32x5xf32>
    %cst_50 = arith.constant 1.000000e-07 : f32
    %136 = vector.broadcast %cst_50 : f32 to vector<32x5xf32>
    %137 = arith.addf %135, %136 : vector<32x5xf32>
    %138 = math.rsqrt %137 : vector<32x5xf32>
    %cst_51 = arith.constant dense<0.000000e+00> : vector<32x160xf32>
    %139 = tpu.matmul %138, %14, %cst_51 {dimension_numbers = #tpu.dot_dimension_numbers<[1], [0], [0], [1], [0, 0, 1, 1], [], []>} : vector<32x5xf32>, vector<5x160xf32>, vector<32x160xf32> -> vector<32x160xf32>
    %140 = arith.mulf %133, %139 : vector<32x160xf32>
    %c0_52 = arith.constant 0 : index
    %c0_53 = arith.constant 0 : index
    %141 = vector.load %arg3[%c0_52, %c0_53] : memref<32x160xf32, #tpu.memory_space<vmem>>, vector<32x160xf32>
    tpu.vector_store %arg3[%c0_52, %c0_53], %140 {strides = array<i32>} : memref<32x160xf32, #tpu.memory_space<vmem>>, vector<32x160xf32>,
    return
  }
  func.func @transform_0(%arg0: i32) -> (i32, i32) {
    %c0_i32 = arith.constant 0 : i32
    %c0_i32_0 = arith.constant 0 : i32
    return %arg0, %c0_i32 : i32, i32
  }
  func.func @transform_1(%arg0: i32) -> (i32, i32) {
    %c0_i32 = arith.constant 0 : i32
    %c0_i32_0 = arith.constant 0 : i32
    %c0_i32_1 = arith.constant 0 : i32
    return %c0_i32, %c0_i32_0 : i32, i32
  }
  func.func @transform_2(%arg0: i32) -> (i32, i32) {
    %c0_i32 = arith.constant 0 : i32
    %c0_i32_0 = arith.constant 0 : i32
    return %arg0, %c0_i32 : i32, i32
  }
}

</mosaic_0001>

<bundles_post_ra>
// kernel: capsule_forward.1
= control target key start
LH: loop header
LB: loop body
LE: loop exit
PB: predicated region body
PF: predicated region fallthrough
CT: control target
= control target key end

     0   :  { %s8344_s9 = smov 0   ;;  %s11703_s0 = inlined_call_operand.vmem [shape: f32[512,32], index: 0, kind: input, shape index: {}]   ;;  %s11704_s1 = inlined_call_operand.vmem [shape: f32[32,160], index: 1, kind: input, shape index: {}]   ;;  %s11705_s2 = inlined_call_operand.vmem [shape: f32[64,160], index: 2, kind: output, shape index: {}]  }
   0x1 LB: > { %s6800_s10 = sadd.s32 4294967295, %s8323_s9   ;;  %p6804_p0 = scmp.ge.s32.totalorder %s8323_s9, 1  ;;  %s8323_s9 = sphi %s8344_s9, %s12_s9  }
   0x2   : > { %p113_p1 = scmp.lt.s32.totalorder %s8323_s9, 3 }
   0x4   : > { %p114_p2 = pnand %p6804_p0, %p113_p1 }
   0x6   : > { %117 = sbr.rel (%p114_p2) target bundleno = 6465 (0x1941), region = 28 }
   0xd   : > { %vm11759_vm0 = vcmask 39936   ;;  %v182_v0 = vld [vmem:[%s11704_s1 + $0x8] sm:$0xff]  ;;  %v184_v1 = vld [vmem:[%s11704_s1 + $0x18] sm:$0xff]  ;;  %v181_v2 = vld [vmem:[%s11704_s1] sm:$0xff]  ;;  %v11706_v3 = vmov 0.0   ;;  %s6805_s23 = sshll.u32 %s6800_s10, 5  ;;  %v543_v14 = vlaneseq }
   0xe   : > { %v842_v4 = vsel %vm11759_vm0, 1.0, %v11706_v3  ;;  %v7385_v5 = vpack.c.bf16 %v184_v1, %v182_v0  ;;  %v183_v6 = vld [vmem:[%s11704_s1 + $0x10] sm:$0xff]  ;;  %v186_v7 = vld [vmem:[%s11704_s1 + $0x28] sm:$0xff]  ;;  %v188_v8 = vld [vmem:[%s11704_s1 + $0x38] sm:$0xff]  ;;  %530 = vmatprep.mubr.f32.mxu1 %v11706_v3  ;;  %350 = vmatprep.mubr.f32.mxu0 %v11706_v3  ;;  %p137_p3 = scmp.lt.s32.totalorder %s6805_s23, 63  ;;  %vm11762_vm1 = vcmask 261120  }
   0xf   : > { %843 = vadd.xlane.f32.xlu0 %v842_v4  ;;  %v7387_v9 = vpack.c.bf16 %v183_v6, %v181_v2  ;;  %v7389_v10 = vpack.c.bf16 %v188_v8, %v186_v7  ;;  %v185_v11 = vld [vmem:[%s11704_s1 + $0x20] sm:$0xff]  ;;  %v187_v12 = vld [vmem:[%s11704_s1 + $0x30] sm:$0xff]  ;;  %v8387_v15 = vshrl.u32 %v543_v14, 7  ;;  %v8389_v16 = vand.u32 127, %v543_v14  ;;  %s6807_s4 = sshll.u32 %s6800_s10, 2 }
  0x10   : > { %7883 = vmatprep.subr.bf16.mxu1 %v7385_v5  ;;  %7386 = vmatprep.subr.bf16.mxu0 %v7385_v5  ;;  %v7391_v13 = vpack.c.bf16 %v187_v12, %v185_v11  ;;  %s13093_s23 = smov (!%p137_p3, %s6805_s23), 63  ;;  %vm11763_vm5 = vcmask 1044480   ;;  %p143_p4 = scmp.lt.s32.totalorder %s6807_s4, 7 }
  0x11   : > { %7885 = vmatpush1.bf16.msra.mxu1 %v7387_v9  ;;  %7388 = vmatpush1.bf16.msra.mxu0 %v7387_v9  ;;  %s6806_s28 = sshll.u32 %s13093_s23, 3  ;;  %v8395_v19 = vadd.s32 128, %v8389_v16  ;;  %v548_v20 = vmul.u32 32, %v8387_v15 }
  0x12   : > { %7884 = vmatprep.subr.bf16.mxu1 %v7389_v10  ;;  %7390 = vmatprep.subr.bf16.mxu0 %v7389_v10  ;;  %s8385_s3 = scalar_lea.vmem %s11703_s0, %s6806_s28  ;;  %s13095_s4 = smov (!%p143_p4, %s6807_s4), 7 }
  0x13   : > { %v179_v17 = vld [vmem:[%s8385_s3 + $0xf0] sm:$0xff]  ;;  %v149_v18 = vld [vmem:[%s8385_s3] sm:$0xff]  ;;  %12024 = vst [vmem:[#allocation2_spill] sm:$0xff] %v8395_v19  ;;  %v180_v21 = vld [vmem:[%s8385_s3 + $0xf8] sm:$0xff]  ;;  %vm550_vm2 = vcmp.ge.s32.totalorder %v8395_v19, %v548_v20  ;;  %v551_v22 = vadd.s32 32, %v548_v20  ;;  %vm549_vm3 = vcmp.ge.s32.totalorder %v8389_v16, %v548_v20  ;;  %s7384_s5 = sshll.u32 %s13095_s4, 4 }
  0x14   : > { %v150_v25 = vld [vmem:[%s8385_s3 + $0x8] sm:$0xff]  ;;  %v151_v26 = vld [vmem:[%s8385_s3 + $0x10] sm:$0xff]  ;;  %v152_v27 = vld [vmem:[%s8385_s3 + $0x18] sm:$0xff]  ;;  %s147_s8 = scalar_lea.vmem %s11705_s2, %s7384_s5 }
  0x15   : > { %7886 = vmatpush1.bf16.msra.mxu1 %v7391_v13  ;;  %7392 = vmatpush1.bf16.msra.mxu0 %v7391_v13  ;;  %vm553_vm4 = vcmp.lt.s32.totalorder %v8395_v19, %v551_v22  ;;  %vm552_vm6 = vcmp.lt.s32.totalorder %v8389_v16, %v551_v22  ;;  %v153_v28 = vld [vmem:[%s8385_s3 + $0x20] sm:$0xff]  ;;  %v154_v29 = vld [vmem:[%s8385_s3 + $0x28] sm:$0xff]  ;;  %v155_v30 = vld [vmem:[%s8385_s3 + $0x30] sm:$0xff] }
  0x16   : > { %vm555_vm7 = vmand %vm550_vm2, %vm553_vm4  ;;  %v156_v31 = vld [vmem:[%s8385_s3 + $0x38] sm:$0xff]  ;;  %v157_v32 = vld [vmem:[%s8385_s3 + $0x40] sm:$0xff] }
  0x17   : > { %v8409_v23 = vsel %vm555_vm7, 1.0, %v11706_v3  ;;  %vm554_vm8 = vmand %vm549_vm3, %vm552_vm6  ;;  %v158_v33 = vld [vmem:[%s8385_s3 + $0x48] sm:$0xff]  ;;  %v159_v34 = vld [vmem:[%s8385_s3 + $0x50] sm:$0xff] }
  0x18   : > { %6840 = vmatmul.mubr.msk.f32.vlgmr.msra.gmra.mrb[0].mxu1 %vm11762_vm1, %v179_v17  ;;  %6810 = vmatmul.mubr.msk.f32.vlgmr.msra.gmra.mrb[0].mxu0 %vm11762_vm1, %v149_v18  ;;  %12025 = vst [vmem:[#allocation3_spill] sm:$0xff] %v8409_v23  ;;  %v8414_v24 = vsel %vm554_vm8, 1.0, %v11706_v3  ;;  %v160_v35 = vld [vmem:[%s8385_s3 + $0x58] sm:$0xff]  ;;  %v161_v36 = vld [vmem:[%s8385_s3 + $0x60] sm:$0xff]  ;;  %v162_v37 = vld [vmem:[%s8385_s3 + $0x68] sm:$0xff] }
  0x19   : > { %536 = vmatprep.mubr.f32.mxu1 %v11706_v3  ;;  %356 = vmatprep.mubr.f32.mxu0 %v11706_v3  ;;  %12026 = vst [vmem:[#allocation4_spill] sm:$0xff] %v8414_v24  ;;  %v163_v38 = vld [vmem:[%s8385_s3 + $0x70] sm:$0xff]  ;;  %v164_v39 = vld [vmem:[%s8385_s3 + $0x78] sm:$0xff]  ;;  %v165_v40 = vld [vmem:[%s8385_s3 + $0x80] sm:$0xff] }
  0x1a   : > { %6842 = vmatprep.subr.msk.mxu1 %vm11763_vm5, %v8409_v23  ;;  %v166_v41 = vld [vmem:[%s8385_s3 + $0x88] sm:$0xff]  ;;  %v167_v42 = vld [vmem:[%s8385_s3 + $0x90] sm:$0xff]  ;;  %v168_v43 = vld [vmem:[%s8385_s3 + $0x98] sm:$0xff] }
  0x1b   : > { %6843 = vmatpush1.msk.msra.mxu1 %vm11763_vm5, %v8414_v24  ;;  %v169_v44 = vld [vmem:[%s8385_s3 + $0xa0] sm:$0xff]  ;;  %v170_v45 = vld [vmem:[%s8385_s3 + $0xa8] sm:$0xff]  ;;  %v171_v46 = vld [vmem:[%s8385_s3 + $0xb0] sm:$0xff] }
  0x1c   : > { %6841 = vmatmul.mubr.msk.f32.gmra.mrb[2].mxu1 %vm11762_vm1, %v180_v21  ;;  %6811 = vmatmul.mubr.msk.f32.gmra.mrb[2].mxu0 %vm11762_vm1, %v150_v25  ;;  %v172_v47 = vld [vmem:[%s8385_s3 + $0xb8] sm:$0xff]  ;;  %v173_v48 = vld [vmem:[%s8385_s3 + $0xc0] sm:$0xff]  ;;  %v174_v49 = vld [vmem:[%s8385_s3 + $0xc8] sm:$0xff] }
  0x1d   : > { %920 = vmatprep.mubr.f32.mxu1 %v11706_v3  ;;  %362 = vmatprep.mubr.f32.mxu0 %v11706_v3  ;;  %v175_v50 = vld [vmem:[%s8385_s3 + $0xd0] sm:$0xff]  ;;  %v176_v51 = vld [vmem:[%s8385_s3 + $0xd8] sm:$0xff]  ;;  %v177_v52 = vld [vmem:[%s8385_s3 + $0xe0] sm:$0xff] }
  0x1e   : > { %v178_v53 = vld [vmem:[%s8385_s3 + $0xe8] sm:$0xff] }
  0x20   : > { %6812 = vmatmul.mubr.msk.f32.gmra.mrb[4].mxu0 %vm11762_vm1, %v151_v26 }
  0x21   : > { %368 = vmatprep.mubr.f32.mxu0 %v11706_v3 }
  0x24   : > { %6813 = vmatmul.mubr.msk.f32.gmra.mrb[6].mxu0 %vm11762_vm1, %v152_v27 }
  0x25   : > { %374 = vmatprep.mubr.f32.mxu0 %v11706_v3 }
  0x28   : > { %6814 = vmatmul.mubr.msk.f32.gmra.mrb[8].mxu0 %vm11762_vm1, %v153_v28 }
  0x29   : > { %380 = vmatprep.mubr.f32.mxu0 %v11706_v3 }
  0x2c   : > { %6815 = vmatmul.mubr.msk.f32.gmra.mrb[10].mxu0 %vm11762_vm1, %v154_v29 }
  0x2d   : > { %386 = vmatprep.mubr.f32.mxu0 %v11706_v3 }
  0x30   : > { %6816 = vmatmul.mubr.msk.f32.gmra.mrb[12].mxu0 %vm11762_vm1, %v155_v30 }
  0x31   : > { %392 = vmatprep.mubr.f32.mxu0 %v11706_v3 }
  0x34   : > { %6817 = vmatmul.mubr.msk.f32.gmra.mrb[14].mxu0 %vm11762_vm1, %v156_v31 }
  0x35   : > { %398 = vmatprep.mubr.f32.mxu0 %v11706_v3 }
  0x38   : > { %6818 = vmatmul.mubr.msk.f32.gmra.mrb[16].mxu0 %vm11762_vm1, %v157_v32 }
  0x39   : > { %404 = vmatprep.mubr.f32.mxu0 %v11706_v3 }
  0x3c   : > { %6819 = vmatmul.mubr.msk.f32.gmra.mrb[18].mxu0 %vm11762_vm1, %v158_v33 }
  0x3d   : > { %410 = vmatprep.mubr.f32.mxu0 %v11706_v3 }
  0x40   : > { %6820 = vmatmul.mubr.msk.f32.gmra.mrb[20].mxu0 %vm11762_vm1, %v159_v34 }
  0x41   : > { %416 = vmatprep.mubr.f32.mxu0 %v11706_v3 }
  0x44   : > { %6821 = vmatmul.mubr.msk.f32.gmra.mrb[22].mxu0 %vm11762_vm1, %v160_v35 }
  0x45   : > { %422 = vmatprep.mubr.f32.mxu0 %v11706_v3 }
  0x48   : > { %6822 = vmatmul.mubr.msk.f32.gmra.mrb[24].mxu0 %vm11762_vm1, %v161_v36 }
  0x49   : > { %428 = vmatprep.mubr.f32.mxu0 %v11706_v3 }
  0x4c   : > { %6823 = vmatmul.mubr.msk.f32.gmra.mrb[26].mxu0 %vm11762_vm1, %v162_v37 }
  0x4d   : > { %434 = vmatprep.mubr.f32.mxu0 %v11706_v3 }
  0x50   : > { %6824 = vmatmul.mubr.msk.f32.gmra.mrb[28].mxu0 %vm11762_vm1, %v163_v38 }
  0x51   : > { %440 = vmatprep.mubr.f32.mxu0 %v11706_v3 }
  0x54   : > { %6825 = vmatmul.mubr.msk.f32.gmra.mrb[30].mxu0 %vm11762_vm1, %v164_v39 }
  0x55   : > { %446 = vmatprep.mubr.f32.mxu0 %v11706_v3 }
  0x58   : > { %6826 = vmatmul.mubr.msk.f32.gmra.mrb[32].mxu0 %vm11762_vm1, %v165_v40 }
  0x59   : > { %452 = vmatprep.mubr.f32.mxu0 %v11706_v3 }
  0x5c   : > { %6827 = vmatmul.mubr.msk.f32.gmra.mrb[34].mxu0 %vm11762_vm1, %v166_v41 }
  0x5d   : > { %458 = vmatprep.mubr.f32.mxu0 %v11706_v3 }
  0x60   : > { %6828 = vmatmul.mubr.msk.f32.gmra.mrb[36].mxu0 %vm11762_vm1, %v167_v42 }
  0x61   : > { %464 = vmatprep.mubr.f32.mxu0 %v11706_v3 }
  0x64   : > { %6829 = vmatmul.mubr.msk.f32.gmra.mrb[38].mxu0 %vm11762_vm1, %v168_v43 }
  0x65   : > { %470 = vmatprep.mubr.f32.mxu0 %v11706_v3 }
  0x68   : > { %6830 = vmatmul.mubr.msk.f32.gmra.mrb[40].mxu0 %vm11762_vm1, %v169_v44 }
  0x69   : > { %476 = vmatprep.mubr.f32.mxu0 %v11706_v3 }
  0x6c   : > { %6831 = vmatmul.mubr.msk.f32.gmra.mrb[42].mxu0 %vm11762_vm1, %v170_v45 }
  0x6d   : > { %482 = vmatprep.mubr.f32.mxu0 %v11706_v3 }
  0x70   : > { %6832 = vmatmul.mubr.msk.f32.gmra.mrb[44].mxu0 %vm11762_vm1, %v171_v46 }
  0x71   : > { %488 = vmatprep.mubr.f32.mxu0 %v11706_v3 }
  0x74   : > { %6833 = vmatmul.mubr.msk.f32.gmra.mrb[46].mxu0 %vm11762_vm1, %v172_v47 }
  0x75   : > { %494 = vmatprep.mubr.f32.mxu0 %v11706_v3 }
  0x78   : > { %6834 = vmatmul.mubr.msk.f32.gmra.mrb[48].mxu0 %vm11762_vm1, %v173_v48 }
  0x79   : > { %500 = vmatprep.mubr.f32.mxu0 %v11706_v3 }
  0x7c   : > { %6835 = vmatmul.mubr.msk.f32.gmra.mrb[50].mxu0 %vm11762_vm1, %v174_v49 }
  0x7d   : > { %506 = vmatprep.mubr.f32.mxu0 %v11706_v3 }
  0x80   : > { %6836 = vmatmul.mubr.msk.f32.gmra.mrb[52].mxu0 %vm11762_vm1, %v175_v50 }
  0x81   : > { %512 = vmatprep.mubr.f32.mxu0 %v11706_v3 }
  0x84   : > { %6837 = vmatmul.mubr.msk.f32.gmra.mrb[54].mxu0 %vm11762_vm1, %v176_v51 }
  0x85   : > { %518 = vmatprep.mubr.f32.mxu0 %v11706_v3 }
  0x88   : > { %6838 = vmatmul.mubr.msk.f32.gmra.mrb[56].mxu0 %vm11762_vm1, %v177_v52 }
  0x89   : > { %524 = vmatprep.mubr.f32.mxu0 %v11706_v3 }
  0x8c   : > { %6839 = vmatmul.mubr.msk.f32.gmra.mrb[58].mxu0 %vm11762_vm1, %v178_v53 }
  0x9c   : > { %v844_v54 = vpop.xlane.xlu0 %843 }
  0x9d   : > { %7899 = vrcp.f32 %v844_v54 }
  0xa7   : > { %v8504_v55 = vpop.eup %7899 }
  0xa8   : > { %6844 = vmatmul.mubr.msk.f32.vlgmr.msra.gmra.mrb[4].mxu1 %vm11759_vm0, %v8504_v55 }
  0xa9   : > { %926 = vmatprep.mubr.f32.mxu1 %v11706_v3 }
  0xac   : > { %6845 = vmatmul.mubr.msk.f32.gmra.mrb[6].mxu1 %vm11759_vm0, %v8504_v55 }
  0xad   : > { %932 = vmatprep.mubr.f32.mxu1 %v11706_v3 }
  0xb0   : > { %6846 = vmatmul.mubr.msk.f32.gmra.mrb[8].mxu1 %vm11759_vm0, %v8504_v55 }
  0xb1   : > { %938 = vmatprep.mubr.f32.mxu1 %v11706_v3 }
  0xb4   : > { %6847 = vmatmul.mubr.msk.f32.gmra.mrb[10].mxu1 %vm11759_vm0, %v8504_v55 }
  0xb5   : > { %944 = vmatprep.mubr.f32.mxu1 %v11706_v3 }
  0xb8   : > { %6848 = vmatmul.mubr.msk.f32.gmra.mrb[12].mxu1 %vm11759_vm0, %v8504_v55 }
  0xb9   : > { %950 = vmatprep.mubr.f32.mxu1 %v11706_v3 }
  0xbc   : > { %6849 = vmatmul.mubr.msk.f32.gmra.mrb[14].mxu1 %vm11759_vm0, %v8504_v55 }
  0xbd   : > { %956 = vmatprep.mubr.f32.mxu1 %v11706_v3 }
  0xc0   : > { %6850 = vmatmul.mubr.msk.f32.gmra.mrb[16].mxu1 %vm11759_vm0, %v8504_v55 }
  0xc1   : > { %962 = vmatprep.mubr.f32.mxu1 %v11706_v3 }
  0xc4   : > { %6851 = vmatmul.mubr.msk.f32.gmra.mrb[18].mxu1 %vm11759_vm0, %v8504_v55 }
  0xc5   : > { %968 = vmatprep.mubr.f32.mxu1 %v11706_v3 }
  0xc8   : > { %6852 = vmatmul.mubr.msk.f32.gmra.mrb[20].mxu1 %vm11759_vm0, %v8504_v55 }
  0xc9   : > { %974 = vmatprep.mubr.f32.mxu1 %v11706_v3 }
  0xcc   : > { %6853 = vmatmul.mubr.msk.f32.gmra.mrb[22].mxu1 %vm11759_vm0, %v8504_v55 }
  0xcd   : > { %980 = vmatprep.mubr.f32.mxu1 %v11706_v3 }
  0xd0   : > { %6854 = vmatmul.mubr.msk.f32.gmra.mrb[24].mxu1 %vm11759_vm0, %v8504_v55 }
  0xd1   : > { %986 = vmatprep.mubr.f32.mxu1 %v11706_v3 }
  0xd4   : > { %6855 = vmatmul.mubr.msk.f32.gmra.mrb[26].mxu1 %vm11759_vm0, %v8504_v55 }
  0xd5   : > { %992 = vmatprep.mubr.f32.mxu1 %v11706_v3 }
  0xd8   : > { %6856 = vmatmul.mubr.msk.f32.gmra.mrb[28].mxu1 %vm11759_vm0, %v8504_v55 }
  0xd9   : > { %998 = vmatprep.mubr.f32.mxu1 %v11706_v3 }
  0xdc   : > { %6857 = vmatmul.mubr.msk.f32.gmra.mrb[30].mxu1 %vm11759_vm0, %v8504_v55 }
  0xdd   : > { %1004 = vmatprep.mubr.f32.mxu1 %v11706_v3 }
  0xe0   : > { %6858 = vmatmul.mubr.msk.f32.gmra.mrb[32].mxu1 %vm11759_vm0, %v8504_v55 }
  0xe1   : > { %1010 = vmatprep.mubr.f32.mxu1 %v11706_v3 }
  0xe4   : > { %6859 = vmatmul.mubr.msk.f32.gmra.mrb[34].mxu1 %vm11759_vm0, %v8504_v55 }
  0xe5   : > { %1016 = vmatprep.mubr.f32.mxu1 %v11706_v3 }
  0xe8   : > { %6860 = vmatmul.mubr.msk.f32.gmra.mrb[36].mxu1 %vm11759_vm0, %v8504_v55 }
  0xe9   : > { %1022 = vmatprep.mubr.f32.mxu1 %v11706_v3 }
  0xeb   : > { %v8563_v56 = vpop.f32.mrb[0].mxu1  ;;  %v8565_v57 = vpop.f32.mrb[0].mxu0 }
  0xec   : > { %6861 = vmatmul.mubr.msk.f32.gmra.mrb[38].mxu1 %vm11759_vm0, %v8504_v55  ;;  %12027 = vst [vmem:[#allocation5_spill] sm:$0xff] %v8563_v56  ;;  %12028 = vst [vmem:[#allocation6_spill] sm:$0xff] %v8565_v57  ;;  %v8567_v58 = vpop.f32.mrb[1].mxu1  ;;  %v8569_v59 = vpop.f32.mrb[1].mxu0  ;;  %v659_v56 = vmul.u32 8, %v8387_v15 }
  0xed   : > { %1028 = vmatprep.mubr.f32.mxu1 %v11706_v3  ;;  %12029 = vst [vmem:[#allocation7_spill] sm:$0xff] %v8567_v58  ;;  %12030 = vst [vmem:[#allocation8_spill] sm:$0xff] %v8569_v59 }
  0xee   : > { %vm664_vm9 = vcmp.ge.s32.totalorder %v8395_v19, %v659_v56  ;;  %vm663_vm13 = vcmp.ge.s32.totalorder %v8389_v16, %v659_v56 }
  0xef   : > { %v8574_v60 = vpop.f32.mrb[2].mxu1  ;;  %v8584_v62 = vpop.f32.mrb[2].mxu0 }
  0xf0   : > { %6862 = vmatmul.mubr.msk.f32.gmra.mrb[40].mxu1 %vm11759_vm0, %v8504_v55  ;;  %12031 = vst [vmem:[#allocation9_spill] sm:$0xff] %v8574_v60  ;;  %v8576_v61 = vpop.f32.mrb[3].mxu1  ;;  %12033 = vst [vmem:[#allocation11_spill] sm:$0xff] %v8584_v62  ;;  %v8586_v63 = vpop.f32.mrb[3].mxu0 }
  0xf1   : > { %1034 = vmatprep.mubr.f32.mxu1 %v11706_v3  ;;  %12032 = vst [vmem:[#allocation10_spill] sm:$0xff] %v8576_v61  ;;  %12034 = vst [vmem:[#allocation12_spill] sm:$0xff] %v8586_v63 }
  0xf3   : > { %v8591_v0 = vpop.f32.mrb[4].mxu0 }
  0xf4   : > { %6863 = vmatmul.mubr.msk.f32.gmra.mrb[42].mxu1 %vm11759_vm0, %v8504_v55  ;;  %12035 = vst [vmem:[#allocation13_spill] sm:$0xff] %v8591_v0  ;;  %v8593_v1 = vpop.f32.mrb[5].mxu0 }
  0xf5   : > { %1040 = vmatprep.mubr.f32.mxu1 %v11706_v3  ;;  %12036 = vst [vmem:[#allocation14_spill] sm:$0xff] %v8593_v1 }
  0xf7   : > { %v8598_v2 = vpop.f32.mrb[6].mxu0 }
  0xf8   : > { %6864 = vmatmul.mubr.msk.f32.gmra.mrb[44].mxu1 %vm11759_vm0, %v8504_v55  ;;  %12037 = vst [vmem:[#allocation15_spill] sm:$0xff] %v8598_v2  ;;  %v8600_v4 = vpop.f32.mrb[7].mxu0 }
  0xf9   : > { %1046 = vmatprep.mubr.f32.mxu1 %v11706_v3  ;;  %12038 = vst [vmem:[#allocation16_spill] sm:$0xff] %v8600_v4 }
  0xfb   : > { %v8605_v5 = vpop.f32.mrb[8].mxu0 }
  0xfc   : > { %6865 = vmatmul.mubr.msk.f32.gmra.mrb[46].mxu1 %vm11759_vm0, %v8504_v55  ;;  %12039 = vst [vmem:[#allocation17_spill] sm:$0xff] %v8605_v5  ;;  %v8607_v6 = vpop.f32.mrb[9].mxu0 }
  0xfd   : > { %1052 = vmatprep.mubr.f32.mxu1 %v11706_v3  ;;  %12040 = vst [vmem:[#allocation18_spill] sm:$0xff] %v8607_v6 }
  0xff   : > { %v8612_v7 = vpop.f32.mrb[10].mxu0 }
 0x100   : > { %6866 = vmatmul.mubr.msk.f32.gmra.mrb[48].mxu1 %vm11759_vm0, %v8504_v55  ;;  %12041 = vst [vmem:[#allocation19_spill] sm:$0xff] %v8612_v7  ;;  %v8614_v8 = vpop.f32.mrb[11].mxu0 }
 0x101   : > { %1058 = vmatprep.mubr.f32.mxu1 %v11706_v3  ;;  %12042 = vst [vmem:[#allocation20_spill] sm:$0xff] %v8614_v8 }
 0x103   : > { %v8619_v9 = vpop.f32.mrb[12].mxu0 }
 0x104   : > { %6867 = vmatmul.mubr.msk.f32.gmra.mrb[50].mxu1 %vm11759_vm0, %v8504_v55  ;;  %12043 = vst [vmem:[#allocation21_spill] sm:$0xff] %v8619_v9  ;;  %v8621_v10 = vpop.f32.mrb[13].mxu0 }
 0x105   : > { %1064 = vmatprep.mubr.f32.mxu1 %v11706_v3  ;;  %12044 = vst [vmem:[#allocation22_spill] sm:$0xff] %v8621_v10 }
 0x107   : > { %v8626_v11 = vpop.f32.mrb[14].mxu0 }
 0x108   : > { %6868 = vmatmul.mubr.msk.f32.gmra.mrb[52].mxu1 %vm11759_vm0, %v8504_v55  ;;  %12045 = vst [vmem:[#allocation23_spill] sm:$0xff] %v8626_v11  ;;  %v8628_v12 = vpop.f32.mrb[15].mxu0 }
 0x109   : > { %1070 = vmatprep.mubr.f32.mxu1 %v11706_v3  ;;  %12046 = vst [vmem:[#allocation24_spill] sm:$0xff] %v8628_v12 }
 0x10b   : > { %v8633_v13 = vpop.f32.mrb[16].mxu0 }
 0x10c   : > { %6869 = vmatmul.mubr.msk.f32.gmra.mrb[54].mxu1 %vm11759_vm0, %v8504_v55  ;;  %12047 = vst [vmem:[#allocation25_spill] sm:$0xff] %v8633_v13  ;;  %v8635_v14 = vpop.f32.mrb[17].mxu0 }
 0x10d   : > { %1076 = vmatprep.mubr.f32.mxu1 %v11706_v3  ;;  %12048 = vst [vmem:[#allocation26_spill] sm:$0xff] %v8635_v14 }
 0x10f   : > { %v8640_v17 = vpop.f32.mrb[18].mxu0 }
 0x110   : > { %6870 = vmatmul.mubr.msk.f32.gmra.mrb[56].mxu1 %vm11759_vm0, %v8504_v55  ;;  %12049 = vst [vmem:[#allocation27_spill] sm:$0xff] %v8640_v17  ;;  %v8642_v18 = vpop.f32.mrb[19].mxu0 }
 0x111   : > { %1082 = vmatprep.mubr.f32.mxu1 %v11706_v3  ;;  %12050 = vst [vmem:[#allocation28_spill] sm:$0xff] %v8642_v18 }
 0x113   : > { %v8647_v20 = vpop.f32.mrb[20].mxu0 }
 0x114   : > { %6871 = vmatmul.mubr.msk.f32.gmra.mrb[58].mxu1 %vm11759_vm0, %v8504_v55  ;;  %12051 = vst [vmem:[#allocation29_spill] sm:$0xff] %v8647_v20  ;;  %v8649_v21 = vpop.f32.mrb[21].mxu0 }
 0x115   : > { %1088 = vmatprep.mubr.f32.mxu1 %v11706_v3  ;;  %12052 = vst [vmem:[#allocation30_spill] sm:$0xff] %v8649_v21 }
 0x117   : > { %v8653_v22 = vpop.f32.mrb[22].mxu0 }
 0x118   : > { %6872 = vmatmul.mubr.msk.f32.gmra.mrb[60].mxu1 %vm11759_vm0, %v8504_v55  ;;  %12053 = vst [vmem:[#allocation31_spill] sm:$0xff] %v8653_v22  ;;  %v8655_v25 = vpop.f32.mrb[23].mxu0 }
 0x119   : > { %1094 = vmatprep.mubr.f32.mxu1 %v11706_v3  ;;  %12054 = vst [vmem:[#allocation32_spill] sm:$0xff] %v8655_v25 }
 0x11b   : > { %v8657_v26 = vpop.f32.mrb[24].mxu0 }
 0x11c   : > { %6873 = vmatmul.mubr.msk.f32.gmra.mrb[62].mxu1 %vm11759_vm0, %v8504_v55  ;;  %12055 = vst [vmem:[#allocation33_spill] sm:$0xff] %v8657_v26  ;;  %v8659_v27 = vpop.f32.mrb[25].mxu0 }
 0x11d   : > { %1100 = vmatprep.mubr.f32.mxu1 %v11706_v3  ;;  %12056 = vst [vmem:[#allocation34_spill] sm:$0xff] %v8659_v27 }
 0x11f   : > { %v8661_v28 = vpop.f32.mrb[26].mxu0 }
 0x120   : > { %6874 = vmatmul.mubr.msk.f32.gmra.mrb[64].mxu1 %vm11759_vm0, %v8504_v55  ;;  %12057 = vst [vmem:[#allocation35_spill] sm:$0xff] %v8661_v28  ;;  %v8663_v29 = vpop.f32.mrb[27].mxu0 }
 0x121   : > { %1106 = vmatprep.mubr.f32.mxu1 %v11706_v3  ;;  %12058 = vst [vmem:[#allocation36_spill] sm:$0xff] %v8663_v29 }
 0x123   : > { %v8665_v30 = vpop.f32.mrb[28].mxu0 }
 0x124   : > { %6875 = vmatmul.mubr.msk.f32.gmra.mrb[66].mxu1 %vm11759_vm0, %v8504_v55  ;;  %12059 = vst [vmem:[#allocation37_spill] sm:$0xff] %v8665_v30  ;;  %v8667_v31 = vpop.f32.mrb[29].mxu0 }
 0x125   : > { %12060 = vst [vmem:[#allocation38_spill] sm:$0xff] %v8667_v31 }
 0x127   : > { %v8669_v32 = vpop.f32.mrb[30].mxu0 }
 0x128   : > { %12061 = vst [vmem:[#allocation39_spill] sm:$0xff] %v8669_v32  ;;  %v8671_v33 = vpop.f32.mrb[31].mxu0 }
 0x129   : > { %12062 = vst [vmem:[#allocation40_spill] sm:$0xff] %v8671_v33 }
 0x12b   : > { %v8673_v34 = vpop.f32.mrb[32].mxu0 }
 0x12c   : > { %12063 = vst [vmem:[#allocation41_spill] sm:$0xff] %v8673_v34  ;;  %v8675_v35 = vpop.f32.mrb[33].mxu0 }
 0x12d   : > { %12064 = vst [vmem:[#allocation42_spill] sm:$0xff] %v8675_v35 }
 0x12f   : > { %v8677_v36 = vpop.f32.mrb[34].mxu0 }
 0x130   : > { %12065 = vst [vmem:[#allocation43_spill] sm:$0xff] %v8677_v36  ;;  %v8679_v37 = vpop.f32.mrb[35].mxu0 }
 0x131   : > { %12066 = vst [vmem:[#allocation44_spill] sm:$0xff] %v8679_v37 }
 0x133   : > { %v8681_v38 = vpop.f32.mrb[36].mxu0 }
 0x134   : > { %12067 = vst [vmem:[#allocation45_spill] sm:$0xff] %v8681_v38  ;;  %v8683_v39 = vpop.f32.mrb[37].mxu0 }
 0x135   : > { %12068 = vst [vmem:[#allocation46_spill] sm:$0xff] %v8683_v39 }
 0x137   : > { %v8685_v40 = vpop.f32.mrb[38].mxu0 }
 0x138   : > { %12069 = vst [vmem:[#allocation47_spill] sm:$0xff] %v8685_v40  ;;  %v8687_v41 = vpop.f32.mrb[39].mxu0 }
 0x139   : > { %12070 = vst [vmem:[#allocation48_spill] sm:$0xff] %v8687_v41 }
 0x13b   : > { %v8689_v42 = vpop.f32.mrb[40].mxu0 }
 0x13c   : > { %12071 = vst [vmem:[#allocation49_spill] sm:$0xff] %v8689_v42  ;;  %v8691_v43 = vpop.f32.mrb[41].mxu0 }
 0x13d   : > { %12072 = vst [vmem:[#allocation50_spill] sm:$0xff] %v8691_v43 }
 0x13f   : > { %v8693_v44 = vpop.f32.mrb[42].mxu0 }
 0x140   : > { %12073 = vst [vmem:[#allocation51_spill] sm:$0xff] %v8693_v44  ;;  %v8695_v45 = vpop.f32.mrb[43].mxu0 }
 0x141   : > { %12074 = vst [vmem:[#allocation52_spill] sm:$0xff] %v8695_v45 }
 0x143   : > { %v8697_v46 = vpop.f32.mrb[44].mxu0 }
 0x144   : > { %12075 = vst [vmem:[#allocation53_spill] sm:$0xff] %v8697_v46  ;;  %v8699_v47 = vpop.f32.mrb[45].mxu0 }
 0x145   : > { %12076 = vst [vmem:[#allocation54_spill] sm:$0xff] %v8699_v47 }
 0x147   : > { %v8701_v48 = vpop.f32.mrb[46].mxu0 }
 0x148   : > { %12077 = vst [vmem:[#allocation55_spill] sm:$0xff] %v8701_v48  ;;  %v8703_v49 = vpop.f32.mrb[47].mxu0 }
 0x149   : > { %12078 = vst [vmem:[#allocation56_spill] sm:$0xff] %v8703_v49 }
 0x14b   : > { %v8705_v50 = vpop.f32.mrb[48].mxu0 }
 0x14c   : > { %12079 = vst [vmem:[#allocation57_spill] sm:$0xff] %v8705_v50  ;;  %v8707_v51 = vpop.f32.mrb[49].mxu0 }
 0x14d   : > { %12080 = vst [vmem:[#allocation58_spill] sm:$0xff] %v8707_v51  ;;  %v671_v51 = vadd.s32 8, %v659_v56 }
 0x14f   : > { %v8709_v52 = vpop.f32.mrb[50].mxu0  ;;  %vm675_vm10 = vcmp.lt.s32.totalorder %v8389_v16, %v671_v51  ;;  %vm676_vm11 = vcmp.lt.s32.totalorder %v8395_v19, %v671_v51 }
 0x150   : > { %12081 = vst [vmem:[#allocation59_spill] sm:$0xff] %v8709_v52  ;;  %v8711_v53 = vpop.f32.mrb[51].mxu0  ;;  %vm8735_vm12 = vmand %vm664_vm9, %vm676_vm11 }
 0x151   : > { %12082 = vst [vmem:[#allocation60_spill] sm:$0xff] %v8711_v53  ;;  %vm8744_vm14 = vmand %vm663_vm13, %vm675_vm10 }
 0x153   : > { %v8713_v54 = vpop.f32.mrb[52].mxu0 }
 0x154   : > { %12083 = vst [vmem:[#allocation61_spill] sm:$0xff] %v8713_v54  ;;  %v8715_v55 = vpop.f32.mrb[53].mxu0 }
 0x155   : > { %12084 = vst [vmem:[#allocation62_spill] sm:$0xff] %v8715_v55 }
 0x157   : > { %v8717_v3 = vpop.f32.mrb[54].mxu0 }
 0x158   : > { %12085 = vst [vmem:[#allocation63_spill] sm:$0xff] %v8717_v3  ;;  %v8719_v24 = vpop.f32.mrb[55].mxu0 }
 0x159   : > { %12086 = vst [vmem:[#allocation64_spill] sm:$0xff] %v8719_v24 }
 0x15b   : > { %v8721_v23 = vpop.f32.mrb[56].mxu0 }
 0x15c   : > { %12087 = vst [vmem:[#allocation65_spill] sm:$0xff] %v8721_v23  ;;  %v8723_v61 = vpop.f32.mrb[57].mxu0 }
 0x15d   : > { %12088 = vst [vmem:[#allocation66_spill] sm:$0xff] %v8723_v61 }
 0x15f   : > { %v8725_v60 = vpop.f32.mrb[58].mxu0 }
 0x160   : > { %12089 = vst [vmem:[#allocation67_spill] sm:$0xff] %v8725_v60  ;;  %v8727_v58 = vpop.f32.mrb[59].mxu0  ;;  %v12091_v60 = vmov 0 }
 0x161   : > { %12090 = vst [vmem:[#allocation68_spill] sm:$0xff] %v8727_v58  ;;  %v12092_v60 = vsel %vm8735_vm12, 4294967295, %v12091_v60 }
 0x162   : > { %12093 = vst [vmem:[#allocation69_spill] sm:$0xff] %v12092_v60 }
 0x17b   : > { %v922_v52 = vpop.f32.mrb[4].mxu1 }
 0x17c   : > { %v1113_v53 = vmul.f32 %v922_v52, %v8565_v57  ;;  %v924_v54 = vpop.f32.mrb[5].mxu1  ;;  %v11736_v57 = vmov 1.0  }
 0x17d   : > { %v1114_v55 = vmul.f32 %v924_v54, %v8569_v59  ;;  %6876 = vmatprep.mubr.msk.f32.mxu1 %vm8735_vm12, %v11736_v57  ;;  %v12094_v54 = vmov 0 }
 0x17e   : > { %v12095_v54 = vsel %vm8744_vm14, 4294967295, %v12094_v54 }
 0x17f   : > { %v928_v61 = vpop.f32.mrb[6].mxu1  ;;  %12096 = vst [vmem:[#allocation70_spill] sm:$0xff] %v12095_v54 }
 0x180   : > { %v1115_v58 = vmul.f32 %v928_v61, %v8584_v62  ;;  %v930_v52 = vpop.f32.mrb[7].mxu1 }
 0x181   : > { %v1116_v51 = vmul.f32 %v930_v52, %v8586_v63  ;;  %v8782_v52 = vadd.s32 32, %v8387_v15  ;;  %v12124_v63 = vmov 0 }
 0x182   : > { %v7395_v59 = vpack.c.bf16 %v1115_v58, %v1113_v53 }
 0x183   : > { %v934_v19 = vpop.f32.mrb[8].mxu1  ;;  %v7393_v23 = vpack.c.bf16 %v1116_v51, %v1114_v55  ;;  %v8789_v51 = vadd.s32 40, %v8387_v15 }
 0x184   : > { %v1117_v24 = vmul.f32 %v934_v19, %v8591_v0  ;;  %v936_v56 = vpop.f32.mrb[9].mxu1  ;;  %v8756_v19 = vmul.u32 32, %v8389_v16 }
 0x185   : > { %v1118_v61 = vmul.f32 %v936_v56, %v8593_v1  ;;  %7394 = vmatprep.subr.bf16.mxu1 %v7393_v23  ;;  %v8759_v23 = vadd.s32 8, %v8387_v15 }
 0x186   : > { %7396 = vmatpush1.bf16.msra.mxu1 %v7395_v59  ;;  %v11743_v59 = vmov 0.0|0.0   ;;  %vm578_vm15 = vcmp.ge.s32.totalorder %v8387_v15, %v8756_v19 }
 0x187   : > { %v940_v62 = vpop.f32.mrb[10].mxu1  ;;  %7457 = vmatprep.subr.bf16.mxu0 %v11743_v59  ;;  %vm579_vm2 = vcmp.ge.s32.totalorder %v8759_v23, %v8756_v19 }
 0x188   : > { %v1119_v60 = vmul.f32 %v940_v62, %v8598_v2  ;;  %v942_v57 = vpop.f32.mrb[11].mxu1  ;;  %v8915_v2 = vadd.s32 120, %v8387_v15 }
 0x189   : > { %v1120_v3 = vmul.f32 %v942_v57, %v8600_v4 }
 0x18a   : > { %v7399_v50 = vpack.c.bf16 %v1119_v60, %v1117_v24  ;;  %v8763_v24 = vadd.s32 16, %v8387_v15 }
 0x18b   : > { %v946_v54 = vpop.f32.mrb[12].mxu1  ;;  %v7397_v49 = vpack.c.bf16 %v1120_v3, %v1118_v61  ;;  %v8768_v3 = vadd.s32 32, %v8756_v19 }
 0x18c   : > { %v1121_v58 = vmul.f32 %v946_v54, %v8605_v5  ;;  %v948_v53 = vpop.f32.mrb[13].mxu1  ;;  %vm580_vm7 = vcmp.ge.s32.totalorder %v8763_v24, %v8756_v19 }
 0x18d   : > { %v1122_v55 = vmul.f32 %v948_v53, %v8607_v6  ;;  %7398 = vmatprep.subr.bf16.mxu1 %v7397_v49  ;;  %v8772_v49 = vadd.s32 24, %v8387_v15  ;;  %vm599_vm3 = vcmp.lt.s32.totalorder %v8387_v15, %v8768_v3  ;;  %vm600_vm4 = vcmp.lt.s32.totalorder %v8759_v23, %v8768_v3 }
 0x18e   : > { %7400 = vmatpush1.bf16.msra.mxu1 %v7399_v50  ;;  %vm619_vm6 = vmand %vm578_vm15, %vm599_vm3  ;;  %vm601_vm8 = vcmp.lt.s32.totalorder %v8763_v24, %v8768_v3  ;;  %vm603_vm3 = vcmp.lt.s32.totalorder %v8782_v52, %v8768_v3 }
 0x18f   : > { %v952_v57 = vpop.f32.mrb[14].mxu1  ;;  %vm620_vm9 = vmand %vm579_vm2, %vm600_vm4  ;;  %vm581_vm10 = vcmp.ge.s32.totalorder %v8772_v49, %v8756_v19  ;;  %vm602_vm11 = vcmp.lt.s32.totalorder %v8772_v49, %v8768_v3  ;;  %vm582_vm2 = vcmp.ge.s32.totalorder %v8782_v52, %v8756_v19 }
 0x190   : > { %v1123_v60 = vmul.f32 %v952_v57, %v8612_v7  ;;  %v954_v62 = vpop.f32.mrb[15].mxu1  ;;  %vm8796_vm13 = vmpackc.low %vm620_vm9, %vm619_vm6  ;;  %v12097_v57 = vmov 0  ;;  %vm583_vm6 = vcmp.ge.s32.totalorder %v8789_v51, %v8756_v19 }
 0x191   : > { %v1124_v50 = vmul.f32 %v954_v62, %v8614_v8  ;;  %v12098_v57 = vsel %vm8796_vm13, 4294967295, %v12097_v57  ;;  %vm621_vm15 = vmand %vm580_vm7, %vm601_vm8  ;;  %vm604_vm7 = vcmp.lt.s32.totalorder %v8789_v51, %v8768_v3  ;;  %v12105_v8 = vmov 0 }
 0x192   : > { %v7403_v54 = vpack.c.bf16 %v1123_v60, %v1121_v58  ;;  %12099 = vst [vmem:[#allocation71_spill] sm:$0xff] %v12098_v57  ;;  %v8801_v60 = vadd.s32 48, %v8387_v15  ;;  %vm622_vm4 = vmand %vm581_vm10, %vm602_vm11 }
 0x193   : > { %v958_v56 = vpop.f32.mrb[16].mxu1  ;;  %v7401_v61 = vpack.c.bf16 %v1124_v50, %v1122_v55  ;;  %v11745_v55 = vmov 1.0|1.0   ;;  %v8818_v50 = vadd.s32 56, %v8387_v15  ;;  %vm8831_vm8 = vmpackc.low %vm622_vm4, %vm621_vm15 }
 0x194   : > { %v1125_v58 = vmul.f32 %v958_v56, %v8619_v9  ;;  %v960_v53 = vpop.f32.mrb[17].mxu1  ;;  %7459 = vmatpush1.bf16.msk.msra.mxu0 %vm8796_vm13, %v11745_v55  ;;  %vm623_vm9 = vmand %vm582_vm2, %vm603_vm3  ;;  %vm584_vm10 = vcmp.ge.s32.totalorder %v8801_v60, %v8756_v19  ;;  %vm605_vm11 = vcmp.lt.s32.totalorder %v8801_v60, %v8768_v3  ;;  %v8844_v55 = vadd.s32 72, %v8387_v15 }
 0x195   : > { %v1126_v62 = vmul.f32 %v960_v53, %v8621_v10  ;;  %7402 = vmatprep.subr.bf16.mxu1 %v7401_v61  ;;  %7460 = vmatprep.subr.bf16.mxu0 %v11743_v59  ;;  %v12100_v61 = vmov 0  ;;  %v12103_v9 = vmov 1.0|1.0   ;;  %vm624_vm15 = vmand %vm583_vm6, %vm604_vm7  ;;  %vm585_vm4 = vcmp.ge.s32.totalorder %v8818_v50, %v8756_v19 }
 0x196   : > { %7404 = vmatpush1.bf16.msra.mxu1 %v7403_v54  ;;  %v12101_v61 = vsel %vm8831_vm8, 4294967295, %v12100_v61  ;;  %v8836_v54 = vadd.s32 64, %v8387_v15  ;;  %vm606_vm2 = vcmp.lt.s32.totalorder %v8818_v50, %v8768_v3  ;;  %vm8855_vm3 = vmpackc.low %vm624_vm15, %vm623_vm9  ;;  %vm587_vm15 = vcmp.ge.s32.totalorder %v8844_v55, %v8756_v19 }
 0x197   : > { %v964_v56 = vpop.f32.mrb[18].mxu1  ;;  %12102 = vst [vmem:[#allocation72_spill] sm:$0xff] %v12101_v61  ;;  %v12106_v8 = vsel %vm8855_vm3, 4294967295, %v12105_v8  ;;  %vm625_vm0 = vmand %vm584_vm10, %vm605_vm11  ;;  %vm608_vm1 = vcmp.lt.s32.totalorder %v8844_v55, %v8768_v3 }
 0x198   : > { %v1127_v53 = vmul.f32 %v964_v56, %v8626_v11  ;;  %v966_v59 = vpop.f32.mrb[19].mxu1  ;;  %7462 = vmatpush1.bf16.msk.msra.mxu0 %vm8831_vm8, %v12103_v9  ;;  %v12104_v11 = vmov 0.0|0.0   ;;  %12107 = vst [vmem:[#allocation73_spill] sm:$0xff] %v12106_v8  ;;  %vm586_vm6 = vcmp.ge.s32.totalorder %v8836_v54, %v8756_v19  ;;  %vm607_vm7 = vcmp.lt.s32.totalorder %v8836_v54, %v8768_v3  ;;  %vm626_vm9 = vmand %vm585_vm4, %vm606_vm2 }
 0x199   : > { %v1128_v10 = vmul.f32 %v966_v59, %v8628_v12  ;;  %7463 = vmatprep.subr.bf16.mxu0 %v12104_v11  ;;  %v8860_v59 = vadd.s32 80, %v8387_v15  ;;  %vm8878_vm10 = vmpackc.low %vm626_vm9, %vm625_vm0 }
 0x19a   : > { %v7407_v56 = vpack.c.bf16 %v1127_v53, %v1125_v58  ;;  %v8867_v58 = vadd.s32 88, %v8387_v15  ;;  %vm627_vm11 = vmand %vm586_vm6, %vm607_vm7 }
 0x19b   : > { %v970_v12 = vpop.f32.mrb[20].mxu1  ;;  %v7405_v7 = vpack.c.bf16 %v1128_v10, %v1126_v62  ;;  %v12108_v62 = vmov 0  ;;  %vm588_vm4 = vcmp.ge.s32.totalorder %v8860_v59, %v8756_v19  ;;  %vm609_vm2 = vcmp.lt.s32.totalorder %v8860_v59, %v8768_v3  ;;  %vm628_vm5 = vmand %vm587_vm15, %vm608_vm1 }
 0x19c   : > { %v1129_v53 = vmul.f32 %v970_v12, %v8633_v13  ;;  %v972_v6 = vpop.f32.mrb[21].mxu1  ;;  %7465 = vmatpush1.bf16.msk.msra.mxu0 %vm8855_vm3, %v12103_v9  ;;  %v12109_v62 = vsel %vm8878_vm10, 4294967295, %v12108_v62  ;;  %vm589_vm12 = vcmp.ge.s32.totalorder %v8867_v58, %v8756_v19  ;;  %vm610_vm0 = vcmp.lt.s32.totalorder %v8867_v58, %v8768_v3  ;;  %vm8895_vm6 = vmpackc.low %vm628_vm5, %vm627_vm11 }
 0x19d   : > { %v1130_v10 = vmul.f32 %v972_v6, %v8635_v14  ;;  %7406 = vmatprep.subr.bf16.mxu1 %v7405_v7  ;;  %12110 = vst [vmem:[#allocation74_spill] sm:$0xff] %v12109_v62  ;;  %7466 = vmatprep.subr.bf16.mxu0 %v12104_v11  ;;  %v8892_v7 = vadd.s32 96, %v8387_v15  ;;  %v12111_v14 = vmov 0  ;;  %v8900_v13 = vadd.s32 104, %v8387_v15  ;;  %vm8906_vm1 = vmand %vm588_vm4, %vm609_vm2 }
 0x19e   : > { %7408 = vmatpush1.bf16.msra.mxu1 %v7407_v56  ;;  %v12112_v14 = vsel %vm8895_vm6, 4294967295, %v12111_v14  ;;  %vm630_vm5 = vmand %vm589_vm12, %vm610_vm0  ;;  %vm593_vm15 = vcmp.ge.s32.totalorder %v8915_v2, %v8756_v19 }
 0x19f   : > { %v976_v6 = vpop.f32.mrb[22].mxu1  ;;  %12113 = vst [vmem:[#allocation75_spill] sm:$0xff] %v12112_v14  ;;  %vm590_vm7 = vcmp.ge.s32.totalorder %v8892_v7, %v8756_v19  ;;  %vm611_vm9 = vcmp.lt.s32.totalorder %v8892_v7, %v8768_v3  ;;  %vm612_vm12 = vcmp.lt.s32.totalorder %v8900_v13, %v8768_v3  ;;  %vm8932_vm11 = vmpackc.low %vm630_vm5, %vm8906_vm1  ;;  %vm614_vm1 = vcmp.lt.s32.totalorder %v8915_v2, %v8768_v3 }
 0x1a0   : > { %v1131_v12 = vmul.f32 %v976_v6, %v8640_v17  ;;  %v978_v56 = vpop.f32.mrb[23].mxu1  ;;  %7468 = vmatpush1.bf16.msk.msra.mxu0 %vm8878_vm10, %v12103_v9  ;;  %v8911_v6 = vadd.s32 112, %v8387_v15  ;;  %vm8941_vm0 = vmand %vm590_vm7, %vm611_vm9  ;;  %vm12121_vm5 = vcmp.ge.s32.totalorder %v8900_v13, %v8756_v19 }
 0x1a1   : > { %v1132_v5 = vmul.f32 %v978_v56, %v8642_v18  ;;  %7469 = vmatprep.subr.bf16.mxu0 %v12104_v11  ;;  %vm634_vm9 = vmand %vm593_vm15, %vm614_vm1 }
 0x1a2   : > { %v7411_v17 = vpack.c.bf16 %v1131_v12, %v1129_v53  ;;  %vm592_vm4 = vcmp.ge.s32.totalorder %v8911_v6, %v8756_v19  ;;  %vm613_vm2 = vcmp.lt.s32.totalorder %v8911_v6, %v8768_v3 }
 0x1a3   : > { %v982_v1 = vpop.f32.mrb[24].mxu1  ;;  %v7409_v56 = vpack.c.bf16 %v1132_v5, %v1130_v10  ;;  %v12116_v5 = vmov 0  ;;  %vm8959_vm7 = vmand %vm592_vm4, %vm613_vm2 }
 0x1a4   : > { %v1133_v18 = vmul.f32 %v982_v1, %v8647_v20  ;;  %v984_v0 = vpop.f32.mrb[25].mxu1  ;;  %7471 = vmatpush1.bf16.msk.msra.mxu0 %vm8895_vm6, %v12103_v9  ;;  %v12117_v5 = vsel %vm8932_vm11, 4294967295, %v12116_v5  ;;  %v8950_v1 = vadd.s32 128, %v8387_v15  ;;  %vm632_vm6 = vmand %vm12121_vm5, %vm612_vm12 }
 0x1a5   : > { %v1134_v53 = vmul.f32 %v984_v0, %v8649_v21  ;;  %7410 = vmatprep.subr.bf16.mxu1 %v7409_v56  ;;  %12118 = vst [vmem:[#allocation76_spill] sm:$0xff] %v12117_v5  ;;  %7472 = vmatprep.subr.bf16.mxu0 %v12104_v11  ;;  %vm8970_vm12 = vmpackc.low %vm632_vm6, %vm8941_vm0 }
 0x1a6   : > { %7412 = vmatpush1.bf16.msra.mxu1 %v7411_v17  ;;  %v8956_v17 = vadd.s32 136, %v8387_v15  ;;  %v12125_v63 = vsel %vm8970_vm12, 4294967295, %v12124_v63  ;;  %vm594_vm4 = vcmp.ge.s32.totalorder %v8950_v1, %v8756_v19  ;;  %vm615_vm2 = vcmp.lt.s32.totalorder %v8950_v1, %v8768_v3  ;;  %vm8988_vm6 = vmpackc.low %vm634_vm9, %vm8959_vm7 }
 0x1a7   : > { %v988_v4 = vpop.f32.mrb[26].mxu1  ;;  %12126 = vst [vmem:[#allocation77_spill] sm:$0xff] %v12125_v63  ;;  %vm635_vm0 = vmand %vm594_vm4, %vm615_vm2 }
 0x1a8   : > { %v1135_v10 = vmul.f32 %v988_v4, %v8653_v22  ;;  %v990_v12 = vpop.f32.mrb[27].mxu1  ;;  %7474 = vmatpush1.bf16.msk.msra.mxu0 %vm8932_vm11, %v12103_v9  ;;  %vm595_vm15 = vcmp.ge.s32.totalorder %v8956_v17, %v8756_v19  ;;  %vm616_vm1 = vcmp.lt.s32.totalorder %v8956_v17, %v8768_v3 }
 0x1a9   : > { %v1136_v21 = vmul.f32 %v990_v12, %v8655_v25  ;;  %7475 = vmatprep.subr.bf16.mxu0 %v12104_v11  ;;  %v12127_v25 = vmov 0  ;;  %vm636_vm5 = vmand %vm595_vm15, %vm616_vm1 }
 0x1aa   : > { %v7415_v20 = vpack.c.bf16 %v1135_v10, %v1133_v18  ;;  %v8983_v18 = vadd.s32 144, %v8387_v15  ;;  %v12128_v25 = vsel %vm8988_vm6, 4294967295, %v12127_v25  ;;  %vm9013_vm2 = vmpackc.low %vm636_vm5, %vm635_vm0 }
 0x1ab   : > { %v994_v4 = vpop.f32.mrb[28].mxu1  ;;  %v7413_v12 = vpack.c.bf16 %v1136_v21, %v1134_v53  ;;  %12129 = vst [vmem:[#allocation78_spill] sm:$0xff] %v12128_v25  ;;  %v8993_v21 = vadd.s32 152, %v8387_v15 }
 0x1ac   : > { %v1137_v0 = vmul.f32 %v994_v4, %v8657_v26  ;;  %v996_v10 = vpop.f32.mrb[29].mxu1  ;;  %7477 = vmatpush1.bf16.msk.msra.mxu0 %vm8970_vm12, %v12103_v9  ;;  %vm596_vm7 = vcmp.ge.s32.totalorder %v8983_v18, %v8756_v19  ;;  %vm617_vm9 = vcmp.lt.s32.totalorder %v8983_v18, %v8768_v3 }
 0x1ad   : > { %12130 = vst [vmem:[#allocation79_spill] sm:$0xff] %v8993_v21  ;;  %v1138_v53 = vmul.f32 %v996_v10, %v8659_v27  ;;  %7414 = vmatprep.subr.bf16.mxu1 %v7413_v12  ;;  %7478 = vmatprep.subr.bf16.mxu0 %v12104_v11  ;;  %vm597_vm11 = vcmp.ge.s32.totalorder %v8993_v21, %v8756_v19  ;;  %v12131_v12 = vmov 0  ;;  %vm637_vm15 = vmand %vm596_vm7, %vm617_vm9 }
 0x1ae   : > { %7416 = vmatpush1.bf16.msra.mxu1 %v7415_v20  ;;  %vm618_vm4 = vcmp.lt.s32.totalorder %v8993_v21, %v8768_v3  ;;  %v12132_v12 = vsel %vm9013_vm2, 4294967295, %v12131_v12 }
 0x1af   : > { %v1000_v56 = vpop.f32.mrb[30].mxu1  ;;  %12133 = vst [vmem:[#allocation80_spill] sm:$0xff] %v12132_v12  ;;  %vm638_vm1 = vmand %vm597_vm11, %vm618_vm4 }
 0x1b0   : > { %v1139_v4 = vmul.f32 %v1000_v56, %v8661_v28  ;;  %v1002_v10 = vpop.f32.mrb[31].mxu1  ;;  %7480 = vmatpush1.bf16.msk.msra.mxu0 %vm8988_vm6, %v12103_v9  ;;  %vm9024_vm0 = vmpackc.low %vm638_vm1, %vm637_vm15  ;;  %vm12159_vm15 = vcmask 1044480  }
 0x1b1   : > { %v1140_v20 = vmul.f32 %v1002_v10, %v8663_v29  ;;  %7481 = vmatprep.subr.bf16.mxu0 %v12104_v11 }
 0x1b2   : > { %v7419_v27 = vpack.c.bf16 %v1139_v4, %v1137_v0  ;;  %v12134_v0 = vmov 0 }
 0x1b3   : > { %v1006_v56 = vpop.f32.mrb[32].mxu1  ;;  %v7417_v28 = vpack.c.bf16 %v1140_v20, %v1138_v53  ;;  %v12135_v0 = vsel %vm9024_vm0, 4294967295, %v12134_v0 }
 0x1b4   : > { %v1141_v19 = vmul.f32 %v1006_v56, %v8665_v30  ;;  %v1008_v3 = vpop.f32.mrb[33].mxu1  ;;  %7483 = vmatpush1.bf16.msk.msra.mxu0 %vm9013_vm2, %v12103_v9  ;;  %12136 = vst [vmem:[#allocation81_spill] sm:$0xff] %v12135_v0 }
 0x1b5   : > { %v1142_v10 = vmul.f32 %v1008_v3, %v8667_v31  ;;  %7418 = vmatprep.subr.bf16.mxu1 %v7417_v28  ;;  %7484 = vmatprep.subr.bf16.mxu0 %v12104_v11 }
 0x1b6   : > { %7420 = vmatpush1.bf16.msra.mxu1 %v7419_v27 }
 0x1b7   : > { %v1012_v4 = vpop.f32.mrb[34].mxu1 }
 0x1b8   : > { %v1143_v53 = vmul.f32 %v1012_v4, %v8669_v32  ;;  %v1014_v20 = vpop.f32.mrb[35].mxu1  ;;  %7486 = vmatpush1.bf16.msk.msra.mxu0 %vm9024_vm0, %v12103_v9 }
 0x1b9   : > { %v1144_v56 = vmul.f32 %v1014_v20, %v8671_v33 }
 0x1ba   : > { %v7423_v28 = vpack.c.bf16 %v1143_v53, %v1141_v19 }
 0x1bb   : > { %v1018_v3 = vpop.f32.mrb[36].mxu1  ;;  %v7421_v31 = vpack.c.bf16 %v1144_v56, %v1142_v10 }
 0x1bc   : > { %v1145_v27 = vmul.f32 %v1018_v3, %v8673_v34  ;;  %v1020_v30 = vpop.f32.mrb[37].mxu1 }
 0x1bd   : > { %v1146_v29 = vmul.f32 %v1020_v30, %v8675_v35  ;;  %7422 = vmatprep.subr.bf16.mxu1 %v7421_v31 }
 0x1be   : > { %7424 = vmatpush1.bf16.msra.mxu1 %v7423_v28 }
 0x1bf   : > { %v1024_v26 = vpop.f32.mrb[38].mxu1 }
 0x1c0   : > { %v1147_v4 = vmul.f32 %v1024_v26, %v8677_v36  ;;  %v1026_v32 = vpop.f32.mrb[39].mxu1 }
 0x1c1   : > { %v1148_v20 = vmul.f32 %v1026_v32, %v8679_v37 }
 0x1c2   : > { %v7427_v33 = vpack.c.bf16 %v1147_v4, %v1145_v27 }
 0x1c3   : > { %v1030_v22 = vpop.f32.mrb[40].mxu1  ;;  %v7425_v21 = vpack.c.bf16 %v1148_v20, %v1146_v29 }
 0x1c4   : > { %v1149_v19 = vmul.f32 %v1030_v22, %v8681_v38  ;;  %v1032_v53 = vpop.f32.mrb[41].mxu1 }
 0x1c5   : > { %v1150_v10 = vmul.f32 %v1032_v53, %v8683_v39  ;;  %7426 = vmatprep.subr.bf16.mxu1 %v7425_v21 }
 0x1c6   : > { %7428 = vmatpush1.bf16.msra.mxu1 %v7427_v33 }
 0x1c7   : > { %v1036_v56 = vpop.f32.mrb[42].mxu1 }
 0x1c8   : > { %v1151_v30 = vmul.f32 %v1036_v56, %v8685_v40  ;;  %v1038_v31 = vpop.f32.mrb[43].mxu1 }
 0x1c9   : > { %v1152_v28 = vmul.f32 %v1038_v31, %v8687_v41 }
 0x1ca   : > { %v7431_v26 = vpack.c.bf16 %v1151_v30, %v1149_v19 }
 0x1cb   : > { %v1042_v3 = vpop.f32.mrb[44].mxu1  ;;  %v7429_v36 = vpack.c.bf16 %v1152_v28, %v1150_v10 }
 0x1cc   : > { %v1153_v32 = vmul.f32 %v1042_v3, %v8689_v42  ;;  %v1044_v27 = vpop.f32.mrb[45].mxu1 }
 0x1cd   : > { %v1154_v29 = vmul.f32 %v1044_v27, %v8691_v43  ;;  %7430 = vmatprep.subr.bf16.mxu1 %v7429_v36 }
 0x1ce   : > { %7432 = vmatpush1.bf16.msra.mxu1 %v7431_v26  ;;  %v12137_v26 = vld [vmem:[#allocation56_spill] sm:$0xff] }
 0x1cf   : > { %v1048_v22 = vpop.f32.mrb[46].mxu1 }
 0x1d0   : > { %v1155_v21 = vmul.f32 %v1048_v22, %v8693_v44  ;;  %v1050_v33 = vpop.f32.mrb[47].mxu1 }
 0x1d1   : > { %v1156_v4 = vmul.f32 %v1050_v33, %v8695_v45  ;;  %v12138_v33 = vld [vmem:[#allocation57_spill] sm:$0xff] }
 0x1d2   : > { %v7435_v20 = vpack.c.bf16 %v1155_v21, %v1153_v32 }
 0x1d3   : > { %v1054_v53 = vpop.f32.mrb[48].mxu1  ;;  %v7433_v56 = vpack.c.bf16 %v1156_v4, %v1154_v29  ;;  %v12139_v29 = vld [vmem:[#allocation58_spill] sm:$0xff] }
 0x1d4   : > { %v1157_v19 = vmul.f32 %v1054_v53, %v8697_v46  ;;  %v1056_v30 = vpop.f32.mrb[49].mxu1 }
 0x1d5   : > { %v1158_v10 = vmul.f32 %v1056_v30, %v8699_v47  ;;  %7434 = vmatprep.subr.bf16.mxu1 %v7433_v56  ;;  %v12140_v30 = vld [vmem:[#allocation59_spill] sm:$0xff]  ;;  %v12141_v47 = vld [vmem:[#allocation60_spill] sm:$0xff] }
 0x1d6   : > { %7436 = vmatpush1.bf16.msra.mxu1 %v7435_v20 }
 0x1d7   : > { %v1060_v31 = vpop.f32.mrb[50].mxu1 }
 0x1d8   : > { %v1159_v36 = vmul.f32 %v1060_v31, %v8701_v48  ;;  %v1062_v28 = vpop.f32.mrb[51].mxu1 }
 0x1d9   : > { %v1160_v3 = vmul.f32 %v1062_v28, %v12137_v26  ;;  %v12142_v28 = vld [vmem:[#allocation61_spill] sm:$0xff] }
 0x1da   : > { %v7439_v27 = vpack.c.bf16 %v1159_v36, %v1157_v19 }
 0x1db   : > { %v1066_v22 = vpop.f32.mrb[52].mxu1  ;;  %v7437_v44 = vpack.c.bf16 %v1160_v3, %v1158_v10  ;;  %v12143_v10 = vld [vmem:[#allocation62_spill] sm:$0xff] }
 0x1dc   : > { %v1161_v32 = vmul.f32 %v1066_v22, %v12138_v33  ;;  %v1068_v21 = vpop.f32.mrb[53].mxu1 }
 0x1dd   : > { %v1162_v4 = vmul.f32 %v1068_v21, %v12139_v29  ;;  %7438 = vmatprep.subr.bf16.mxu1 %v7437_v44  ;;  %v12144_v21 = vld [vmem:[#allocation63_spill] sm:$0xff]  ;;  %v12145_v29 = vld [vmem:[#allocation64_spill] sm:$0xff] }
 0x1de   : > { %7440 = vmatpush1.bf16.msra.mxu1 %v7439_v27 }
 0x1df   : > { %v1072_v53 = vpop.f32.mrb[54].mxu1 }
 0x1e0   : > { %v1163_v56 = vmul.f32 %v1072_v53, %v12140_v30  ;;  %v1074_v20 = vpop.f32.mrb[55].mxu1 }
 0x1e1   : > { %v1164_v46 = vmul.f32 %v1074_v20, %v12141_v47  ;;  %v12146_v20 = vld [vmem:[#allocation65_spill] sm:$0xff] }
 0x1e2   : > { %v7443_v31 = vpack.c.bf16 %v1163_v56, %v1161_v32 }
 0x1e3   : > { %v1078_v48 = vpop.f32.mrb[56].mxu1  ;;  %v7441_v45 = vpack.c.bf16 %v1164_v46, %v1162_v4  ;;  %v12147_v46 = vld [vmem:[#allocation66_spill] sm:$0xff] }
 0x1e4   : > { %v1165_v19 = vmul.f32 %v1078_v48, %v12142_v28  ;;  %v1080_v36 = vpop.f32.mrb[57].mxu1 }
 0x1e5   : > { %v1166_v3 = vmul.f32 %v1080_v36, %v12143_v10  ;;  %7442 = vmatprep.subr.bf16.mxu1 %v7441_v45  ;;  %v12148_v36 = vld [vmem:[#allocation67_spill] sm:$0xff]  ;;  %v12149_v10 = vld [vmem:[#allocation68_spill] sm:$0xff] }
 0x1e6   : > { %7444 = vmatpush1.bf16.msra.mxu1 %v7443_v31 }
 0x1e7   : > { %v1084_v22 = vpop.f32.mrb[58].mxu1 }
 0x1e8   : > { %v1167_v44 = vmul.f32 %v1084_v22, %v12144_v21  ;;  %v1086_v27 = vpop.f32.mrb[59].mxu1 }
 0x1e9   : > { %v1168_v33 = vmul.f32 %v1086_v27, %v12145_v29  ;;  %v12150_v27 = vld [vmem:[#allocation5_spill] sm:$0xff] }
 0x1ea   : > { %v7447_v53 = vpack.c.bf16 %v1167_v44, %v1165_v19 }
 0x1eb   : > { %v1090_v30 = vpop.f32.mrb[60].mxu1  ;;  %v7445_v26 = vpack.c.bf16 %v1168_v33, %v1166_v3  ;;  %v660_v33 = vmul.u32 8, %v8759_v23 }
 0x1ec   : > { %v1169_v32 = vmul.f32 %v1090_v30, %v12146_v20  ;;  %v1092_v56 = vpop.f32.mrb[61].mxu1  ;;  %v12151_v30 = vld [vmem:[#allocation7_spill] sm:$0xff] }
 0x1ed   : > { %v1170_v4 = vmul.f32 %v1092_v56, %v12147_v46  ;;  %7446 = vmatprep.subr.bf16.mxu1 %v7445_v26  ;;  %vm665_vm9 = vcmp.ge.s32.totalorder %v8389_v16, %v660_v33 }
 0x1ee   : > { %7448 = vmatpush1.bf16.msra.mxu1 %v7447_v53  ;;  %v12152_v53 = vld [vmem:[#allocation9_spill] sm:$0xff] }
 0x1ef   : > { %v1096_v48 = vpop.f32.mrb[62].mxu1 }
 0x1f0   : > { %v1171_v45 = vmul.f32 %v1096_v48, %v12148_v36  ;;  %v1098_v31 = vpop.f32.mrb[63].mxu1  ;;  %v672_v48 = vadd.s32 8, %v660_v33  ;;  %v661_v36 = vmul.u32 8, %v8763_v24 }
 0x1f1   : > { %v1172_v28 = vmul.f32 %v1098_v31, %v12149_v10  ;;  %v12153_v31 = vld [vmem:[#allocation10_spill] sm:$0xff] }
 0x1f2   : > { %v7451_v22 = vpack.c.bf16 %v1171_v45, %v1169_v32  ;;  %vm677_vm4 = vcmp.lt.s32.totalorder %v8389_v16, %v672_v48  ;;  %vm667_vm2 = vcmp.ge.s32.totalorder %v8389_v16, %v661_v36 }
 0x1f3   : > { %v1102_v21 = vpop.f32.mrb[64].mxu1  ;;  %v7449_v47 = vpack.c.bf16 %v1172_v28, %v1170_v4  ;;  %v12154_v4 = vld [vmem:[#allocation2_spill] sm:$0xff] }
 0x1f4   : > { %v1173_v19 = vmul.f32 %v1102_v21, %v12150_v27  ;;  %v1104_v44 = vpop.f32.mrb[65].mxu1  ;;  %vm666_vm11 = vcmp.ge.s32.totalorder %v12154_v4, %v660_v33  ;;  %vm678_vm5 = vcmp.lt.s32.totalorder %v12154_v4, %v672_v48  ;;  %v673_v21 = vadd.s32 8, %v661_v36 }
 0x1f5   : > { %v1174_v3 = vmul.f32 %v1104_v44, %v12151_v30  ;;  %7450 = vmatprep.subr.bf16.mxu1 %v7449_v47  ;;  %v662_v44 = vmul.u32 8, %v8772_v49  ;;  %vm9070_vm7 = vmand %vm666_vm11, %vm678_vm5  ;;  %v12155_v47 = vmov 0  ;;  %vm668_vm1 = vcmp.ge.s32.totalorder %v12154_v4, %v661_v36 }
 0x1f6   : > { %7452 = vmatpush1.bf16.msra.mxu1 %v7451_v22  ;;  %v12156_v47 = vsel %vm9070_vm7, 4294967295, %v12155_v47  ;;  %vm680_vm0 = vcmp.lt.s32.totalorder %v12154_v4, %v673_v21  ;;  %vm9086_vm11 = vmand %vm665_vm9, %vm677_vm4  ;;  %v12162_v33 = vmov 0  ;;  %vm679_vm6 = vcmp.lt.s32.totalorder %v8389_v16, %v673_v21 }
 0x1f7   : > { %v1108_v26 = vpop.f32.mrb[66].mxu1  ;;  %12157 = vst [vmem:[#allocation2_spill] sm:$0xff] %v12156_v47  ;;  %v674_v22 = vadd.s32 8, %v662_v44  ;;  %v12163_v33 = vsel %vm9086_vm11, 4294967295, %v12162_v33  ;;  %vm12166_vm5 = vmmov %vm12159_vm15  ;;  %v12170_v48 = vmov 0  ;;  %v12173_v36 = vmov 0 }
 0x1f8   : > { %v1175_v56 = vmul.f32 %v1108_v26, %v12152_v53  ;;  %v1110_v46 = vpop.f32.mrb[67].mxu1  ;;  %12164 = vst [vmem:[#allocation82_spill] sm:$0xff] %v12163_v33  ;;  %v12165_v26 = vld [vmem:[#allocation4_spill] sm:$0xff] }
 0x1f9   : > { %v1176_v32 = vmul.f32 %v1110_v46, %v12153_v31  ;;  %v12158_v46 = vld [vmem:[#allocation3_spill] sm:$0xff]  ;;  %vm682_vm9 = vcmp.lt.s32.totalorder %v12154_v4, %v674_v22 }
 0x1fa   : > { %v7455_v45 = vpack.c.bf16 %v1175_v56, %v1173_v19  ;;  %v12160_v19 = vmov 1.0   ;;  %v12167_v56 = vmov 0 }
 0x1fb   : > { %v7453_v28 = vpack.c.bf16 %v1176_v32, %v1174_v3  ;;  %v12176_v32 = vmov 0 }
 0x1fd   : > { %7454 = vmatprep.subr.bf16.mxu1 %v7453_v28 }
 0x1fe   : > { %7456 = vmatpush1.bf16.msra.mxu1 %v7455_v45  ;;  %v12179_v45 = vmov 0.0  }
 0x1ff   : > { %6908 = vmatprep.subr.msk.mxu1 %vm12159_vm15, %v12158_v46  ;;  %vm9092_vm15 = vmand %vm668_vm1, %vm680_vm0  ;;  %vm669_vm1 = vcmp.ge.s32.totalorder %v8389_v16, %v662_v44 }
 0x200   : > { %v12168_v56 = vsel %vm9092_vm15, 4294967295, %v12167_v56  ;;  %vm9107_vm0 = vmand %vm667_vm2, %vm679_vm6 }
 0x201   : > { %6877 = vmatmul.mubr.msk.f32.vlgmr.msra.gmra.mrb[68].mxu1 %vm8744_vm14, %v12160_v19  ;;  %12169 = vst [vmem:[#allocation83_spill] sm:$0xff] %v12168_v56  ;;  %vm670_vm14 = vcmp.ge.s32.totalorder %v12154_v4, %v662_v44  ;;  %v12171_v48 = vsel %vm9107_vm0, 4294967295, %v12170_v48 }
 0x202   : > { %6878 = vmatprep.mubr.msk.f32.mxu1 %vm9070_vm7, %v12160_v19  ;;  %6909 = vmatpush1.msk.msra.mxu1 %vm12166_vm5, %v12165_v26  ;;  %12172 = vst [vmem:[#allocation84_spill] sm:$0xff] %v12171_v48  ;;  %vm9111_vm4 = vmand %vm670_vm14, %vm682_vm9  ;;  %vm681_vm5 = vcmp.lt.s32.totalorder %v8389_v16, %v674_v22  ;;  %vm12180_vm14 = vcmask 261120  }
 0x203   : > { %7495 = vmatprep.subr.bf16.mxu1 %v12104_v11  ;;  %v12174_v36 = vsel %vm9111_vm4, 4294967295, %v12173_v36  ;;  %vm9123_vm6 = vmand %vm669_vm1, %vm681_vm5  ;;  %vm12184_vm5 = vcmask 39936  }
 0x204   : > { %12175 = vst [vmem:[#allocation85_spill] sm:$0xff] %v12174_v36  ;;  %v12177_v32 = vsel %vm9123_vm6, 4294967295, %v12176_v32  ;;  %vm12181_vm2 = vmmov %vm12180_vm14 }
 0x205   : > { %6879 = vmatmul.mubr.msk.f32.gmra.mrb[70].mxu1 %vm9086_vm11, %v12160_v19  ;;  %12178 = vst [vmem:[#allocation86_spill] sm:$0xff] %v12177_v32  ;;  %vm12182_vm9 = vmmov %vm12181_vm2 }
 0x206   : > { %6880 = vmatprep.mubr.msk.f32.mxu1 %vm9092_vm15, %v12160_v19  ;;  %vm12183_vm1 = vmmov %vm12181_vm2 }
 0x209   : > { %6881 = vmatmul.mubr.msk.f32.gmra.mrb[72].mxu1 %vm9107_vm0, %v12160_v19 }
 0x20a   : > { %6882 = vmatprep.mubr.msk.f32.mxu1 %vm9111_vm4, %v12160_v19 }
 0x20d   : > { %6883 = vmatmul.mubr.msk.f32.gmra.mrb[74].mxu1 %vm9123_vm6, %v12160_v19 }
 0x20e   : > { %1451 = vmatprep.mubr.f32.mxu1 %v12179_v45 }
 0x2d4   : > { %v9131_v28 = vpop.f32.mrb[68].mxu1 }
 0x2d5   : > { %v9133_v4 = vpop.f32.mrb[69].mxu1  ;;  %v1266_v44 = vmul.f32 %v9131_v28, %v9131_v28 }
 0x2d6   : > { %v1267_v21 = vmul.f32 %v9133_v4, %v9133_v4 }
 0x2d8   : > { %v9139_v22 = vpop.f32.mrb[70].mxu1  ;;  %6904 = vmatprep.mubr.msk.f32.mxu0 %vm12180_vm14, %v1267_v21  ;;  %vm12185_vm14 = vmmov %vm12184_vm5 }
 0x2d9   : > { %v9142_v36 = vpop.f32.mrb[71].mxu1  ;;  %1351 = vmatmul.mubr.f32.vlgmr.msra.gmra.mrb[60].mxu0 %v1266_v44  ;;  %v1268_v48 = vmul.f32 %v9139_v22, %v9139_v22 }
 0x2da   : > { %v1269_v32 = vmul.f32 %v9142_v36, %v9142_v36 }
 0x2dc   : > { %v9148_v56 = vpop.f32.mrb[72].mxu1  ;;  %6905 = vmatprep.mubr.msk.f32.mxu0 %vm12181_vm2, %v1269_v32  ;;  %vm12186_vm2 = vmmov %vm12184_vm5 }
 0x2dd   : > { %v9151_v33 = vpop.f32.mrb[73].mxu1  ;;  %1356 = vmatmul.mubr.f32.gmra.mrb[62].mxu0 %v1268_v48  ;;  %v1270_v21 = vmul.f32 %v9148_v56, %v9148_v56 }
 0x2de   : > { %v1271_v47 = vmul.f32 %v9151_v33, %v9151_v33 }
 0x2e0   : > { %v9157_v44 = vpop.f32.mrb[74].mxu1  ;;  %6906 = vmatprep.mubr.msk.f32.mxu0 %vm12182_vm9, %v1271_v47  ;;  %vm12187_vm9 = vmmov %vm12186_vm2 }
 0x2e1   : > { %v9160_v3 = vpop.f32.mrb[75].mxu1  ;;  %1361 = vmatmul.mubr.f32.gmra.mrb[64].mxu0 %v1270_v21  ;;  %v1272_v32 = vmul.f32 %v9157_v44, %v9157_v44 }
 0x2e2   : > { %v1273_v19 = vmul.f32 %v9160_v3, %v9160_v3 }
 0x2e4   : > { %6907 = vmatprep.mubr.msk.f32.mxu0 %vm12183_vm1, %v1273_v19  ;;  %vm12188_vm1 = vnez %v12112_v14 }
 0x2e5   : > { %1366 = vmatmul.mubr.f32.gmra.mrb[66].mxu0 %v1272_v32 }
 0x2e6   : > { %1644 = vmatprep.mubr.f32.mxu0 %v12179_v45 }
 0x3ac   : > { %v1352_v48 = vpop.f32.mrb[60].mxu0 }
 0x3ad   : > { %v1353_v31 = vadd.f32 1e-07, %v1352_v48  ;;  %v1354_v53 = vpop.f32.mrb[61].mxu0 }
 0x3ae   : > { %v9217_v53 = vmul.u32 8, %v8389_v16 }
 0x3af   : > { %7901 = vrsqrt.f32 %v1353_v31 }
 0x3b0   : > { %v1357_v30 = vpop.f32.mrb[62].mxu0  ;;  %vm712_vm6 = vcmp.ge.s32.totalorder %v8387_v15, %v9217_v53  ;;  %vm713_vm15 = vcmp.ge.s32.totalorder %v8759_v23, %v9217_v53 }
 0x3b1   : > { %v1358_v47 = vadd.f32 1e-07, %v1357_v30  ;;  %v1359_v27 = vpop.f32.mrb[63].mxu0 }
 0x3b3   : > { %7903 = vrsqrt.f32 %v1358_v47 }
 0x3b4   : > { %v1362_v21 = vpop.f32.mrb[64].mxu0 }
 0x3b5   : > { %v1363_v10 = vadd.f32 1e-07, %v1362_v21  ;;  %v1364_v20 = vpop.f32.mrb[65].mxu0 }
 0x3b7   : > { %7905 = vrsqrt.f32 %v1363_v10 }
 0x3b8   : > { %v1367_v29 = vpop.f32.mrb[66].mxu0 }
 0x3b9   : > { %v7902_v43 = vpop.eup %7901  ;;  %v1368_v42 = vadd.f32 1e-07, %v1367_v29  ;;  %v1369_v41 = vpop.f32.mrb[67].mxu0 }
 0x3ba   : > { %6910 = vmatmul.mubr.msk.f32.vlgmr.msra.gmra.mrb[76].mxu1 %vm12184_vm5, %v7902_v43  ;;  %vm12189_vm5 = vnez %v12117_v5 }
 0x3bb   : > { %7907 = vrsqrt.f32 %v1368_v42  ;;  %1457 = vmatprep.mubr.f32.mxu1 %v12179_v45  ;;  %7497 = vmatpush1.bf16.msk.msra.mxu1 %vm8796_vm13, %v12103_v9 }
 0x3bc   : > { %7498 = vmatprep.subr.bf16.mxu1 %v12104_v11 }
 0x3bd   : > { %v7904_v27 = vpop.eup %7903 }
 0x3be   : > { %6911 = vmatmul.mubr.msk.f32.gmra.mrb[78].mxu1 %vm12185_vm14, %v7904_v27  ;;  %vm12190_vm14 = vnez %v12128_v25 }
 0x3bf   : > { %1463 = vmatprep.mubr.f32.mxu1 %v12179_v45  ;;  %7500 = vmatpush1.bf16.msk.msra.mxu1 %vm8831_vm8, %v12103_v9 }
 0x3c0   : > { %7501 = vmatprep.subr.bf16.mxu1 %v12104_v11 }
 0x3c1   : > { %v7906_v41 = vpop.eup %7905 }
 0x3c2   : > { %6912 = vmatmul.mubr.msk.f32.gmra.mrb[80].mxu1 %vm12186_vm2, %v7906_v41  ;;  %vm12191_vm2 = vnez %v12132_v12 }
 0x3c3   : > { %1469 = vmatprep.mubr.f32.mxu1 %v12179_v45  ;;  %7503 = vmatpush1.bf16.msk.msra.mxu1 %vm8855_vm3, %v12103_v9 }
 0x3c4   : > { %7504 = vmatprep.subr.bf16.mxu1 %v12104_v11 }
 0x3c5   : > { %v7908_v42 = vpop.eup %7907 }
 0x3c6   : > { %6913 = vmatmul.mubr.msk.f32.gmra.mrb[82].mxu1 %vm12187_vm9, %v7908_v42  ;;  %vm12192_vm9 = vnez %v12135_v0 }
 0x3c7   : > { %7506 = vmatpush1.bf16.msk.msra.mxu1 %vm8878_vm10, %v12103_v9 }
 0x3c8   : > { %7507 = vmatprep.subr.bf16.mxu1 %v12104_v11 }
 0x3cb   : > { %7509 = vmatpush1.bf16.msk.msra.mxu1 %vm12188_vm1, %v12103_v9 }
 0x3cc   : > { %7510 = vmatprep.subr.bf16.mxu1 %v12104_v11 }
 0x3cf   : > { %7512 = vmatpush1.bf16.msk.msra.mxu1 %vm12189_vm5, %v12103_v9 }
 0x3d0   : > { %7513 = vmatprep.subr.bf16.mxu1 %v12104_v11 }
 0x3d3   : > { %7515 = vmatpush1.bf16.msk.msra.mxu1 %vm8970_vm12, %v12103_v9 }
 0x3d4   : > { %7516 = vmatprep.subr.bf16.mxu1 %v12104_v11 }
 0x3d7   : > { %7518 = vmatpush1.bf16.msk.msra.mxu1 %vm12190_vm14, %v12103_v9 }
 0x3d8   : > { %7519 = vmatprep.subr.bf16.mxu1 %v12104_v11 }
 0x3db   : > { %7521 = vmatpush1.bf16.msk.msra.mxu1 %vm12191_vm2, %v12103_v9  ;;  %vm714_vm2 = vcmp.ge.s32.totalorder %v8763_v24, %v9217_v53 }
 0x3dc   : > { %7522 = vmatprep.subr.bf16.mxu1 %v12104_v11 }
 0x3df   : > { %7524 = vmatpush1.bf16.msk.msra.mxu1 %vm12192_vm9, %v12103_v9  ;;  %vm12194_vm9 = vcmask 1044480  }
 0x48d   : > { %v1453_v43 = vpop.f32.mrb[76].mxu1 }
 0x48e   : > { %v1476_v29 = vmul.f32 %v1453_v43, %v9131_v28  ;;  %v1455_v10 = vpop.f32.mrb[77].mxu1  ;;  %v9223_v28 = vadd.s32 8, %v9217_v53 }
 0x48f   : > { %v1477_v20 = vmul.f32 %v1455_v10, %v9133_v4 }
 0x490   : > { %vm745_vm4 = vcmp.lt.s32.totalorder %v8387_v15, %v9223_v28  ;;  %vm746_vm11 = vcmp.lt.s32.totalorder %v8759_v23, %v9223_v28 }
 0x491   : > { %v1459_v30 = vpop.f32.mrb[78].mxu1  ;;  %vm777_vm0 = vmand %vm712_vm6, %vm745_vm4  ;;  %vm747_vm4 = vcmp.lt.s32.totalorder %v8763_v24, %v9223_v28  ;;  %vm12195_vm6 = vcmask 261120  }
 0x492   : > { %v1478_v31 = vmul.f32 %v1459_v30, %v9139_v22  ;;  %v1461_v19 = vpop.f32.mrb[79].mxu1  ;;  %vm778_vm7 = vmand %vm713_vm15, %vm746_vm11  ;;  %vm715_vm15 = vcmp.ge.s32.totalorder %v8772_v49, %v9217_v53 }
 0x493   : > { %v1479_v32 = vmul.f32 %v1461_v19, %v9142_v36  ;;  %v9249_v23 = vsel %vm778_vm7, 1.0, %v12179_v45  ;;  %vm779_vm11 = vmand %vm714_vm2, %vm747_vm4  ;;  %vm716_vm2 = vcmp.ge.s32.totalorder %v8782_v52, %v9217_v53  ;;  %vm749_vm4 = vcmp.lt.s32.totalorder %v8782_v52, %v9223_v28 }
 0x494   : > { %v7489_v48 = vpack.c.bf16 %v1478_v31, %v1476_v29  ;;  %12196 = vst [vmem:[#allocation88_spill] sm:$0xff] %v9249_v23  ;;  %vm12198_vm14 = vmmov %vm12195_vm6  ;;  %v9262_v24 = vsel %vm779_vm11, 1.0, %v12179_v45  ;;  %vm750_vm11 = vcmp.lt.s32.totalorder %v8789_v51, %v9223_v28  ;;  %v700_v29 = vadd.s32 168, %v8387_v15 }
 0x495   : > { %v1465_v47 = vpop.f32.mrb[80].mxu1  ;;  %v7487_v21 = vpack.c.bf16 %v1479_v32, %v1477_v20  ;;  %12199 = vst [vmem:[#allocation89_spill] sm:$0xff] %v9262_v24  ;;  %v701_v20 = vadd.s32 176, %v8387_v15  ;;  %v702_v31 = vadd.s32 184, %v8387_v15  ;;  %v703_v32 = vadd.s32 192, %v8387_v15 }
 0x496   : > { %v1480_v27 = vmul.f32 %v1465_v47, %v9148_v56  ;;  %v1467_v41 = vpop.f32.mrb[81].mxu1  ;;  %v704_v47 = vadd.s32 200, %v8387_v15 }
 0x497   : > { %v1481_v4 = vmul.f32 %v1467_v41, %v9151_v33  ;;  %7488 = vmatprep.subr.bf16.mxu0 %v7487_v21  ;;  %v9237_v33 = vsel %vm777_vm0, 1.0, %v12179_v45  ;;  %vm12197_vm0 = vmmov %vm12194_vm9 }
 0x498   : > { %7490 = vmatpush1.bf16.msra.mxu0 %v7489_v48  ;;  %12193 = vst [vmem:[#allocation87_spill] sm:$0xff] %v9237_v33 }
 0x499   : > { %v1471_v16 = vpop.f32.mrb[82].mxu1 }
 0x49a   : > { %v1482_v42 = vmul.f32 %v1471_v16, %v9157_v44  ;;  %v1473_v22 = vpop.f32.mrb[83].mxu1  ;;  %v699_v44 = vadd.s32 160, %v8387_v15 }
 0x49b   : > { %v1483_v56 = vmul.f32 %v1473_v22, %v9160_v3  ;;  %v12229_v3 = vld [vmem:[#allocation79_spill] sm:$0xff] }
 0x49c   : > { %v7493_v36 = vpack.c.bf16 %v1482_v42, %v1480_v27  ;;  %v705_v27 = vadd.s32 208, %v8387_v15  ;;  %v707_v42 = vadd.s32 224, %v8387_v15 }
 0x49d   : > { %v7491_v43 = vpack.c.bf16 %v1483_v56, %v1481_v4  ;;  %v706_v4 = vadd.s32 216, %v8387_v15  ;;  %v708_v56 = vadd.s32 232, %v8387_v15 }
 0x49f   : > { %7492 = vmatprep.subr.bf16.mxu0 %v7491_v43  ;;  %v709_v43 = vadd.s32 240, %v8387_v15 }
 0x4a0   : > { %7494 = vmatpush1.bf16.msra.mxu0 %v7493_v36 }
 0x4a1   : > { %6998 = vmatprep.subr.msk.mxu0 %vm12194_vm9, %v12158_v46  ;;  %vm748_vm9 = vcmp.lt.s32.totalorder %v8772_v49, %v9223_v28 }
 0x4a2   : > { %vm780_vm7 = vmand %vm715_vm15, %vm748_vm9 }
 0x4a3   : > { %6914 = vmatmul.mubr.msk.f32.vlgmr.msra.gmra.mrb[68].mxu0 %vm12195_vm6, %v9237_v33  ;;  %v9272_v49 = vsel %vm780_vm7, 1.0, %v12179_v45  ;;  %vm12201_vm15 = vmmov %vm12195_vm6  ;;  %vm718_vm7 = vcmp.ge.s32.totalorder %v8801_v60, %v9217_v53 }
 0x4a4   : > { %1650 = vmatprep.mubr.f32.mxu0 %v12179_v45  ;;  %6999 = vmatpush1.msk.msra.mxu0 %vm12197_vm0, %v12165_v26  ;;  %12200 = vst [vmem:[#allocation90_spill] sm:$0xff] %v9272_v49  ;;  %vm717_vm0 = vcmp.ge.s32.totalorder %v8789_v51, %v9217_v53 }
 0x4a5   : > { %7627 = vmatprep.subr.bf16.mxu0 %v12104_v11  ;;  %vm782_vm9 = vmand %vm717_vm0, %vm750_vm11  ;;  %vm752_vm0 = vcmp.lt.s32.totalorder %v8818_v50, %v9223_v28 }
 0x4a6   : > { %v9292_v51 = vsel %vm782_vm9, 1.0, %v12179_v45  ;;  %vm720_vm9 = vcmp.ge.s32.totalorder %v8836_v54, %v9217_v53 }
 0x4a7   : > { %6915 = vmatmul.mubr.msk.f32.gmra.mrb[70].mxu0 %vm12198_vm14, %v9249_v23  ;;  %vm781_vm14 = vmand %vm716_vm2, %vm749_vm4  ;;  %vm751_vm2 = vcmp.lt.s32.totalorder %v8801_v60, %v9223_v28  ;;  %12204 = vst [vmem:[#allocation92_spill] sm:$0xff] %v9292_v51 }
 0x4a8   : > { %1656 = vmatprep.mubr.f32.mxu0 %v12179_v45  ;;  %v9282_v52 = vsel %vm781_vm14, 1.0, %v12179_v45  ;;  %vm12203_vm4 = vmmov %vm12195_vm6  ;;  %vm719_vm14 = vcmp.ge.s32.totalorder %v8818_v50, %v9217_v53 }
 0x4a9   : > { %12202 = vst [vmem:[#allocation91_spill] sm:$0xff] %v9282_v52  ;;  %vm12205_vm11 = vmmov %vm12203_vm4 }
 0x4ab   : > { %6916 = vmatmul.mubr.msk.f32.gmra.mrb[72].mxu0 %vm12195_vm6, %v9262_v24  ;;  %vm783_vm6 = vmand %vm718_vm7, %vm751_vm2  ;;  %vm753_vm7 = vcmp.lt.s32.totalorder %v8836_v54, %v9223_v28 }
 0x4ac   : > { %1662 = vmatprep.mubr.f32.mxu0 %v12179_v45  ;;  %v9302_v60 = vsel %vm783_vm6, 1.0, %v12179_v45  ;;  %vm12207_vm2 = vmmov %vm12203_vm4  ;;  %vm721_vm6 = vcmp.ge.s32.totalorder %v8844_v55, %v9217_v53 }
 0x4ad   : > { %12206 = vst [vmem:[#allocation93_spill] sm:$0xff] %v9302_v60 }
 0x4af   : > { %6917 = vmatmul.mubr.msk.f32.gmra.mrb[74].mxu0 %vm12201_vm15, %v9272_v49  ;;  %vm784_vm15 = vmand %vm719_vm14, %vm752_vm0  ;;  %vm754_vm14 = vcmp.lt.s32.totalorder %v8844_v55, %v9223_v28 }
 0x4b0   : > { %1668 = vmatprep.mubr.f32.mxu0 %v12179_v45  ;;  %v9312_v50 = vsel %vm784_vm15, 1.0, %v12179_v45  ;;  %vm12209_vm0 = vmmov %vm12207_vm2  ;;  %vm722_vm15 = vcmp.ge.s32.totalorder %v8860_v59, %v9217_v53 }
 0x4b1   : > { %12208 = vst [vmem:[#allocation94_spill] sm:$0xff] %v9312_v50 }
 0x4b3   : > { %6918 = vmatmul.mubr.msk.f32.gmra.mrb[76].mxu0 %vm12203_vm4, %v9282_v52  ;;  %vm785_vm4 = vmand %vm720_vm9, %vm753_vm7  ;;  %vm755_vm9 = vcmp.lt.s32.totalorder %v8860_v59, %v9223_v28 }
 0x4b4   : > { %1674 = vmatprep.mubr.f32.mxu0 %v12179_v45  ;;  %v9322_v54 = vsel %vm785_vm4, 1.0, %v12179_v45  ;;  %vm12211_vm7 = vmmov %vm12209_vm0  ;;  %vm723_vm4 = vcmp.ge.s32.totalorder %v8867_v58, %v9217_v53 }
 0x4b5   : > { %12210 = vst [vmem:[#allocation95_spill] sm:$0xff] %v9322_v54 }
 0x4b7   : > { %6919 = vmatmul.mubr.msk.f32.gmra.mrb[78].mxu0 %vm12205_vm11, %v9292_v51  ;;  %vm786_vm11 = vmand %vm721_vm6, %vm754_vm14  ;;  %vm756_vm6 = vcmp.lt.s32.totalorder %v8867_v58, %v9223_v28 }
 0x4b8   : > { %1680 = vmatprep.mubr.f32.mxu0 %v12179_v45  ;;  %v9332_v55 = vsel %vm786_vm11, 1.0, %v12179_v45  ;;  %vm12213_vm14 = vmmov %vm12209_vm0  ;;  %vm724_vm11 = vcmp.ge.s32.totalorder %v8892_v7, %v9217_v53 }
 0x4b9   : > { %12212 = vst [vmem:[#allocation96_spill] sm:$0xff] %v9332_v55 }
 0x4bb   : > { %6920 = vmatmul.mubr.msk.f32.gmra.mrb[80].mxu0 %vm12207_vm2, %v9302_v60  ;;  %vm787_vm2 = vmand %vm722_vm15, %vm755_vm9  ;;  %vm757_vm15 = vcmp.lt.s32.totalorder %v8892_v7, %v9223_v28 }
 0x4bc   : > { %1686 = vmatprep.mubr.f32.mxu0 %v12179_v45  ;;  %v9342_v59 = vsel %vm787_vm2, 1.0, %v12179_v45  ;;  %vm12215_vm9 = vmmov %vm12211_vm7  ;;  %vm725_vm2 = vcmp.ge.s32.totalorder %v8900_v13, %v9217_v53 }
 0x4bd   : > { %12214 = vst [vmem:[#allocation97_spill] sm:$0xff] %v9342_v59 }
 0x4bf   : > { %6921 = vmatmul.mubr.msk.f32.gmra.mrb[82].mxu0 %vm12209_vm0, %v9312_v50  ;;  %vm788_vm0 = vmand %vm723_vm4, %vm756_vm6  ;;  %vm758_vm4 = vcmp.lt.s32.totalorder %v8900_v13, %v9223_v28 }
 0x4c0   : > { %1692 = vmatprep.mubr.f32.mxu0 %v12179_v45  ;;  %v9352_v58 = vsel %vm788_vm0, 1.0, %v12179_v45  ;;  %vm12217_vm6 = vmmov %vm12215_vm9  ;;  %vm726_vm0 = vcmp.ge.s32.totalorder %v8911_v6, %v9217_v53 }
 0x4c1   : > { %12216 = vst [vmem:[#allocation98_spill] sm:$0xff] %v9352_v58 }
 0x4c3   : > { %6922 = vmatmul.mubr.msk.f32.gmra.mrb[84].mxu0 %vm12211_vm7, %v9322_v54  ;;  %vm789_vm7 = vmand %vm724_vm11, %vm757_vm15  ;;  %vm759_vm11 = vcmp.lt.s32.totalorder %v8911_v6, %v9223_v28 }
 0x4c4   : > { %1698 = vmatprep.mubr.f32.mxu0 %v12179_v45  ;;  %v9362_v7 = vsel %vm789_vm7, 1.0, %v12179_v45  ;;  %vm12219_vm15 = vmmov %vm12217_vm6  ;;  %vm727_vm7 = vcmp.ge.s32.totalorder %v8915_v2, %v9217_v53 }
 0x4c5   : > { %12218 = vst [vmem:[#allocation99_spill] sm:$0xff] %v9362_v7 }
 0x4c7   : > { %6923 = vmatmul.mubr.msk.f32.gmra.mrb[86].mxu0 %vm12213_vm14, %v9332_v55  ;;  %vm790_vm14 = vmand %vm725_vm2, %vm758_vm4  ;;  %vm760_vm2 = vcmp.lt.s32.totalorder %v8915_v2, %v9223_v28 }
 0x4c8   : > { %1704 = vmatprep.mubr.f32.mxu0 %v12179_v45  ;;  %v9372_v13 = vsel %vm790_vm14, 1.0, %v12179_v45  ;;  %vm12221_vm4 = vmmov %vm12217_vm6  ;;  %vm728_vm14 = vcmp.ge.s32.totalorder %v8950_v1, %v9217_v53 }
 0x4c9   : > { %12220 = vst [vmem:[#allocation100_spill] sm:$0xff] %v9372_v13 }
 0x4cb   : > { %6924 = vmatmul.mubr.msk.f32.gmra.mrb[88].mxu0 %vm12215_vm9, %v9342_v59  ;;  %vm791_vm9 = vmand %vm726_vm0, %vm759_vm11  ;;  %vm761_vm0 = vcmp.lt.s32.totalorder %v8950_v1, %v9223_v28 }
 0x4cc   : > { %1710 = vmatprep.mubr.f32.mxu0 %v12179_v45  ;;  %v9382_v6 = vsel %vm791_vm9, 1.0, %v12179_v45  ;;  %vm12223_vm11 = vmmov %vm12221_vm4  ;;  %vm729_vm9 = vcmp.ge.s32.totalorder %v8956_v17, %v9217_v53 }
 0x4cd   : > { %12222 = vst [vmem:[#allocation101_spill] sm:$0xff] %v9382_v6 }
 0x4cf   : > { %6925 = vmatmul.mubr.msk.f32.gmra.mrb[90].mxu0 %vm12217_vm6, %v9352_v58  ;;  %vm792_vm6 = vmand %vm727_vm7, %vm760_vm2  ;;  %vm762_vm7 = vcmp.lt.s32.totalorder %v8956_v17, %v9223_v28 }
 0x4d0   : > { %1716 = vmatprep.mubr.f32.mxu0 %v12179_v45  ;;  %v9392_v2 = vsel %vm792_vm6, 1.0, %v12179_v45  ;;  %vm12225_vm2 = vmmov %vm12221_vm4  ;;  %vm730_vm6 = vcmp.ge.s32.totalorder %v8983_v18, %v9217_v53 }
 0x4d1   : > { %12224 = vst [vmem:[#allocation102_spill] sm:$0xff] %v9392_v2 }
 0x4d3   : > { %6926 = vmatmul.mubr.msk.f32.gmra.mrb[92].mxu0 %vm12219_vm15, %v9362_v7  ;;  %vm793_vm15 = vmand %vm728_vm14, %vm761_vm0  ;;  %vm763_vm14 = vcmp.lt.s32.totalorder %v8983_v18, %v9223_v28 }
 0x4d4   : > { %1722 = vmatprep.mubr.f32.mxu0 %v12179_v45  ;;  %v9402_v1 = vsel %vm793_vm15, 1.0, %v12179_v45  ;;  %vm12227_vm0 = vmmov %vm12225_vm2  ;;  %vm731_vm15 = vcmp.ge.s32.totalorder %v12229_v3, %v9217_v53 }
 0x4d5   : > { %12226 = vst [vmem:[#allocation103_spill] sm:$0xff] %v9402_v1 }
 0x4d7   : > { %6927 = vmatmul.mubr.msk.f32.gmra.mrb[94].mxu0 %vm12221_vm4, %v9372_v13  ;;  %vm794_vm4 = vmand %vm729_vm9, %vm762_vm7  ;;  %vm764_vm9 = vcmp.lt.s32.totalorder %v12229_v3, %v9223_v28 }
 0x4d8   : > { %1728 = vmatprep.mubr.f32.mxu0 %v12179_v45  ;;  %v9412_v17 = vsel %vm794_vm4, 1.0, %v12179_v45  ;;  %vm12230_vm7 = vmmov %vm12227_vm0  ;;  %vm732_vm4 = vcmp.ge.s32.totalorder %v699_v44, %v9217_v53 }
 0x4d9   : > { %12228 = vst [vmem:[#allocation104_spill] sm:$0xff] %v9412_v17 }
 0x4db   : > { %6928 = vmatmul.mubr.msk.f32.gmra.mrb[96].mxu0 %vm12223_vm11, %v9382_v6  ;;  %vm795_vm11 = vmand %vm730_vm6, %vm763_vm14  ;;  %vm765_vm6 = vcmp.lt.s32.totalorder %v699_v44, %v9223_v28  ;;  %v710_v44 = vadd.s32 248, %v8387_v15 }
 0x4dc   : > { %1734 = vmatprep.mubr.f32.mxu0 %v12179_v45  ;;  %v9423_v18 = vsel %vm795_vm11, 1.0, %v12179_v45  ;;  %vm12232_vm14 = vmmov %vm12227_vm0  ;;  %vm766_vm11 = vcmp.lt.s32.totalorder %v700_v29, %v9223_v28 }
 0x4dd   : > { %12231 = vst [vmem:[#allocation79_spill] sm:$0xff] %v9423_v18 }
 0x4df   : > { %6929 = vmatmul.mubr.msk.f32.gmra.mrb[98].mxu0 %vm12225_vm2, %v9392_v2  ;;  %vm796_vm2 = vmand %vm731_vm15, %vm764_vm9 }
 0x4e0   : > { %1740 = vmatprep.mubr.f32.mxu0 %v12179_v45  ;;  %v9432_v10 = vsel %vm796_vm2, 1.0, %v12179_v45  ;;  %vm12234_vm15 = vmmov %vm12232_vm14  ;;  %vm767_vm2 = vcmp.lt.s32.totalorder %v701_v20, %v9223_v28 }
 0x4e1   : > { %12233 = vst [vmem:[#allocation105_spill] sm:$0xff] %v9432_v10 }
 0x4e3   : > { %6930 = vmatmul.mubr.msk.f32.gmra.mrb[100].mxu0 %vm12227_vm0, %v9402_v1  ;;  %vm797_vm0 = vmand %vm732_vm4, %vm765_vm6 }
 0x4e4   : > { %1746 = vmatprep.mubr.f32.mxu0 %v12179_v45  ;;  %v9441_v30 = vsel %vm797_vm0, 1.0, %v12179_v45  ;;  %vm12236_vm4 = vmmov %vm12234_vm15  ;;  %vm768_vm0 = vcmp.lt.s32.totalorder %v702_v31, %v9223_v28 }
 0x4e5   : > { %12235 = vst [vmem:[#allocation106_spill] sm:$0xff] %v9441_v30 }
 0x4e7   : > { %6931 = vmatmul.mubr.msk.f32.gmra.mrb[102].mxu0 %vm12230_vm7, %v9412_v17  ;;  %vm733_vm7 = vcmp.ge.s32.totalorder %v700_v29, %v9217_v53 }
 0x4e8   : > { %1752 = vmatprep.mubr.f32.mxu0 %v12179_v45  ;;  %vm798_vm9 = vmand %vm733_vm7, %vm766_vm11 }
 0x4e9   : > { %v9450_v19 = vsel %vm798_vm9, 1.0, %v12179_v45  ;;  %vm12238_vm7 = vmmov %vm12236_vm4  ;;  %vm769_vm9 = vcmp.lt.s32.totalorder %v703_v32, %v9223_v28 }
 0x4ea   : > { %12237 = vst [vmem:[#allocation107_spill] sm:$0xff] %v9450_v19 }
 0x4eb   : > { %6932 = vmatmul.mubr.msk.f32.gmra.mrb[104].mxu0 %vm12232_vm14, %v9423_v18  ;;  %vm734_vm14 = vcmp.ge.s32.totalorder %v701_v20, %v9217_v53 }
 0x4ec   : > { %1758 = vmatprep.mubr.f32.mxu0 %v12179_v45  ;;  %vm799_vm6 = vmand %vm734_vm14, %vm767_vm2 }
 0x4ed   : > { %v9459_v48 = vsel %vm799_vm6, 1.0, %v12179_v45  ;;  %vm12240_vm14 = vmmov %vm12238_vm7  ;;  %vm770_vm6 = vcmp.lt.s32.totalorder %v704_v47, %v9223_v28 }
 0x4ee   : > { %12239 = vst [vmem:[#allocation108_spill] sm:$0xff] %v9459_v48 }
 0x4ef   : > { %6933 = vmatmul.mubr.msk.f32.gmra.mrb[106].mxu0 %vm12234_vm15, %v9432_v10  ;;  %vm735_vm15 = vcmp.ge.s32.totalorder %v702_v31, %v9217_v53 }
 0x4f0   : > { %1764 = vmatprep.mubr.f32.mxu0 %v12179_v45  ;;  %vm800_vm11 = vmand %vm735_vm15, %vm768_vm0 }
 0x4f1   : > { %v9468_v21 = vsel %vm800_vm11, 1.0, %v12179_v45  ;;  %vm12242_vm15 = vmmov %vm12240_vm14  ;;  %vm771_vm11 = vcmp.lt.s32.totalorder %v705_v27, %v9223_v28 }
 0x4f2   : > { %12241 = vst [vmem:[#allocation109_spill] sm:$0xff] %v9468_v21 }
 0x4f3   : > { %6934 = vmatmul.mubr.msk.f32.gmra.mrb[108].mxu0 %vm12236_vm4, %v9441_v30  ;;  %vm736_vm4 = vcmp.ge.s32.totalorder %v703_v32, %v9217_v53 }
 0x4f4   : > { %1770 = vmatprep.mubr.f32.mxu0 %v12179_v45  ;;  %vm801_vm2 = vmand %vm736_vm4, %vm769_vm9 }
 0x4f5   : > { %v9477_v41 = vsel %vm801_vm2, 1.0, %v12179_v45  ;;  %vm12244_vm4 = vmmov %vm12242_vm15  ;;  %vm772_vm2 = vcmp.lt.s32.totalorder %v706_v4, %v9223_v28 }
 0x4f6   : > { %12243 = vst [vmem:[#allocation110_spill] sm:$0xff] %v9477_v41 }
 0x4f7   : > { %6935 = vmatmul.mubr.msk.f32.gmra.mrb[110].mxu0 %vm12238_vm7, %v9450_v19  ;;  %vm737_vm7 = vcmp.ge.s32.totalorder %v704_v47, %v9217_v53  ;;  %v12259_v47 = vld [vmem:[#allocation8_spill] sm:$0xff] }
 0x4f8   : > { %1776 = vmatprep.mubr.f32.mxu0 %v12179_v45  ;;  %vm802_vm0 = vmand %vm737_vm7, %vm770_vm6 }
 0x4f9   : > { %v9486_v16 = vsel %vm802_vm0, 1.0, %v12179_v45  ;;  %vm12246_vm7 = vmmov %vm12244_vm4  ;;  %vm773_vm0 = vcmp.lt.s32.totalorder %v707_v42, %v9223_v28 }
 0x4fa   : > { %12245 = vst [vmem:[#allocation111_spill] sm:$0xff] %v9486_v16 }
 0x4fb   : > { %6936 = vmatmul.mubr.msk.f32.gmra.mrb[112].mxu0 %vm12240_vm14, %v9459_v48  ;;  %vm738_vm14 = vcmp.ge.s32.totalorder %v705_v27, %v9217_v53 }
 0x4fc   : > { %1782 = vmatprep.mubr.f32.mxu0 %v12179_v45  ;;  %vm803_vm9 = vmand %vm738_vm14, %vm771_vm11 }
 0x4fd   : > { %v9495_v22 = vsel %vm803_vm9, 1.0, %v12179_v45  ;;  %vm12248_vm14 = vmmov %vm12246_vm7  ;;  %vm774_vm9 = vcmp.lt.s32.totalorder %v708_v56, %v9223_v28 }
 0x4fe   : > { %12247 = vst [vmem:[#allocation112_spill] sm:$0xff] %v9495_v22 }
 0x4ff   : > { %6937 = vmatmul.mubr.msk.f32.gmra.mrb[114].mxu0 %vm12242_vm15, %v9468_v21  ;;  %vm739_vm15 = vcmp.ge.s32.totalorder %v706_v4, %v9217_v53 }
 0x500   : > { %1788 = vmatprep.mubr.f32.mxu0 %v12179_v45  ;;  %vm804_vm6 = vmand %vm739_vm15, %vm772_vm2 }
 0x501   : > { %v9504_v36 = vsel %vm804_vm6, 1.0, %v12179_v45  ;;  %vm12250_vm15 = vmmov %vm12248_vm14  ;;  %vm775_vm6 = vcmp.lt.s32.totalorder %v709_v43, %v9223_v28 }
 0x502   : > { %12249 = vst [vmem:[#allocation113_spill] sm:$0xff] %v9504_v36 }
 0x503   : > { %6938 = vmatmul.mubr.msk.f32.gmra.mrb[116].mxu0 %vm12244_vm4, %v9477_v41  ;;  %vm740_vm4 = vcmp.ge.s32.totalorder %v707_v42, %v9217_v53  ;;  %v12261_v42 = vld [vmem:[#allocation11_spill] sm:$0xff] }
 0x504   : > { %1794 = vmatprep.mubr.f32.mxu0 %v12179_v45  ;;  %vm805_vm11 = vmand %vm740_vm4, %vm773_vm0 }
 0x505   : > { %v9513_v3 = vsel %vm805_vm11, 1.0, %v12179_v45  ;;  %vm12252_vm4 = vmmov %vm12250_vm15  ;;  %vm776_vm11 = vcmp.lt.s32.totalorder %v710_v44, %v9223_v28  ;;  %v12258_v28 = vld [vmem:[#allocation6_spill] sm:$0xff] }
 0x506   : > { %12251 = vst [vmem:[#allocation114_spill] sm:$0xff] %v9513_v3 }
 0x507   : > { %6939 = vmatmul.mubr.msk.f32.gmra.mrb[118].mxu0 %vm12246_vm7, %v9486_v16  ;;  %vm741_vm7 = vcmp.ge.s32.totalorder %v708_v56, %v9217_v53 }
 0x508   : > { %1800 = vmatprep.mubr.f32.mxu0 %v12179_v45  ;;  %vm806_vm2 = vmand %vm741_vm7, %vm774_vm9 }
 0x509   : > { %v9522_v29 = vsel %vm806_vm2, 1.0, %v12179_v45  ;;  %vm12254_vm7 = vmmov %vm12252_vm4 }
 0x50a   : > { %12253 = vst [vmem:[#allocation115_spill] sm:$0xff] %v9522_v29  ;;  %vm12257_vm2 = vmmov %vm12252_vm4 }
 0x50b   : > { %6940 = vmatmul.mubr.msk.f32.gmra.mrb[120].mxu0 %vm12248_vm14, %v9495_v22  ;;  %vm742_vm14 = vcmp.ge.s32.totalorder %v709_v43, %v9217_v53 }
 0x50c   : > { %1806 = vmatprep.mubr.f32.mxu0 %v12179_v45  ;;  %vm807_vm0 = vmand %vm742_vm14, %vm775_vm6 }
 0x50d   : > { %v9530_v15 = vsel %vm807_vm0, 1.0, %v12179_v45  ;;  %vm12260_vm14 = vmmov %vm12257_vm2 }
 0x50e   : > { %12255 = vst [vmem:[#allocation116_spill] sm:$0xff] %v9530_v15  ;;  %vm12263_vm6 = vmmov %vm12257_vm2 }
 0x50f   : > { %6941 = vmatmul.mubr.msk.f32.gmra.mrb[122].mxu0 %vm12250_vm15, %v9504_v36  ;;  %vm743_vm15 = vcmp.ge.s32.totalorder %v710_v44, %v9217_v53  ;;  %v12262_v44 = vld [vmem:[#allocation12_spill] sm:$0xff]  ;;  %vm12266_vm0 = vmmov %vm12257_vm2 }
 0x510   : > { %1812 = vmatprep.mubr.f32.mxu0 %v12179_v45  ;;  %vm808_vm9 = vmand %vm743_vm15, %vm776_vm11 }
 0x511   : > { %v9536_v20 = vsel %vm808_vm9, 1.0, %v12179_v45  ;;  %vm12269_vm15 = vmmov %vm12266_vm0 }
 0x512   : > { %12256 = vst [vmem:[#allocation117_spill] sm:$0xff] %v9536_v20  ;;  %vm12272_vm11 = vmmov %vm12266_vm0 }
 0x513   : > { %6942 = vmatmul.mubr.msk.f32.gmra.mrb[124].mxu0 %vm12252_vm4, %v9513_v3  ;;  %vm12278_vm9 = vmmov %vm12266_vm0 }
 0x514   : > { %1818 = vmatprep.mubr.f32.mxu0 %v12179_v45 }
 0x517   : > { %6943 = vmatmul.mubr.msk.f32.gmra.mrb[126].mxu0 %vm12254_vm7, %v9522_v29  ;;  %vm12275_vm7 = vmmov %vm12266_vm0 }
 0x518   : > { %1824 = vmatprep.mubr.f32.mxu0 %v12179_v45 }
 0x51b   : > { %6944 = vmatmul.mubr.msk.f32.gmra.mrb[128].mxu0 %vm12252_vm4, %v9530_v15  ;;  %vm12281_vm4 = vmmov %vm12266_vm0 }
 0x51c   : > { %1830 = vmatprep.mubr.f32.mxu0 %v12179_v45 }
 0x51f   : > { %6945 = vmatmul.mubr.msk.f32.gmra.mrb[130].mxu0 %vm12257_vm2, %v9536_v20  ;;  %v12264_v20 = vld [vmem:[#allocation13_spill] sm:$0xff]  ;;  %vm12284_vm2 = vmmov %vm12266_vm0 }
 0x520   : > { %2734 = vmatprep.mubr.f32.mxu0 %v12179_v45 }
 0x576   : > { %v1646_v53 = vpop.f32.mrb[68].mxu0 }
 0x577   : > { %v1837_v31 = vmul.f32 %v1646_v53, %v12258_v28  ;;  %v1648_v32 = vpop.f32.mrb[69].mxu0  ;;  %v12265_v53 = vld [vmem:[#allocation14_spill] sm:$0xff] }
 0x578   : > { %v1838_v27 = vmul.f32 %v1648_v32, %v12259_v47  ;;  %v12267_v32 = vld [vmem:[#allocation15_spill] sm:$0xff] }
 0x57a   : > { %v1652_v4 = vpop.f32.mrb[70].mxu0  ;;  %6966 = vmatprep.mubr.msk.f32.mxu1 %vm12260_vm14, %v1838_v27  ;;  %vm12287_vm14 = vmmov %vm12266_vm0 }
 0x57b   : > { %v1839_v56 = vmul.f32 %v1652_v4, %v12261_v42  ;;  %v1654_v43 = vpop.f32.mrb[71].mxu0  ;;  %2062 = vmatmul.mubr.f32.vlgmr.msra.gmra.mrb[84].mxu1 %v1837_v31  ;;  %v12268_v4 = vld [vmem:[#allocation16_spill] sm:$0xff] }
 0x57c   : > { %v1840_v15 = vmul.f32 %v1654_v43, %v12262_v44  ;;  %v12270_v43 = vld [vmem:[#allocation17_spill] sm:$0xff] }
 0x57e   : > { %v1658_v29 = vpop.f32.mrb[72].mxu0  ;;  %6967 = vmatprep.mubr.msk.f32.mxu1 %vm12263_vm6, %v1840_v15  ;;  %vm12290_vm6 = vmmov %vm12266_vm0 }
 0x57f   : > { %v1841_v3 = vmul.f32 %v1658_v29, %v12264_v20  ;;  %v1660_v36 = vpop.f32.mrb[73].mxu0  ;;  %2067 = vmatmul.mubr.f32.gmra.mrb[86].mxu1 %v1839_v56  ;;  %v12271_v29 = vld [vmem:[#allocation18_spill] sm:$0xff] }
 0x580   : > { %v1842_v22 = vmul.f32 %v1660_v36, %v12265_v53  ;;  %v12273_v36 = vld [vmem:[#allocation19_spill] sm:$0xff] }
 0x582   : > { %v1664_v16 = vpop.f32.mrb[74].mxu0  ;;  %6968 = vmatprep.mubr.msk.f32.mxu1 %vm12266_vm0, %v1842_v22 }
 0x583   : > { %v1843_v27 = vmul.f32 %v1664_v16, %v12267_v32  ;;  %v1666_v41 = vpop.f32.mrb[75].mxu0  ;;  %2072 = vmatmul.mubr.f32.gmra.mrb[88].mxu1 %v1841_v3  ;;  %v12274_v16 = vld [vmem:[#allocation20_spill] sm:$0xff] }
 0x584   : > { %v1844_v31 = vmul.f32 %v1666_v41, %v12268_v4  ;;  %v12276_v41 = vld [vmem:[#allocation21_spill] sm:$0xff] }
 0x586   : > { %v1670_v21 = vpop.f32.mrb[76].mxu0  ;;  %6969 = vmatprep.mubr.msk.f32.mxu1 %vm12269_vm15, %v1844_v31  ;;  %vm12295_vm15 = vmmov %vm12266_vm0 }
 0x587   : > { %v1845_v15 = vmul.f32 %v1670_v21, %v12270_v43  ;;  %v1672_v48 = vpop.f32.mrb[77].mxu0  ;;  %2077 = vmatmul.mubr.f32.gmra.mrb[90].mxu1 %v1843_v27  ;;  %v12277_v21 = vld [vmem:[#allocation22_spill] sm:$0xff] }
 0x588   : > { %v1846_v56 = vmul.f32 %v1672_v48, %v12271_v29  ;;  %v12279_v48 = vld [vmem:[#allocation23_spill] sm:$0xff] }
 0x58a   : > { %v1676_v19 = vpop.f32.mrb[78].mxu0  ;;  %6970 = vmatprep.mubr.msk.f32.mxu1 %vm12272_vm11, %v1846_v56  ;;  %vm12298_vm11 = vmmov %vm12266_vm0 }
 0x58b   : > { %v1847_v22 = vmul.f32 %v1676_v19, %v12273_v36  ;;  %v1678_v30 = vpop.f32.mrb[79].mxu0  ;;  %2082 = vmatmul.mubr.f32.gmra.mrb[92].mxu1 %v1845_v15  ;;  %v12280_v19 = vld [vmem:[#allocation24_spill] sm:$0xff] }
 0x58c   : > { %v1848_v3 = vmul.f32 %v1678_v30, %v12274_v16  ;;  %v12282_v30 = vld [vmem:[#allocation25_spill] sm:$0xff] }
 0x58e   : > { %v1682_v10 = vpop.f32.mrb[80].mxu0  ;;  %6971 = vmatprep.mubr.msk.f32.mxu1 %vm12275_vm7, %v1848_v3  ;;  %vm12301_vm7 = vmmov %vm12266_vm0 }
 0x58f   : > { %v1849_v31 = vmul.f32 %v1682_v10, %v12276_v41  ;;  %v1684_v18 = vpop.f32.mrb[81].mxu0  ;;  %2087 = vmatmul.mubr.f32.gmra.mrb[94].mxu1 %v1847_v22  ;;  %v12283_v10 = vld [vmem:[#allocation26_spill] sm:$0xff] }
 0x590   : > { %v1850_v27 = vmul.f32 %v1684_v18, %v12277_v21  ;;  %v12285_v18 = vld [vmem:[#allocation27_spill] sm:$0xff] }
 0x592   : > { %v1688_v17 = vpop.f32.mrb[82].mxu0  ;;  %6972 = vmatprep.mubr.msk.f32.mxu1 %vm12278_vm9, %v1850_v27  ;;  %vm12304_vm9 = vmmov %vm12266_vm0 }
 0x593   : > { %v1851_v56 = vmul.f32 %v1688_v17, %v12279_v48  ;;  %v1690_v1 = vpop.f32.mrb[83].mxu0  ;;  %2092 = vmatmul.mubr.f32.gmra.mrb[96].mxu1 %v1849_v31  ;;  %v12286_v17 = vld [vmem:[#allocation28_spill] sm:$0xff] }
 0x594   : > { %v1852_v15 = vmul.f32 %v1690_v1, %v12280_v19  ;;  %v12288_v1 = vld [vmem:[#allocation29_spill] sm:$0xff] }
 0x596   : > { %v1694_v2 = vpop.f32.mrb[84].mxu0  ;;  %6973 = vmatprep.mubr.msk.f32.mxu1 %vm12281_vm4, %v1852_v15  ;;  %vm12305_vm4 = vmmov %vm12266_vm0 }
 0x597   : > { %v1853_v3 = vmul.f32 %v1694_v2, %v12282_v30  ;;  %v1696_v6 = vpop.f32.mrb[85].mxu0  ;;  %2097 = vmatmul.mubr.f32.gmra.mrb[98].mxu1 %v1851_v56  ;;  %v12289_v2 = vld [vmem:[#allocation30_spill] sm:$0xff] }
 0x598   : > { %v1854_v22 = vmul.f32 %v1696_v6, %v12283_v10  ;;  %v12291_v6 = vld [vmem:[#allocation31_spill] sm:$0xff] }
 0x59a   : > { %v1700_v13 = vpop.f32.mrb[86].mxu0  ;;  %6974 = vmatprep.mubr.msk.f32.mxu1 %vm12284_vm2, %v1854_v22  ;;  %vm12307_vm2 = vmmov %vm12266_vm0 }
 0x59b   : > { %v1855_v27 = vmul.f32 %v1700_v13, %v12285_v18  ;;  %v1702_v7 = vpop.f32.mrb[87].mxu0  ;;  %2102 = vmatmul.mubr.f32.gmra.mrb[100].mxu1 %v1853_v3  ;;  %v12292_v13 = vld [vmem:[#allocation32_spill] sm:$0xff] }
 0x59c   : > { %v1856_v31 = vmul.f32 %v1702_v7, %v12286_v17  ;;  %v12293_v7 = vld [vmem:[#allocation33_spill] sm:$0xff] }
 0x59e   : > { %v1706_v58 = vpop.f32.mrb[88].mxu0  ;;  %6975 = vmatprep.mubr.msk.f32.mxu1 %vm12287_vm14, %v1856_v31  ;;  %vm12308_vm14 = vmmov %vm12266_vm0 }
 0x59f   : > { %v1857_v15 = vmul.f32 %v1706_v58, %v12288_v1  ;;  %v1708_v59 = vpop.f32.mrb[89].mxu0  ;;  %2107 = vmatmul.mubr.f32.gmra.mrb[102].mxu1 %v1855_v27  ;;  %v12294_v58 = vld [vmem:[#allocation34_spill] sm:$0xff] }
 0x5a0   : > { %v1858_v56 = vmul.f32 %v1708_v59, %v12289_v2  ;;  %v12296_v59 = vld [vmem:[#allocation35_spill] sm:$0xff] }
 0x5a2   : > { %v1712_v55 = vpop.f32.mrb[90].mxu0  ;;  %6976 = vmatprep.mubr.msk.f32.mxu1 %vm12290_vm6, %v1858_v56  ;;  %vm12310_vm6 = vmmov %vm12266_vm0 }
 0x5a3   : > { %v1859_v22 = vmul.f32 %v1712_v55, %v12291_v6  ;;  %v1714_v54 = vpop.f32.mrb[91].mxu0  ;;  %2112 = vmatmul.mubr.f32.gmra.mrb[104].mxu1 %v1857_v15  ;;  %v12297_v55 = vld [vmem:[#allocation36_spill] sm:$0xff] }
 0x5a4   : > { %v1860_v3 = vmul.f32 %v1714_v54, %v12292_v13  ;;  %v12299_v54 = vld [vmem:[#allocation37_spill] sm:$0xff] }
 0x5a6   : > { %v1718_v50 = vpop.f32.mrb[92].mxu0  ;;  %6977 = vmatprep.mubr.msk.f32.mxu1 %vm12266_vm0, %v1860_v3 }
 0x5a7   : > { %v1861_v31 = vmul.f32 %v1718_v50, %v12293_v7  ;;  %v1720_v60 = vpop.f32.mrb[93].mxu0  ;;  %2117 = vmatmul.mubr.f32.gmra.mrb[106].mxu1 %v1859_v22  ;;  %v12300_v50 = vld [vmem:[#allocation38_spill] sm:$0xff] }
 0x5a8   : > { %v1862_v27 = vmul.f32 %v1720_v60, %v12294_v58  ;;  %v12302_v60 = vld [vmem:[#allocation39_spill] sm:$0xff] }
 0x5aa   : > { %v1724_v51 = vpop.f32.mrb[94].mxu0  ;;  %6978 = vmatprep.mubr.msk.f32.mxu1 %vm12295_vm15, %v1862_v27  ;;  %vm12315_vm15 = vmmov %vm12266_vm0 }
 0x5ab   : > { %v1863_v56 = vmul.f32 %v1724_v51, %v12296_v59  ;;  %v1726_v52 = vpop.f32.mrb[95].mxu0  ;;  %2122 = vmatmul.mubr.f32.gmra.mrb[108].mxu1 %v1861_v31  ;;  %v12303_v51 = vld [vmem:[#allocation40_spill] sm:$0xff] }
 0x5ac   : > { %v1864_v15 = vmul.f32 %v1726_v52, %v12297_v55 }
 0x5ae   : > { %v1730_v49 = vpop.f32.mrb[96].mxu0  ;;  %6979 = vmatprep.mubr.msk.f32.mxu1 %vm12298_vm11, %v1864_v15  ;;  %vm12318_vm11 = vmmov %vm12266_vm0 }
 0x5af   : > { %v1865_v3 = vmul.f32 %v1730_v49, %v12299_v54  ;;  %v1732_v24 = vpop.f32.mrb[97].mxu0  ;;  %2127 = vmatmul.mubr.f32.gmra.mrb[110].mxu1 %v1863_v56 }
 0x5b0   : > { %v1866_v22 = vmul.f32 %v1732_v24, %v12300_v50  ;;  %v12306_v24 = vld [vmem:[#allocation43_spill] sm:$0xff] }
 0x5b2   : > { %v1736_v23 = vpop.f32.mrb[98].mxu0  ;;  %6980 = vmatprep.mubr.msk.f32.mxu1 %vm12301_vm7, %v1866_v22  ;;  %vm12321_vm7 = vmmov %vm12266_vm0 }
 0x5b3   : > { %v1867_v27 = vmul.f32 %v1736_v23, %v12302_v60  ;;  %v1738_v33 = vpop.f32.mrb[99].mxu0  ;;  %2132 = vmatmul.mubr.f32.gmra.mrb[112].mxu1 %v1865_v3 }
 0x5b4   : > { %v1868_v31 = vmul.f32 %v1738_v33, %v12303_v51 }
 0x5b6   : > { %v1742_v26 = vpop.f32.mrb[100].mxu0  ;;  %6981 = vmatprep.mubr.msk.f32.mxu1 %vm12304_vm9, %v1868_v31  ;;  %vm12324_vm9 = vmmov %vm12266_vm0 }
 0x5b7   : > { %v1869_v52 = vmul.f32 %v1742_v26, %v8673_v34  ;;  %v1744_v15 = vpop.f32.mrb[101].mxu0  ;;  %2137 = vmatmul.mubr.f32.gmra.mrb[114].mxu1 %v1867_v27 }
 0x5b8   : > { %v1870_v49 = vmul.f32 %v1744_v15, %v8675_v35 }
 0x5ba   : > { %v1748_v56 = vpop.f32.mrb[102].mxu0  ;;  %6982 = vmatprep.mubr.msk.f32.mxu1 %vm12305_vm4, %v1870_v49  ;;  %vm12327_vm4 = vmmov %vm12266_vm0 }
 0x5bb   : > { %v1871_v22 = vmul.f32 %v1748_v56, %v12306_v24  ;;  %v1750_v46 = vpop.f32.mrb[103].mxu0  ;;  %2142 = vmatmul.mubr.f32.gmra.mrb[116].mxu1 %v1869_v52  ;;  %v12309_v56 = vld [vmem:[#allocation48_spill] sm:$0xff] }
 0x5bc   : > { %v1872_v23 = vmul.f32 %v1750_v46, %v8679_v37  ;;  %v12311_v46 = vld [vmem:[#allocation49_spill] sm:$0xff] }
 0x5be   : > { %v1754_v3 = vpop.f32.mrb[104].mxu0  ;;  %6983 = vmatprep.mubr.msk.f32.mxu1 %vm12307_vm2, %v1872_v23  ;;  %vm12330_vm2 = vmmov %vm12266_vm0 }
 0x5bf   : > { %v1873_v33 = vmul.f32 %v1754_v3, %v8681_v38  ;;  %v1756_v31 = vpop.f32.mrb[105].mxu0  ;;  %2147 = vmatmul.mubr.f32.gmra.mrb[118].mxu1 %v1871_v22  ;;  %v12312_v3 = vld [vmem:[#allocation50_spill] sm:$0xff] }
 0x5c0   : > { %v1874_v26 = vmul.f32 %v1756_v31, %v8683_v39  ;;  %v12313_v31 = vld [vmem:[#allocation51_spill] sm:$0xff] }
 0x5c2   : > { %v1760_v27 = vpop.f32.mrb[106].mxu0  ;;  %6984 = vmatprep.mubr.msk.f32.mxu1 %vm12308_vm14, %v1874_v26  ;;  %vm12333_vm14 = vmmov %vm12266_vm0 }
 0x5c3   : > { %v1875_v15 = vmul.f32 %v1760_v27, %v8685_v40  ;;  %v1762_v49 = vpop.f32.mrb[107].mxu0  ;;  %2152 = vmatmul.mubr.f32.gmra.mrb[120].mxu1 %v1873_v33  ;;  %v12314_v27 = vld [vmem:[#allocation52_spill] sm:$0xff] }
 0x5c4   : > { %v1876_v52 = vmul.f32 %v1762_v49, %v12309_v56  ;;  %v12316_v49 = vld [vmem:[#allocation53_spill] sm:$0xff] }
 0x5c6   : > { %v1766_v24 = vpop.f32.mrb[108].mxu0  ;;  %6985 = vmatprep.mubr.msk.f32.mxu1 %vm12310_vm6, %v1876_v52  ;;  %vm12336_vm6 = vmmov %vm12266_vm0 }
 0x5c7   : > { %v1877_v23 = vmul.f32 %v1766_v24, %v12311_v46  ;;  %v1768_v37 = vpop.f32.mrb[109].mxu0  ;;  %2157 = vmatmul.mubr.f32.gmra.mrb[122].mxu1 %v1875_v15  ;;  %v12317_v24 = vld [vmem:[#allocation54_spill] sm:$0xff] }
 0x5c8   : > { %v1878_v22 = vmul.f32 %v1768_v37, %v12312_v3  ;;  %v12319_v37 = vld [vmem:[#allocation55_spill] sm:$0xff] }
 0x5ca   : > { %v1772_v38 = vpop.f32.mrb[110].mxu0  ;;  %6986 = vmatprep.mubr.msk.f32.mxu1 %vm12266_vm0, %v1878_v22 }
 0x5cb   : > { %v1879_v26 = vmul.f32 %v1772_v38, %v12313_v31  ;;  %v1774_v39 = vpop.f32.mrb[111].mxu0  ;;  %2162 = vmatmul.mubr.f32.gmra.mrb[124].mxu1 %v1877_v23  ;;  %v12320_v38 = vld [vmem:[#allocation56_spill] sm:$0xff] }
 0x5cc   : > { %v1880_v33 = vmul.f32 %v1774_v39, %v12314_v27  ;;  %v12322_v39 = vld [vmem:[#allocation57_spill] sm:$0xff] }
 0x5ce   : > { %v1778_v40 = vpop.f32.mrb[112].mxu0  ;;  %6987 = vmatprep.mubr.msk.f32.mxu1 %vm12315_vm15, %v1880_v33  ;;  %vm12341_vm15 = vmmov %vm12266_vm0 }
 0x5cf   : > { %v1881_v52 = vmul.f32 %v1778_v40, %v12316_v49  ;;  %v1780_v56 = vpop.f32.mrb[113].mxu0  ;;  %2167 = vmatmul.mubr.f32.gmra.mrb[126].mxu1 %v1879_v26  ;;  %v12323_v40 = vld [vmem:[#allocation58_spill] sm:$0xff] }
 0x5d0   : > { %v1882_v15 = vmul.f32 %v1780_v56, %v12317_v24  ;;  %v12325_v56 = vld [vmem:[#allocation59_spill] sm:$0xff] }
 0x5d2   : > { %v1784_v46 = vpop.f32.mrb[114].mxu0  ;;  %6988 = vmatprep.mubr.msk.f32.mxu1 %vm12318_vm11, %v1882_v15  ;;  %vm12344_vm11 = vmmov %vm12266_vm0 }
 0x5d3   : > { %v1883_v22 = vmul.f32 %v1784_v46, %v12319_v37  ;;  %v1786_v3 = vpop.f32.mrb[115].mxu0  ;;  %2172 = vmatmul.mubr.f32.gmra.mrb[128].mxu1 %v1881_v52  ;;  %v12326_v46 = vld [vmem:[#allocation60_spill] sm:$0xff] }
 0x5d4   : > { %v1884_v23 = vmul.f32 %v1786_v3, %v12320_v38  ;;  %v12328_v3 = vld [vmem:[#allocation61_spill] sm:$0xff] }
 0x5d6   : > { %v1790_v31 = vpop.f32.mrb[116].mxu0  ;;  %6989 = vmatprep.mubr.msk.f32.mxu1 %vm12321_vm7, %v1884_v23 }
 0x5d7   : > { %v1885_v33 = vmul.f32 %v1790_v31, %v12322_v39  ;;  %v1792_v27 = vpop.f32.mrb[117].mxu0  ;;  %2177 = vmatmul.mubr.f32.gmra.mrb[130].mxu1 %v1883_v22  ;;  %v12329_v31 = vld [vmem:[#allocation62_spill] sm:$0xff] }
 0x5d8   : > { %v1886_v26 = vmul.f32 %v1792_v27, %v12323_v40  ;;  %v12331_v27 = vld [vmem:[#allocation63_spill] sm:$0xff] }
 0x5da   : > { %v1796_v49 = vpop.f32.mrb[118].mxu0  ;;  %6990 = vmatprep.mubr.msk.f32.mxu1 %vm12324_vm9, %v1886_v26  ;;  %vm12348_vm9 = vcmask 39936  }
 0x5db   : > { %v1887_v15 = vmul.f32 %v1796_v49, %v12325_v56  ;;  %v1798_v24 = vpop.f32.mrb[119].mxu0  ;;  %2182 = vmatmul.mubr.f32.gmra.mrb[132].mxu1 %v1885_v33  ;;  %v12332_v49 = vld [vmem:[#allocation64_spill] sm:$0xff] }
 0x5dc   : > { %v1888_v52 = vmul.f32 %v1798_v24, %v12326_v46  ;;  %v12334_v24 = vld [vmem:[#allocation65_spill] sm:$0xff] }
 0x5de   : > { %v1802_v37 = vpop.f32.mrb[120].mxu0  ;;  %6991 = vmatprep.mubr.msk.f32.mxu1 %vm12327_vm4, %v1888_v52  ;;  %vm12349_vm4 = vmmov %vm12348_vm9 }
 0x5df   : > { %v1889_v23 = vmul.f32 %v1802_v37, %v12328_v3  ;;  %v1804_v38 = vpop.f32.mrb[121].mxu0  ;;  %2187 = vmatmul.mubr.f32.gmra.mrb[134].mxu1 %v1887_v15  ;;  %v12335_v37 = vld [vmem:[#allocation66_spill] sm:$0xff] }
 0x5e0   : > { %v1890_v22 = vmul.f32 %v1804_v38, %v12329_v31  ;;  %v12337_v38 = vld [vmem:[#allocation67_spill] sm:$0xff] }
 0x5e2   : > { %v1808_v39 = vpop.f32.mrb[122].mxu0  ;;  %6992 = vmatprep.mubr.msk.f32.mxu1 %vm12330_vm2, %v1890_v22  ;;  %vm12350_vm2 = vmmov %vm12349_vm4 }
 0x5e3   : > { %v1891_v26 = vmul.f32 %v1808_v39, %v12331_v27  ;;  %v1810_v40 = vpop.f32.mrb[123].mxu0  ;;  %2192 = vmatmul.mubr.f32.gmra.mrb[136].mxu1 %v1889_v23  ;;  %v12338_v39 = vld [vmem:[#allocation68_spill] sm:$0xff] }
 0x5e4   : > { %v1892_v33 = vmul.f32 %v1810_v40, %v12332_v49  ;;  %v12339_v40 = vld [vmem:[#allocation5_spill] sm:$0xff] }
 0x5e6   : > { %v1814_v56 = vpop.f32.mrb[124].mxu0  ;;  %6993 = vmatprep.mubr.msk.f32.mxu1 %vm12333_vm14, %v1892_v33  ;;  %vm12351_vm14 = vmmov %vm12350_vm2 }
 0x5e7   : > { %v1893_v52 = vmul.f32 %v1814_v56, %v12334_v24  ;;  %v1816_v46 = vpop.f32.mrb[125].mxu0  ;;  %2197 = vmatmul.mubr.f32.gmra.mrb[138].mxu1 %v1891_v26  ;;  %v12340_v56 = vld [vmem:[#allocation7_spill] sm:$0xff] }
 0x5e8   : > { %v1894_v15 = vmul.f32 %v1816_v46, %v12335_v37  ;;  %v12342_v46 = vld [vmem:[#allocation9_spill] sm:$0xff] }
 0x5ea   : > { %v1820_v3 = vpop.f32.mrb[126].mxu0  ;;  %6994 = vmatprep.mubr.msk.f32.mxu1 %vm12336_vm6, %v1894_v15  ;;  %vm12352_vm6 = vmmov %vm12350_vm2 }
 0x5eb   : > { %v1895_v22 = vmul.f32 %v1820_v3, %v12337_v38  ;;  %v1822_v31 = vpop.f32.mrb[127].mxu0  ;;  %2202 = vmatmul.mubr.f32.gmra.mrb[140].mxu1 %v1893_v52  ;;  %v12343_v3 = vld [vmem:[#allocation10_spill] sm:$0xff] }
 0x5ec   : > { %v1896_v23 = vmul.f32 %v1822_v31, %v12338_v39  ;;  %v12345_v31 = vmov 1.0  }
 0x5ee   : > { %v1826_v27 = vpop.f32.mrb[128].mxu0  ;;  %6995 = vmatprep.mubr.msk.f32.mxu1 %vm12266_vm0, %v1896_v23  ;;  %v12346_v23 = vld [vmem:[#allocation69_spill] sm:$0xff]  ;;  %vm12353_vm0 = vmmov %vm12350_vm2 }
 0x5ef   : > { %v1897_v33 = vmul.f32 %v1826_v27, %v12339_v40  ;;  %v1828_v49 = vpop.f32.mrb[129].mxu0  ;;  %2207 = vmatmul.mubr.f32.gmra.mrb[142].mxu1 %v1895_v22  ;;  %vm12347_vm7 = vnez %v12346_v23 }
 0x5f0   : > { %v1898_v26 = vmul.f32 %v1828_v49, %v12340_v56 }
 0x5f2   : > { %v1832_v24 = vpop.f32.mrb[130].mxu0  ;;  %6996 = vmatprep.mubr.msk.f32.mxu1 %vm12341_vm15, %v1898_v26  ;;  %vm12354_vm15 = vmmov %vm12353_vm0 }
 0x5f3   : > { %v1899_v15 = vmul.f32 %v1832_v24, %v12342_v46  ;;  %v1834_v37 = vpop.f32.mrb[131].mxu0  ;;  %2212 = vmatmul.mubr.f32.gmra.mrb[144].mxu1 %v1897_v33 }
 0x5f4   : > { %v1900_v52 = vmul.f32 %v1834_v37, %v12343_v3 }
 0x5f6   : > { %6997 = vmatprep.mubr.msk.f32.mxu1 %vm12344_vm11, %v1900_v52  ;;  %vm12355_vm11 = vmmov %vm12353_vm0 }
 0x5f7   : > { %2217 = vmatmul.mubr.f32.gmra.mrb[146].mxu1 %v1899_v15 }
 0x5f8   : > { %7032 = vmatprep.mubr.msk.f32.mxu1 %vm12347_vm7, %v12345_v31 }
 0x64e   : > { %v9640_v27 = vpop.f32.mrb[84].mxu1 }
 0x64f   : > { %v2065_v22 = vpop.f32.mrb[85].mxu1  ;;  %v2222_v49 = vsel %vm12348_vm9, %v9640_v27, -inf  ;;  %vm12356_vm9 = vmmov %vm12353_vm0 }
 0x650   : > { %2223 = vmax.xlane.f32.xlu0 %v2222_v49 }
 0x652   : > { %v9644_v26 = vpop.f32.mrb[86].mxu1 }
 0x653   : > { %v2070_v24 = vpop.f32.mrb[87].mxu1  ;;  %v2225_v37 = vsel %vm12349_vm4, %v9644_v26, -inf  ;;  %vm12357_vm4 = vmmov %vm12353_vm0 }
 0x654   : > { %2226 = vmax.xlane.f32.xlu1 %v2225_v37 }
 0x656   : > { %v9648_v33 = vpop.f32.mrb[88].mxu1 }
 0x657   : > { %v2075_v15 = vpop.f32.mrb[89].mxu1  ;;  %v2228_v52 = vsel %vm12350_vm2, %v9648_v33, -inf  ;;  %vm12358_vm2 = vmmov %vm12353_vm0 }
 0x658   : > { %2229 = vmax.xlane.f32.xlu1 %v2228_v52 }
 0x65a   : > { %v9652_v23 = vpop.f32.mrb[90].mxu1 }
 0x65b   : > { %v2080_v22 = vpop.f32.mrb[91].mxu1  ;;  %v2231_v49 = vsel %vm12351_vm14, %v9652_v23, -inf  ;;  %vm12359_vm14 = vmmov %vm12353_vm0 }
 0x65c   : > { %2232 = vmax.xlane.f32.xlu0 %v2231_v49 }
 0x65e   : > { %v9656_v31 = vpop.f32.mrb[92].mxu1 }
 0x65f   : > { %v2085_v24 = vpop.f32.mrb[93].mxu1  ;;  %v2234_v37 = vsel %vm12352_vm6, %v9656_v31, -inf  ;;  %vm12360_vm6 = vmmov %vm12353_vm0 }
 0x660   : > { %2235 = vmax.xlane.f32.xlu1 %v2234_v37 }
 0x662   : > { %v9660_v3 = vpop.f32.mrb[94].mxu1 }
 0x663   : > { %v2090_v15 = vpop.f32.mrb[95].mxu1  ;;  %v2237_v52 = vsel %vm12353_vm0, %v9660_v3, -inf }
 0x664   : > { %2238 = vmax.xlane.f32.xlu0 %v2237_v52 }
 0x666   : > { %v9664_v46 = vpop.f32.mrb[96].mxu1 }
 0x667   : > { %v2095_v22 = vpop.f32.mrb[97].mxu1  ;;  %v2240_v49 = vsel %vm12354_vm15, %v9664_v46, -inf  ;;  %vm12361_vm15 = vmmov %vm12353_vm0 }
 0x668   : > { %2241 = vmax.xlane.f32.xlu1 %v2240_v49 }
 0x66a   : > { %v9668_v56 = vpop.f32.mrb[98].mxu1 }
 0x66b   : > { %v2100_v24 = vpop.f32.mrb[99].mxu1  ;;  %v2243_v37 = vsel %vm12355_vm11, %v9668_v56, -inf  ;;  %vm12362_vm11 = vmmov %vm12353_vm0 }
 0x66c   : > { %2244 = vmax.xlane.f32.xlu0 %v2243_v37 }
 0x66e   : > { %v9672_v40 = vpop.f32.mrb[100].mxu1 }
 0x66f   : > { %v2105_v15 = vpop.f32.mrb[101].mxu1  ;;  %v2246_v52 = vsel %vm12356_vm9, %v9672_v40, -inf  ;;  %vm12363_vm9 = vmmov %vm12353_vm0 }
 0x670   : > { %2247 = vmax.xlane.f32.xlu1 %v2246_v52 }
 0x672   : > { %v9676_v39 = vpop.f32.mrb[102].mxu1 }
 0x673   : > { %v2110_v22 = vpop.f32.mrb[103].mxu1  ;;  %v2249_v49 = vsel %vm12357_vm4, %v9676_v39, -inf  ;;  %vm12364_vm4 = vmmov %vm12353_vm0 }
 0x674   : > { %2250 = vmax.xlane.f32.xlu0 %v2249_v49 }
 0x676   : > { %v9680_v38 = vpop.f32.mrb[104].mxu1 }
 0x677   : > { %v2115_v24 = vpop.f32.mrb[105].mxu1  ;;  %v2252_v37 = vsel %vm12358_vm2, %v9680_v38, -inf  ;;  %vm12365_vm2 = vmmov %vm12353_vm0 }
 0x678   : > { %2253 = vmax.xlane.f32.xlu1 %v2252_v37 }
 0x67a   : > { %v9684_v35 = vpop.f32.mrb[106].mxu1 }
 0x67b   : > { %v2120_v15 = vpop.f32.mrb[107].mxu1  ;;  %v2255_v52 = vsel %vm12359_vm14, %v9684_v35, -inf  ;;  %vm12366_vm14 = vmmov %vm12353_vm0 }
 0x67c   : > { %2256 = vmax.xlane.f32.xlu0 %v2255_v52 }
 0x67e   : > { %v9688_v34 = vpop.f32.mrb[108].mxu1 }
 0x67f   : > { %v2125_v22 = vpop.f32.mrb[109].mxu1  ;;  %v2258_v49 = vsel %vm12360_vm6, %v9688_v34, -inf  ;;  %vm12367_vm6 = vmmov %vm12353_vm0 }
 0x680   : > { %2259 = vmax.xlane.f32.xlu1 %v2258_v49 }
 0x682   : > { %v9692_v51 = vpop.f32.mrb[110].mxu1 }
 0x683   : > { %v2130_v24 = vpop.f32.mrb[111].mxu1  ;;  %v2261_v37 = vsel %vm12353_vm0, %v9692_v51, -inf }
 0x684   : > { %2262 = vmax.xlane.f32.xlu0 %v2261_v37 }
 0x686   : > { %v9696_v60 = vpop.f32.mrb[112].mxu1 }
 0x687   : > { %v2135_v15 = vpop.f32.mrb[113].mxu1  ;;  %v2264_v52 = vsel %vm12361_vm15, %v9696_v60, -inf  ;;  %vm12368_vm15 = vmmov %vm12353_vm0 }
 0x688   : > { %2265 = vmax.xlane.f32.xlu1 %v2264_v52 }
 0x68a   : > { %v9700_v50 = vpop.f32.mrb[114].mxu1 }
 0x68b   : > { %v2140_v22 = vpop.f32.mrb[115].mxu1  ;;  %v2267_v49 = vsel %vm12362_vm11, %v9700_v50, -inf  ;;  %vm12369_vm11 = vmmov %vm12353_vm0 }
 0x68c   : > { %2268 = vmax.xlane.f32.xlu0 %v2267_v49 }
 0x68e   : > { %v9704_v54 = vpop.f32.mrb[116].mxu1 }
 0x68f   : > { %v2145_v24 = vpop.f32.mrb[117].mxu1  ;;  %v2270_v37 = vsel %vm12363_vm9, %v9704_v54, -inf  ;;  %vm12370_vm9 = vmmov %vm12353_vm0 }
 0x690   : > { %2271 = vmax.xlane.f32.xlu1 %v2270_v37 }
 0x692   : > { %v9708_v55 = vpop.f32.mrb[118].mxu1 }
 0x693   : > { %v2150_v15 = vpop.f32.mrb[119].mxu1  ;;  %v2273_v52 = vsel %vm12364_vm4, %v9708_v55, -inf  ;;  %vm12371_vm4 = vmmov %vm12353_vm0 }
 0x694   : > { %2274 = vmax.xlane.f32.xlu0 %v2273_v52 }
 0x696   : > { %v9712_v59 = vpop.f32.mrb[120].mxu1 }
 0x697   : > { %v2155_v22 = vpop.f32.mrb[121].mxu1  ;;  %v2276_v49 = vsel %vm12365_vm2, %v9712_v59, -inf  ;;  %vm12372_vm2 = vmmov %vm12353_vm0 }
 0x698   : > { %2277 = vmax.xlane.f32.xlu1 %v2276_v49 }
 0x69a   : > { %v9716_v58 = vpop.f32.mrb[122].mxu1 }
 0x69b   : > { %v2160_v24 = vpop.f32.mrb[123].mxu1  ;;  %v2279_v37 = vsel %vm12366_vm14, %v9716_v58, -inf  ;;  %vm12373_vm14 = vmmov %vm12353_vm0 }
 0x69c   : > { %2280 = vmax.xlane.f32.xlu0 %v2279_v37 }
 0x69e   : > { %v9720_v7 = vpop.f32.mrb[124].mxu1 }
 0x69f   : > { %v2165_v15 = vpop.f32.mrb[125].mxu1  ;;  %v2282_v52 = vsel %vm12367_vm6, %v9720_v7, -inf  ;;  %vm12374_vm6 = vmmov %vm12353_vm0 }
 0x6a0   : > { %2283 = vmax.xlane.f32.xlu1 %v2282_v52 }
 0x6a2   : > { %v9724_v13 = vpop.f32.mrb[126].mxu1 }
 0x6a3   : > { %v2170_v22 = vpop.f32.mrb[127].mxu1  ;;  %v2285_v49 = vsel %vm12353_vm0, %v9724_v13, -inf }
 0x6a4   : > { %2286 = vmax.xlane.f32.xlu0 %v2285_v49 }
 0x6a6   : > { %v9728_v6 = vpop.f32.mrb[128].mxu1 }
 0x6a7   : > { %v2175_v24 = vpop.f32.mrb[129].mxu1  ;;  %v2288_v37 = vsel %vm12368_vm15, %v9728_v6, -inf  ;;  %vm12375_vm15 = vmmov %vm12353_vm0 }
 0x6a8   : > { %2289 = vmax.xlane.f32.xlu1 %v2288_v37 }
 0x6aa   : > { %v9732_v2 = vpop.f32.mrb[130].mxu1 }
 0x6ab   : > { %v2180_v15 = vpop.f32.mrb[131].mxu1  ;;  %v2291_v52 = vsel %vm12369_vm11, %v9732_v2, -inf  ;;  %vm12376_vm11 = vmmov %vm12353_vm0 }
 0x6ac   : > { %2292 = vmax.xlane.f32.xlu1 %v2291_v52 }
 0x6ae   : > { %v9736_v1 = vpop.f32.mrb[132].mxu1 }
 0x6af   : > { %v2185_v22 = vpop.f32.mrb[133].mxu1  ;;  %v2294_v49 = vsel %vm12370_vm9, %v9736_v1, -inf  ;;  %vm12377_vm9 = vmmov %vm12353_vm0 }
 0x6b0   : > { %2295 = vmax.xlane.f32.xlu1 %v2294_v49 }
 0x6b2   : > { %v9740_v17 = vpop.f32.mrb[134].mxu1 }
 0x6b3   : > { %v2190_v24 = vpop.f32.mrb[135].mxu1  ;;  %v2297_v37 = vsel %vm12371_vm4, %v9740_v17, -inf  ;;  %vm12378_vm4 = vmmov %vm12353_vm0 }
 0x6b4   : > { %2298 = vmax.xlane.f32.xlu1 %v2297_v37 }
 0x6b6   : > { %v9744_v18 = vpop.f32.mrb[136].mxu1 }
 0x6b7   : > { %v2195_v15 = vpop.f32.mrb[137].mxu1  ;;  %v2300_v52 = vsel %vm12372_vm2, %v9744_v18, -inf  ;;  %vm12379_vm2 = vmmov %vm12353_vm0 }
 0x6b8   : > { %2301 = vmax.xlane.f32.xlu1 %v2300_v52 }
 0x6ba   : > { %v9748_v10 = vpop.f32.mrb[138].mxu1 }
 0x6bb   : > { %v2200_v22 = vpop.f32.mrb[139].mxu1  ;;  %v2303_v49 = vsel %vm12373_vm14, %v9748_v10, -inf  ;;  %vm12380_vm14 = vmmov %vm12353_vm0 }
 0x6bc   : > { %2304 = vmax.xlane.f32.xlu1 %v2303_v49 }
 0x6be   : > { %v9752_v30 = vpop.f32.mrb[140].mxu1 }
 0x6bf   : > { %v2205_v24 = vpop.f32.mrb[141].mxu1  ;;  %v2306_v37 = vsel %vm12374_vm6, %v9752_v30, -inf  ;;  %vm12381_vm6 = vmmov %vm12353_vm0 }
 0x6c0   : > { %2307 = vmax.xlane.f32.xlu1 %v2306_v37 }
 0x6c2   : > { %v9756_v19 = vpop.f32.mrb[142].mxu1 }
 0x6c3   : > { %v2210_v15 = vpop.f32.mrb[143].mxu1  ;;  %v2309_v52 = vsel %vm12353_vm0, %v9756_v19, -inf }
 0x6c4   : > { %2310 = vmax.xlane.f32.xlu1 %v2309_v52 }
 0x6c6   : > { %v9760_v48 = vpop.f32.mrb[144].mxu1 }
 0x6c7   : > { %v2215_v22 = vpop.f32.mrb[145].mxu1  ;;  %v2312_v49 = vsel %vm12375_vm15, %v9760_v48, -inf  ;;  %vm12382_vm15 = vmmov %vm12353_vm0 }
 0x6c8   : > { %2313 = vmax.xlane.f32.xlu1 %v2312_v49 }
 0x6ca   : > { %v9764_v21 = vpop.f32.mrb[146].mxu1 }
 0x6cb   : > { %v2220_v24 = vpop.f32.mrb[147].mxu1  ;;  %v2315_v37 = vsel %vm12376_vm11, %v9764_v21, -inf  ;;  %vm12383_vm11 = vmmov %vm12353_vm0 }
 0x6cc   : > { %2316 = vmax.xlane.f32.xlu1 %v2315_v37 }
 0x6dd   : > { %v2224_v41 = vpop.xlane.xlu0 %2223 }
 0x6de   : > { %v2318_v15 = vsub.f32 %v9640_v27, %v2224_v41 }
 0x6e0   : > { %v2350_v16 = vmul.f32 1.442695, %v2318_v15 }
 0x6e1   : > { %v2227_v36 = vpop.xlane.xlu1 %2226 }
 0x6e2   : > { %7909 = vpow2.f32 %v2350_v16  ;;  %v2319_v52 = vsub.f32 %v9644_v26, %v2227_v36 }
 0x6e4   : > { %v2352_v22 = vmul.f32 1.442695, %v2319_v52 }
 0x6e5   : > { %v2230_v29 = vpop.xlane.xlu1 %2229 }
 0x6e6   : > { %7911 = vpow2.f32 %v2352_v22  ;;  %v2320_v49 = vsub.f32 %v9648_v33, %v2230_v29 }
 0x6e8   : > { %v2354_v43 = vmul.f32 1.442695, %v2320_v49 }
 0x6e9   : > { %v2233_v4 = vpop.xlane.xlu0 %2232 }
 0x6ea   : > { %7913 = vpow2.f32 %v2354_v43  ;;  %v2321_v24 = vsub.f32 %v9652_v23, %v2233_v4 }
 0x6ec   : > { %v9772_v32 = vpop.eup %7909  ;;  %v2356_v37 = vmul.f32 1.442695, %v2321_v24 }
 0x6ed   : > { %v2236_v53 = vpop.xlane.xlu1 %2235  ;;  %v2414_v41 = vsel %vm12377_vm9, %v9772_v32, 0.0  ;;  %vm12384_vm9 = vmmov %vm12353_vm0 }
 0x6ee   : > { %7915 = vpow2.f32 %v2356_v37  ;;  %v2322_v36 = vsub.f32 %v9656_v31, %v2236_v53  ;;  %2415 = vadd.xlane.f32.xlu0 %v2414_v41 }
 0x6f0   : > { %v9777_v16 = vpop.eup %7911  ;;  %v2358_v27 = vmul.f32 1.442695, %v2322_v36 }
 0x6f1   : > { %v2239_v29 = vpop.xlane.xlu0 %2238  ;;  %v2417_v43 = vsel %vm12378_vm4, %v9777_v16, 0.0  ;;  %vm12385_vm4 = vmmov %vm12353_vm0 }
 0x6f2   : > { %7917 = vpow2.f32 %v2358_v27  ;;  %v2323_v4 = vsub.f32 %v9660_v3, %v2239_v29  ;;  %2418 = vadd.xlane.f32.xlu0 %v2417_v43 }
 0x6f4   : > { %v9782_v23 = vpop.eup %7913  ;;  %v2360_v26 = vmul.f32 1.442695, %v2323_v4 }
 0x6f5   : > { %v2242_v33 = vpop.xlane.xlu1 %2241  ;;  %v2420_v15 = vsel %vm12379_vm2, %v9782_v23, 0.0  ;;  %vm12386_vm2 = vmmov %vm12353_vm0 }
 0x6f6   : > { %7919 = vpow2.f32 %v2360_v26  ;;  %v2324_v53 = vsub.f32 %v9664_v46, %v2242_v33  ;;  %2421 = vadd.xlane.f32.xlu0 %v2420_v15 }
 0x6f8   : > { %v9787_v31 = vpop.eup %7915  ;;  %v2362_v52 = vmul.f32 1.442695, %v2324_v53 }
 0x6f9   : > { %v2245_v22 = vpop.xlane.xlu0 %2244  ;;  %v2423_v49 = vsel %vm12380_vm14, %v9787_v31, 0.0  ;;  %vm12387_vm14 = vmmov %vm12353_vm0 }
 0x6fa   : > { %7921 = vpow2.f32 %v2362_v52  ;;  %v2325_v3 = vsub.f32 %v9668_v56, %v2245_v22  ;;  %2424 = vadd.xlane.f32.xlu0 %v2423_v49 }
 0x6fc   : > { %v9792_v24 = vpop.eup %7917  ;;  %v2364_v37 = vmul.f32 1.442695, %v2325_v3 }
 0x6fd   : > { %v2248_v41 = vpop.xlane.xlu1 %2247  ;;  %v2426_v36 = vsel %vm12381_vm6, %v9792_v24, 0.0  ;;  %vm12388_vm6 = vmmov %vm12353_vm0 }
 0x6fe   : > { %7923 = vpow2.f32 %v2364_v37  ;;  %v2326_v46 = vsub.f32 %v9672_v40, %v2248_v41  ;;  %2427 = vadd.xlane.f32.xlu0 %v2426_v36 }
 0x700   : > { %v9797_v27 = vpop.eup %7919  ;;  %v2366_v29 = vmul.f32 1.442695, %v2326_v46 }
 0x701   : > { %v2251_v43 = vpop.xlane.xlu0 %2250  ;;  %v2429_v4 = vsel %vm12353_vm0, %v9797_v27, 0.0 }
 0x702   : > { %7925 = vpow2.f32 %v2366_v29  ;;  %v2327_v56 = vsub.f32 %v9676_v39, %v2251_v43  ;;  %2430 = vadd.xlane.f32.xlu0 %v2429_v4 }
 0x704   : > { %v9802_v26 = vpop.eup %7921  ;;  %v2368_v33 = vmul.f32 1.442695, %v2327_v56 }
 0x705   : > { %v2254_v15 = vpop.xlane.xlu1 %2253  ;;  %v2432_v53 = vsel %vm12382_vm15, %v9802_v26, 0.0  ;;  %vm12389_vm15 = vmmov %vm12353_vm0 }
 0x706   : > { %7927 = vpow2.f32 %v2368_v33  ;;  %v2328_v40 = vsub.f32 %v9680_v38, %v2254_v15  ;;  %2433 = vadd.xlane.f32.xlu0 %v2432_v53 }
 0x708   : > { %v9807_v52 = vpop.eup %7923  ;;  %v2370_v22 = vmul.f32 1.442695, %v2328_v40 }
 0x709   : > { %v2257_v49 = vpop.xlane.xlu0 %2256  ;;  %v2435_v3 = vsel %vm12383_vm11, %v9807_v52, 0.0  ;;  %vm12390_vm11 = vmmov %vm12353_vm0 }
 0x70a   : > { %7929 = vpow2.f32 %v2370_v22  ;;  %v2329_v39 = vsub.f32 %v9684_v35, %v2257_v49  ;;  %2436 = vadd.xlane.f32.xlu0 %v2435_v3 }
 0x70c   : > { %v9812_v37 = vpop.eup %7925  ;;  %v2372_v41 = vmul.f32 1.442695, %v2329_v39 }
 0x70d   : > { %v2260_v36 = vpop.xlane.xlu1 %2259  ;;  %v2438_v46 = vsel %vm12384_vm9, %v9812_v37, 0.0  ;;  %vm12391_vm9 = vmmov %vm12353_vm0 }
 0x70e   : > { %7931 = vpow2.f32 %v2372_v41  ;;  %v2330_v38 = vsub.f32 %v9688_v34, %v2260_v36  ;;  %2439 = vadd.xlane.f32.xlu0 %v2438_v46 }
 0x710   : > { %v9817_v29 = vpop.eup %7927  ;;  %v2374_v43 = vmul.f32 1.442695, %v2330_v38 }
 0x711   : > { %v2263_v4 = vpop.xlane.xlu0 %2262  ;;  %v2441_v56 = vsel %vm12385_vm4, %v9817_v29, 0.0  ;;  %vm12392_vm4 = vmmov %vm12353_vm0 }
 0x712   : > { %7933 = vpow2.f32 %v2374_v43  ;;  %v2331_v35 = vsub.f32 %v9692_v51, %v2263_v4  ;;  %2442 = vadd.xlane.f32.xlu0 %v2441_v56 }
 0x714   : > { %v9822_v33 = vpop.eup %7929  ;;  %v2376_v15 = vmul.f32 1.442695, %v2331_v35 }
 0x715   : > { %v2266_v53 = vpop.xlane.xlu1 %2265  ;;  %v2444_v40 = vsel %vm12386_vm2, %v9822_v33, 0.0  ;;  %vm12393_vm2 = vmmov %vm12353_vm0 }
 0x716   : > { %7935 = vpow2.f32 %v2376_v15  ;;  %v2332_v34 = vsub.f32 %v9696_v60, %v2266_v53  ;;  %2445 = vadd.xlane.f32.xlu1 %v2444_v40 }
 0x718   : > { %v9827_v22 = vpop.eup %7931  ;;  %v2378_v49 = vmul.f32 1.442695, %v2332_v34 }
 0x719   : > { %v2269_v3 = vpop.xlane.xlu0 %2268  ;;  %v2447_v39 = vsel %vm12387_vm14, %v9827_v22, 0.0  ;;  %vm12394_vm14 = vmmov %vm12353_vm0 }
 0x71a   : > { %7937 = vpow2.f32 %v2378_v49  ;;  %v2333_v51 = vsub.f32 %v9700_v50, %v2269_v3  ;;  %2448 = vadd.xlane.f32.xlu0 %v2447_v39 }
 0x71c   : > { %v9832_v41 = vpop.eup %7933  ;;  %v2380_v36 = vmul.f32 1.442695, %v2333_v51 }
 0x71d   : > { %v2272_v46 = vpop.xlane.xlu1 %2271  ;;  %v2450_v38 = vsel %vm12388_vm6, %v9832_v41, 0.0  ;;  %vm12395_vm6 = vmmov %vm12353_vm0 }
 0x71e   : > { %7939 = vpow2.f32 %v2380_v36  ;;  %v2334_v60 = vsub.f32 %v9704_v54, %v2272_v46  ;;  %2451 = vadd.xlane.f32.xlu1 %v2450_v38 }
 0x720   : > { %v9837_v43 = vpop.eup %7935  ;;  %v2382_v4 = vmul.f32 1.442695, %v2334_v60 }
 0x721   : > { %v2275_v56 = vpop.xlane.xlu0 %2274  ;;  %v2453_v35 = vsel %vm12353_vm0, %v9837_v43, 0.0 }
 0x722   : > { %7941 = vpow2.f32 %v2382_v4  ;;  %v2335_v50 = vsub.f32 %v9708_v55, %v2275_v56  ;;  %2454 = vadd.xlane.f32.xlu0 %v2453_v35 }
 0x724   : > { %v9842_v15 = vpop.eup %7937  ;;  %v2384_v53 = vmul.f32 1.442695, %v2335_v50 }
 0x725   : > { %v2278_v40 = vpop.xlane.xlu1 %2277  ;;  %v2456_v34 = vsel %vm12389_vm15, %v9842_v15, 0.0  ;;  %vm12396_vm15 = vmmov %vm12353_vm0 }
 0x726   : > { %7943 = vpow2.f32 %v2384_v53  ;;  %v2336_v54 = vsub.f32 %v9712_v59, %v2278_v40  ;;  %2457 = vadd.xlane.f32.xlu1 %v2456_v34 }
 0x728   : > { %v9847_v49 = vpop.eup %7939  ;;  %v2386_v3 = vmul.f32 1.442695, %v2336_v54 }
 0x729   : > { %v2281_v39 = vpop.xlane.xlu0 %2280  ;;  %v2459_v51 = vsel %vm12390_vm11, %v9847_v49, 0.0  ;;  %vm12397_vm11 = vmmov %vm12353_vm0 }
 0x72a   : > { %7945 = vpow2.f32 %v2386_v3  ;;  %v2337_v55 = vsub.f32 %v9716_v58, %v2281_v39  ;;  %2460 = vadd.xlane.f32.xlu0 %v2459_v51 }
 0x72c   : > { %v9852_v36 = vpop.eup %7941  ;;  %v2388_v46 = vmul.f32 1.442695, %v2337_v55 }
 0x72d   : > { %v2284_v38 = vpop.xlane.xlu1 %2283  ;;  %v2462_v60 = vsel %vm12391_vm9, %v9852_v36, 0.0  ;;  %vm12398_vm9 = vmmov %vm12353_vm0 }
 0x72e   : > { %7947 = vpow2.f32 %v2388_v46  ;;  %v2338_v59 = vsub.f32 %v9720_v7, %v2284_v38  ;;  %2463 = vadd.xlane.f32.xlu1 %v2462_v60 }
 0x730   : > { %v9857_v4 = vpop.eup %7943  ;;  %v2390_v56 = vmul.f32 1.442695, %v2338_v59 }
 0x731   : > { %v2287_v35 = vpop.xlane.xlu0 %2286  ;;  %v2465_v50 = vsel %vm12392_vm4, %v9857_v4, 0.0  ;;  %vm12399_vm4 = vmmov %vm12353_vm0 }
 0x732   : > { %7949 = vpow2.f32 %v2390_v56  ;;  %v2339_v58 = vsub.f32 %v9724_v13, %v2287_v35  ;;  %2466 = vadd.xlane.f32.xlu0 %v2465_v50 }
 0x734   : > { %v9862_v53 = vpop.eup %7945  ;;  %v2392_v40 = vmul.f32 1.442695, %v2339_v58 }
 0x735   : > { %v2290_v34 = vpop.xlane.xlu1 %2289  ;;  %v2468_v54 = vsel %vm12393_vm2, %v9862_v53, 0.0  ;;  %vm12400_vm2 = vmmov %vm12353_vm0 }
 0x736   : > { %7951 = vpow2.f32 %v2392_v40  ;;  %v2340_v7 = vsub.f32 %v9728_v6, %v2290_v34  ;;  %2469 = vadd.xlane.f32.xlu1 %v2468_v54 }
 0x738   : > { %v9867_v3 = vpop.eup %7947  ;;  %v2394_v39 = vmul.f32 1.442695, %v2340_v7 }
 0x739   : > { %v2293_v51 = vpop.xlane.xlu1 %2292  ;;  %v2471_v55 = vsel %vm12394_vm14, %v9867_v3, 0.0  ;;  %vm12401_vm14 = vmmov %vm12353_vm0 }
 0x73a   : > { %7953 = vpow2.f32 %v2394_v39  ;;  %v2341_v13 = vsub.f32 %v9732_v2, %v2293_v51  ;;  %2472 = vadd.xlane.f32.xlu0 %v2471_v55 }
 0x73c   : > { %v9872_v46 = vpop.eup %7949  ;;  %v2396_v38 = vmul.f32 1.442695, %v2341_v13 }
 0x73d   : > { %v2296_v60 = vpop.xlane.xlu1 %2295  ;;  %v2474_v59 = vsel %vm12395_vm6, %v9872_v46, 0.0  ;;  %vm12402_vm6 = vmmov %vm12353_vm0 }
 0x73e   : > { %7955 = vpow2.f32 %v2396_v38  ;;  %v2342_v6 = vsub.f32 %v9736_v1, %v2296_v60  ;;  %2475 = vadd.xlane.f32.xlu1 %v2474_v59 }
 0x740   : > { %v9877_v56 = vpop.eup %7951  ;;  %v2398_v35 = vmul.f32 1.442695, %v2342_v6 }
 0x741   : > { %v2299_v50 = vpop.xlane.xlu1 %2298  ;;  %v2477_v58 = vsel %vm12353_vm0, %v9877_v56, 0.0 }
 0x742   : > { %7957 = vpow2.f32 %v2398_v35  ;;  %v2343_v2 = vsub.f32 %v9740_v17, %v2299_v50  ;;  %2478 = vadd.xlane.f32.xlu0 %v2477_v58 }
 0x744   : > { %v9882_v40 = vpop.eup %7953  ;;  %v2400_v34 = vmul.f32 1.442695, %v2343_v2 }
 0x745   : > { %v2302_v54 = vpop.xlane.xlu1 %2301  ;;  %v2480_v7 = vsel %vm12396_vm15, %v9882_v40, 0.0  ;;  %vm12403_vm15 = vmmov %vm12353_vm0 }
 0x746   : > { %7959 = vpow2.f32 %v2400_v34  ;;  %v2344_v1 = vsub.f32 %v9744_v18, %v2302_v54  ;;  %2481 = vadd.xlane.f32.xlu1 %v2480_v7 }
 0x748   : > { %v9887_v39 = vpop.eup %7955  ;;  %v2402_v51 = vmul.f32 1.442695, %v2344_v1 }
 0x749   : > { %v2305_v55 = vpop.xlane.xlu1 %2304  ;;  %v2483_v13 = vsel %vm12397_vm11, %v9887_v39, 0.0  ;;  %vm12404_vm11 = vmmov %vm12353_vm0 }
 0x74a   : > { %7961 = vpow2.f32 %v2402_v51  ;;  %v2345_v17 = vsub.f32 %v9748_v10, %v2305_v55  ;;  %2484 = vadd.xlane.f32.xlu0 %v2483_v13 }
 0x74c   : > { %v9892_v38 = vpop.eup %7957  ;;  %v2404_v60 = vmul.f32 1.442695, %v2345_v17 }
 0x74d   : > { %v2308_v59 = vpop.xlane.xlu1 %2307  ;;  %v2486_v6 = vsel %vm12398_vm9, %v9892_v38, 0.0  ;;  %vm12405_vm9 = vmmov %vm12353_vm0 }
 0x74e   : > { %7963 = vpow2.f32 %v2404_v60  ;;  %v2346_v18 = vsub.f32 %v9752_v30, %v2308_v59  ;;  %2487 = vadd.xlane.f32.xlu1 %v2486_v6 }
 0x750   : > { %v9897_v35 = vpop.eup %7959  ;;  %v2406_v50 = vmul.f32 1.442695, %v2346_v18 }
 0x751   : > { %v2311_v58 = vpop.xlane.xlu1 %2310  ;;  %v2489_v2 = vsel %vm12399_vm4, %v9897_v35, 0.0  ;;  %vm12406_vm4 = vmmov %vm12353_vm0 }
 0x752   : > { %7965 = vpow2.f32 %v2406_v50  ;;  %v2347_v10 = vsub.f32 %v9756_v19, %v2311_v58  ;;  %2490 = vadd.xlane.f32.xlu0 %v2489_v2 }
 0x754   : > { %v9902_v34 = vpop.eup %7961  ;;  %v2408_v54 = vmul.f32 1.442695, %v2347_v10 }
 0x755   : > { %v2314_v7 = vpop.xlane.xlu1 %2313  ;;  %v2492_v1 = vsel %vm12400_vm2, %v9902_v34, 0.0  ;;  %vm12407_vm2 = vmmov %vm12353_vm0 }
 0x756   : > { %7967 = vpow2.f32 %v2408_v54  ;;  %v2348_v30 = vsub.f32 %v9760_v48, %v2314_v7  ;;  %2493 = vadd.xlane.f32.xlu1 %v2492_v1 }
 0x758   : > { %v9907_v51 = vpop.eup %7963  ;;  %v2410_v55 = vmul.f32 1.442695, %v2348_v30 }
 0x759   : > { %v2317_v13 = vpop.xlane.xlu1 %2316  ;;  %v2495_v17 = vsel %vm12401_vm14, %v9907_v51, 0.0  ;;  %vm12408_vm14 = vmmov %vm12353_vm0 }
 0x75a   : > { %7969 = vpow2.f32 %v2410_v55  ;;  %v2349_v19 = vsub.f32 %v9764_v21, %v2317_v13  ;;  %2496 = vadd.xlane.f32.xlu0 %v2495_v17 }
 0x75c   : > { %v9912_v60 = vpop.eup %7965  ;;  %v2412_v59 = vmul.f32 1.442695, %v2349_v19 }
 0x75d   : > { %v2498_v6 = vsel %vm12402_vm6, %v9912_v60, 0.0  ;;  %vm12409_vm6 = vmmov %vm12353_vm0 }
 0x75e   : > { %7971 = vpow2.f32 %v2412_v59  ;;  %2499 = vadd.xlane.f32.xlu1 %v2498_v6 }
 0x760   : > { %v9916_v48 = vpop.eup %7967 }
 0x761   : > { %v2501_v18 = vsel %vm12353_vm0, %v9916_v48, 0.0 }
 0x762   : > { %2502 = vadd.xlane.f32.xlu0 %v2501_v18 }
 0x764   : > { %v9920_v50 = vpop.eup %7969 }
 0x765   : > { %v2504_v21 = vsel %vm12403_vm15, %v9920_v50, 0.0  ;;  %vm12410_vm15 = vmmov %vm12353_vm0 }
 0x766   : > { %2505 = vadd.xlane.f32.xlu1 %v2504_v21 }
 0x768   : > { %v9924_v58 = vpop.eup %7971 }
 0x769   : > { %v2507_v2 = vsel %vm12404_vm11, %v9924_v58, 0.0  ;;  %vm12411_vm11 = vmmov %vm12353_vm0 }
 0x76a   : > { %2508 = vadd.xlane.f32.xlu0 %v2507_v2 }
 0x77b   : > { %v2416_v10 = vpop.xlane.xlu0 %2415 }
 0x77c   : > { %7973 = vrcp.f32 %v2416_v10 }
 0x77f   : > { %v2419_v54 = vpop.xlane.xlu0 %2418 }
 0x780   : > { %7975 = vrcp.f32 %v2419_v54 }
 0x783   : > { %v2422_v7 = vpop.xlane.xlu0 %2421 }
 0x784   : > { %7977 = vrcp.f32 %v2422_v7 }
 0x786   : > { %v7974_v1 = vpop.eup %7973 }
 0x787   : > { %v2542_v30 = vmul.f32 %v7974_v1, %v9772_v32  ;;  %v2425_v55 = vpop.xlane.xlu0 %2424 }
 0x788   : > { %7979 = vrcp.f32 %v2425_v55 }
 0x789   : > { %7000 = vmatmul.mubr.msk.f32.vlgmr.msra.gmra.mrb[132].mxu0 %vm12405_vm9, %v2542_v30  ;;  %vm12412_vm9 = vnez %v12128_v25 }
 0x78a   : > { %v7976_v13 = vpop.eup %7975  ;;  %2740 = vmatprep.mubr.f32.mxu0 %v12179_v45  ;;  %7629 = vmatpush1.bf16.msk.msra.mxu0 %vm8796_vm13, %v12103_v9 }
 0x78b   : > { %v2428_v17 = vpop.xlane.xlu0 %2427  ;;  %v2543_v19 = vmul.f32 %v7976_v13, %v9777_v16  ;;  %7630 = vmatprep.subr.bf16.mxu0 %v12104_v11 }
 0x78c   : > { %7981 = vrcp.f32 %v2428_v17 }
 0x78d   : > { %7001 = vmatmul.mubr.msk.f32.gmra.mrb[134].mxu0 %vm12406_vm4, %v2543_v19  ;;  %vm12413_vm4 = vmmov %vm12353_vm0 }
 0x78e   : > { %v7978_v32 = vpop.eup %7977  ;;  %2746 = vmatprep.mubr.f32.mxu0 %v12179_v45  ;;  %7632 = vmatpush1.bf16.msk.msra.mxu0 %vm8831_vm8, %v12103_v9 }
 0x78f   : > { %v2431_v59 = vpop.xlane.xlu0 %2430  ;;  %v2544_v6 = vmul.f32 %v7978_v32, %v9782_v23  ;;  %7633 = vmatprep.subr.bf16.mxu0 %v12104_v11 }
 0x790   : > { %7983 = vrcp.f32 %v2431_v59 }
 0x791   : > { %7002 = vmatmul.mubr.msk.f32.gmra.mrb[136].mxu0 %vm12407_vm2, %v2544_v6  ;;  %vm12414_vm2 = vnez %v12132_v12 }
 0x792   : > { %v7980_v16 = vpop.eup %7979  ;;  %2752 = vmatprep.mubr.f32.mxu0 %v12179_v45  ;;  %7635 = vmatpush1.bf16.msk.msra.mxu0 %vm8855_vm3, %v12103_v9 }
 0x793   : > { %v2434_v18 = vpop.xlane.xlu0 %2433  ;;  %v2545_v21 = vmul.f32 %v7980_v16, %v9787_v31  ;;  %7636 = vmatprep.subr.bf16.mxu0 %v12104_v11 }
 0x794   : > { %7985 = vrcp.f32 %v2434_v18 }
 0x795   : > { %7003 = vmatmul.mubr.msk.f32.gmra.mrb[138].mxu0 %vm12408_vm14, %v2545_v21  ;;  %vm12415_vm14 = vmmov %vm12353_vm0 }
 0x796   : > { %v7982_v23 = vpop.eup %7981  ;;  %2758 = vmatprep.mubr.f32.mxu0 %v12179_v45  ;;  %7638 = vmatpush1.bf16.msk.msra.mxu0 %vm8878_vm10, %v12103_v9 }
 0x797   : > { %v2437_v2 = vpop.xlane.xlu0 %2436  ;;  %v2546_v10 = vmul.f32 %v7982_v23, %v9792_v24  ;;  %7639 = vmatprep.subr.bf16.mxu0 %v12104_v11 }
 0x798   : > { %7987 = vrcp.f32 %v2437_v2 }
 0x799   : > { %7004 = vmatmul.mubr.msk.f32.gmra.mrb[140].mxu0 %vm12409_vm6, %v2546_v10  ;;  %vm12416_vm6 = vnez %v12135_v0 }
 0x79a   : > { %v7984_v31 = vpop.eup %7983  ;;  %2764 = vmatprep.mubr.f32.mxu0 %v12179_v45  ;;  %7641 = vmatpush1.bf16.msk.msra.mxu0 %vm12188_vm1, %v12103_v9 }
 0x79b   : > { %v2440_v54 = vpop.xlane.xlu0 %2439  ;;  %v2547_v7 = vmul.f32 %v7984_v31, %v9797_v27  ;;  %7642 = vmatprep.subr.bf16.mxu0 %v12104_v11 }
 0x79c   : > { %7989 = vrcp.f32 %v2440_v54 }
 0x79d   : > { %7005 = vmatmul.mubr.msk.f32.gmra.mrb[142].mxu0 %vm12353_vm0, %v2547_v7 }
 0x79e   : > { %v7986_v24 = vpop.eup %7985  ;;  %2770 = vmatprep.mubr.f32.mxu0 %v12179_v45  ;;  %7644 = vmatpush1.bf16.msk.msra.mxu0 %vm12189_vm5, %v12103_v9 }
 0x79f   : > { %v2443_v1 = vpop.xlane.xlu0 %2442  ;;  %v2548_v30 = vmul.f32 %v7986_v24, %v9802_v26  ;;  %7645 = vmatprep.subr.bf16.mxu0 %v12104_v11 }
 0x7a0   : > { %7991 = vrcp.f32 %v2443_v1 }
 0x7a1   : > { %7006 = vmatmul.mubr.msk.f32.gmra.mrb[144].mxu0 %vm12410_vm15, %v2548_v30  ;;  %vm12417_vm15 = vmmov %vm12353_vm0 }
 0x7a2   : > { %v7988_v27 = vpop.eup %7987  ;;  %2776 = vmatprep.mubr.f32.mxu0 %v12179_v45  ;;  %7647 = vmatpush1.bf16.msk.msra.mxu0 %vm8970_vm12, %v12103_v9 }
 0x7a3   : > { %v2446_v55 = vpop.xlane.xlu1 %2445  ;;  %v2549_v13 = vmul.f32 %v7988_v27, %v9807_v52  ;;  %7648 = vmatprep.subr.bf16.mxu0 %v12104_v11 }
 0x7a4   : > { %7993 = vrcp.f32 %v2446_v55 }
 0x7a5   : > { %7007 = vmatmul.mubr.msk.f32.gmra.mrb[146].mxu0 %vm12411_vm11, %v2549_v13  ;;  %vm12418_vm11 = vmmov %vm12353_vm0 }
 0x7a6   : > { %v7990_v26 = vpop.eup %7989  ;;  %2782 = vmatprep.mubr.f32.mxu0 %v12179_v45  ;;  %7650 = vmatpush1.bf16.msk.msra.mxu0 %vm12412_vm9, %v12103_v9 }
 0x7a7   : > { %v2449_v17 = vpop.xlane.xlu0 %2448  ;;  %v2550_v19 = vmul.f32 %v7990_v26, %v9812_v37  ;;  %7651 = vmatprep.subr.bf16.mxu0 %v12104_v11 }
 0x7a8   : > { %7995 = vrcp.f32 %v2449_v17 }
 0x7a9   : > { %7008 = vmatmul.mubr.msk.f32.gmra.mrb[148].mxu0 %vm12413_vm4, %v2550_v19  ;;  %vm12419_vm4 = vmmov %vm12353_vm0 }
 0x7aa   : > { %v7992_v52 = vpop.eup %7991  ;;  %2788 = vmatprep.mubr.f32.mxu0 %v12179_v45  ;;  %7653 = vmatpush1.bf16.msk.msra.mxu0 %vm12414_vm2, %v12103_v9 }
 0x7ab   : > { %v2452_v32 = vpop.xlane.xlu1 %2451  ;;  %v2551_v59 = vmul.f32 %v7992_v52, %v9817_v29  ;;  %7654 = vmatprep.subr.bf16.mxu0 %v12104_v11 }
 0x7ac   : > { %7997 = vrcp.f32 %v2452_v32 }
 0x7ad   : > { %7009 = vmatmul.mubr.msk.f32.gmra.mrb[150].mxu0 %vm12415_vm14, %v2551_v59  ;;  %vm12420_vm14 = vmmov %vm12353_vm0 }
 0x7ae   : > { %v7994_v37 = vpop.eup %7993  ;;  %2794 = vmatprep.mubr.f32.mxu0 %v12179_v45  ;;  %7656 = vmatpush1.bf16.msk.msra.mxu0 %vm12416_vm6, %v12103_v9 }
 0x7af   : > { %v2455_v6 = vpop.xlane.xlu0 %2454  ;;  %v2552_v16 = vmul.f32 %v7994_v37, %v9822_v33 }
 0x7b0   : > { %7999 = vrcp.f32 %v2455_v6 }
 0x7b1   : > { %7010 = vmatmul.mubr.msk.f32.gmra.mrb[152].mxu0 %vm12353_vm0, %v2552_v16 }
 0x7b2   : > { %v7996_v18 = vpop.eup %7995  ;;  %2800 = vmatprep.mubr.f32.mxu0 %v12179_v45 }
 0x7b3   : > { %v2458_v29 = vpop.xlane.xlu1 %2457  ;;  %v2553_v21 = vmul.f32 %v7996_v18, %v9827_v22 }
 0x7b4   : > { %8001 = vrcp.f32 %v2458_v29 }
 0x7b5   : > { %7011 = vmatmul.mubr.msk.f32.gmra.mrb[154].mxu0 %vm12417_vm15, %v2553_v21  ;;  %vm12421_vm15 = vmmov %vm12353_vm0 }
 0x7b6   : > { %v7998_v23 = vpop.eup %7997  ;;  %2806 = vmatprep.mubr.f32.mxu0 %v12179_v45 }
 0x7b7   : > { %v2461_v2 = vpop.xlane.xlu0 %2460  ;;  %v2554_v10 = vmul.f32 %v7998_v23, %v9832_v41 }
 0x7b8   : > { %8003 = vrcp.f32 %v2461_v2 }
 0x7b9   : > { %7012 = vmatmul.mubr.msk.f32.gmra.mrb[156].mxu0 %vm12418_vm11, %v2554_v10  ;;  %vm12422_vm11 = vmmov %vm12353_vm0 }
 0x7ba   : > { %v8000_v33 = vpop.eup %7999  ;;  %2812 = vmatprep.mubr.f32.mxu0 %v12179_v45 }
 0x7bb   : > { %v2464_v31 = vpop.xlane.xlu1 %2463  ;;  %v2555_v54 = vmul.f32 %v8000_v33, %v9837_v43 }
 0x7bc   : > { %8005 = vrcp.f32 %v2464_v31 }
 0x7bd   : > { %7013 = vmatmul.mubr.msk.f32.gmra.mrb[158].mxu0 %vm12419_vm4, %v2555_v54  ;;  %vm12423_vm4 = vmmov %vm12353_vm0 }
 0x7be   : > { %v8002_v22 = vpop.eup %8001  ;;  %2818 = vmatprep.mubr.f32.mxu0 %v12179_v45 }
 0x7bf   : > { %v2467_v7 = vpop.xlane.xlu0 %2466  ;;  %v2556_v24 = vmul.f32 %v8002_v22, %v9842_v15 }
 0x7c0   : > { %8007 = vrcp.f32 %v2467_v7 }
 0x7c1   : > { %7014 = vmatmul.mubr.msk.f32.gmra.mrb[160].mxu0 %vm12420_vm14, %v2556_v24  ;;  %vm12424_vm14 = vmmov %vm12353_vm0 }
 0x7c2   : > { %v8004_v41 = vpop.eup %8003  ;;  %2824 = vmatprep.mubr.f32.mxu0 %v12179_v45 }
 0x7c3   : > { %v2470_v1 = vpop.xlane.xlu1 %2469  ;;  %v2557_v30 = vmul.f32 %v8004_v41, %v9847_v49 }
 0x7c4   : > { %8009 = vrcp.f32 %v2470_v1 }
 0x7c5   : > { %7015 = vmatmul.mubr.msk.f32.gmra.mrb[162].mxu0 %vm12353_vm0, %v2557_v30 }
 0x7c6   : > { %v8006_v43 = vpop.eup %8005  ;;  %2830 = vmatprep.mubr.f32.mxu0 %v12179_v45 }
 0x7c7   : > { %v2473_v27 = vpop.xlane.xlu0 %2472  ;;  %v2558_v55 = vmul.f32 %v8006_v43, %v9852_v36 }
 0x7c8   : > { %8011 = vrcp.f32 %v2473_v27 }
 0x7c9   : > { %7016 = vmatmul.mubr.msk.f32.gmra.mrb[164].mxu0 %vm12421_vm15, %v2558_v55  ;;  %vm12425_vm15 = vmmov %vm12353_vm0 }
 0x7ca   : > { %v8008_v15 = vpop.eup %8007  ;;  %2836 = vmatprep.mubr.f32.mxu0 %v12179_v45 }
 0x7cb   : > { %v2476_v13 = vpop.xlane.xlu1 %2475  ;;  %v2559_v26 = vmul.f32 %v8008_v15, %v9857_v4 }
 0x7cc   : > { %8013 = vrcp.f32 %v2476_v13 }
 0x7cd   : > { %7017 = vmatmul.mubr.msk.f32.gmra.mrb[166].mxu0 %vm12422_vm11, %v2559_v26  ;;  %vm12426_vm11 = vmmov %vm12353_vm0 }
 0x7ce   : > { %v8010_v49 = vpop.eup %8009  ;;  %2842 = vmatprep.mubr.f32.mxu0 %v12179_v45 }
 0x7cf   : > { %v2479_v17 = vpop.xlane.xlu0 %2478  ;;  %v2560_v19 = vmul.f32 %v8010_v49, %v9862_v53 }
 0x7d0   : > { %8015 = vrcp.f32 %v2479_v17 }
 0x7d1   : > { %7018 = vmatmul.mubr.msk.f32.gmra.mrb[168].mxu0 %vm12423_vm4, %v2560_v19  ;;  %vm12427_vm4 = vmmov %vm12353_vm0 }
 0x7d2   : > { %v8012_v36 = vpop.eup %8011  ;;  %2848 = vmatprep.mubr.f32.mxu0 %v12179_v45 }
 0x7d3   : > { %v2482_v52 = vpop.xlane.xlu1 %2481  ;;  %v2561_v32 = vmul.f32 %v8012_v36, %v9867_v3 }
 0x7d4   : > { %8017 = vrcp.f32 %v2482_v52 }
 0x7d5   : > { %7019 = vmatmul.mubr.msk.f32.gmra.mrb[170].mxu0 %vm12424_vm14, %v2561_v32  ;;  %vm12428_vm14 = vmmov %vm12353_vm0 }
 0x7d6   : > { %v8014_v4 = vpop.eup %8013  ;;  %2854 = vmatprep.mubr.f32.mxu0 %v12179_v45 }
 0x7d7   : > { %v2485_v59 = vpop.xlane.xlu0 %2484  ;;  %v2562_v37 = vmul.f32 %v8014_v4, %v9872_v46  ;;  %v12434_v4 = vld [vmem:[#allocation14_spill] sm:$0xff] }
 0x7d8   : > { %8019 = vrcp.f32 %v2485_v59 }
 0x7d9   : > { %7020 = vmatmul.mubr.msk.f32.gmra.mrb[172].mxu0 %vm12353_vm0, %v2562_v37 }
 0x7da   : > { %v8016_v53 = vpop.eup %8015  ;;  %2860 = vmatprep.mubr.f32.mxu0 %v12179_v45 }
 0x7db   : > { %v2488_v6 = vpop.xlane.xlu1 %2487  ;;  %v2563_v16 = vmul.f32 %v8016_v53, %v9877_v56  ;;  %v12435_v53 = vld [vmem:[#allocation15_spill] sm:$0xff] }
 0x7dc   : > { %8021 = vrcp.f32 %v2488_v6 }
 0x7dd   : > { %7021 = vmatmul.mubr.msk.f32.gmra.mrb[174].mxu0 %vm12425_vm15, %v2563_v16  ;;  %vm12429_vm15 = vmmov %vm12353_vm0 }
 0x7de   : > { %v8018_v3 = vpop.eup %8017  ;;  %2866 = vmatprep.mubr.f32.mxu0 %v12179_v45 }
 0x7df   : > { %v2491_v18 = vpop.xlane.xlu0 %2490  ;;  %v2564_v29 = vmul.f32 %v8018_v3, %v9882_v40  ;;  %v12436_v3 = vld [vmem:[#allocation16_spill] sm:$0xff] }
 0x7e0   : > { %8023 = vrcp.f32 %v2491_v18 }
 0x7e1   : > { %7022 = vmatmul.mubr.msk.f32.gmra.mrb[176].mxu0 %vm12426_vm11, %v2564_v29  ;;  %vm12430_vm11 = vmmov %vm12353_vm0 }
 0x7e2   : > { %v8020_v46 = vpop.eup %8019  ;;  %2872 = vmatprep.mubr.f32.mxu0 %v12179_v45 }
 0x7e3   : > { %v2494_v21 = vpop.xlane.xlu1 %2493  ;;  %v2565_v23 = vmul.f32 %v8020_v46, %v9887_v39 }
 0x7e4   : > { %8025 = vrcp.f32 %v2494_v21 }
 0x7e5   : > { %7023 = vmatmul.mubr.msk.f32.gmra.mrb[178].mxu0 %vm12427_vm4, %v2565_v23  ;;  %vm12431_vm4 = vmmov %vm12353_vm0  ;;  %v12437_v23 = vld [vmem:[#allocation17_spill] sm:$0xff] }
 0x7e6   : > { %v8022_v56 = vpop.eup %8021  ;;  %2878 = vmatprep.mubr.f32.mxu0 %v12179_v45 }
 0x7e7   : > { %v2497_v2 = vpop.xlane.xlu0 %2496  ;;  %v2566_v10 = vmul.f32 %v8022_v56, %v9892_v38 }
 0x7e8   : > { %8027 = vrcp.f32 %v2497_v2 }
 0x7e9   : > { %7024 = vmatmul.mubr.msk.f32.gmra.mrb[180].mxu0 %vm12428_vm14, %v2566_v10  ;;  %vm12432_vm14 = vmmov %vm12353_vm0  ;;  %v12438_v10 = vld [vmem:[#allocation18_spill] sm:$0xff] }
 0x7ea   : > { %v8024_v40 = vpop.eup %8023  ;;  %2884 = vmatprep.mubr.f32.mxu0 %v12179_v45 }
 0x7eb   : > { %v2500_v33 = vpop.xlane.xlu1 %2499  ;;  %v2567_v31 = vmul.f32 %v8024_v40, %v9897_v35 }
 0x7ec   : > { %8029 = vrcp.f32 %v2500_v33 }
 0x7ed   : > { %7025 = vmatmul.mubr.msk.f32.gmra.mrb[182].mxu0 %vm12353_vm0, %v2567_v31  ;;  %v12439_v31 = vld [vmem:[#allocation19_spill] sm:$0xff] }
 0x7ee   : > { %v8026_v39 = vpop.eup %8025  ;;  %2890 = vmatprep.mubr.f32.mxu0 %v12179_v45 }
 0x7ef   : > { %v2503_v54 = vpop.xlane.xlu0 %2502  ;;  %v2568_v22 = vmul.f32 %v8026_v39, %v9902_v34 }
 0x7f0   : > { %8031 = vrcp.f32 %v2503_v54 }
 0x7f1   : > { %7026 = vmatmul.mubr.msk.f32.gmra.mrb[184].mxu0 %vm12429_vm15, %v2568_v22  ;;  %vm12433_vm15 = vmmov %vm12353_vm0  ;;  %v12440_v22 = vld [vmem:[#allocation20_spill] sm:$0xff] }
 0x7f2   : > { %v8028_v38 = vpop.eup %8027  ;;  %2896 = vmatprep.mubr.f32.mxu0 %v12179_v45 }
 0x7f3   : > { %v2506_v7 = vpop.xlane.xlu1 %2505  ;;  %v2569_v24 = vmul.f32 %v8028_v38, %v9907_v51 }
 0x7f4   : > { %8033 = vrcp.f32 %v2506_v7 }
 0x7f5   : > { %7027 = vmatmul.mubr.msk.f32.gmra.mrb[186].mxu0 %vm12430_vm11, %v2569_v24 }
 0x7f6   : > { %v8030_v35 = vpop.eup %8029  ;;  %2902 = vmatprep.mubr.f32.mxu0 %v12179_v45 }
 0x7f7   : > { %v2509_v41 = vpop.xlane.xlu0 %2508  ;;  %v2570_v1 = vmul.f32 %v8030_v35, %v9912_v60 }
 0x7f8   : > { %8035 = vrcp.f32 %v2509_v41  ;;  %v12441_v41 = vld [vmem:[#allocation21_spill] sm:$0xff] }
 0x7f9   : > { %7028 = vmatmul.mubr.msk.f32.gmra.mrb[188].mxu0 %vm12431_vm4, %v2570_v1 }
 0x7fa   : > { %v8032_v34 = vpop.eup %8031  ;;  %2908 = vmatprep.mubr.f32.mxu0 %v12179_v45 }
 0x7fb   : > { %v2571_v30 = vmul.f32 %v8032_v34, %v9916_v48 }
 0x7fd   : > { %7029 = vmatmul.mubr.msk.f32.gmra.mrb[190].mxu0 %vm12432_vm14, %v2571_v30  ;;  %v12442_v30 = vld [vmem:[#allocation22_spill] sm:$0xff] }
 0x7fe   : > { %v8034_v51 = vpop.eup %8033  ;;  %2914 = vmatprep.mubr.f32.mxu0 %v12179_v45 }
 0x7ff   : > { %v2572_v43 = vmul.f32 %v8034_v51, %v9920_v50 }
 0x801   : > { %7030 = vmatmul.mubr.msk.f32.gmra.mrb[192].mxu0 %vm12353_vm0, %v2572_v43 }
 0x802   : > { %v8036_v27 = vpop.eup %8035  ;;  %2920 = vmatprep.mubr.f32.mxu0 %v12179_v45 }
 0x803   : > { %v2573_v60 = vmul.f32 %v8036_v27, %v9924_v58  ;;  %v12443_v27 = vld [vmem:[#allocation23_spill] sm:$0xff] }
 0x805   : > { %7031 = vmatmul.mubr.msk.f32.gmra.mrb[194].mxu0 %vm12433_vm15, %v2573_v60 }
 0x85c   : > { %v2736_v55 = vpop.f32.mrb[132].mxu0 }
 0x85d   : > { %v2927_v15 = vmul.f32 %v2736_v55, %v12258_v28  ;;  %v2738_v48 = vpop.f32.mrb[133].mxu0 }
 0x85e   : > { %v2928_v13 = vmul.f32 %v2738_v48, %v12259_v47 }
 0x860   : > { %v2742_v26 = vpop.f32.mrb[134].mxu0 }
 0x861   : > { %v2929_v49 = vmul.f32 %v2742_v26, %v12261_v42  ;;  %v2744_v17 = vpop.f32.mrb[135].mxu0 }
 0x862   : > { %v2930_v50 = vmul.f32 %v2744_v17, %v12262_v44  ;;  %v12445_v17 = vld [vmem:[#allocation25_spill] sm:$0xff] }
 0x863   : > { %v7527_v19 = vpack.c.bf16 %v2929_v49, %v2927_v15  ;;  %v12444_v15 = vld [vmem:[#allocation24_spill] sm:$0xff] }
 0x864   : > { %v2748_v36 = vpop.f32.mrb[136].mxu0  ;;  %v7525_v52 = vpack.c.bf16 %v2930_v50, %v2928_v13 }
 0x865   : > { %v2931_v32 = vmul.f32 %v2748_v36, %v12264_v20  ;;  %v2750_v58 = vpop.f32.mrb[137].mxu0  ;;  %v12446_v36 = vld [vmem:[#allocation26_spill] sm:$0xff] }
 0x866   : > { %v2932_v59 = vmul.f32 %v2750_v58, %v12434_v4  ;;  %7526 = vmatprep.subr.bf16.mxu1 %v7525_v52  ;;  %v12447_v58 = vld [vmem:[#allocation27_spill] sm:$0xff] }
 0x867   : > { %7528 = vmatpush1.bf16.msra.mxu1 %v7527_v19 }
 0x868   : > { %v2754_v37 = vpop.f32.mrb[138].mxu0 }
 0x869   : > { %v2933_v6 = vmul.f32 %v2754_v37, %v12435_v53  ;;  %v2756_v16 = vpop.f32.mrb[139].mxu0 }
 0x86a   : > { %v2934_v18 = vmul.f32 %v2756_v16, %v12436_v3 }
 0x86b   : > { %v7531_v29 = vpack.c.bf16 %v2933_v6, %v2931_v32  ;;  %v12448_v6 = vld [vmem:[#allocation28_spill] sm:$0xff] }
 0x86c   : > { %v2760_v46 = vpop.f32.mrb[140].mxu0  ;;  %v7529_v21 = vpack.c.bf16 %v2934_v18, %v2932_v59 }
 0x86d   : > { %v2935_v56 = vmul.f32 %v2760_v46, %v12437_v23  ;;  %v2762_v2 = vpop.f32.mrb[141].mxu0 }
 0x86e   : > { %v2936_v40 = vmul.f32 %v2762_v2, %v12438_v10  ;;  %7530 = vmatprep.subr.bf16.mxu1 %v7529_v21  ;;  %v12449_v21 = vld [vmem:[#allocation29_spill] sm:$0xff] }
 0x86f   : > { %7532 = vmatpush1.bf16.msra.mxu1 %v7531_v29 }
 0x870   : > { %v2766_v33 = vpop.f32.mrb[142].mxu0 }
 0x871   : > { %v2937_v39 = vmul.f32 %v2766_v33, %v12439_v31  ;;  %v2768_v54 = vpop.f32.mrb[143].mxu0 }
 0x872   : > { %v2938_v38 = vmul.f32 %v2768_v54, %v12440_v22  ;;  %v12451_v54 = vld [vmem:[#allocation31_spill] sm:$0xff] }
 0x873   : > { %v7535_v7 = vpack.c.bf16 %v2937_v39, %v2935_v56 }
 0x874   : > { %v2772_v24 = vpop.f32.mrb[144].mxu0  ;;  %v7533_v35 = vpack.c.bf16 %v2938_v38, %v2936_v40  ;;  %v12450_v40 = vld [vmem:[#allocation30_spill] sm:$0xff] }
 0x875   : > { %v2939_v1 = vmul.f32 %v2772_v24, %v12441_v41  ;;  %v2774_v34 = vpop.f32.mrb[145].mxu0  ;;  %v12452_v24 = vld [vmem:[#allocation32_spill] sm:$0xff] }
 0x876   : > { %v2940_v51 = vmul.f32 %v2774_v34, %v12442_v30  ;;  %7534 = vmatprep.subr.bf16.mxu1 %v7533_v35 }
 0x877   : > { %7536 = vmatpush1.bf16.msra.mxu1 %v7535_v7 }
 0x878   : > { %v2778_v43 = vpop.f32.mrb[146].mxu0 }
 0x879   : > { %v2941_v60 = vmul.f32 %v2778_v43, %v12443_v27  ;;  %v2780_v55 = vpop.f32.mrb[147].mxu0  ;;  %v12453_v43 = vld [vmem:[#allocation33_spill] sm:$0xff] }
 0x87a   : > { %v2942_v48 = vmul.f32 %v2780_v55, %v12444_v15 }
 0x87b   : > { %v7539_v13 = vpack.c.bf16 %v2941_v60, %v2939_v1 }
 0x87c   : > { %v2784_v26 = vpop.f32.mrb[148].mxu0  ;;  %v7537_v49 = vpack.c.bf16 %v2942_v48, %v2940_v51  ;;  %v12454_v48 = vld [vmem:[#allocation34_spill] sm:$0xff] }
 0x87d   : > { %v2943_v50 = vmul.f32 %v2784_v26, %v12445_v17  ;;  %v2786_v19 = vpop.f32.mrb[149].mxu0 }
 0x87e   : > { %v2944_v52 = vmul.f32 %v2786_v19, %v12446_v36  ;;  %7538 = vmatprep.subr.bf16.mxu1 %v7537_v49  ;;  %v12455_v49 = vld [vmem:[#allocation35_spill] sm:$0xff] }
 0x87f   : > { %7540 = vmatpush1.bf16.msra.mxu1 %v7539_v13 }
 0x880   : > { %v2790_v32 = vpop.f32.mrb[150].mxu0 }
 0x881   : > { %v2945_v59 = vmul.f32 %v2790_v32, %v12447_v58  ;;  %v2792_v37 = vpop.f32.mrb[151].mxu0 }
 0x882   : > { %v2946_v16 = vmul.f32 %v2792_v37, %v12448_v6 }
 0x883   : > { %v7543_v18 = vpack.c.bf16 %v2945_v59, %v2943_v50 }
 0x884   : > { %v2796_v29 = vpop.f32.mrb[152].mxu0  ;;  %v7541_v46 = vpack.c.bf16 %v2946_v16, %v2944_v52  ;;  %v12456_v52 = vld [vmem:[#allocation36_spill] sm:$0xff] }
 0x885   : > { %v2947_v56 = vmul.f32 %v2796_v29, %v12449_v21  ;;  %v2798_v2 = vpop.f32.mrb[153].mxu0 }
 0x886   : > { %v2948_v33 = vmul.f32 %v2798_v2, %v12450_v40  ;;  %7542 = vmatprep.subr.bf16.mxu1 %v7541_v46 }
 0x887   : > { %7544 = vmatpush1.bf16.msra.mxu1 %v7543_v18  ;;  %v12457_v18 = vld [vmem:[#allocation37_spill] sm:$0xff] }
 0x888   : > { %v2802_v39 = vpop.f32.mrb[154].mxu0 }
 0x889   : > { %v2949_v38 = vmul.f32 %v2802_v39, %v12451_v54  ;;  %v2804_v7 = vpop.f32.mrb[155].mxu0  ;;  %v12459_v39 = vld [vmem:[#allocation39_spill] sm:$0xff] }
 0x88a   : > { %v2950_v35 = vmul.f32 %v2804_v7, %v12452_v24 }
 0x88b   : > { %v7547_v1 = vpack.c.bf16 %v2949_v38, %v2947_v56  ;;  %v12458_v56 = vld [vmem:[#allocation38_spill] sm:$0xff] }
 0x88c   : > { %v2808_v34 = vpop.f32.mrb[156].mxu0  ;;  %v7545_v51 = vpack.c.bf16 %v2950_v35, %v2948_v33  ;;  %v12460_v35 = vld [vmem:[#allocation40_spill] sm:$0xff] }
 0x88d   : > { %v2951_v60 = vmul.f32 %v2808_v34, %v12453_v43  ;;  %v2810_v55 = vpop.f32.mrb[157].mxu0 }
 0x88e   : > { %v2952_v13 = vmul.f32 %v2810_v55, %v12454_v48  ;;  %7546 = vmatprep.subr.bf16.mxu1 %v7545_v51 }
 0x88f   : > { %7548 = vmatpush1.bf16.msra.mxu1 %v7547_v1 }
 0x890   : > { %v2814_v26 = vpop.f32.mrb[158].mxu0 }
 0x891   : > { %v2953_v50 = vmul.f32 %v2814_v26, %v12455_v49  ;;  %v2816_v19 = vpop.f32.mrb[159].mxu0  ;;  %v12461_v26 = vld [vmem:[#allocation41_spill] sm:$0xff] }
 0x892   : > { %v2954_v32 = vmul.f32 %v2816_v19, %v12456_v52 }
 0x893   : > { %v7551_v59 = vpack.c.bf16 %v2953_v50, %v2951_v60  ;;  %v12462_v50 = vld [vmem:[#allocation42_spill] sm:$0xff] }
 0x894   : > { %v7549_v37 = vpack.c.bf16 %v2954_v32, %v2952_v13  ;;  %v2820_v16 = vpop.f32.mrb[160].mxu0 }
 0x895   : > { %v2955_v29 = vmul.f32 %v2820_v16, %v12457_v18  ;;  %v2822_v46 = vpop.f32.mrb[161].mxu0  ;;  %v12463_v16 = vld [vmem:[#allocation43_spill] sm:$0xff] }
 0x896   : > { %v2956_v2 = vmul.f32 %v2822_v46, %v12458_v56  ;;  %7550 = vmatprep.subr.bf16.mxu1 %v7549_v37  ;;  %v12464_v46 = vld [vmem:[#allocation44_spill] sm:$0xff] }
 0x897   : > { %7552 = vmatpush1.bf16.msra.mxu1 %v7551_v59 }
 0x898   : > { %v2826_v33 = vpop.f32.mrb[162].mxu0 }
 0x899   : > { %v2957_v38 = vmul.f32 %v2826_v33, %v12459_v39  ;;  %v2828_v7 = vpop.f32.mrb[163].mxu0 }
 0x89a   : > { %v2958_v1 = vmul.f32 %v2828_v7, %v12460_v35  ;;  %v12465_v7 = vld [vmem:[#allocation45_spill] sm:$0xff] }
 0x89b   : > { %v7555_v34 = vpack.c.bf16 %v2957_v38, %v2955_v29  ;;  %v12466_v38 = vld [vmem:[#allocation46_spill] sm:$0xff] }
 0x89c   : > { %v7553_v51 = vpack.c.bf16 %v2958_v1, %v2956_v2  ;;  %v2832_v55 = vpop.f32.mrb[164].mxu0 }
 0x89d   : > { %v2959_v60 = vmul.f32 %v2832_v55, %v12461_v26  ;;  %v2834_v13 = vpop.f32.mrb[165].mxu0 }
 0x89e   : > { %v2960_v19 = vmul.f32 %v2834_v13, %v12462_v50  ;;  %7554 = vmatprep.subr.bf16.mxu1 %v7553_v51  ;;  %v12467_v13 = vld [vmem:[#allocation47_spill] sm:$0xff]  ;;  %v12468_v50 = vld [vmem:[#allocation48_spill] sm:$0xff] }
 0x89f   : > { %7556 = vmatpush1.bf16.msra.mxu1 %v7555_v34 }
 0x8a0   : > { %v2838_v32 = vpop.f32.mrb[166].mxu0 }
 0x8a1   : > { %v2961_v37 = vmul.f32 %v2838_v32, %v12463_v16  ;;  %v2840_v59 = vpop.f32.mrb[167].mxu0 }
 0x8a2   : > { %v2962_v56 = vmul.f32 %v2840_v59, %v12464_v46  ;;  %v12469_v59 = vld [vmem:[#allocation49_spill] sm:$0xff] }
 0x8a3   : > { %v7559_v33 = vpack.c.bf16 %v2961_v37, %v2959_v60 }
 0x8a4   : > { %v7557_v39 = vpack.c.bf16 %v2962_v56, %v2960_v19  ;;  %v2844_v18 = vpop.f32.mrb[168].mxu0  ;;  %v12470_v19 = vld [vmem:[#allocation50_spill] sm:$0xff] }
 0x8a5   : > { %v2963_v29 = vmul.f32 %v2844_v18, %v12465_v7  ;;  %v2846_v2 = vpop.f32.mrb[169].mxu0 }
 0x8a6   : > { %v2964_v1 = vmul.f32 %v2846_v2, %v12466_v38  ;;  %7558 = vmatprep.subr.bf16.mxu1 %v7557_v39  ;;  %v12471_v2 = vld [vmem:[#allocation51_spill] sm:$0xff]  ;;  %v12472_v38 = vld [vmem:[#allocation52_spill] sm:$0xff] }
 0x8a7   : > { %7560 = vmatpush1.bf16.msra.mxu1 %v7559_v33 }
 0x8a8   : > { %v2850_v55 = vpop.f32.mrb[170].mxu0 }
 0x8a9   : > { %v2965_v51 = vmul.f32 %v2850_v55, %v12467_v13  ;;  %v2852_v34 = vpop.f32.mrb[171].mxu0 }
 0x8aa   : > { %v2966_v26 = vmul.f32 %v2852_v34, %v12468_v50  ;;  %v12473_v34 = vld [vmem:[#allocation53_spill] sm:$0xff] }
 0x8ab   : > { %v7563_v32 = vpack.c.bf16 %v2965_v51, %v2963_v29 }
 0x8ac   : > { %v7561_v16 = vpack.c.bf16 %v2966_v26, %v2964_v1  ;;  %v2856_v35 = vpop.f32.mrb[172].mxu0  ;;  %v12474_v1 = vld [vmem:[#allocation54_spill] sm:$0xff] }
 0x8ad   : > { %v2967_v60 = vmul.f32 %v2856_v35, %v12469_v59  ;;  %v2858_v56 = vpop.f32.mrb[173].mxu0 }
 0x8ae   : > { %v2968_v37 = vmul.f32 %v2858_v56, %v12470_v19  ;;  %7562 = vmatprep.subr.bf16.mxu1 %v7561_v16  ;;  %v12475_v56 = vld [vmem:[#allocation55_spill] sm:$0xff]  ;;  %v12476_v19 = vld [vmem:[#allocation56_spill] sm:$0xff] }
 0x8af   : > { %7564 = vmatpush1.bf16.msra.mxu1 %v7563_v32 }
 0x8b0   : > { %v2862_v18 = vpop.f32.mrb[174].mxu0 }
 0x8b1   : > { %v2969_v39 = vmul.f32 %v2862_v18, %v12471_v2  ;;  %v2864_v33 = vpop.f32.mrb[175].mxu0 }
 0x8b2   : > { %v2970_v7 = vmul.f32 %v2864_v33, %v12472_v38  ;;  %v12477_v33 = vld [vmem:[#allocation57_spill] sm:$0xff] }
 0x8b3   : > { %v7567_v55 = vpack.c.bf16 %v2969_v39, %v2967_v60 }
 0x8b4   : > { %v7565_v13 = vpack.c.bf16 %v2970_v7, %v2968_v37  ;;  %v2868_v46 = vpop.f32.mrb[176].mxu0  ;;  %v12478_v37 = vld [vmem:[#allocation58_spill] sm:$0xff] }
 0x8b5   : > { %v2971_v29 = vmul.f32 %v2868_v46, %v12473_v34  ;;  %v2870_v26 = vpop.f32.mrb[177].mxu0 }
 0x8b6   : > { %v2972_v51 = vmul.f32 %v2870_v26, %v12474_v1  ;;  %7566 = vmatprep.subr.bf16.mxu1 %v7565_v13  ;;  %v12479_v26 = vld [vmem:[#allocation59_spill] sm:$0xff]  ;;  %v12480_v1 = vld [vmem:[#allocation60_spill] sm:$0xff] }
 0x8b7   : > { %7568 = vmatpush1.bf16.msra.mxu1 %v7567_v55 }
 0x8b8   : > { %v2874_v35 = vpop.f32.mrb[178].mxu0 }
 0x8b9   : > { %v2973_v16 = vmul.f32 %v2874_v35, %v12475_v56  ;;  %v2876_v32 = vpop.f32.mrb[179].mxu0 }
 0x8ba   : > { %v2974_v59 = vmul.f32 %v2876_v32, %v12476_v19  ;;  %v12481_v32 = vld [vmem:[#allocation61_spill] sm:$0xff] }
 0x8bb   : > { %v7571_v18 = vpack.c.bf16 %v2973_v16, %v2971_v29 }
 0x8bc   : > { %v7569_v2 = vpack.c.bf16 %v2974_v59, %v2972_v51  ;;  %v2880_v50 = vpop.f32.mrb[180].mxu0  ;;  %v12482_v51 = vld [vmem:[#allocation62_spill] sm:$0xff] }
 0x8bd   : > { %v2975_v60 = vmul.f32 %v2880_v50, %v12477_v33  ;;  %v2882_v7 = vpop.f32.mrb[181].mxu0 }
 0x8be   : > { %v2976_v39 = vmul.f32 %v2882_v7, %v12478_v37  ;;  %7570 = vmatprep.subr.bf16.mxu1 %v7569_v2  ;;  %v12483_v7 = vld [vmem:[#allocation63_spill] sm:$0xff]  ;;  %v12484_v37 = vld [vmem:[#allocation64_spill] sm:$0xff] }
 0x8bf   : > { %7572 = vmatpush1.bf16.msra.mxu1 %v7571_v18 }
 0x8c0   : > { %v2886_v46 = vpop.f32.mrb[182].mxu0 }
 0x8c1   : > { %v2977_v13 = vmul.f32 %v2886_v46, %v12479_v26  ;;  %v2888_v55 = vpop.f32.mrb[183].mxu0 }
 0x8c2   : > { %v2978_v34 = vmul.f32 %v2888_v55, %v12480_v1  ;;  %v12485_v55 = vld [vmem:[#allocation65_spill] sm:$0xff] }
 0x8c3   : > { %v7575_v35 = vpack.c.bf16 %v2977_v13, %v2975_v60 }
 0x8c4   : > { %v7573_v56 = vpack.c.bf16 %v2978_v34, %v2976_v39  ;;  %v2892_v38 = vpop.f32.mrb[184].mxu0  ;;  %v12486_v39 = vld [vmem:[#allocation66_spill] sm:$0xff] }
 0x8c5   : > { %v2979_v29 = vmul.f32 %v2892_v38, %v12481_v32  ;;  %v2894_v59 = vpop.f32.mrb[185].mxu0 }
 0x8c6   : > { %v2980_v16 = vmul.f32 %v2894_v59, %v12482_v51  ;;  %7574 = vmatprep.subr.bf16.mxu1 %v7573_v56  ;;  %v12487_v59 = vld [vmem:[#allocation67_spill] sm:$0xff]  ;;  %v12488_v51 = vld [vmem:[#allocation68_spill] sm:$0xff] }
 0x8c7   : > { %7576 = vmatpush1.bf16.msra.mxu1 %v7575_v35 }
 0x8c8   : > { %v2898_v50 = vpop.f32.mrb[186].mxu0 }
 0x8c9   : > { %v2981_v2 = vmul.f32 %v2898_v50, %v12483_v7  ;;  %v2900_v18 = vpop.f32.mrb[187].mxu0 }
 0x8ca   : > { %v2982_v33 = vmul.f32 %v2900_v18, %v12484_v37  ;;  %v12489_v18 = vld [vmem:[#allocation5_spill] sm:$0xff] }
 0x8cb   : > { %v7579_v46 = vpack.c.bf16 %v2981_v2, %v2979_v29 }
 0x8cc   : > { %v7577_v26 = vpack.c.bf16 %v2982_v33, %v2980_v16  ;;  %v2904_v19 = vpop.f32.mrb[188].mxu0  ;;  %v12490_v16 = vld [vmem:[#allocation7_spill] sm:$0xff] }
 0x8cd   : > { %v2983_v60 = vmul.f32 %v2904_v19, %v12485_v55  ;;  %v2906_v34 = vpop.f32.mrb[189].mxu0 }
 0x8ce   : > { %v2984_v13 = vmul.f32 %v2906_v34, %v12486_v39  ;;  %7578 = vmatprep.subr.bf16.mxu1 %v7577_v26  ;;  %v12491_v34 = vld [vmem:[#allocation9_spill] sm:$0xff]  ;;  %v12492_v39 = vld [vmem:[#allocation10_spill] sm:$0xff] }
 0x8cf   : > { %7580 = vmatpush1.bf16.msra.mxu1 %v7579_v46 }
 0x8d0   : > { %v2910_v38 = vpop.f32.mrb[190].mxu0 }
 0x8d1   : > { %v2985_v56 = vmul.f32 %v2910_v38, %v12487_v59  ;;  %v2912_v35 = vpop.f32.mrb[191].mxu0 }
 0x8d2   : > { %v2986_v32 = vmul.f32 %v2912_v35, %v12488_v51  ;;  %v12508_v35 = vld [vmem:[#allocation3_spill] sm:$0xff] }
 0x8d3   : > { %v7583_v50 = vpack.c.bf16 %v2985_v56, %v2983_v60  ;;  %v12494_v60 = vld [vmem:[#allocation70_spill] sm:$0xff] }
 0x8d4   : > { %v7581_v7 = vpack.c.bf16 %v2986_v32, %v2984_v13  ;;  %v2916_v1 = vpop.f32.mrb[192].mxu0  ;;  %v12493_v32 = vmov 1.0   ;;  %vm12495_vm11 = vnez %v12494_v60  ;;  %v12502_v13 = vld [vmem:[#allocation84_spill] sm:$0xff]  ;;  %v12506_v56 = vld [vmem:[#allocation86_spill] sm:$0xff] }
 0x8d5   : > { %v2987_v29 = vmul.f32 %v2916_v1, %v12489_v18  ;;  %v2918_v33 = vpop.f32.mrb[193].mxu0  ;;  %v12496_v1 = vld [vmem:[#allocation2_spill] sm:$0xff]  ;;  %vm12503_vm15 = vnez %v12502_v13 }
 0x8d6   : > { %v2988_v2 = vmul.f32 %v2918_v33, %v12490_v16  ;;  %7582 = vmatprep.subr.bf16.mxu1 %v7581_v7  ;;  %vm12497_vm4 = vnez %v12496_v1  ;;  %v12498_v7 = vld [vmem:[#allocation82_spill] sm:$0xff] }
 0x8d7   : > { %7584 = vmatpush1.bf16.msra.mxu1 %v7583_v50  ;;  %vm12499_vm14 = vnez %v12498_v7 }
 0x8d8   : > { %v2922_v19 = vpop.f32.mrb[194].mxu0 }
 0x8d9   : > { %v2989_v26 = vmul.f32 %v2922_v19, %v12491_v34  ;;  %v2924_v46 = vpop.f32.mrb[195].mxu0 }
 0x8da   : > { %v2990_v55 = vmul.f32 %v2924_v46, %v12492_v39 }
 0x8db   : > { %v7587_v38 = vpack.c.bf16 %v2989_v26, %v2987_v29 }
 0x8dc   : > { %v7585_v59 = vpack.c.bf16 %v2990_v55, %v2988_v2  ;;  %v12500_v55 = vld [vmem:[#allocation83_spill] sm:$0xff] }
 0x8dd   : > { %vm12501_vm0 = vnez %v12500_v55 }
 0x8de   : > { %7586 = vmatprep.subr.bf16.mxu1 %v7585_v59  ;;  %v12504_v59 = vld [vmem:[#allocation85_spill] sm:$0xff] }
 0x8df   : > { %7588 = vmatpush1.bf16.msra.mxu1 %v7587_v38  ;;  %v12511_v38 = vld [vmem:[#allocation4_spill] sm:$0xff] }
 0x8e0   : > { %7589 = vmatprep.subr.bf16.mxu1 %v12104_v11 }
 0x8e2   : > { %7033 = vmatmul.mubr.msk.f32.vlgmr.msra.gmra.mrb[148].mxu1 %vm12495_vm11, %v12493_v32 }
 0x8e3   : > { %7034 = vmatprep.mubr.msk.f32.mxu1 %vm12497_vm4, %v12493_v32  ;;  %7591 = vmatpush1.bf16.msk.msra.mxu1 %vm8796_vm13, %v12103_v9  ;;  %vm12505_vm4 = vnez %v12504_v59 }
 0x8e4   : > { %7592 = vmatprep.subr.bf16.mxu1 %v12104_v11 }
 0x8e6   : > { %7035 = vmatmul.mubr.msk.f32.gmra.mrb[150].mxu1 %vm12499_vm14, %v12493_v32 }
 0x8e7   : > { %7036 = vmatprep.mubr.msk.f32.mxu1 %vm12501_vm0, %v12493_v32  ;;  %7594 = vmatpush1.bf16.msk.msra.mxu1 %vm8831_vm8, %v12103_v9  ;;  %vm12507_vm0 = vnez %v12506_v56 }
 0x8e8   : > { %7595 = vmatprep.subr.bf16.mxu1 %v12104_v11 }
 0x8ea   : > { %7037 = vmatmul.mubr.msk.f32.gmra.mrb[152].mxu1 %vm12503_vm15, %v12493_v32 }
 0x8eb   : > { %7038 = vmatprep.mubr.msk.f32.mxu1 %vm12505_vm4, %v12493_v32  ;;  %7597 = vmatpush1.bf16.msk.msra.mxu1 %vm8855_vm3, %v12103_v9  ;;  %vm12510_vm4 = vcmask 261120  }
 0x8ec   : > { %7598 = vmatprep.subr.bf16.mxu1 %v12104_v11  ;;  %vm12513_vm14 = vmmov %vm12510_vm4 }
 0x8ee   : > { %7039 = vmatmul.mubr.msk.f32.gmra.mrb[154].mxu1 %vm12507_vm0, %v12493_v32  ;;  %vm12509_vm0 = vcmask 1044480  }
 0x8ef   : > { %7600 = vmatpush1.bf16.msk.msra.mxu1 %vm8878_vm10, %v12103_v9  ;;  %vm12512_vm15 = vmmov %vm12509_vm0 }
 0x8f0   : > { %7601 = vmatprep.subr.bf16.mxu1 %v12104_v11 }
 0x8f3   : > { %7603 = vmatpush1.bf16.msk.msra.mxu1 %vm12188_vm1, %v12103_v9 }
 0x8f4   : > { %7604 = vmatprep.subr.bf16.mxu1 %v12104_v11 }
 0x8f7   : > { %7606 = vmatpush1.bf16.msk.msra.mxu1 %vm12189_vm5, %v12103_v9 }
 0x8f8   : > { %7607 = vmatprep.subr.bf16.mxu1 %v12104_v11 }
 0x8fb   : > { %7609 = vmatpush1.bf16.msk.msra.mxu1 %vm8970_vm12, %v12103_v9 }
 0x8fc   : > { %7610 = vmatprep.subr.bf16.mxu1 %v12104_v11 }
 0x8ff   : > { %7612 = vmatpush1.bf16.msk.msra.mxu1 %vm12412_vm9, %v12103_v9 }
 0x900   : > { %7613 = vmatprep.subr.bf16.mxu1 %v12104_v11 }
 0x903   : > { %7615 = vmatpush1.bf16.msk.msra.mxu1 %vm12414_vm2, %v12103_v9 }
 0x904   : > { %7616 = vmatprep.subr.bf16.mxu1 %v12104_v11 }
 0x907   : > { %7618 = vmatpush1.bf16.msk.msra.mxu1 %vm12416_vm6, %v12103_v9 }
 0x908   : > { %7064 = vmatprep.subr.msk.mxu1 %vm12509_vm0, %v12508_v35  ;;  %vm12514_vm0 = vmmov %vm12510_vm4 }
 0x9b5   : > { %v3057_v50 = vpop.f32.mrb[148].mxu1 }
 0x9b6   : > { %v3059_v29 = vpop.f32.mrb[149].mxu1  ;;  %v3080_v2 = vmul.f32 %v3057_v50, %v3057_v50 }
 0x9b7   : > { %v3081_v33 = vmul.f32 %v3059_v29, %v3059_v29 }
 0x9b9   : > { %v3063_v19 = vpop.f32.mrb[150].mxu1  ;;  %7060 = vmatprep.mubr.msk.f32.mxu1 %vm12510_vm4, %v3081_v33  ;;  %vm12515_vm4 = vmmov %vm12514_vm0 }
 0x9ba   : > { %v3065_v26 = vpop.f32.mrb[151].mxu1  ;;  %3165 = vmatmul.mubr.f32.vlgmr.msra.gmra.mrb[156].mxu1 %v3080_v2  ;;  %v3082_v56 = vmul.f32 %v3063_v19, %v3063_v19 }
 0x9bb   : > { %v3083_v46 = vmul.f32 %v3065_v26, %v3065_v26  ;;  %7065 = vmatpush1.msk.msra.mxu1 %vm12512_vm15, %v12511_v38 }
 0x9bd   : > { %v3069_v59 = vpop.f32.mrb[152].mxu1  ;;  %7061 = vmatprep.mubr.msk.f32.mxu1 %vm12513_vm14, %v3083_v46  ;;  %vm12516_vm14 = vcmask 39936  }
 0x9be   : > { %v3071_v13 = vpop.f32.mrb[153].mxu1  ;;  %3170 = vmatmul.mubr.f32.gmra.mrb[158].mxu1 %v3082_v56  ;;  %v3084_v7 = vmul.f32 %v3069_v59, %v3069_v59  ;;  %vm12517_vm15 = vmmov %vm12516_vm14 }
 0x9bf   : > { %v3085_v55 = vmul.f32 %v3071_v13, %v3071_v13 }
 0x9c1   : > { %v3075_v1 = vpop.f32.mrb[154].mxu1  ;;  %7062 = vmatprep.mubr.msk.f32.mxu1 %vm12514_vm0, %v3085_v55  ;;  %vm12518_vm0 = vmmov %vm12516_vm14 }
 0x9c2   : > { %v3077_v60 = vpop.f32.mrb[155].mxu1  ;;  %3175 = vmatmul.mubr.f32.gmra.mrb[160].mxu1 %v3084_v7  ;;  %v3086_v0 = vmul.f32 %v3075_v1, %v3075_v1 }
 0x9c3   : > { %v3087_v33 = vmul.f32 %v3077_v60, %v3077_v60 }
 0x9c5   : > { %7063 = vmatprep.mubr.msk.f32.mxu1 %vm12515_vm4, %v3087_v33  ;;  %vm12519_vm4 = vmmov %vm12518_vm0 }
 0x9c6   : > { %3180 = vmatmul.mubr.f32.gmra.mrb[162].mxu1 %v3086_v0 }
 0x9c7   : > { %3265 = vmatprep.mubr.f32.mxu1 %v12179_v45 }
 0xa8d   : > { %v3166_v2 = vpop.f32.mrb[156].mxu1 }
 0xa8e   : > { %v3167_v12 = vadd.f32 1e-07, %v3166_v2  ;;  %v3168_v25 = vpop.f32.mrb[157].mxu1 }
 0xa90   : > { %8037 = vrsqrt.f32 %v3167_v12 }
 0xa91   : > { %v3171_v46 = vpop.f32.mrb[158].mxu1 }
 0xa92   : > { %v3172_v56 = vadd.f32 1e-07, %v3171_v46  ;;  %v3173_v63 = vpop.f32.mrb[159].mxu1 }
 0xa94   : > { %8039 = vrsqrt.f32 %v3172_v56 }
 0xa95   : > { %v3176_v5 = vpop.f32.mrb[160].mxu1 }
 0xa96   : > { %v3177_v14 = vadd.f32 1e-07, %v3176_v5  ;;  %v3178_v55 = vpop.f32.mrb[161].mxu1 }
 0xa98   : > { %8041 = vrsqrt.f32 %v3177_v14 }
 0xa99   : > { %v3181_v7 = vpop.f32.mrb[162].mxu1 }
 0xa9a   : > { %v8038_v62 = vpop.eup %8037  ;;  %v3182_v8 = vadd.f32 1e-07, %v3181_v7  ;;  %v3183_v61 = vpop.f32.mrb[163].mxu1 }
 0xa9b   : > { %7066 = vmatmul.mubr.msk.f32.vlgmr.msra.gmra.mrb[164].mxu1 %vm12516_vm14, %v8038_v62  ;;  %vm12520_vm14 = vcmask 1044480  }
 0xa9c   : > { %8043 = vrsqrt.f32 %v3182_v8  ;;  %3271 = vmatprep.mubr.f32.mxu1 %v12179_v45 }
 0xa9e   : > { %v8040_v0 = vpop.eup %8039 }
 0xa9f   : > { %7067 = vmatmul.mubr.msk.f32.gmra.mrb[166].mxu1 %vm12517_vm15, %v8040_v0  ;;  %vm12522_vm15 = vcmask 261120  }
 0xaa0   : > { %3277 = vmatprep.mubr.f32.mxu1 %v12179_v45 }
 0xaa2   : > { %v8042_v63 = vpop.eup %8041 }
 0xaa3   : > { %7068 = vmatmul.mubr.msk.f32.gmra.mrb[168].mxu1 %vm12518_vm0, %v8042_v63  ;;  %vm12523_vm0 = vmmov %vm12520_vm14 }
 0xaa4   : > { %3283 = vmatprep.mubr.f32.mxu1 %v12179_v45 }
 0xaa6   : > { %v8044_v14 = vpop.eup %8043 }
 0xaa7   : > { %7069 = vmatmul.mubr.msk.f32.gmra.mrb[170].mxu1 %vm12519_vm4, %v8044_v14  ;;  %vm12525_vm4 = vmmov %vm12522_vm15 }
 0xaa8   : > { %3362 = vmatprep.mubr.f32.mxu1 %v12179_v45  ;;  %vm12527_vm11 = vmmov %vm12525_vm4 }
 0xb6e   : > { %v3267_v25 = vpop.f32.mrb[164].mxu1 }
 0xb6f   : > { %v3290_v61 = vmul.f32 %v3267_v25, %v3057_v50  ;;  %v3269_v8 = vpop.f32.mrb[165].mxu1  ;;  %v12543_v25 = vld [vmem:[#allocation98_spill] sm:$0xff] }
 0xb70   : > { %v3291_v62 = vmul.f32 %v3269_v8, %v3059_v29  ;;  %v12521_v29 = vld [vmem:[#allocation87_spill] sm:$0xff]  ;;  %v12547_v8 = vld [vmem:[#allocation100_spill] sm:$0xff] }
 0xb72   : > { %v3273_v5 = vpop.f32.mrb[166].mxu1 }
 0xb73   : > { %v3292_v12 = vmul.f32 %v3273_v5, %v3063_v19  ;;  %v3275_v33 = vpop.f32.mrb[167].mxu1  ;;  %v12540_v19 = vld [vmem:[#allocation96_spill] sm:$0xff]  ;;  %v12551_v5 = vld [vmem:[#allocation102_spill] sm:$0xff] }
 0xb74   : > { %v3293_v2 = vmul.f32 %v3275_v33, %v3065_v26  ;;  %v12542_v26 = vld [vmem:[#allocation97_spill] sm:$0xff]  ;;  %v12554_v33 = vld [vmem:[#allocation104_spill] sm:$0xff] }
 0xb75   : > { %v7621_v46 = vpack.c.bf16 %v3292_v12, %v3290_v61  ;;  %v12545_v61 = vld [vmem:[#allocation99_spill] sm:$0xff] }
 0xb76   : > { %v7619_v56 = vpack.c.bf16 %v3293_v2, %v3291_v62  ;;  %v3279_v55 = vpop.f32.mrb[168].mxu1  ;;  %v12549_v62 = vld [vmem:[#allocation101_spill] sm:$0xff]  ;;  %v12552_v12 = vld [vmem:[#allocation103_spill] sm:$0xff] }
 0xb77   : > { %v3294_v7 = vmul.f32 %v3279_v55, %v3069_v59  ;;  %v3281_v0 = vpop.f32.mrb[169].mxu1  ;;  %v12538_v59 = vld [vmem:[#allocation95_spill] sm:$0xff] }
 0xb78   : > { %v3295_v63 = vmul.f32 %v3281_v0, %v3071_v13  ;;  %7620 = vmatprep.subr.bf16.mxu1 %v7619_v56  ;;  %v12536_v13 = vld [vmem:[#allocation94_spill] sm:$0xff]  ;;  %v12556_v2 = vld [vmem:[#allocation79_spill] sm:$0xff]  ;;  %v12565_v0 = vld [vmem:[#allocation109_spill] sm:$0xff] }
 0xb79   : > { %7622 = vmatpush1.bf16.msra.mxu1 %v7621_v46  ;;  %v12558_v46 = vld [vmem:[#allocation105_spill] sm:$0xff]  ;;  %v12560_v56 = vld [vmem:[#allocation106_spill] sm:$0xff]  ;;  %v12561_v55 = vld [vmem:[#allocation107_spill] sm:$0xff] }
 0xb7a   : > { %v3285_v57 = vpop.f32.mrb[170].mxu1 }
 0xb7b   : > { %v3296_v14 = vmul.f32 %v3285_v57, %v3075_v1  ;;  %v3287_v9 = vpop.f32.mrb[171].mxu1  ;;  %v12524_v57 = vld [vmem:[#allocation88_spill] sm:$0xff]  ;;  %v12534_v1 = vld [vmem:[#allocation93_spill] sm:$0xff] }
 0xb7c   : > { %v3297_v32 = vmul.f32 %v3287_v9, %v3077_v60  ;;  %v12526_v9 = vld [vmem:[#allocation89_spill] sm:$0xff]  ;;  %v12532_v60 = vld [vmem:[#allocation92_spill] sm:$0xff] }
 0xb7d   : > { %v7625_v39 = vpack.c.bf16 %v3296_v14, %v3294_v7  ;;  %v12563_v7 = vld [vmem:[#allocation108_spill] sm:$0xff]  ;;  %v12569_v14 = vld [vmem:[#allocation111_spill] sm:$0xff] }
 0xb7e   : > { %v7623_v50 = vpack.c.bf16 %v3297_v32, %v3295_v63  ;;  %v12530_v32 = vld [vmem:[#allocation91_spill] sm:$0xff]  ;;  %v12567_v63 = vld [vmem:[#allocation110_spill] sm:$0xff] }
 0xb80   : > { %7624 = vmatprep.subr.bf16.mxu1 %v7623_v50  ;;  %v12570_v50 = vld [vmem:[#allocation112_spill] sm:$0xff] }
 0xb81   : > { %7626 = vmatpush1.bf16.msra.mxu1 %v7625_v39  ;;  %v12528_v39 = vld [vmem:[#allocation90_spill] sm:$0xff] }
 0xb82   : > { %7154 = vmatprep.subr.msk.mxu1 %vm12520_vm14, %v12508_v35  ;;  %vm12529_vm14 = vmmov %vm12525_vm4 }
 0xb84   : > { %7070 = vmatmul.mubr.msk.f32.vlgmr.msra.gmra.mrb[172].mxu1 %vm12522_vm15, %v12521_v29  ;;  %vm12531_vm15 = vmmov %vm12525_vm4 }
 0xb85   : > { %3368 = vmatprep.mubr.f32.mxu1 %v12179_v45  ;;  %7155 = vmatpush1.msk.msra.mxu1 %vm12523_vm0, %v12511_v38  ;;  %vm12533_vm0 = vmmov %vm12525_vm4 }
 0xb86   : > { %7759 = vmatprep.subr.bf16.mxu1 %v12104_v11 }
 0xb88   : > { %7071 = vmatmul.mubr.msk.f32.gmra.mrb[174].mxu1 %vm12525_vm4, %v12524_v57  ;;  %vm12535_vm4 = vmmov %vm12533_vm0 }
 0xb89   : > { %3374 = vmatprep.mubr.f32.mxu1 %v12179_v45 }
 0xb8c   : > { %7072 = vmatmul.mubr.msk.f32.gmra.mrb[176].mxu1 %vm12527_vm11, %v12526_v9  ;;  %vm12537_vm11 = vmmov %vm12533_vm0 }
 0xb8d   : > { %3380 = vmatprep.mubr.f32.mxu1 %v12179_v45 }
 0xb90   : > { %7073 = vmatmul.mubr.msk.f32.gmra.mrb[178].mxu1 %vm12529_vm14, %v12528_v39  ;;  %vm12539_vm14 = vmmov %vm12533_vm0 }
 0xb91   : > { %3386 = vmatprep.mubr.f32.mxu1 %v12179_v45 }
 0xb94   : > { %7074 = vmatmul.mubr.msk.f32.gmra.mrb[180].mxu1 %vm12531_vm15, %v12530_v32  ;;  %vm12541_vm15 = vmmov %vm12533_vm0 }
 0xb95   : > { %3392 = vmatprep.mubr.f32.mxu1 %v12179_v45 }
 0xb98   : > { %7075 = vmatmul.mubr.msk.f32.gmra.mrb[182].mxu1 %vm12533_vm0, %v12532_v60 }
 0xb99   : > { %3398 = vmatprep.mubr.f32.mxu1 %v12179_v45 }
 0xb9c   : > { %7076 = vmatmul.mubr.msk.f32.gmra.mrb[184].mxu1 %vm12535_vm4, %v12534_v1  ;;  %vm12544_vm4 = vmmov %vm12533_vm0 }
 0xb9d   : > { %3404 = vmatprep.mubr.f32.mxu1 %v12179_v45 }
 0xba0   : > { %7077 = vmatmul.mubr.msk.f32.gmra.mrb[186].mxu1 %vm12537_vm11, %v12536_v13  ;;  %vm12546_vm11 = vmmov %vm12533_vm0 }
 0xba1   : > { %3410 = vmatprep.mubr.f32.mxu1 %v12179_v45 }
 0xba4   : > { %7078 = vmatmul.mubr.msk.f32.gmra.mrb[188].mxu1 %vm12539_vm14, %v12538_v59  ;;  %vm12548_vm14 = vmmov %vm12533_vm0 }
 0xba5   : > { %3416 = vmatprep.mubr.f32.mxu1 %v12179_v45 }
 0xba8   : > { %7079 = vmatmul.mubr.msk.f32.gmra.mrb[190].mxu1 %vm12541_vm15, %v12540_v19  ;;  %vm12550_vm15 = vmmov %vm12533_vm0 }
 0xba9   : > { %3422 = vmatprep.mubr.f32.mxu1 %v12179_v45 }
 0xbac   : > { %7080 = vmatmul.mubr.msk.f32.gmra.mrb[192].mxu1 %vm12533_vm0, %v12542_v26 }
 0xbad   : > { %3428 = vmatprep.mubr.f32.mxu1 %v12179_v45 }
 0xbb0   : > { %7081 = vmatmul.mubr.msk.f32.gmra.mrb[194].mxu1 %vm12544_vm4, %v12543_v25  ;;  %vm12553_vm4 = vmmov %vm12533_vm0 }
 0xbb1   : > { %3434 = vmatprep.mubr.f32.mxu1 %v12179_v45 }
 0xbb4   : > { %7082 = vmatmul.mubr.msk.f32.gmra.mrb[196].mxu1 %vm12546_vm11, %v12545_v61  ;;  %vm12555_vm11 = vmmov %vm12533_vm0 }
 0xbb5   : > { %3440 = vmatprep.mubr.f32.mxu1 %v12179_v45 }
 0xbb8   : > { %7083 = vmatmul.mubr.msk.f32.gmra.mrb[198].mxu1 %vm12548_vm14, %v12547_v8  ;;  %vm12557_vm14 = vmmov %vm12533_vm0 }
 0xbb9   : > { %3446 = vmatprep.mubr.f32.mxu1 %v12179_v45 }
 0xbbc   : > { %7084 = vmatmul.mubr.msk.f32.gmra.mrb[200].mxu1 %vm12550_vm15, %v12549_v62  ;;  %vm12559_vm15 = vmmov %vm12533_vm0 }
 0xbbd   : > { %3452 = vmatprep.mubr.f32.mxu1 %v12179_v45 }
 0xbc0   : > { %7085 = vmatmul.mubr.msk.f32.gmra.mrb[202].mxu1 %vm12533_vm0, %v12551_v5 }
 0xbc1   : > { %3458 = vmatprep.mubr.f32.mxu1 %v12179_v45 }
 0xbc4   : > { %7086 = vmatmul.mubr.msk.f32.gmra.mrb[204].mxu1 %vm12553_vm4, %v12552_v12  ;;  %vm12562_vm4 = vmmov %vm12533_vm0 }
 0xbc5   : > { %3464 = vmatprep.mubr.f32.mxu1 %v12179_v45 }
 0xbc8   : > { %7087 = vmatmul.mubr.msk.f32.gmra.mrb[206].mxu1 %vm12555_vm11, %v12554_v33  ;;  %vm12564_vm11 = vmmov %vm12533_vm0 }
 0xbc9   : > { %3470 = vmatprep.mubr.f32.mxu1 %v12179_v45 }
 0xbcc   : > { %7088 = vmatmul.mubr.msk.f32.gmra.mrb[208].mxu1 %vm12557_vm14, %v12556_v2  ;;  %vm12566_vm14 = vmmov %vm12533_vm0 }
 0xbcd   : > { %3476 = vmatprep.mubr.f32.mxu1 %v12179_v45 }
 0xbd0   : > { %7089 = vmatmul.mubr.msk.f32.gmra.mrb[210].mxu1 %vm12559_vm15, %v12558_v46  ;;  %vm12568_vm15 = vmmov %vm12533_vm0 }
 0xbd1   : > { %3482 = vmatprep.mubr.f32.mxu1 %v12179_v45 }
 0xbd4   : > { %7090 = vmatmul.mubr.msk.f32.gmra.mrb[212].mxu1 %vm12533_vm0, %v12560_v56 }
 0xbd5   : > { %3488 = vmatprep.mubr.f32.mxu1 %v12179_v45 }
 0xbd8   : > { %7091 = vmatmul.mubr.msk.f32.gmra.mrb[214].mxu1 %vm12562_vm4, %v12561_v55  ;;  %vm12571_vm4 = vmmov %vm12533_vm0 }
 0xbd9   : > { %3494 = vmatprep.mubr.f32.mxu1 %v12179_v45 }
 0xbdc   : > { %7092 = vmatmul.mubr.msk.f32.gmra.mrb[216].mxu1 %vm12564_vm11, %v12563_v7  ;;  %v12572_v7 = vld [vmem:[#allocation113_spill] sm:$0xff]  ;;  %vm12573_vm11 = vmmov %vm12533_vm0 }
 0xbdd   : > { %3500 = vmatprep.mubr.f32.mxu1 %v12179_v45 }
 0xbe0   : > { %7093 = vmatmul.mubr.msk.f32.gmra.mrb[218].mxu1 %vm12566_vm14, %v12565_v0  ;;  %v12574_v0 = vld [vmem:[#allocation114_spill] sm:$0xff]  ;;  %vm12575_vm14 = vmmov %vm12533_vm0 }
 0xbe1   : > { %3506 = vmatprep.mubr.f32.mxu1 %v12179_v45 }
 0xbe4   : > { %7094 = vmatmul.mubr.msk.f32.gmra.mrb[220].mxu1 %vm12568_vm15, %v12567_v63  ;;  %v12576_v63 = vld [vmem:[#allocation115_spill] sm:$0xff]  ;;  %vm12577_vm15 = vmmov %vm12533_vm0 }
 0xbe5   : > { %3512 = vmatprep.mubr.f32.mxu1 %v12179_v45 }
 0xbe8   : > { %7095 = vmatmul.mubr.msk.f32.gmra.mrb[222].mxu1 %vm12533_vm0, %v12569_v14  ;;  %v12578_v14 = vld [vmem:[#allocation116_spill] sm:$0xff] }
 0xbe9   : > { %3518 = vmatprep.mubr.f32.mxu1 %v12179_v45 }
 0xbec   : > { %7096 = vmatmul.mubr.msk.f32.gmra.mrb[224].mxu1 %vm12571_vm4, %v12570_v50  ;;  %v12579_v50 = vld [vmem:[#allocation117_spill] sm:$0xff]  ;;  %vm12580_vm4 = vmmov %vm12533_vm0 }
 0xbed   : > { %3524 = vmatprep.mubr.f32.mxu1 %v12179_v45 }
 0xbf0   : > { %7097 = vmatmul.mubr.msk.f32.gmra.mrb[226].mxu1 %vm12573_vm11, %v12572_v7  ;;  %vm12581_vm11 = vmmov %vm12533_vm0 }
 0xbf1   : > { %3530 = vmatprep.mubr.f32.mxu1 %v12179_v45 }
 0xbf4   : > { %7098 = vmatmul.mubr.msk.f32.gmra.mrb[228].mxu1 %vm12575_vm14, %v12574_v0  ;;  %vm12582_vm14 = vmmov %vm12533_vm0 }
 0xbf5   : > { %3536 = vmatprep.mubr.f32.mxu1 %v12179_v45 }
 0xbf8   : > { %7099 = vmatmul.mubr.msk.f32.gmra.mrb[230].mxu1 %vm12577_vm15, %v12576_v63  ;;  %vm12583_vm15 = vmmov %vm12533_vm0 }
 0xbf9   : > { %3542 = vmatprep.mubr.f32.mxu1 %v12179_v45 }
 0xbfc   : > { %7100 = vmatmul.mubr.msk.f32.gmra.mrb[232].mxu1 %vm12533_vm0, %v12578_v14 }
 0xbfd   : > { %3548 = vmatprep.mubr.f32.mxu1 %v12179_v45 }
 0xc00   : > { %7101 = vmatmul.mubr.msk.f32.gmra.mrb[234].mxu1 %vm12580_vm4, %v12579_v50  ;;  %vm12584_vm4 = vmmov %vm12533_vm0 }
 0xc01   : > { %4452 = vmatprep.mubr.f32.mxu1 %v12179_v45 }
 0xc57   : > { %v3364_v7 = vpop.f32.mrb[172].mxu1 }
 0xc58   : > { %v3555_v0 = vmul.f32 %v3364_v7, %v12258_v28  ;;  %v3366_v55 = vpop.f32.mrb[173].mxu1 }
 0xc59   : > { %v3556_v56 = vmul.f32 %v3366_v55, %v12259_v47 }
 0xc5b   : > { %v3370_v46 = vpop.f32.mrb[174].mxu1  ;;  %7122 = vmatprep.mubr.msk.f32.mxu0 %vm12581_vm11, %v3556_v56  ;;  %vm12585_vm11 = vmmov %vm12533_vm0 }
 0xc5c   : > { %v3557_v63 = vmul.f32 %v3370_v46, %v12261_v42  ;;  %v3372_v2 = vpop.f32.mrb[175].mxu1  ;;  %3780 = vmatmul.mubr.f32.vlgmr.msra.gmra.mrb[196].mxu0 %v3555_v0 }
 0xc5d   : > { %v3558_v14 = vmul.f32 %v3372_v2, %v12262_v44 }
 0xc5f   : > { %v3376_v33 = vpop.f32.mrb[176].mxu1  ;;  %7123 = vmatprep.mubr.msk.f32.mxu0 %vm12582_vm14, %v3558_v14  ;;  %vm12586_vm14 = vmmov %vm12533_vm0 }
 0xc60   : > { %v3559_v50 = vmul.f32 %v3376_v33, %v12264_v20  ;;  %v3378_v12 = vpop.f32.mrb[177].mxu1  ;;  %3785 = vmatmul.mubr.f32.gmra.mrb[198].mxu0 %v3557_v63 }
 0xc61   : > { %v3560_v7 = vmul.f32 %v3378_v12, %v12434_v4 }
 0xc63   : > { %v3382_v5 = vpop.f32.mrb[178].mxu1  ;;  %7124 = vmatprep.mubr.msk.f32.mxu0 %vm12583_vm15, %v3560_v7  ;;  %vm12587_vm15 = vmmov %vm12533_vm0 }
 0xc64   : > { %v3561_v56 = vmul.f32 %v3382_v5, %v12435_v53  ;;  %v3384_v55 = vpop.f32.mrb[179].mxu1  ;;  %3790 = vmatmul.mubr.f32.gmra.mrb[200].mxu0 %v3559_v50 }
 0xc65   : > { %v3562_v46 = vmul.f32 %v3384_v55, %v12436_v3 }
 0xc67   : > { %v3388_v0 = vpop.f32.mrb[180].mxu1  ;;  %7125 = vmatprep.mubr.msk.f32.mxu0 %vm12533_vm0, %v3562_v46 }
 0xc68   : > { %v3563_v2 = vmul.f32 %v3388_v0, %v12437_v23  ;;  %v3390_v14 = vpop.f32.mrb[181].mxu1  ;;  %3795 = vmatmul.mubr.f32.gmra.mrb[202].mxu0 %v3561_v56 }
 0xc69   : > { %v3564_v33 = vmul.f32 %v3390_v14, %v12438_v10 }
 0xc6b   : > { %v3394_v63 = vpop.f32.mrb[182].mxu1  ;;  %7126 = vmatprep.mubr.msk.f32.mxu0 %vm12584_vm4, %v3564_v33  ;;  %vm12588_vm4 = vmmov %vm12533_vm0 }
 0xc6c   : > { %v3565_v12 = vmul.f32 %v3394_v63, %v12439_v31  ;;  %v3396_v7 = vpop.f32.mrb[183].mxu1  ;;  %3800 = vmatmul.mubr.f32.gmra.mrb[204].mxu0 %v3563_v2 }
 0xc6d   : > { %v3566_v5 = vmul.f32 %v3396_v7, %v12440_v22 }
 0xc6f   : > { %v3400_v50 = vpop.f32.mrb[184].mxu1  ;;  %7127 = vmatprep.mubr.msk.f32.mxu0 %vm12585_vm11, %v3566_v5  ;;  %vm12589_vm11 = vmmov %vm12533_vm0 }
 0xc70   : > { %v3567_v55 = vmul.f32 %v3400_v50, %v12441_v41  ;;  %v3402_v46 = vpop.f32.mrb[185].mxu1  ;;  %3805 = vmatmul.mubr.f32.gmra.mrb[206].mxu0 %v3565_v12 }
 0xc71   : > { %v3568_v56 = vmul.f32 %v3402_v46, %v12442_v30 }
 0xc73   : > { %v3406_v0 = vpop.f32.mrb[186].mxu1  ;;  %7128 = vmatprep.mubr.msk.f32.mxu0 %vm12586_vm14, %v3568_v56  ;;  %vm12590_vm14 = vmmov %vm12533_vm0 }
 0xc74   : > { %v3569_v14 = vmul.f32 %v3406_v0, %v12443_v27  ;;  %v3408_v33 = vpop.f32.mrb[187].mxu1  ;;  %3810 = vmatmul.mubr.f32.gmra.mrb[208].mxu0 %v3567_v55 }
 0xc75   : > { %v3570_v2 = vmul.f32 %v3408_v33, %v12444_v15 }
 0xc77   : > { %v3412_v63 = vpop.f32.mrb[188].mxu1  ;;  %7129 = vmatprep.mubr.msk.f32.mxu0 %vm12587_vm15, %v3570_v2  ;;  %vm12591_vm15 = vmmov %vm12533_vm0 }
 0xc78   : > { %v3571_v7 = vmul.f32 %v3412_v63, %v12445_v17  ;;  %v3414_v5 = vpop.f32.mrb[189].mxu1  ;;  %3815 = vmatmul.mubr.f32.gmra.mrb[210].mxu0 %v3569_v14 }
 0xc79   : > { %v3572_v12 = vmul.f32 %v3414_v5, %v12446_v36 }
 0xc7b   : > { %v3418_v50 = vpop.f32.mrb[190].mxu1  ;;  %7130 = vmatprep.mubr.msk.f32.mxu0 %vm12533_vm0, %v3572_v12 }
 0xc7c   : > { %v3573_v46 = vmul.f32 %v3418_v50, %v12447_v58  ;;  %v3420_v56 = vpop.f32.mrb[191].mxu1  ;;  %3820 = vmatmul.mubr.f32.gmra.mrb[212].mxu0 %v3571_v7 }
 0xc7d   : > { %v3574_v55 = vmul.f32 %v3420_v56, %v12448_v6 }
 0xc7f   : > { %v3424_v0 = vpop.f32.mrb[192].mxu1  ;;  %7131 = vmatprep.mubr.msk.f32.mxu0 %vm12588_vm4, %v3574_v55  ;;  %vm12594_vm4 = vmmov %vm12533_vm0 }
 0xc80   : > { %v3575_v33 = vmul.f32 %v3424_v0, %v12449_v21  ;;  %v3426_v2 = vpop.f32.mrb[193].mxu1  ;;  %3825 = vmatmul.mubr.f32.gmra.mrb[214].mxu0 %v3573_v46 }
 0xc81   : > { %v3576_v14 = vmul.f32 %v3426_v2, %v12450_v40 }
 0xc83   : > { %v3430_v63 = vpop.f32.mrb[194].mxu1  ;;  %7132 = vmatprep.mubr.msk.f32.mxu0 %vm12589_vm11, %v3576_v14  ;;  %vm12597_vm11 = vmmov %vm12533_vm0 }
 0xc84   : > { %v3577_v5 = vmul.f32 %v3430_v63, %v12451_v54  ;;  %v3432_v12 = vpop.f32.mrb[195].mxu1  ;;  %3830 = vmatmul.mubr.f32.gmra.mrb[216].mxu0 %v3575_v33 }
 0xc85   : > { %v3578_v7 = vmul.f32 %v3432_v12, %v12452_v24  ;;  %v12592_v12 = vld [vmem:[#allocation37_spill] sm:$0xff] }
 0xc87   : > { %v3436_v50 = vpop.f32.mrb[196].mxu1  ;;  %7133 = vmatprep.mubr.msk.f32.mxu0 %vm12590_vm14, %v3578_v7  ;;  %vm12600_vm14 = vmmov %vm12533_vm0 }
 0xc88   : > { %v3579_v56 = vmul.f32 %v3436_v50, %v12453_v43  ;;  %v3438_v55 = vpop.f32.mrb[197].mxu1  ;;  %3835 = vmatmul.mubr.f32.gmra.mrb[218].mxu0 %v3577_v5  ;;  %v12593_v50 = vld [vmem:[#allocation38_spill] sm:$0xff] }
 0xc89   : > { %v3580_v46 = vmul.f32 %v3438_v55, %v12454_v48  ;;  %v12595_v55 = vld [vmem:[#allocation39_spill] sm:$0xff] }
 0xc8b   : > { %v3442_v0 = vpop.f32.mrb[198].mxu1  ;;  %7134 = vmatprep.mubr.msk.f32.mxu0 %vm12591_vm15, %v3580_v46  ;;  %vm12603_vm15 = vmmov %vm12533_vm0 }
 0xc8c   : > { %v3581_v2 = vmul.f32 %v3442_v0, %v12455_v49  ;;  %v3444_v14 = vpop.f32.mrb[199].mxu1  ;;  %3840 = vmatmul.mubr.f32.gmra.mrb[220].mxu0 %v3579_v56  ;;  %v12596_v0 = vld [vmem:[#allocation40_spill] sm:$0xff] }
 0xc8d   : > { %v3582_v33 = vmul.f32 %v3444_v14, %v12456_v52  ;;  %v12598_v14 = vld [vmem:[#allocation41_spill] sm:$0xff] }
 0xc8f   : > { %v3448_v63 = vpop.f32.mrb[200].mxu1  ;;  %7135 = vmatprep.mubr.msk.f32.mxu0 %vm12533_vm0, %v3582_v33 }
 0xc90   : > { %v3583_v7 = vmul.f32 %v3448_v63, %v12592_v12  ;;  %v3450_v62 = vpop.f32.mrb[201].mxu1  ;;  %3845 = vmatmul.mubr.f32.gmra.mrb[222].mxu0 %v3581_v2  ;;  %v12599_v63 = vld [vmem:[#allocation42_spill] sm:$0xff] }
 0xc91   : > { %v3584_v5 = vmul.f32 %v3450_v62, %v12593_v50  ;;  %v12601_v62 = vld [vmem:[#allocation43_spill] sm:$0xff] }
 0xc93   : > { %v3454_v8 = vpop.f32.mrb[202].mxu1  ;;  %7136 = vmatprep.mubr.msk.f32.mxu0 %vm12594_vm4, %v3584_v5  ;;  %vm12608_vm4 = vmmov %vm12533_vm0 }
 0xc94   : > { %v3585_v46 = vmul.f32 %v3454_v8, %v12595_v55  ;;  %v3456_v61 = vpop.f32.mrb[203].mxu1  ;;  %3850 = vmatmul.mubr.f32.gmra.mrb[224].mxu0 %v3583_v7  ;;  %v12602_v8 = vld [vmem:[#allocation44_spill] sm:$0xff] }
 0xc95   : > { %v3586_v56 = vmul.f32 %v3456_v61, %v12596_v0  ;;  %v12604_v61 = vld [vmem:[#allocation45_spill] sm:$0xff] }
 0xc97   : > { %v3460_v25 = vpop.f32.mrb[204].mxu1  ;;  %7137 = vmatprep.mubr.msk.f32.mxu0 %vm12597_vm11, %v3586_v56  ;;  %vm12611_vm11 = vmmov %vm12533_vm0 }
 0xc98   : > { %v3587_v33 = vmul.f32 %v3460_v25, %v12598_v14  ;;  %v3462_v26 = vpop.f32.mrb[205].mxu1  ;;  %3855 = vmatmul.mubr.f32.gmra.mrb[226].mxu0 %v3585_v46  ;;  %v12605_v25 = vld [vmem:[#allocation46_spill] sm:$0xff] }
 0xc99   : > { %v3588_v2 = vmul.f32 %v3462_v26, %v12599_v63  ;;  %v12606_v26 = vld [vmem:[#allocation47_spill] sm:$0xff] }
 0xc9b   : > { %v3466_v19 = vpop.f32.mrb[206].mxu1  ;;  %7138 = vmatprep.mubr.msk.f32.mxu0 %vm12600_vm14, %v3588_v2  ;;  %vm12614_vm14 = vmmov %vm12533_vm0 }
 0xc9c   : > { %v3589_v5 = vmul.f32 %v3466_v19, %v12601_v62  ;;  %v3468_v59 = vpop.f32.mrb[207].mxu1  ;;  %3860 = vmatmul.mubr.f32.gmra.mrb[228].mxu0 %v3587_v33  ;;  %v12607_v19 = vld [vmem:[#allocation48_spill] sm:$0xff] }
 0xc9d   : > { %v3590_v7 = vmul.f32 %v3468_v59, %v12602_v8  ;;  %v12609_v59 = vld [vmem:[#allocation49_spill] sm:$0xff] }
 0xc9f   : > { %v3472_v13 = vpop.f32.mrb[208].mxu1  ;;  %7139 = vmatprep.mubr.msk.f32.mxu0 %vm12603_vm15, %v3590_v7  ;;  %vm12617_vm15 = vmmov %vm12533_vm0 }
 0xca0   : > { %v3591_v56 = vmul.f32 %v3472_v13, %v12604_v61  ;;  %v3474_v1 = vpop.f32.mrb[209].mxu1  ;;  %3865 = vmatmul.mubr.f32.gmra.mrb[230].mxu0 %v3589_v5  ;;  %v12610_v13 = vld [vmem:[#allocation50_spill] sm:$0xff] }
 0xca1   : > { %v3592_v46 = vmul.f32 %v3474_v1, %v12605_v25  ;;  %v12612_v1 = vld [vmem:[#allocation51_spill] sm:$0xff] }
 0xca3   : > { %v3478_v60 = vpop.f32.mrb[210].mxu1  ;;  %7140 = vmatprep.mubr.msk.f32.mxu0 %vm12533_vm0, %v3592_v46 }
 0xca4   : > { %v3593_v2 = vmul.f32 %v3478_v60, %v12606_v26  ;;  %v3480_v32 = vpop.f32.mrb[211].mxu1  ;;  %3870 = vmatmul.mubr.f32.gmra.mrb[232].mxu0 %v3591_v56  ;;  %v12613_v60 = vld [vmem:[#allocation52_spill] sm:$0xff] }
 0xca5   : > { %v3594_v33 = vmul.f32 %v3480_v32, %v12607_v19  ;;  %v12615_v32 = vld [vmem:[#allocation53_spill] sm:$0xff] }
 0xca7   : > { %v3484_v39 = vpop.f32.mrb[212].mxu1  ;;  %7141 = vmatprep.mubr.msk.f32.mxu0 %vm12608_vm4, %v3594_v33  ;;  %vm12622_vm4 = vmmov %vm12533_vm0 }
 0xca8   : > { %v3595_v7 = vmul.f32 %v3484_v39, %v12609_v59  ;;  %v3486_v9 = vpop.f32.mrb[213].mxu1  ;;  %3875 = vmatmul.mubr.f32.gmra.mrb[234].mxu0 %v3593_v2  ;;  %v12616_v39 = vld [vmem:[#allocation54_spill] sm:$0xff] }
 0xca9   : > { %v3596_v5 = vmul.f32 %v3486_v9, %v12610_v13  ;;  %v12618_v9 = vld [vmem:[#allocation55_spill] sm:$0xff] }
 0xcab   : > { %v3490_v57 = vpop.f32.mrb[214].mxu1  ;;  %7142 = vmatprep.mubr.msk.f32.mxu0 %vm12611_vm11, %v3596_v5  ;;  %vm12625_vm11 = vmmov %vm12533_vm0 }
 0xcac   : > { %v3597_v46 = vmul.f32 %v3490_v57, %v12612_v1  ;;  %v3492_v29 = vpop.f32.mrb[215].mxu1  ;;  %3880 = vmatmul.mubr.f32.gmra.mrb[236].mxu0 %v3595_v7  ;;  %v12619_v57 = vld [vmem:[#allocation56_spill] sm:$0xff] }
 0xcad   : > { %v3598_v56 = vmul.f32 %v3492_v29, %v12613_v60  ;;  %v12620_v29 = vld [vmem:[#allocation57_spill] sm:$0xff] }
 0xcaf   : > { %v3496_v38 = vpop.f32.mrb[216].mxu1  ;;  %7143 = vmatprep.mubr.msk.f32.mxu0 %vm12614_vm14, %v3598_v56  ;;  %vm12628_vm14 = vmmov %vm12533_vm0 }
 0xcb0   : > { %v3599_v33 = vmul.f32 %v3496_v38, %v12615_v32  ;;  %v3498_v35 = vpop.f32.mrb[217].mxu1  ;;  %3885 = vmatmul.mubr.f32.gmra.mrb[238].mxu0 %v3597_v46  ;;  %v12621_v38 = vld [vmem:[#allocation58_spill] sm:$0xff] }
 0xcb1   : > { %v3600_v2 = vmul.f32 %v3498_v35, %v12616_v39  ;;  %v12623_v35 = vld [vmem:[#allocation59_spill] sm:$0xff] }
 0xcb3   : > { %v3502_v59 = vpop.f32.mrb[218].mxu1  ;;  %7144 = vmatprep.mubr.msk.f32.mxu0 %vm12617_vm15, %v3600_v2  ;;  %vm12630_vm15 = vmmov %vm12533_vm0 }
 0xcb4   : > { %v3601_v5 = vmul.f32 %v3502_v59, %v12618_v9  ;;  %v3504_v13 = vpop.f32.mrb[219].mxu1  ;;  %3890 = vmatmul.mubr.f32.gmra.mrb[240].mxu0 %v3599_v33  ;;  %v12624_v59 = vld [vmem:[#allocation60_spill] sm:$0xff] }
 0xcb5   : > { %v3602_v7 = vmul.f32 %v3504_v13, %v12619_v57  ;;  %v12626_v13 = vld [vmem:[#allocation61_spill] sm:$0xff] }
 0xcb7   : > { %v3508_v1 = vpop.f32.mrb[220].mxu1  ;;  %7145 = vmatprep.mubr.msk.f32.mxu0 %vm12533_vm0, %v3602_v7 }
 0xcb8   : > { %v3603_v56 = vmul.f32 %v3508_v1, %v12620_v29  ;;  %v3510_v60 = vpop.f32.mrb[221].mxu1  ;;  %3895 = vmatmul.mubr.f32.gmra.mrb[242].mxu0 %v3601_v5  ;;  %v12627_v1 = vld [vmem:[#allocation62_spill] sm:$0xff] }
 0xcb9   : > { %v3604_v46 = vmul.f32 %v3510_v60, %v12621_v38  ;;  %v12629_v60 = vld [vmem:[#allocation63_spill] sm:$0xff] }
 0xcbb   : > { %v3514_v32 = vpop.f32.mrb[222].mxu1  ;;  %7146 = vmatprep.mubr.msk.f32.mxu0 %vm12622_vm4, %v3604_v46  ;;  %vm12634_vm4 = vmmov %vm12533_vm0 }
 0xcbc   : > { %v3605_v2 = vmul.f32 %v3514_v32, %v12623_v35  ;;  %v3516_v39 = vpop.f32.mrb[223].mxu1  ;;  %3900 = vmatmul.mubr.f32.gmra.mrb[244].mxu0 %v3603_v56 }
 0xcbd   : > { %v3606_v33 = vmul.f32 %v3516_v39, %v12624_v59  ;;  %v12631_v39 = vld [vmem:[#allocation65_spill] sm:$0xff] }
 0xcbf   : > { %v3520_v9 = vpop.f32.mrb[224].mxu1  ;;  %7147 = vmatprep.mubr.msk.f32.mxu0 %vm12625_vm11, %v3606_v33  ;;  %vm12635_vm11 = vmmov %vm12533_vm0 }
 0xcc0   : > { %v3607_v7 = vmul.f32 %v3520_v9, %v12626_v13  ;;  %v3522_v57 = vpop.f32.mrb[225].mxu1  ;;  %3905 = vmatmul.mubr.f32.gmra.mrb[246].mxu0 %v3605_v2  ;;  %v12632_v9 = vld [vmem:[#allocation66_spill] sm:$0xff] }
 0xcc1   : > { %v3608_v5 = vmul.f32 %v3522_v57, %v12627_v1  ;;  %v12633_v57 = vld [vmem:[#allocation67_spill] sm:$0xff] }
 0xcc3   : > { %v3526_v29 = vpop.f32.mrb[226].mxu1  ;;  %7148 = vmatprep.mubr.msk.f32.mxu0 %vm12628_vm14, %v3608_v5  ;;  %vm12637_vm14 = vmmov %vm12533_vm0 }
 0xcc4   : > { %v3609_v46 = vmul.f32 %v3526_v29, %v12629_v60  ;;  %v3528_v38 = vpop.f32.mrb[227].mxu1  ;;  %3910 = vmatmul.mubr.f32.gmra.mrb[248].mxu0 %v3607_v7 }
 0xcc5   : > { %v3610_v32 = vmul.f32 %v3528_v38, %v12484_v37 }
 0xcc7   : > { %v3532_v56 = vpop.f32.mrb[228].mxu1  ;;  %7149 = vmatprep.mubr.msk.f32.mxu0 %vm12630_vm15, %v3610_v32  ;;  %vm12640_vm15 = vcmask 39936  }
 0xcc8   : > { %v3611_v33 = vmul.f32 %v3532_v56, %v12631_v39  ;;  %v3534_v59 = vpop.f32.mrb[229].mxu1  ;;  %3915 = vmatmul.mubr.f32.gmra.mrb[250].mxu0 %v3609_v46 }
 0xcc9   : > { %v3612_v2 = vmul.f32 %v3534_v59, %v12632_v9 }
 0xccb   : > { %v3538_v13 = vpop.f32.mrb[230].mxu1  ;;  %7150 = vmatprep.mubr.msk.f32.mxu0 %vm12533_vm0, %v3612_v2  ;;  %vm12641_vm0 = vmmov %vm12640_vm15 }
 0xccc   : > { %v3613_v5 = vmul.f32 %v3538_v13, %v12633_v57  ;;  %v3540_v1 = vpop.f32.mrb[231].mxu1  ;;  %3920 = vmatmul.mubr.f32.gmra.mrb[252].mxu0 %v3611_v33  ;;  %v12636_v13 = vld [vmem:[#allocation10_spill] sm:$0xff] }
 0xccd   : > { %v3614_v29 = vmul.f32 %v3540_v1, %v12488_v51  ;;  %v12638_v1 = vmov 1.0  }
 0xccf   : > { %v3544_v7 = vpop.f32.mrb[232].mxu1  ;;  %7151 = vmatprep.mubr.msk.f32.mxu0 %vm12634_vm4, %v3614_v29  ;;  %vm12642_vm4 = vmmov %vm12641_vm0 }
 0xcd0   : > { %v3615_v38 = vmul.f32 %v3544_v7, %v12489_v18  ;;  %v3546_v32 = vpop.f32.mrb[233].mxu1  ;;  %3925 = vmatmul.mubr.f32.gmra.mrb[254].mxu0 %v3613_v5 }
 0xcd1   : > { %v3616_v46 = vmul.f32 %v3546_v32, %v12490_v16 }
 0xcd3   : > { %v3550_v56 = vpop.f32.mrb[234].mxu1  ;;  %7152 = vmatprep.mubr.msk.f32.mxu0 %vm12635_vm11, %v3616_v46  ;;  %vm12643_vm11 = vmmov %vm12641_vm0 }
 0xcd4   : > { %v3617_v59 = vmul.f32 %v3550_v56, %v12491_v34  ;;  %v3552_v2 = vpop.f32.mrb[235].mxu1  ;;  %3930 = vmatmul.mubr.f32.gmra.mrb[0].mxu0 %v3615_v38 }
 0xcd5   : > { %v3618_v33 = vmul.f32 %v3552_v2, %v12636_v13 }
 0xcd7   : > { %7153 = vmatprep.mubr.msk.f32.mxu0 %vm12637_vm14, %v3618_v33  ;;  %vm12644_vm14 = vmmov %vm12641_vm0 }
 0xcd8   : > { %3935 = vmatmul.mubr.f32.gmra.mrb[2].mxu0 %v3617_v59 }
 0xcd9   : > { %7188 = vmatprep.mubr.msk.f32.mxu0 %vm12347_vm7, %v12638_v1 }
 0xd2f   : > { %v10404_v7 = vpop.f32.mrb[196].mxu0 }
 0xd30   : > { %v3783_v5 = vpop.f32.mrb[197].mxu0  ;;  %v3940_v32 = vsel %vm12640_vm15, %v10404_v7, -inf  ;;  %vm12645_vm15 = vmmov %vm12641_vm0 }
 0xd31   : > { %3941 = vmax.xlane.f32.xlu1 %v3940_v32 }
 0xd33   : > { %v10408_v46 = vpop.f32.mrb[198].mxu0 }
 0xd34   : > { %v3788_v56 = vpop.f32.mrb[199].mxu0  ;;  %v3943_v38 = vsel %vm12641_vm0, %v10408_v46, -inf }
 0xd35   : > { %3944 = vmax.xlane.f32.xlu0 %v3943_v38 }
 0xd37   : > { %v10412_v2 = vpop.f32.mrb[200].mxu0 }
 0xd38   : > { %v3793_v59 = vpop.f32.mrb[201].mxu0  ;;  %v3946_v33 = vsel %vm12642_vm4, %v10412_v2, -inf  ;;  %vm12646_vm4 = vmmov %vm12641_vm0 }
 0xd39   : > { %3947 = vmax.xlane.f32.xlu1 %v3946_v33 }
 0xd3b   : > { %v10416_v29 = vpop.f32.mrb[202].mxu0 }
 0xd3c   : > { %v3798_v5 = vpop.f32.mrb[203].mxu0  ;;  %v3949_v32 = vsel %vm12643_vm11, %v10416_v29, -inf  ;;  %vm12647_vm11 = vmmov %vm12641_vm0 }
 0xd3d   : > { %3950 = vmax.xlane.f32.xlu0 %v3949_v32 }
 0xd3f   : > { %v10420_v1 = vpop.f32.mrb[204].mxu0 }
 0xd40   : > { %v3803_v56 = vpop.f32.mrb[205].mxu0  ;;  %v3952_v38 = vsel %vm12644_vm14, %v10420_v1, -inf  ;;  %vm12648_vm14 = vmmov %vm12641_vm0 }
 0xd41   : > { %3953 = vmax.xlane.f32.xlu1 %v3952_v38 }
 0xd43   : > { %v10424_v13 = vpop.f32.mrb[206].mxu0 }
 0xd44   : > { %v3808_v59 = vpop.f32.mrb[207].mxu0  ;;  %v3955_v33 = vsel %vm12645_vm15, %v10424_v13, -inf  ;;  %vm12649_vm15 = vmmov %vm12641_vm0 }
 0xd45   : > { %3956 = vmax.xlane.f32.xlu0 %v3955_v33 }
 0xd47   : > { %v10428_v34 = vpop.f32.mrb[208].mxu0 }
 0xd48   : > { %v3813_v5 = vpop.f32.mrb[209].mxu0  ;;  %v3958_v32 = vsel %vm12641_vm0, %v10428_v34, -inf }
 0xd49   : > { %3959 = vmax.xlane.f32.xlu1 %v3958_v32 }
 0xd4b   : > { %v10432_v16 = vpop.f32.mrb[210].mxu0 }
 0xd4c   : > { %v3818_v56 = vpop.f32.mrb[211].mxu0  ;;  %v3961_v38 = vsel %vm12646_vm4, %v10432_v16, -inf  ;;  %vm12650_vm4 = vmmov %vm12641_vm0 }
 0xd4d   : > { %3962 = vmax.xlane.f32.xlu0 %v3961_v38 }
 0xd4f   : > { %v10436_v18 = vpop.f32.mrb[212].mxu0 }
 0xd50   : > { %v3823_v59 = vpop.f32.mrb[213].mxu0  ;;  %v3964_v33 = vsel %vm12647_vm11, %v10436_v18, -inf  ;;  %vm12651_vm11 = vmmov %vm12641_vm0 }
 0xd51   : > { %3965 = vmax.xlane.f32.xlu1 %v3964_v33 }
 0xd53   : > { %v10440_v51 = vpop.f32.mrb[214].mxu0 }
 0xd54   : > { %v3828_v5 = vpop.f32.mrb[215].mxu0  ;;  %v3967_v32 = vsel %vm12648_vm14, %v10440_v51, -inf  ;;  %vm12652_vm14 = vmmov %vm12641_vm0 }
 0xd55   : > { %3968 = vmax.xlane.f32.xlu0 %v3967_v32 }
 0xd57   : > { %v10444_v57 = vpop.f32.mrb[216].mxu0 }
 0xd58   : > { %v3833_v56 = vpop.f32.mrb[217].mxu0  ;;  %v3970_v38 = vsel %vm12649_vm15, %v10444_v57, -inf  ;;  %vm12653_vm15 = vmmov %vm12641_vm0 }
 0xd59   : > { %3971 = vmax.xlane.f32.xlu1 %v3970_v38 }
 0xd5b   : > { %v10448_v9 = vpop.f32.mrb[218].mxu0 }
 0xd5c   : > { %v3838_v59 = vpop.f32.mrb[219].mxu0  ;;  %v3973_v33 = vsel %vm12641_vm0, %v10448_v9, -inf }
 0xd5d   : > { %3974 = vmax.xlane.f32.xlu0 %v3973_v33 }
 0xd5f   : > { %v10452_v39 = vpop.f32.mrb[220].mxu0 }
 0xd60   : > { %v3843_v5 = vpop.f32.mrb[221].mxu0  ;;  %v3976_v32 = vsel %vm12650_vm4, %v10452_v39, -inf  ;;  %vm12654_vm4 = vmmov %vm12641_vm0 }
 0xd61   : > { %3977 = vmax.xlane.f32.xlu1 %v3976_v32 }
 0xd63   : > { %v10456_v37 = vpop.f32.mrb[222].mxu0 }
 0xd64   : > { %v3848_v56 = vpop.f32.mrb[223].mxu0  ;;  %v3979_v38 = vsel %vm12651_vm11, %v10456_v37, -inf  ;;  %vm12655_vm11 = vmmov %vm12641_vm0 }
 0xd65   : > { %3980 = vmax.xlane.f32.xlu0 %v3979_v38 }
 0xd67   : > { %v10460_v60 = vpop.f32.mrb[224].mxu0 }
 0xd68   : > { %v3853_v59 = vpop.f32.mrb[225].mxu0  ;;  %v3982_v33 = vsel %vm12652_vm14, %v10460_v60, -inf  ;;  %vm12656_vm14 = vmmov %vm12641_vm0 }
 0xd69   : > { %3983 = vmax.xlane.f32.xlu1 %v3982_v33 }
 0xd6b   : > { %v10464_v35 = vpop.f32.mrb[226].mxu0 }
 0xd6c   : > { %v3858_v5 = vpop.f32.mrb[227].mxu0  ;;  %v3985_v32 = vsel %vm12653_vm15, %v10464_v35, -inf  ;;  %vm12657_vm15 = vmmov %vm12641_vm0 }
 0xd6d   : > { %3986 = vmax.xlane.f32.xlu0 %v3985_v32 }
 0xd6f   : > { %v10468_v19 = vpop.f32.mrb[228].mxu0 }
 0xd70   : > { %v3863_v56 = vpop.f32.mrb[229].mxu0  ;;  %v3988_v38 = vsel %vm12641_vm0, %v10468_v19, -inf }
 0xd71   : > { %3989 = vmax.xlane.f32.xlu1 %v3988_v38 }
 0xd73   : > { %v10472_v26 = vpop.f32.mrb[230].mxu0 }
 0xd74   : > { %v3868_v59 = vpop.f32.mrb[231].mxu0  ;;  %v3991_v33 = vsel %vm12654_vm4, %v10472_v26, -inf  ;;  %vm12658_vm4 = vmmov %vm12641_vm0 }
 0xd75   : > { %3992 = vmax.xlane.f32.xlu0 %v3991_v33 }
 0xd77   : > { %v10476_v25 = vpop.f32.mrb[232].mxu0 }
 0xd78   : > { %v3873_v5 = vpop.f32.mrb[233].mxu0  ;;  %v3994_v32 = vsel %vm12655_vm11, %v10476_v25, -inf  ;;  %vm12659_vm11 = vmmov %vm12641_vm0 }
 0xd79   : > { %3995 = vmax.xlane.f32.xlu1 %v3994_v32 }
 0xd7b   : > { %v10480_v61 = vpop.f32.mrb[234].mxu0 }
 0xd7c   : > { %v3878_v56 = vpop.f32.mrb[235].mxu0  ;;  %v3997_v38 = vsel %vm12656_vm14, %v10480_v61, -inf  ;;  %vm12660_vm14 = vmmov %vm12641_vm0 }
 0xd7d   : > { %3998 = vmax.xlane.f32.xlu0 %v3997_v38 }
 0xd7f   : > { %v10484_v8 = vpop.f32.mrb[236].mxu0 }
 0xd80   : > { %v3883_v59 = vpop.f32.mrb[237].mxu0  ;;  %v4000_v33 = vsel %vm12657_vm15, %v10484_v8, -inf  ;;  %vm12661_vm15 = vmmov %vm12641_vm0 }
 0xd81   : > { %4001 = vmax.xlane.f32.xlu1 %v4000_v33 }
 0xd83   : > { %v10488_v62 = vpop.f32.mrb[238].mxu0 }
 0xd84   : > { %v3888_v5 = vpop.f32.mrb[239].mxu0  ;;  %v4003_v32 = vsel %vm12641_vm0, %v10488_v62, -inf }
 0xd85   : > { %4004 = vmax.xlane.f32.xlu0 %v4003_v32 }
 0xd87   : > { %v10492_v63 = vpop.f32.mrb[240].mxu0 }
 0xd88   : > { %v3893_v56 = vpop.f32.mrb[241].mxu0  ;;  %v4006_v38 = vsel %vm12658_vm4, %v10492_v63, -inf  ;;  %vm12662_vm4 = vmmov %vm12641_vm0 }
 0xd89   : > { %4007 = vmax.xlane.f32.xlu1 %v4006_v38 }
 0xd8b   : > { %v10496_v14 = vpop.f32.mrb[242].mxu0 }
 0xd8c   : > { %v3898_v59 = vpop.f32.mrb[243].mxu0  ;;  %v4009_v33 = vsel %vm12659_vm11, %v10496_v14, -inf  ;;  %vm12663_vm11 = vmmov %vm12641_vm0 }
 0xd8d   : > { %4010 = vmax.xlane.f32.xlu1 %v4009_v33 }
 0xd8f   : > { %v10500_v0 = vpop.f32.mrb[244].mxu0 }
 0xd90   : > { %v3903_v5 = vpop.f32.mrb[245].mxu0  ;;  %v4012_v32 = vsel %vm12660_vm14, %v10500_v0, -inf  ;;  %vm12664_vm14 = vmmov %vm12641_vm0 }
 0xd91   : > { %4013 = vmax.xlane.f32.xlu1 %v4012_v32 }
 0xd93   : > { %v10504_v55 = vpop.f32.mrb[246].mxu0 }
 0xd94   : > { %v3908_v56 = vpop.f32.mrb[247].mxu0  ;;  %v4015_v38 = vsel %vm12661_vm15, %v10504_v55, -inf  ;;  %vm12665_vm15 = vmmov %vm12641_vm0 }
 0xd95   : > { %4016 = vmax.xlane.f32.xlu1 %v4015_v38 }
 0xd97   : > { %v10508_v50 = vpop.f32.mrb[248].mxu0 }
 0xd98   : > { %v3913_v59 = vpop.f32.mrb[249].mxu0  ;;  %v4018_v33 = vsel %vm12641_vm0, %v10508_v50, -inf }
 0xd99   : > { %4019 = vmax.xlane.f32.xlu1 %v4018_v33 }
 0xd9b   : > { %v10512_v12 = vpop.f32.mrb[250].mxu0 }
 0xd9c   : > { %v3918_v5 = vpop.f32.mrb[251].mxu0  ;;  %v4021_v32 = vsel %vm12662_vm4, %v10512_v12, -inf  ;;  %vm12666_vm4 = vmmov %vm12641_vm0 }
 0xd9d   : > { %4022 = vmax.xlane.f32.xlu1 %v4021_v32 }
 0xd9f   : > { %v10516_v52 = vpop.f32.mrb[252].mxu0 }
 0xda0   : > { %v3923_v56 = vpop.f32.mrb[253].mxu0  ;;  %v4024_v38 = vsel %vm12663_vm11, %v10516_v52, -inf  ;;  %vm12667_vm11 = vmmov %vm12641_vm0 }
 0xda1   : > { %4025 = vmax.xlane.f32.xlu1 %v4024_v38 }
 0xda3   : > { %v10520_v49 = vpop.f32.mrb[254].mxu0 }
 0xda4   : > { %v3928_v59 = vpop.f32.mrb[255].mxu0  ;;  %v4027_v33 = vsel %vm12664_vm14, %v10520_v49, -inf  ;;  %vm12668_vm14 = vmmov %vm12641_vm0 }
 0xda5   : > { %4028 = vmax.xlane.f32.xlu1 %v4027_v33 }
 0xda7   : > { %v10524_v48 = vpop.f32.mrb[0].mxu0 }
 0xda8   : > { %v3933_v5 = vpop.f32.mrb[1].mxu0  ;;  %v4030_v32 = vsel %vm12665_vm15, %v10524_v48, -inf  ;;  %vm12669_vm15 = vmmov %vm12641_vm0 }
 0xda9   : > { %4031 = vmax.xlane.f32.xlu1 %v4030_v32 }
 0xdab   : > { %v10528_v43 = vpop.f32.mrb[2].mxu0 }
 0xdac   : > { %v3938_v56 = vpop.f32.mrb[3].mxu0  ;;  %v4033_v38 = vsel %vm12641_vm0, %v10528_v43, -inf }
 0xdad   : > { %4034 = vmax.xlane.f32.xlu1 %v4033_v38 }
 0xdbe   : > { %v3942_v24 = vpop.xlane.xlu1 %3941 }
 0xdbf   : > { %v4036_v59 = vsub.f32 %v10404_v7, %v3942_v24 }
 0xdc1   : > { %v4068_v54 = vmul.f32 1.442695, %v4036_v59 }
 0xdc2   : > { %v3945_v40 = vpop.xlane.xlu0 %3944 }
 0xdc3   : > { %8045 = vpow2.f32 %v4068_v54  ;;  %v4037_v33 = vsub.f32 %v10408_v46, %v3945_v40 }
 0xdc5   : > { %v4070_v5 = vmul.f32 1.442695, %v4037_v33 }
 0xdc6   : > { %v3948_v21 = vpop.xlane.xlu1 %3947 }
 0xdc7   : > { %8047 = vpow2.f32 %v4070_v5  ;;  %v4038_v32 = vsub.f32 %v10412_v2, %v3948_v21 }
 0xdc9   : > { %v4072_v6 = vmul.f32 1.442695, %v4038_v32 }
 0xdca   : > { %v3951_v58 = vpop.xlane.xlu0 %3950 }
 0xdcb   : > { %8049 = vpow2.f32 %v4072_v6  ;;  %v4039_v56 = vsub.f32 %v10416_v29, %v3951_v58 }
 0xdcd   : > { %v10536_v36 = vpop.eup %8045  ;;  %v4074_v38 = vmul.f32 1.442695, %v4039_v56 }
 0xdce   : > { %v3954_v17 = vpop.xlane.xlu1 %3953  ;;  %v4132_v24 = vsel %vm12666_vm4, %v10536_v36, 0.0  ;;  %vm12670_vm4 = vmmov %vm12641_vm0 }
 0xdcf   : > { %8051 = vpow2.f32 %v4074_v38  ;;  %v4040_v40 = vsub.f32 %v10420_v1, %v3954_v17  ;;  %4133 = vadd.xlane.f32.xlu0 %v4132_v24 }
 0xdd1   : > { %v10541_v54 = vpop.eup %8047  ;;  %v4076_v7 = vmul.f32 1.442695, %v4040_v40 }
 0xdd2   : > { %v3957_v21 = vpop.xlane.xlu0 %3956  ;;  %v4135_v6 = vsel %vm12667_vm11, %v10541_v54, 0.0  ;;  %vm12671_vm11 = vmmov %vm12641_vm0 }
 0xdd3   : > { %8053 = vpow2.f32 %v4076_v7  ;;  %v4041_v58 = vsub.f32 %v10424_v13, %v3957_v21  ;;  %4136 = vadd.xlane.f32.xlu0 %v4135_v6 }
 0xdd5   : > { %v10546_v29 = vpop.eup %8049  ;;  %v4078_v46 = vmul.f32 1.442695, %v4041_v58 }
 0xdd6   : > { %v3960_v2 = vpop.xlane.xlu1 %3959  ;;  %v4138_v59 = vsel %vm12668_vm14, %v10546_v29, 0.0  ;;  %vm12672_vm14 = vmmov %vm12641_vm0 }
 0xdd7   : > { %8055 = vpow2.f32 %v4078_v46  ;;  %v4042_v17 = vsub.f32 %v10428_v34, %v3960_v2  ;;  %4139 = vadd.xlane.f32.xlu0 %v4138_v59 }
 0xdd9   : > { %v10551_v1 = vpop.eup %8051  ;;  %v4080_v33 = vmul.f32 1.442695, %v4042_v17 }
 0xdda   : > { %v3963_v5 = vpop.xlane.xlu0 %3962  ;;  %v4141_v32 = vsel %vm12669_vm15, %v10551_v1, 0.0  ;;  %vm12673_vm15 = vmmov %vm12641_vm0 }
 0xddb   : > { %8057 = vpow2.f32 %v4080_v33  ;;  %v4043_v13 = vsub.f32 %v10432_v16, %v3963_v5  ;;  %4142 = vadd.xlane.f32.xlu0 %v4141_v32 }
 0xddd   : > { %v10556_v56 = vpop.eup %8053  ;;  %v4082_v38 = vmul.f32 1.442695, %v4043_v13 }
 0xdde   : > { %v3966_v24 = vpop.xlane.xlu1 %3965  ;;  %v4144_v40 = vsel %vm12641_vm0, %v10556_v56, 0.0 }
 0xddf   : > { %8059 = vpow2.f32 %v4082_v38  ;;  %v4044_v34 = vsub.f32 %v10436_v18, %v3966_v24  ;;  %4145 = vadd.xlane.f32.xlu0 %v4144_v40 }
 0xde1   : > { %v10561_v7 = vpop.eup %8055  ;;  %v4084_v21 = vmul.f32 1.442695, %v4044_v34 }
 0xde2   : > { %v3969_v6 = vpop.xlane.xlu0 %3968  ;;  %v4147_v58 = vsel %vm12670_vm4, %v10561_v7, 0.0  ;;  %vm12674_vm4 = vmmov %vm12641_vm0 }
 0xde3   : > { %8061 = vpow2.f32 %v4084_v21  ;;  %v4045_v16 = vsub.f32 %v10440_v51, %v3969_v6  ;;  %4148 = vadd.xlane.f32.xlu0 %v4147_v58 }
 0xde5   : > { %v10566_v46 = vpop.eup %8057  ;;  %v4086_v2 = vmul.f32 1.442695, %v4045_v16 }
 0xde6   : > { %v3972_v59 = vpop.xlane.xlu1 %3971  ;;  %v4150_v17 = vsel %vm12671_vm11, %v10566_v46, 0.0  ;;  %vm12675_vm11 = vmmov %vm12641_vm0 }
 0xde7   : > { %8063 = vpow2.f32 %v4086_v2  ;;  %v4046_v18 = vsub.f32 %v10444_v57, %v3972_v59  ;;  %4151 = vadd.xlane.f32.xlu0 %v4150_v17 }
 0xde9   : > { %v10571_v33 = vpop.eup %8059  ;;  %v4088_v5 = vmul.f32 1.442695, %v4046_v18 }
 0xdea   : > { %v3975_v32 = vpop.xlane.xlu0 %3974  ;;  %v4153_v13 = vsel %vm12672_vm14, %v10571_v33, 0.0  ;;  %vm12676_vm14 = vmmov %vm12641_vm0 }
 0xdeb   : > { %8065 = vpow2.f32 %v4088_v5  ;;  %v4047_v51 = vsub.f32 %v10448_v9, %v3975_v32  ;;  %4154 = vadd.xlane.f32.xlu0 %v4153_v13 }
 0xded   : > { %v10576_v38 = vpop.eup %8061  ;;  %v4090_v24 = vmul.f32 1.442695, %v4047_v51 }
 0xdee   : > { %v3978_v40 = vpop.xlane.xlu1 %3977  ;;  %v4156_v34 = vsel %vm12673_vm15, %v10576_v38, 0.0  ;;  %vm12677_vm15 = vmmov %vm12641_vm0 }
 0xdef   : > { %8067 = vpow2.f32 %v4090_v24  ;;  %v4048_v57 = vsub.f32 %v10452_v39, %v3978_v40  ;;  %4157 = vadd.xlane.f32.xlu0 %v4156_v34 }
 0xdf1   : > { %v10581_v21 = vpop.eup %8063  ;;  %v4092_v6 = vmul.f32 1.442695, %v4048_v57 }
 0xdf2   : > { %v3981_v58 = vpop.xlane.xlu0 %3980  ;;  %v4159_v16 = vsel %vm12641_vm0, %v10581_v21, 0.0 }
 0xdf3   : > { %8069 = vpow2.f32 %v4092_v6  ;;  %v4049_v9 = vsub.f32 %v10456_v37, %v3981_v58  ;;  %4160 = vadd.xlane.f32.xlu0 %v4159_v16 }
 0xdf5   : > { %v10586_v2 = vpop.eup %8065  ;;  %v4094_v59 = vmul.f32 1.442695, %v4049_v9 }
 0xdf6   : > { %v3984_v17 = vpop.xlane.xlu1 %3983  ;;  %v4162_v18 = vsel %vm12674_vm4, %v10586_v2, 0.0  ;;  %vm12678_vm4 = vmmov %vm12641_vm0 }
 0xdf7   : > { %8071 = vpow2.f32 %v4094_v59  ;;  %v4050_v39 = vsub.f32 %v10460_v60, %v3984_v17  ;;  %4163 = vadd.xlane.f32.xlu1 %v4162_v18 }
 0xdf9   : > { %v10591_v5 = vpop.eup %8067  ;;  %v4096_v32 = vmul.f32 1.442695, %v4050_v39 }
 0xdfa   : > { %v3987_v13 = vpop.xlane.xlu0 %3986  ;;  %v4165_v51 = vsel %vm12675_vm11, %v10591_v5, 0.0  ;;  %vm12679_vm11 = vmmov %vm12641_vm0 }
 0xdfb   : > { %8073 = vpow2.f32 %v4096_v32  ;;  %v4051_v37 = vsub.f32 %v10464_v35, %v3987_v13  ;;  %4166 = vadd.xlane.f32.xlu0 %v4165_v51 }
 0xdfd   : > { %v10596_v24 = vpop.eup %8069  ;;  %v4098_v40 = vmul.f32 1.442695, %v4051_v37 }
 0xdfe   : > { %v3990_v34 = vpop.xlane.xlu1 %3989  ;;  %v4168_v57 = vsel %vm12676_vm14, %v10596_v24, 0.0  ;;  %vm12680_vm14 = vmmov %vm12641_vm0 }
 0xdff   : > { %8075 = vpow2.f32 %v4098_v40  ;;  %v4052_v60 = vsub.f32 %v10468_v19, %v3990_v34  ;;  %4169 = vadd.xlane.f32.xlu1 %v4168_v57 }
 0xe01   : > { %v10601_v6 = vpop.eup %8071  ;;  %v4100_v58 = vmul.f32 1.442695, %v4052_v60 }
 0xe02   : > { %v3993_v16 = vpop.xlane.xlu0 %3992  ;;  %v4171_v9 = vsel %vm12677_vm15, %v10601_v6, 0.0  ;;  %vm12681_vm15 = vmmov %vm12641_vm0 }
 0xe03   : > { %8077 = vpow2.f32 %v4100_v58  ;;  %v4053_v35 = vsub.f32 %v10472_v26, %v3993_v16  ;;  %4172 = vadd.xlane.f32.xlu0 %v4171_v9 }
 0xe05   : > { %v10606_v59 = vpop.eup %8073  ;;  %v4102_v17 = vmul.f32 1.442695, %v4053_v35 }
 0xe06   : > { %v3996_v18 = vpop.xlane.xlu1 %3995  ;;  %v4174_v39 = vsel %vm12641_vm0, %v10606_v59, 0.0 }
 0xe07   : > { %8079 = vpow2.f32 %v4102_v17  ;;  %v4054_v19 = vsub.f32 %v10476_v25, %v3996_v18  ;;  %4175 = vadd.xlane.f32.xlu1 %v4174_v39 }
 0xe09   : > { %v10611_v32 = vpop.eup %8075  ;;  %v4104_v13 = vmul.f32 1.442695, %v4054_v19 }
 0xe0a   : > { %v3999_v51 = vpop.xlane.xlu0 %3998  ;;  %v4177_v37 = vsel %vm12678_vm4, %v10611_v32, 0.0  ;;  %vm12682_vm4 = vmmov %vm12641_vm0 }
 0xe0b   : > { %8081 = vpow2.f32 %v4104_v13  ;;  %v4055_v26 = vsub.f32 %v10480_v61, %v3999_v51  ;;  %4178 = vadd.xlane.f32.xlu0 %v4177_v37 }
 0xe0d   : > { %v10616_v40 = vpop.eup %8077  ;;  %v4106_v34 = vmul.f32 1.442695, %v4055_v26 }
 0xe0e   : > { %v4002_v57 = vpop.xlane.xlu1 %4001  ;;  %v4180_v60 = vsel %vm12679_vm11, %v10616_v40, 0.0  ;;  %vm12683_vm11 = vmmov %vm12641_vm0 }
 0xe0f   : > { %8083 = vpow2.f32 %v4106_v34  ;;  %v4056_v25 = vsub.f32 %v10484_v8, %v4002_v57  ;;  %4181 = vadd.xlane.f32.xlu1 %v4180_v60 }
 0xe11   : > { %v10621_v58 = vpop.eup %8079  ;;  %v4108_v16 = vmul.f32 1.442695, %v4056_v25 }
 0xe12   : > { %v4005_v9 = vpop.xlane.xlu0 %4004  ;;  %v4183_v35 = vsel %vm12680_vm14, %v10621_v58, 0.0  ;;  %vm12684_vm14 = vmmov %vm12641_vm0 }
 0xe13   : > { %8085 = vpow2.f32 %v4108_v16  ;;  %v4057_v61 = vsub.f32 %v10488_v62, %v4005_v9  ;;  %4184 = vadd.xlane.f32.xlu0 %v4183_v35 }
 0xe15   : > { %v10626_v17 = vpop.eup %8081  ;;  %v4110_v18 = vmul.f32 1.442695, %v4057_v61 }
 0xe16   : > { %v4008_v39 = vpop.xlane.xlu1 %4007  ;;  %v4186_v19 = vsel %vm12681_vm15, %v10626_v17, 0.0  ;;  %vm12685_vm15 = vmmov %vm12641_vm0 }
 0xe17   : > { %8087 = vpow2.f32 %v4110_v18  ;;  %v4058_v8 = vsub.f32 %v10492_v63, %v4008_v39  ;;  %4187 = vadd.xlane.f32.xlu1 %v4186_v19 }
 0xe19   : > { %v10631_v13 = vpop.eup %8083  ;;  %v4112_v51 = vmul.f32 1.442695, %v4058_v8 }
 0xe1a   : > { %v4011_v37 = vpop.xlane.xlu1 %4010  ;;  %v4189_v26 = vsel %vm12641_vm0, %v10631_v13, 0.0 }
 0xe1b   : > { %8089 = vpow2.f32 %v4112_v51  ;;  %v4059_v62 = vsub.f32 %v10496_v14, %v4011_v37  ;;  %4190 = vadd.xlane.f32.xlu0 %v4189_v26 }
 0xe1d   : > { %v10636_v34 = vpop.eup %8085  ;;  %v4114_v57 = vmul.f32 1.442695, %v4059_v62 }
 0xe1e   : > { %v4014_v60 = vpop.xlane.xlu1 %4013  ;;  %v4192_v25 = vsel %vm12682_vm4, %v10636_v34, 0.0  ;;  %vm12686_vm4 = vmmov %vm12641_vm0 }
 0xe1f   : > { %8091 = vpow2.f32 %v4114_v57  ;;  %v4060_v63 = vsub.f32 %v10500_v0, %v4014_v60  ;;  %4193 = vadd.xlane.f32.xlu1 %v4192_v25 }
 0xe21   : > { %v10641_v16 = vpop.eup %8087  ;;  %v4116_v9 = vmul.f32 1.442695, %v4060_v63 }
 0xe22   : > { %v4017_v35 = vpop.xlane.xlu1 %4016  ;;  %v4195_v61 = vsel %vm12683_vm11, %v10641_v16, 0.0  ;;  %vm12687_vm11 = vmmov %vm12641_vm0 }
 0xe23   : > { %8093 = vpow2.f32 %v4116_v9  ;;  %v4061_v14 = vsub.f32 %v10504_v55, %v4017_v35  ;;  %4196 = vadd.xlane.f32.xlu0 %v4195_v61 }
 0xe25   : > { %v10646_v18 = vpop.eup %8089  ;;  %v4118_v39 = vmul.f32 1.442695, %v4061_v14 }
 0xe26   : > { %v4020_v19 = vpop.xlane.xlu1 %4019  ;;  %v4198_v8 = vsel %vm12684_vm14, %v10646_v18, 0.0  ;;  %vm12688_vm14 = vmmov %vm12641_vm0 }
 0xe27   : > { %8095 = vpow2.f32 %v4118_v39  ;;  %v4062_v0 = vsub.f32 %v10508_v50, %v4020_v19  ;;  %4199 = vadd.xlane.f32.xlu1 %v4198_v8 }
 0xe29   : > { %v10651_v51 = vpop.eup %8091  ;;  %v4120_v37 = vmul.f32 1.442695, %v4062_v0 }
 0xe2a   : > { %v4023_v26 = vpop.xlane.xlu1 %4022  ;;  %v4201_v62 = vsel %vm12685_vm15, %v10651_v51, 0.0  ;;  %vm12689_vm15 = vmmov %vm12641_vm0 }
 0xe2b   : > { %8097 = vpow2.f32 %v4120_v37  ;;  %v4063_v55 = vsub.f32 %v10512_v12, %v4023_v26  ;;  %4202 = vadd.xlane.f32.xlu0 %v4201_v62 }
 0xe2d   : > { %v10656_v57 = vpop.eup %8093  ;;  %v4122_v60 = vmul.f32 1.442695, %v4063_v55 }
 0xe2e   : > { %v4026_v25 = vpop.xlane.xlu1 %4025  ;;  %v4204_v63 = vsel %vm12641_vm0, %v10656_v57, 0.0 }
 0xe2f   : > { %8099 = vpow2.f32 %v4122_v60  ;;  %v4064_v50 = vsub.f32 %v10516_v52, %v4026_v25  ;;  %4205 = vadd.xlane.f32.xlu1 %v4204_v63 }
 0xe31   : > { %v10661_v9 = vpop.eup %8095  ;;  %v4124_v35 = vmul.f32 1.442695, %v4064_v50 }
 0xe32   : > { %v4029_v61 = vpop.xlane.xlu1 %4028  ;;  %v4207_v14 = vsel %vm12686_vm4, %v10661_v9, 0.0  ;;  %vm12690_vm4 = vmmov %vm12641_vm0 }
 0xe33   : > { %8101 = vpow2.f32 %v4124_v35  ;;  %v4065_v12 = vsub.f32 %v10520_v49, %v4029_v61  ;;  %4208 = vadd.xlane.f32.xlu0 %v4207_v14 }
 0xe35   : > { %v10666_v39 = vpop.eup %8097  ;;  %v4126_v19 = vmul.f32 1.442695, %v4065_v12 }
 0xe36   : > { %v4032_v8 = vpop.xlane.xlu1 %4031  ;;  %v4210_v0 = vsel %vm12687_vm11, %v10666_v39, 0.0  ;;  %vm12691_vm11 = vmmov %vm12641_vm0 }
 0xe37   : > { %8103 = vpow2.f32 %v4126_v19  ;;  %v4066_v52 = vsub.f32 %v10524_v48, %v4032_v8  ;;  %4211 = vadd.xlane.f32.xlu1 %v4210_v0 }
 0xe39   : > { %v10671_v37 = vpop.eup %8099  ;;  %v4128_v26 = vmul.f32 1.442695, %v4066_v52 }
 0xe3a   : > { %v4035_v62 = vpop.xlane.xlu1 %4034  ;;  %v4213_v55 = vsel %vm12688_vm14, %v10671_v37, 0.0  ;;  %vm12692_vm14 = vmmov %vm12641_vm0 }
 0xe3b   : > { %8105 = vpow2.f32 %v4128_v26  ;;  %v4067_v49 = vsub.f32 %v10528_v43, %v4035_v62  ;;  %4214 = vadd.xlane.f32.xlu0 %v4213_v55  ;;  %v12693_v55 = vmov 1.0|1.0  }
 0xe3d   : > { %v10676_v60 = vpop.eup %8101  ;;  %v4130_v25 = vmul.f32 1.442695, %v4067_v49 }
 0xe3e   : > { %v4216_v63 = vsel %vm12689_vm15, %v10676_v60, 0.0  ;;  %vm12695_vm15 = vmmov %vm12641_vm0 }
 0xe3f   : > { %8107 = vpow2.f32 %v4130_v25  ;;  %4217 = vadd.xlane.f32.xlu1 %v4216_v63 }
 0xe41   : > { %v10680_v48 = vpop.eup %8103 }
 0xe42   : > { %v4219_v50 = vsel %vm12641_vm0, %v10680_v48, 0.0 }
 0xe43   : > { %4220 = vadd.xlane.f32.xlu0 %v4219_v50 }
 0xe45   : > { %v10684_v35 = vpop.eup %8105 }
 0xe46   : > { %v4222_v43 = vsel %vm12690_vm4, %v10684_v35, 0.0  ;;  %vm12698_vm4 = vmmov %vm12641_vm0 }
 0xe47   : > { %4223 = vadd.xlane.f32.xlu1 %v4222_v43 }
 0xe49   : > { %v10688_v61 = vpop.eup %8107 }
 0xe4a   : > { %v4225_v14 = vsel %vm12691_vm11, %v10688_v61, 0.0  ;;  %vm12700_vm11 = vmmov %vm12641_vm0 }
 0xe4b   : > { %4226 = vadd.xlane.f32.xlu0 %v4225_v14 }
 0xe5c   : > { %v4134_v12 = vpop.xlane.xlu0 %4133 }
 0xe5d   : > { %8109 = vrcp.f32 %v4134_v12 }
 0xe60   : > { %v4137_v19 = vpop.xlane.xlu0 %4136 }
 0xe61   : > { %8111 = vrcp.f32 %v4137_v19 }
 0xe64   : > { %v4140_v8 = vpop.xlane.xlu0 %4139 }
 0xe65   : > { %8113 = vrcp.f32 %v4140_v8 }
 0xe67   : > { %v8110_v0 = vpop.eup %8109 }
 0xe68   : > { %v4260_v52 = vmul.f32 %v8110_v0, %v10536_v36  ;;  %v4143_v26 = vpop.xlane.xlu0 %4142 }
 0xe69   : > { %8115 = vrcp.f32 %v4143_v26 }
 0xe6a   : > { %7156 = vmatmul.mubr.msk.f32.vlgmr.msra.gmra.mrb[236].mxu1 %vm12692_vm14, %v4260_v52  ;;  %vm12702_vm14 = vmmov %vm12641_vm0 }
 0xe6b   : > { %v8112_v62 = vpop.eup %8111  ;;  %4458 = vmatprep.mubr.f32.mxu1 %v12179_v45  ;;  %7761 = vmatpush1.bf16.msk.msra.mxu1 %vm8796_vm13, %v12693_v55 }
 0xe6c   : > { %v4146_v25 = vpop.xlane.xlu0 %4145  ;;  %v4261_v63 = vmul.f32 %v8112_v62, %v10541_v54  ;;  %7762 = vmatprep.subr.bf16.mxu1 %v12104_v11 }
 0xe6d   : > { %8117 = vrcp.f32 %v4146_v25 }
 0xe6e   : > { %7157 = vmatmul.mubr.msk.f32.gmra.mrb[238].mxu1 %vm12695_vm15, %v4261_v63  ;;  %vm12704_vm15 = vmmov %vm12641_vm0 }
 0xe6f   : > { %v8114_v36 = vpop.eup %8113  ;;  %4464 = vmatprep.mubr.f32.mxu1 %v12179_v45  ;;  %7764 = vmatpush1.bf16.msk.msra.mxu1 %vm8831_vm8, %v12693_v55 }
 0xe70   : > { %v4149_v43 = vpop.xlane.xlu0 %4148  ;;  %v4262_v14 = vmul.f32 %v8114_v36, %v10546_v29  ;;  %7765 = vmatprep.subr.bf16.mxu1 %v12104_v11 }
 0xe71   : > { %8119 = vrcp.f32 %v4149_v43 }
 0xe72   : > { %7158 = vmatmul.mubr.msk.f32.gmra.mrb[240].mxu1 %vm12641_vm0, %v4262_v14 }
 0xe73   : > { %v8116_v54 = vpop.eup %8115  ;;  %4470 = vmatprep.mubr.f32.mxu1 %v12179_v45  ;;  %7767 = vmatpush1.bf16.msk.msra.mxu1 %vm8855_vm3, %v12693_v55 }
 0xe74   : > { %v4152_v19 = vpop.xlane.xlu0 %4151  ;;  %v4263_v8 = vmul.f32 %v8116_v54, %v10551_v1  ;;  %7768 = vmatprep.subr.bf16.mxu1 %v12104_v11 }
 0xe75   : > { %8121 = vrcp.f32 %v4152_v19 }
 0xe76   : > { %7159 = vmatmul.mubr.msk.f32.gmra.mrb[242].mxu1 %vm12698_vm4, %v4263_v8  ;;  %vm12707_vm4 = vmmov %vm12641_vm0 }
 0xe77   : > { %v8118_v29 = vpop.eup %8117  ;;  %4476 = vmatprep.mubr.f32.mxu1 %v12179_v45  ;;  %7770 = vmatpush1.bf16.msk.msra.mxu1 %vm8878_vm10, %v12693_v55 }
 0xe78   : > { %v4155_v52 = vpop.xlane.xlu0 %4154  ;;  %v4264_v26 = vmul.f32 %v8118_v29, %v10556_v56  ;;  %7771 = vmatprep.subr.bf16.mxu1 %v12104_v11 }
 0xe79   : > { %8123 = vrcp.f32 %v4155_v52 }
 0xe7a   : > { %7160 = vmatmul.mubr.msk.f32.gmra.mrb[244].mxu1 %vm12700_vm11, %v4264_v26  ;;  %vm12709_vm11 = vmmov %vm12641_vm0 }
 0xe7b   : > { %v8120_v1 = vpop.eup %8119  ;;  %4482 = vmatprep.mubr.f32.mxu1 %v12179_v45  ;;  %7773 = vmatpush1.bf16.msk.msra.mxu1 %vm12188_vm1, %v12693_v55 }
 0xe7c   : > { %v4158_v25 = vpop.xlane.xlu0 %4157  ;;  %v4265_v63 = vmul.f32 %v8120_v1, %v10561_v7  ;;  %7774 = vmatprep.subr.bf16.mxu1 %v12104_v11 }
 0xe7d   : > { %8125 = vrcp.f32 %v4158_v25 }
 0xe7e   : > { %7161 = vmatmul.mubr.msk.f32.gmra.mrb[246].mxu1 %vm12702_vm14, %v4265_v63  ;;  %vm12711_vm14 = vmmov %vm12641_vm0 }
 0xe7f   : > { %v8122_v56 = vpop.eup %8121  ;;  %4488 = vmatprep.mubr.f32.mxu1 %v12179_v45  ;;  %7776 = vmatpush1.bf16.msk.msra.mxu1 %vm12189_vm5, %v12693_v55 }
 0xe80   : > { %v4161_v43 = vpop.xlane.xlu0 %4160  ;;  %v4266_v14 = vmul.f32 %v8122_v56, %v10566_v46  ;;  %7777 = vmatprep.subr.bf16.mxu1 %v12104_v11 }
 0xe81   : > { %8127 = vrcp.f32 %v4161_v43 }
 0xe82   : > { %7162 = vmatmul.mubr.msk.f32.gmra.mrb[248].mxu1 %vm12704_vm15, %v4266_v14  ;;  %vm12712_vm15 = vmmov %vm12641_vm0 }
 0xe83   : > { %v8124_v7 = vpop.eup %8123  ;;  %4494 = vmatprep.mubr.f32.mxu1 %v12179_v45  ;;  %7779 = vmatpush1.bf16.msk.msra.mxu1 %vm8970_vm12, %v12693_v55 }
 0xe84   : > { %v4164_v19 = vpop.xlane.xlu1 %4163  ;;  %v4267_v8 = vmul.f32 %v8124_v7, %v10571_v33  ;;  %7780 = vmatprep.subr.bf16.mxu1 %v12104_v11 }
 0xe85   : > { %8129 = vrcp.f32 %v4164_v19 }
 0xe86   : > { %7163 = vmatmul.mubr.msk.f32.gmra.mrb[250].mxu1 %vm12641_vm0, %v4267_v8 }
 0xe87   : > { %v8126_v46 = vpop.eup %8125  ;;  %4500 = vmatprep.mubr.f32.mxu1 %v12179_v45  ;;  %7782 = vmatpush1.bf16.msk.msra.mxu1 %vm12412_vm9, %v12693_v55 }
 0xe88   : > { %v4167_v52 = vpop.xlane.xlu0 %4166  ;;  %v4268_v26 = vmul.f32 %v8126_v46, %v10576_v38  ;;  %7783 = vmatprep.subr.bf16.mxu1 %v12104_v11 }
 0xe89   : > { %8131 = vrcp.f32 %v4167_v52 }
 0xe8a   : > { %7164 = vmatmul.mubr.msk.f32.gmra.mrb[252].mxu1 %vm12707_vm4, %v4268_v26  ;;  %vm12713_vm4 = vmmov %vm12641_vm0 }
 0xe8b   : > { %v8128_v33 = vpop.eup %8127  ;;  %4506 = vmatprep.mubr.f32.mxu1 %v12179_v45  ;;  %7785 = vmatpush1.bf16.msk.msra.mxu1 %vm12414_vm2, %v12693_v55 }
 0xe8c   : > { %v4170_v25 = vpop.xlane.xlu1 %4169  ;;  %v4269_v63 = vmul.f32 %v8128_v33, %v10581_v21  ;;  %7786 = vmatprep.subr.bf16.mxu1 %v12104_v11 }
 0xe8d   : > { %8133 = vrcp.f32 %v4170_v25 }
 0xe8e   : > { %7165 = vmatmul.mubr.msk.f32.gmra.mrb[254].mxu1 %vm12709_vm11, %v4269_v63  ;;  %vm12714_vm11 = vmmov %vm12641_vm0 }
 0xe8f   : > { %v8130_v38 = vpop.eup %8129  ;;  %4512 = vmatprep.mubr.f32.mxu1 %v12179_v45  ;;  %7788 = vmatpush1.bf16.msk.msra.mxu1 %vm12416_vm6, %v12693_v55 }
 0xe90   : > { %v4270_v43 = vmul.f32 %v8130_v38, %v10586_v2  ;;  %v4173_v14 = vpop.xlane.xlu0 %4172 }
 0xe91   : > { %8135 = vrcp.f32 %v4173_v14 }
 0xe92   : > { %7166 = vmatmul.mubr.msk.f32.gmra.mrb[0].mxu1 %vm12711_vm14, %v4270_v43  ;;  %vm12715_vm14 = vmmov %vm12641_vm0 }
 0xe93   : > { %v8132_v7 = vpop.eup %8131  ;;  %4518 = vmatprep.mubr.f32.mxu1 %v12179_v45 }
 0xe94   : > { %v4271_v21 = vmul.f32 %v8132_v7, %v10591_v5  ;;  %v4176_v19 = vpop.xlane.xlu1 %4175 }
 0xe95   : > { %8137 = vrcp.f32 %v4176_v19 }
 0xe96   : > { %7167 = vmatmul.mubr.msk.f32.gmra.mrb[2].mxu1 %vm12712_vm15, %v4271_v21  ;;  %vm12716_vm15 = vmmov %vm12641_vm0 }
 0xe97   : > { %v8134_v8 = vpop.eup %8133  ;;  %4524 = vmatprep.mubr.f32.mxu1 %v12179_v45 }
 0xe98   : > { %v4272_v46 = vmul.f32 %v8134_v8, %v10596_v24  ;;  %v4179_v52 = vpop.xlane.xlu0 %4178 }
 0xe99   : > { %8139 = vrcp.f32 %v4179_v52 }
 0xe9a   : > { %7168 = vmatmul.mubr.msk.f32.gmra.mrb[4].mxu1 %vm12641_vm0, %v4272_v46 }
 0xe9b   : > { %v8136_v2 = vpop.eup %8135  ;;  %4530 = vmatprep.mubr.f32.mxu1 %v12179_v45 }
 0xe9c   : > { %v4273_v26 = vmul.f32 %v8136_v2, %v10601_v6  ;;  %v4182_v33 = vpop.xlane.xlu1 %4181 }
 0xe9d   : > { %8141 = vrcp.f32 %v4182_v33 }
 0xe9e   : > { %7169 = vmatmul.mubr.msk.f32.gmra.mrb[6].mxu1 %vm12713_vm4, %v4273_v26  ;;  %vm12717_vm4 = vmmov %vm12641_vm0 }
 0xe9f   : > { %v8138_v5 = vpop.eup %8137  ;;  %4536 = vmatprep.mubr.f32.mxu1 %v12179_v45 }
 0xea0   : > { %v4274_v25 = vmul.f32 %v8138_v5, %v10606_v59  ;;  %v4185_v63 = vpop.xlane.xlu0 %4184 }
 0xea1   : > { %8143 = vrcp.f32 %v4185_v63 }
 0xea2   : > { %7170 = vmatmul.mubr.msk.f32.gmra.mrb[8].mxu1 %vm12714_vm11, %v4274_v25  ;;  %vm12718_vm11 = vmmov %vm12641_vm0 }
 0xea3   : > { %v8140_v24 = vpop.eup %8139  ;;  %4542 = vmatprep.mubr.f32.mxu1 %v12179_v45 }
 0xea4   : > { %v4275_v38 = vmul.f32 %v8140_v24, %v10611_v32  ;;  %v4188_v43 = vpop.xlane.xlu1 %4187 }
 0xea5   : > { %8145 = vrcp.f32 %v4188_v43 }
 0xea6   : > { %7171 = vmatmul.mubr.msk.f32.gmra.mrb[10].mxu1 %vm12715_vm14, %v4275_v38  ;;  %vm12719_vm14 = vmmov %vm12641_vm0 }
 0xea7   : > { %v8142_v6 = vpop.eup %8141  ;;  %4548 = vmatprep.mubr.f32.mxu1 %v12179_v45 }
 0xea8   : > { %v4276_v14 = vmul.f32 %v8142_v6, %v10616_v40  ;;  %v4191_v7 = vpop.xlane.xlu0 %4190 }
 0xea9   : > { %8147 = vrcp.f32 %v4191_v7 }
 0xeaa   : > { %7172 = vmatmul.mubr.msk.f32.gmra.mrb[12].mxu1 %vm12716_vm15, %v4276_v14  ;;  %vm12720_vm15 = vmmov %vm12641_vm0 }
 0xeab   : > { %v8144_v59 = vpop.eup %8143  ;;  %4554 = vmatprep.mubr.f32.mxu1 %v12179_v45 }
 0xeac   : > { %v4277_v21 = vmul.f32 %v8144_v59, %v10621_v58  ;;  %v4194_v19 = vpop.xlane.xlu1 %4193 }
 0xead   : > { %8149 = vrcp.f32 %v4194_v19 }
 0xeae   : > { %7173 = vmatmul.mubr.msk.f32.gmra.mrb[14].mxu1 %vm12641_vm0, %v4277_v21 }
 0xeaf   : > { %v8146_v32 = vpop.eup %8145  ;;  %4560 = vmatprep.mubr.f32.mxu1 %v12179_v45 }
 0xeb0   : > { %v4278_v8 = vmul.f32 %v8146_v32, %v10626_v17  ;;  %v4197_v46 = vpop.xlane.xlu0 %4196 }
 0xeb1   : > { %8151 = vrcp.f32 %v4197_v46 }
 0xeb2   : > { %7174 = vmatmul.mubr.msk.f32.gmra.mrb[16].mxu1 %vm12717_vm4, %v4278_v8  ;;  %vm12721_vm4 = vmmov %vm12641_vm0 }
 0xeb3   : > { %v8148_v40 = vpop.eup %8147  ;;  %4566 = vmatprep.mubr.f32.mxu1 %v12179_v45 }
 0xeb4   : > { %v4279_v52 = vmul.f32 %v8148_v40, %v10631_v13  ;;  %v4200_v2 = vpop.xlane.xlu1 %4199 }
 0xeb5   : > { %8153 = vrcp.f32 %v4200_v2 }
 0xeb6   : > { %7175 = vmatmul.mubr.msk.f32.gmra.mrb[18].mxu1 %vm12718_vm11, %v4279_v52  ;;  %vm12722_vm11 = vmmov %vm12641_vm0 }
 0xeb7   : > { %v8150_v58 = vpop.eup %8149  ;;  %4572 = vmatprep.mubr.f32.mxu1 %v12179_v45 }
 0xeb8   : > { %v4280_v26 = vmul.f32 %v8150_v58, %v10636_v34  ;;  %v4203_v33 = vpop.xlane.xlu0 %4202 }
 0xeb9   : > { %8155 = vrcp.f32 %v4203_v33 }
 0xeba   : > { %7176 = vmatmul.mubr.msk.f32.gmra.mrb[20].mxu1 %vm12719_vm14, %v4280_v26  ;;  %vm12723_vm14 = vmmov %vm12641_vm0 }
 0xebb   : > { %v8152_v17 = vpop.eup %8151  ;;  %4578 = vmatprep.mubr.f32.mxu1 %v12179_v45 }
 0xebc   : > { %v4281_v5 = vmul.f32 %v8152_v17, %v10641_v16  ;;  %v4206_v25 = vpop.xlane.xlu1 %4205 }
 0xebd   : > { %8157 = vrcp.f32 %v4206_v25 }
 0xebe   : > { %7177 = vmatmul.mubr.msk.f32.gmra.mrb[22].mxu1 %vm12720_vm15, %v4281_v5  ;;  %vm12724_vm15 = vmmov %vm12641_vm0 }
 0xebf   : > { %v8154_v13 = vpop.eup %8153  ;;  %4584 = vmatprep.mubr.f32.mxu1 %v12179_v45 }
 0xec0   : > { %v4282_v63 = vmul.f32 %v8154_v13, %v10646_v18  ;;  %v4209_v24 = vpop.xlane.xlu0 %4208 }
 0xec1   : > { %8159 = vrcp.f32 %v4209_v24 }
 0xec2   : > { %7178 = vmatmul.mubr.msk.f32.gmra.mrb[24].mxu1 %vm12641_vm0, %v4282_v63 }
 0xec3   : > { %v8156_v34 = vpop.eup %8155  ;;  %4590 = vmatprep.mubr.f32.mxu1 %v12179_v45 }
 0xec4   : > { %v4283_v38 = vmul.f32 %v8156_v34, %v10651_v51  ;;  %v4212_v43 = vpop.xlane.xlu1 %4211 }
 0xec5   : > { %8161 = vrcp.f32 %v4212_v43 }
 0xec6   : > { %7179 = vmatmul.mubr.msk.f32.gmra.mrb[26].mxu1 %vm12721_vm4, %v4283_v38  ;;  %vm12725_vm4 = vmmov %vm12641_vm0 }
 0xec7   : > { %v8158_v16 = vpop.eup %8157  ;;  %4596 = vmatprep.mubr.f32.mxu1 %v12179_v45 }
 0xec8   : > { %v4284_v6 = vmul.f32 %v8158_v16, %v10656_v57  ;;  %v4215_v14 = vpop.xlane.xlu0 %4214 }
 0xec9   : > { %8163 = vrcp.f32 %v4215_v14 }
 0xeca   : > { %7180 = vmatmul.mubr.msk.f32.gmra.mrb[28].mxu1 %vm12722_vm11, %v4284_v6  ;;  %vm12726_vm11 = vmmov %vm12641_vm0 }
 0xecb   : > { %v8160_v18 = vpop.eup %8159  ;;  %4602 = vmatprep.mubr.f32.mxu1 %v12179_v45 }
 0xecc   : > { %v4285_v7 = vmul.f32 %v8160_v18, %v10661_v9  ;;  %v4218_v59 = vpop.xlane.xlu1 %4217 }
 0xecd   : > { %8165 = vrcp.f32 %v4218_v59 }
 0xece   : > { %7181 = vmatmul.mubr.msk.f32.gmra.mrb[30].mxu1 %vm12723_vm14, %v4285_v7  ;;  %vm12727_vm14 = vmmov %vm12641_vm0 }
 0xecf   : > { %v8162_v51 = vpop.eup %8161  ;;  %4608 = vmatprep.mubr.f32.mxu1 %v12179_v45 }
 0xed0   : > { %v4286_v21 = vmul.f32 %v8162_v51, %v10666_v39  ;;  %v4221_v19 = vpop.xlane.xlu0 %4220 }
 0xed1   : > { %8167 = vrcp.f32 %v4221_v19 }
 0xed2   : > { %7182 = vmatmul.mubr.msk.f32.gmra.mrb[32].mxu1 %vm12724_vm15, %v4286_v21  ;;  %vm12728_vm15 = vmmov %vm12641_vm0 }
 0xed3   : > { %v8164_v57 = vpop.eup %8163  ;;  %4614 = vmatprep.mubr.f32.mxu1 %v12179_v45 }
 0xed4   : > { %v4287_v32 = vmul.f32 %v8164_v57, %v10671_v37  ;;  %v4224_v8 = vpop.xlane.xlu1 %4223 }
 0xed5   : > { %8169 = vrcp.f32 %v4224_v8 }
 0xed6   : > { %7183 = vmatmul.mubr.msk.f32.gmra.mrb[34].mxu1 %vm12641_vm0, %v4287_v32 }
 0xed7   : > { %v8166_v9 = vpop.eup %8165  ;;  %4620 = vmatprep.mubr.f32.mxu1 %v12179_v45 }
 0xed8   : > { %v4288_v46 = vmul.f32 %v8166_v9, %v10676_v60  ;;  %v4227_v40 = vpop.xlane.xlu0 %4226 }
 0xed9   : > { %8171 = vrcp.f32 %v4227_v40 }
 0xeda   : > { %7184 = vmatmul.mubr.msk.f32.gmra.mrb[36].mxu1 %vm12725_vm4, %v4288_v46 }
 0xedb   : > { %v8168_v39 = vpop.eup %8167  ;;  %4626 = vmatprep.mubr.f32.mxu1 %v12179_v45 }
 0xedc   : > { %v4289_v52 = vmul.f32 %v8168_v39, %v10680_v48 }
 0xede   : > { %7185 = vmatmul.mubr.msk.f32.gmra.mrb[38].mxu1 %vm12726_vm11, %v4289_v52 }
 0xedf   : > { %v8170_v37 = vpop.eup %8169  ;;  %4632 = vmatprep.mubr.f32.mxu1 %v12179_v45 }
 0xee0   : > { %v4290_v2 = vmul.f32 %v8170_v37, %v10684_v35 }
 0xee2   : > { %7186 = vmatmul.mubr.msk.f32.gmra.mrb[40].mxu1 %vm12727_vm14, %v4290_v2 }
 0xee3   : > { %v8172_v58 = vpop.eup %8171  ;;  %4638 = vmatprep.mubr.f32.mxu1 %v12179_v45 }
 0xee4   : > { %v4291_v60 = vmul.f32 %v8172_v58, %v10688_v61 }
 0xee6   : > { %7187 = vmatmul.mubr.msk.f32.gmra.mrb[42].mxu1 %vm12728_vm15, %v4291_v60 }
 0xf3d   : > { %v4454_v26 = vpop.f32.mrb[236].mxu1 }
 0xf3e   : > { %v4645_v33 = vmul.f32 %v4454_v26, %v12258_v28  ;;  %v4456_v48 = vpop.f32.mrb[237].mxu1 }
 0xf3f   : > { %v4646_v17 = vmul.f32 %v4456_v48, %v12259_v47 }
 0xf41   : > { %v4460_v5 = vpop.f32.mrb[238].mxu1 }
 0xf42   : > { %v4647_v25 = vmul.f32 %v4460_v5, %v12261_v42  ;;  %v4462_v13 = vpop.f32.mrb[239].mxu1 }
 0xf43   : > { %v4648_v35 = vmul.f32 %v4462_v13, %v12262_v44  ;;  %v12729_v13 = vld [vmem:[#allocation25_spill] sm:$0xff] }
 0xf44   : > { %v7659_v63 = vpack.c.bf16 %v4647_v25, %v4645_v33 }
 0xf45   : > { %v7657_v24 = vpack.c.bf16 %v4648_v35, %v4646_v17  ;;  %v4466_v34 = vpop.f32.mrb[240].mxu1 }
 0xf46   : > { %v4649_v38 = vmul.f32 %v4466_v34, %v12264_v20  ;;  %v4468_v61 = vpop.f32.mrb[241].mxu1 }
 0xf47   : > { %v4650_v43 = vmul.f32 %v4468_v61, %v12434_v4  ;;  %7658 = vmatprep.subr.bf16.mxu0 %v7657_v24  ;;  %v12730_v24 = vld [vmem:[#allocation26_spill] sm:$0xff]  ;;  %v12731_v61 = vld [vmem:[#allocation27_spill] sm:$0xff] }
 0xf48   : > { %7660 = vmatpush1.bf16.msra.mxu0 %v7659_v63 }
 0xf49   : > { %v4472_v16 = vpop.f32.mrb[242].mxu1 }
 0xf4a   : > { %v4651_v6 = vmul.f32 %v4472_v16, %v12435_v53  ;;  %v4474_v14 = vpop.f32.mrb[243].mxu1 }
 0xf4b   : > { %v4652_v18 = vmul.f32 %v4474_v14, %v12436_v3 }
 0xf4c   : > { %v7663_v7 = vpack.c.bf16 %v4651_v6, %v4649_v38  ;;  %v12732_v6 = vld [vmem:[#allocation28_spill] sm:$0xff] }
 0xf4d   : > { %v7661_v59 = vpack.c.bf16 %v4652_v18, %v4650_v43  ;;  %v4478_v51 = vpop.f32.mrb[244].mxu1 }
 0xf4e   : > { %v4653_v21 = vmul.f32 %v4478_v51, %v12437_v23  ;;  %v4480_v19 = vpop.f32.mrb[245].mxu1  ;;  %v12733_v51 = vld [vmem:[#allocation29_spill] sm:$0xff] }
 0xf4f   : > { %v4654_v57 = vmul.f32 %v4480_v19, %v12438_v10  ;;  %7662 = vmatprep.subr.bf16.mxu0 %v7661_v59 }
 0xf50   : > { %7664 = vmatpush1.bf16.msra.mxu0 %v7663_v7 }
 0xf51   : > { %v4484_v32 = vpop.f32.mrb[246].mxu1 }
 0xf52   : > { %v4655_v8 = vmul.f32 %v4484_v32, %v12439_v31  ;;  %v4486_v9 = vpop.f32.mrb[247].mxu1 }
 0xf53   : > { %v4656_v46 = vmul.f32 %v4486_v9, %v12440_v22  ;;  %v12735_v9 = vld [vmem:[#allocation31_spill] sm:$0xff] }
 0xf54   : > { %v7667_v40 = vpack.c.bf16 %v4655_v8, %v4653_v21 }
 0xf55   : > { %v7665_v39 = vpack.c.bf16 %v4656_v46, %v4654_v57  ;;  %v4490_v52 = vpop.f32.mrb[248].mxu1  ;;  %v12734_v57 = vld [vmem:[#allocation30_spill] sm:$0xff] }
 0xf56   : > { %v4657_v37 = vmul.f32 %v4490_v52, %v12441_v41  ;;  %v4492_v2 = vpop.f32.mrb[249].mxu1 }
 0xf57   : > { %v4658_v58 = vmul.f32 %v4492_v2, %v12442_v30  ;;  %7666 = vmatprep.subr.bf16.mxu0 %v7665_v39  ;;  %v12736_v39 = vld [vmem:[#allocation32_spill] sm:$0xff] }
 0xf58   : > { %7668 = vmatpush1.bf16.msra.mxu0 %v7667_v40 }
 0xf59   : > { %v4496_v60 = vpop.f32.mrb[250].mxu1 }
 0xf5a   : > { %v4659_v26 = vmul.f32 %v4496_v60, %v12443_v27  ;;  %v4498_v33 = vpop.f32.mrb[251].mxu1  ;;  %v12737_v60 = vld [vmem:[#allocation33_spill] sm:$0xff] }
 0xf5b   : > { %v4660_v48 = vmul.f32 %v4498_v33, %v12444_v15 }
 0xf5c   : > { %v7671_v17 = vpack.c.bf16 %v4659_v26, %v4657_v37 }
 0xf5d   : > { %v7669_v5 = vpack.c.bf16 %v4660_v48, %v4658_v58  ;;  %v4502_v25 = vpop.f32.mrb[252].mxu1  ;;  %v12738_v48 = vld [vmem:[#allocation34_spill] sm:$0xff] }
 0xf5e   : > { %v4661_v35 = vmul.f32 %v4502_v25, %v12729_v13  ;;  %v4504_v63 = vpop.f32.mrb[253].mxu1  ;;  %v12739_v25 = vld [vmem:[#allocation35_spill] sm:$0xff] }
 0xf5f   : > { %v4662_v34 = vmul.f32 %v4504_v63, %v12730_v24  ;;  %7670 = vmatprep.subr.bf16.mxu0 %v7669_v5 }
 0xf60   : > { %7672 = vmatpush1.bf16.msra.mxu0 %v7671_v17 }
 0xf61   : > { %v4508_v38 = vpop.f32.mrb[254].mxu1 }
 0xf62   : > { %v4663_v43 = vmul.f32 %v4508_v38, %v12731_v61  ;;  %v4510_v16 = vpop.f32.mrb[255].mxu1 }
 0xf63   : > { %v4664_v14 = vmul.f32 %v4510_v16, %v12732_v6 }
 0xf64   : > { %v7675_v18 = vpack.c.bf16 %v4663_v43, %v4661_v35 }
 0xf65   : > { %v7673_v7 = vpack.c.bf16 %v4664_v14, %v4662_v34  ;;  %v4514_v59 = vpop.f32.mrb[0].mxu1  ;;  %v12740_v34 = vld [vmem:[#allocation36_spill] sm:$0xff] }
 0xf66   : > { %v4665_v21 = vmul.f32 %v4514_v59, %v12733_v51  ;;  %v4516_v19 = vpop.f32.mrb[1].mxu1 }
 0xf67   : > { %v4666_v32 = vmul.f32 %v4516_v19, %v12734_v57  ;;  %7674 = vmatprep.subr.bf16.mxu0 %v7673_v7 }
 0xf68   : > { %7676 = vmatpush1.bf16.msra.mxu0 %v7675_v18  ;;  %v12741_v18 = vld [vmem:[#allocation37_spill] sm:$0xff] }
 0xf69   : > { %v4520_v8 = vpop.f32.mrb[2].mxu1 }
 0xf6a   : > { %v4667_v46 = vmul.f32 %v4520_v8, %v12735_v9  ;;  %v4522_v40 = vpop.f32.mrb[3].mxu1  ;;  %v12743_v8 = vld [vmem:[#allocation39_spill] sm:$0xff] }
 0xf6b   : > { %v4668_v52 = vmul.f32 %v4522_v40, %v12736_v39 }
 0xf6c   : > { %v7679_v37 = vpack.c.bf16 %v4667_v46, %v4665_v21  ;;  %v12742_v21 = vld [vmem:[#allocation38_spill] sm:$0xff] }
 0xf6d   : > { %v7677_v2 = vpack.c.bf16 %v4668_v52, %v4666_v32  ;;  %v4526_v58 = vpop.f32.mrb[4].mxu1  ;;  %v12744_v52 = vld [vmem:[#allocation40_spill] sm:$0xff] }
 0xf6e   : > { %v4669_v26 = vmul.f32 %v4526_v58, %v12737_v60  ;;  %v4528_v33 = vpop.f32.mrb[5].mxu1 }
 0xf6f   : > { %v4670_v17 = vmul.f32 %v4528_v33, %v12738_v48  ;;  %7678 = vmatprep.subr.bf16.mxu0 %v7677_v2 }
 0xf70   : > { %7680 = vmatpush1.bf16.msra.mxu0 %v7679_v37 }
 0xf71   : > { %v4532_v5 = vpop.f32.mrb[6].mxu1 }
 0xf72   : > { %v4671_v35 = vmul.f32 %v4532_v5, %v12739_v25  ;;  %v4534_v63 = vpop.f32.mrb[7].mxu1  ;;  %v12745_v5 = vld [vmem:[#allocation41_spill] sm:$0xff] }
 0xf73   : > { %v4672_v38 = vmul.f32 %v4534_v63, %v12740_v34 }
 0xf74   : > { %v7683_v43 = vpack.c.bf16 %v4671_v35, %v4669_v26  ;;  %v12746_v35 = vld [vmem:[#allocation42_spill] sm:$0xff] }
 0xf75   : > { %v7681_v16 = vpack.c.bf16 %v4672_v38, %v4670_v17  ;;  %v4538_v14 = vpop.f32.mrb[8].mxu1 }
 0xf76   : > { %v4673_v7 = vmul.f32 %v4538_v14, %v12741_v18  ;;  %v4540_v59 = vpop.f32.mrb[9].mxu1  ;;  %v12747_v14 = vld [vmem:[#allocation43_spill] sm:$0xff] }
 0xf77   : > { %v4674_v19 = vmul.f32 %v4540_v59, %v12742_v21  ;;  %7682 = vmatprep.subr.bf16.mxu0 %v7681_v16  ;;  %v12748_v59 = vld [vmem:[#allocation44_spill] sm:$0xff] }
 0xf78   : > { %7684 = vmatpush1.bf16.msra.mxu0 %v7683_v43 }
 0xf79   : > { %v4544_v32 = vpop.f32.mrb[10].mxu1 }
 0xf7a   : > { %v4675_v46 = vmul.f32 %v4544_v32, %v12743_v8  ;;  %v4546_v40 = vpop.f32.mrb[11].mxu1 }
 0xf7b   : > { %v4676_v37 = vmul.f32 %v4546_v40, %v12744_v52  ;;  %v12749_v40 = vld [vmem:[#allocation45_spill] sm:$0xff] }
 0xf7c   : > { %v7687_v2 = vpack.c.bf16 %v4675_v46, %v4673_v7  ;;  %v12750_v46 = vld [vmem:[#allocation46_spill] sm:$0xff] }
 0xf7d   : > { %v7685_v58 = vpack.c.bf16 %v4676_v37, %v4674_v19  ;;  %v4550_v33 = vpop.f32.mrb[12].mxu1 }
 0xf7e   : > { %v4677_v26 = vmul.f32 %v4550_v33, %v12745_v5  ;;  %v4552_v17 = vpop.f32.mrb[13].mxu1 }
 0xf7f   : > { %v4678_v63 = vmul.f32 %v4552_v17, %v12746_v35  ;;  %7686 = vmatprep.subr.bf16.mxu0 %v7685_v58  ;;  %v12751_v17 = vld [vmem:[#allocation47_spill] sm:$0xff]  ;;  %v12752_v35 = vld [vmem:[#allocation48_spill] sm:$0xff] }
 0xf80   : > { %7688 = vmatpush1.bf16.msra.mxu0 %v7687_v2 }
 0xf81   : > { %v4556_v38 = vpop.f32.mrb[14].mxu1 }
 0xf82   : > { %v4679_v16 = vmul.f32 %v4556_v38, %v12747_v14  ;;  %v4558_v43 = vpop.f32.mrb[15].mxu1 }
 0xf83   : > { %v4680_v21 = vmul.f32 %v4558_v43, %v12748_v59  ;;  %v12753_v43 = vld [vmem:[#allocation49_spill] sm:$0xff] }
 0xf84   : > { %v7691_v32 = vpack.c.bf16 %v4679_v16, %v4677_v26 }
 0xf85   : > { %v7689_v8 = vpack.c.bf16 %v4680_v21, %v4678_v63  ;;  %v4562_v18 = vpop.f32.mrb[16].mxu1  ;;  %v12754_v63 = vld [vmem:[#allocation50_spill] sm:$0xff] }
 0xf86   : > { %v4681_v7 = vmul.f32 %v4562_v18, %v12749_v40  ;;  %v4564_v19 = vpop.f32.mrb[17].mxu1 }
 0xf87   : > { %v4682_v37 = vmul.f32 %v4564_v19, %v12750_v46  ;;  %7690 = vmatprep.subr.bf16.mxu0 %v7689_v8  ;;  %v12755_v19 = vld [vmem:[#allocation51_spill] sm:$0xff]  ;;  %v12756_v46 = vld [vmem:[#allocation52_spill] sm:$0xff] }
 0xf88   : > { %7692 = vmatpush1.bf16.msra.mxu0 %v7691_v32 }
 0xf89   : > { %v4568_v33 = vpop.f32.mrb[18].mxu1 }
 0xf8a   : > { %v4683_v58 = vmul.f32 %v4568_v33, %v12751_v17  ;;  %v4570_v2 = vpop.f32.mrb[19].mxu1 }
 0xf8b   : > { %v4684_v5 = vmul.f32 %v4570_v2, %v12752_v35  ;;  %v12757_v2 = vld [vmem:[#allocation53_spill] sm:$0xff] }
 0xf8c   : > { %v7695_v38 = vpack.c.bf16 %v4683_v58, %v4681_v7 }
 0xf8d   : > { %v7693_v14 = vpack.c.bf16 %v4684_v5, %v4682_v37  ;;  %v4574_v52 = vpop.f32.mrb[20].mxu1  ;;  %v12758_v37 = vld [vmem:[#allocation54_spill] sm:$0xff] }
 0xf8e   : > { %v4685_v26 = vmul.f32 %v4574_v52, %v12753_v43  ;;  %v4576_v21 = vpop.f32.mrb[21].mxu1 }
 0xf8f   : > { %v4686_v16 = vmul.f32 %v4576_v21, %v12754_v63  ;;  %7694 = vmatprep.subr.bf16.mxu0 %v7693_v14  ;;  %v12759_v21 = vld [vmem:[#allocation55_spill] sm:$0xff]  ;;  %v12760_v63 = vld [vmem:[#allocation56_spill] sm:$0xff] }
 0xf90   : > { %7696 = vmatpush1.bf16.msra.mxu0 %v7695_v38 }
 0xf91   : > { %v4580_v18 = vpop.f32.mrb[22].mxu1 }
 0xf92   : > { %v4687_v8 = vmul.f32 %v4580_v18, %v12755_v19  ;;  %v4582_v32 = vpop.f32.mrb[23].mxu1 }
 0xf93   : > { %v4688_v40 = vmul.f32 %v4582_v32, %v12756_v46  ;;  %v12761_v32 = vld [vmem:[#allocation57_spill] sm:$0xff] }
 0xf94   : > { %v7699_v33 = vpack.c.bf16 %v4687_v8, %v4685_v26 }
 0xf95   : > { %v7697_v17 = vpack.c.bf16 %v4688_v40, %v4686_v16  ;;  %v4586_v59 = vpop.f32.mrb[24].mxu1  ;;  %v12762_v16 = vld [vmem:[#allocation58_spill] sm:$0xff] }
 0xf96   : > { %v4689_v7 = vmul.f32 %v4586_v59, %v12757_v2  ;;  %v4588_v5 = vpop.f32.mrb[25].mxu1 }
 0xf97   : > { %v4690_v58 = vmul.f32 %v4588_v5, %v12758_v37  ;;  %7698 = vmatprep.subr.bf16.mxu0 %v7697_v17  ;;  %v12763_v5 = vld [vmem:[#allocation59_spill] sm:$0xff]  ;;  %v12764_v37 = vld [vmem:[#allocation60_spill] sm:$0xff] }
 0xf98   : > { %7700 = vmatpush1.bf16.msra.mxu0 %v7699_v33 }
 0xf99   : > { %v4592_v52 = vpop.f32.mrb[26].mxu1 }
 0xf9a   : > { %v4691_v14 = vmul.f32 %v4592_v52, %v12759_v21  ;;  %v4594_v38 = vpop.f32.mrb[27].mxu1 }
 0xf9b   : > { %v4692_v43 = vmul.f32 %v4594_v38, %v12760_v63  ;;  %v12765_v38 = vld [vmem:[#allocation61_spill] sm:$0xff] }
 0xf9c   : > { %v7703_v18 = vpack.c.bf16 %v4691_v14, %v4689_v7 }
 0xf9d   : > { %v7701_v19 = vpack.c.bf16 %v4692_v43, %v4690_v58  ;;  %v4598_v35 = vpop.f32.mrb[28].mxu1  ;;  %v12766_v58 = vld [vmem:[#allocation62_spill] sm:$0xff] }
 0xf9e   : > { %v4693_v26 = vmul.f32 %v4598_v35, %v12761_v32  ;;  %v4600_v40 = vpop.f32.mrb[29].mxu1 }
 0xf9f   : > { %v4694_v8 = vmul.f32 %v4600_v40, %v12762_v16  ;;  %7702 = vmatprep.subr.bf16.mxu0 %v7701_v19  ;;  %v12767_v40 = vld [vmem:[#allocation63_spill] sm:$0xff]  ;;  %v12768_v16 = vld [vmem:[#allocation64_spill] sm:$0xff] }
 0xfa0   : > { %7704 = vmatpush1.bf16.msra.mxu0 %v7703_v18 }
 0xfa1   : > { %v4604_v59 = vpop.f32.mrb[30].mxu1 }
 0xfa2   : > { %v4695_v17 = vmul.f32 %v4604_v59, %v12763_v5  ;;  %v4606_v33 = vpop.f32.mrb[31].mxu1 }
 0xfa3   : > { %v4696_v2 = vmul.f32 %v4606_v33, %v12764_v37  ;;  %v12769_v33 = vld [vmem:[#allocation65_spill] sm:$0xff] }
 0xfa4   : > { %v7707_v52 = vpack.c.bf16 %v4695_v17, %v4693_v26 }
 0xfa5   : > { %v7705_v21 = vpack.c.bf16 %v4696_v2, %v4694_v8  ;;  %v4610_v46 = vpop.f32.mrb[32].mxu1  ;;  %v12770_v8 = vld [vmem:[#allocation66_spill] sm:$0xff] }
 0xfa6   : > { %v4697_v7 = vmul.f32 %v4610_v46, %v12765_v38  ;;  %v4612_v43 = vpop.f32.mrb[33].mxu1 }
 0xfa7   : > { %v4698_v14 = vmul.f32 %v4612_v43, %v12766_v58  ;;  %7706 = vmatprep.subr.bf16.mxu0 %v7705_v21  ;;  %v12771_v43 = vld [vmem:[#allocation67_spill] sm:$0xff]  ;;  %v12772_v58 = vld [vmem:[#allocation68_spill] sm:$0xff] }
 0xfa8   : > { %7708 = vmatpush1.bf16.msra.mxu0 %v7707_v52 }
 0xfa9   : > { %v4616_v35 = vpop.f32.mrb[34].mxu1 }
 0xfaa   : > { %v4699_v19 = vmul.f32 %v4616_v35, %v12767_v40  ;;  %v4618_v18 = vpop.f32.mrb[35].mxu1 }
 0xfab   : > { %v4700_v32 = vmul.f32 %v4618_v18, %v12768_v16  ;;  %v12773_v18 = vld [vmem:[#allocation5_spill] sm:$0xff] }
 0xfac   : > { %v7711_v59 = vpack.c.bf16 %v4699_v19, %v4697_v7 }
 0xfad   : > { %v7709_v5 = vpack.c.bf16 %v4700_v32, %v4698_v14  ;;  %v4622_v63 = vpop.f32.mrb[36].mxu1  ;;  %v12774_v14 = vld [vmem:[#allocation7_spill] sm:$0xff] }
 0xfae   : > { %v4701_v26 = vmul.f32 %v4622_v63, %v12769_v33  ;;  %v4624_v2 = vpop.f32.mrb[37].mxu1 }
 0xfaf   : > { %v4702_v17 = vmul.f32 %v4624_v2, %v12770_v8  ;;  %7710 = vmatprep.subr.bf16.mxu0 %v7709_v5  ;;  %v12775_v2 = vld [vmem:[#allocation9_spill] sm:$0xff]  ;;  %v12776_v8 = vld [vmem:[#allocation10_spill] sm:$0xff] }
 0xfb0   : > { %7712 = vmatpush1.bf16.msra.mxu0 %v7711_v59 }
 0xfb1   : > { %v4628_v46 = vpop.f32.mrb[38].mxu1 }
 0xfb2   : > { %v4703_v21 = vmul.f32 %v4628_v46, %v12771_v43  ;;  %v4630_v52 = vpop.f32.mrb[39].mxu1 }
 0xfb3   : > { %v4704_v38 = vmul.f32 %v4630_v52, %v12772_v58  ;;  %v12792_v52 = vld [vmem:[#allocation3_spill] sm:$0xff] }
 0xfb4   : > { %v7715_v35 = vpack.c.bf16 %v4703_v21, %v4701_v26  ;;  %v12778_v26 = vld [vmem:[#allocation70_spill] sm:$0xff] }
 0xfb5   : > { %v7713_v40 = vpack.c.bf16 %v4704_v38, %v4702_v17  ;;  %v4634_v37 = vpop.f32.mrb[40].mxu1  ;;  %v12777_v38 = vmov 1.0   ;;  %vm12779_vm0 = vnez %v12778_v26  ;;  %v12786_v17 = vld [vmem:[#allocation84_spill] sm:$0xff]  ;;  %v12790_v21 = vld [vmem:[#allocation86_spill] sm:$0xff] }
 0xfb6   : > { %v4705_v7 = vmul.f32 %v4634_v37, %v12773_v18  ;;  %v4636_v32 = vpop.f32.mrb[41].mxu1  ;;  %v12780_v37 = vld [vmem:[#allocation2_spill] sm:$0xff]  ;;  %vm12787_vm15 = vnez %v12786_v17 }
 0xfb7   : > { %v4706_v19 = vmul.f32 %v4636_v32, %v12774_v14  ;;  %7714 = vmatprep.subr.bf16.mxu0 %v7713_v40  ;;  %vm12781_vm4 = vnez %v12780_v37  ;;  %v12782_v40 = vld [vmem:[#allocation82_spill] sm:$0xff] }
 0xfb8   : > { %7716 = vmatpush1.bf16.msra.mxu0 %v7715_v35  ;;  %vm12783_vm11 = vnez %v12782_v40 }
 0xfb9   : > { %v4640_v63 = vpop.f32.mrb[42].mxu1 }
 0xfba   : > { %v4707_v5 = vmul.f32 %v4640_v63, %v12775_v2  ;;  %v4642_v59 = vpop.f32.mrb[43].mxu1 }
 0xfbb   : > { %v4708_v33 = vmul.f32 %v4642_v59, %v12776_v8 }
 0xfbc   : > { %v7719_v46 = vpack.c.bf16 %v4707_v5, %v4705_v7 }
 0xfbd   : > { %v7717_v43 = vpack.c.bf16 %v4708_v33, %v4706_v19  ;;  %v12784_v33 = vld [vmem:[#allocation83_spill] sm:$0xff] }
 0xfbe   : > { %vm12785_vm14 = vnez %v12784_v33 }
 0xfbf   : > { %7718 = vmatprep.subr.bf16.mxu0 %v7717_v43  ;;  %v12788_v43 = vld [vmem:[#allocation85_spill] sm:$0xff] }
 0xfc0   : > { %7720 = vmatpush1.bf16.msra.mxu0 %v7719_v46  ;;  %v12795_v46 = vld [vmem:[#allocation4_spill] sm:$0xff] }
 0xfc1   : > { %7721 = vmatprep.subr.bf16.mxu0 %v12104_v11 }
 0xfc3   : > { %7189 = vmatmul.mubr.msk.f32.vlgmr.msra.gmra.mrb[4].mxu0 %vm12779_vm0, %v12777_v38 }
 0xfc4   : > { %7190 = vmatprep.mubr.msk.f32.mxu0 %vm12781_vm4, %v12777_v38  ;;  %7723 = vmatpush1.bf16.msk.msra.mxu0 %vm8796_vm13, %v12693_v55  ;;  %vm12789_vm13 = vnez %v12788_v43 }
 0xfc5   : > { %7724 = vmatprep.subr.bf16.mxu0 %v12104_v11 }
 0xfc7   : > { %7191 = vmatmul.mubr.msk.f32.gmra.mrb[6].mxu0 %vm12783_vm11, %v12777_v38 }
 0xfc8   : > { %7192 = vmatprep.mubr.msk.f32.mxu0 %vm12785_vm14, %v12777_v38  ;;  %7726 = vmatpush1.bf16.msk.msra.mxu0 %vm8831_vm8, %v12693_v55  ;;  %vm12791_vm14 = vnez %v12790_v21 }
 0xfc9   : > { %7727 = vmatprep.subr.bf16.mxu0 %v12104_v11 }
 0xfcb   : > { %7193 = vmatmul.mubr.msk.f32.gmra.mrb[8].mxu0 %vm12787_vm15, %v12777_v38 }
 0xfcc   : > { %7194 = vmatprep.mubr.msk.f32.mxu0 %vm12789_vm13, %v12777_v38  ;;  %7729 = vmatpush1.bf16.msk.msra.mxu0 %vm8855_vm3, %v12693_v55 }
 0xfcd   : > { %7730 = vmatprep.subr.bf16.mxu0 %v12104_v11 }
 0xfcf   : > { %7195 = vmatmul.mubr.msk.f32.gmra.mrb[10].mxu0 %vm12791_vm14, %v12777_v38 }
 0xfd0   : > { %7732 = vmatpush1.bf16.msk.msra.mxu0 %vm8878_vm10, %v12693_v55 }
 0xfd1   : > { %7733 = vmatprep.subr.bf16.mxu0 %v12104_v11 }
 0xfd4   : > { %7735 = vmatpush1.bf16.msk.msra.mxu0 %vm12188_vm1, %v12693_v55 }
 0xfd5   : > { %7736 = vmatprep.subr.bf16.mxu0 %v12104_v11 }
 0xfd8   : > { %7738 = vmatpush1.bf16.msk.msra.mxu0 %vm12189_vm5, %v12693_v55 }
 0xfd9   : > { %7739 = vmatprep.subr.bf16.mxu0 %v12104_v11 }
 0xfdc   : > { %7741 = vmatpush1.bf16.msk.msra.mxu0 %vm8970_vm12, %v12693_v55  ;;  %vm12793_vm12 = vcmask 1044480  }
 0xfdd   : > { %7742 = vmatprep.subr.bf16.mxu0 %v12104_v11 }
 0xfe0   : > { %7744 = vmatpush1.bf16.msk.msra.mxu0 %vm12412_vm9, %v12693_v55  ;;  %vm12794_vm9 = vcmask 261120  }
 0xfe1   : > { %7745 = vmatprep.subr.bf16.mxu0 %v12104_v11  ;;  %vm12797_vm5 = vmmov %vm12794_vm9 }
 0xfe4   : > { %7747 = vmatpush1.bf16.msk.msra.mxu0 %vm12414_vm2, %v12693_v55  ;;  %vm12796_vm2 = vmmov %vm12793_vm12 }
 0xfe5   : > { %7748 = vmatprep.subr.bf16.mxu0 %v12104_v11 }
 0xfe8   : > { %7750 = vmatpush1.bf16.msk.msra.mxu0 %vm12416_vm6, %v12693_v55 }
 0xfe9   : > { %7220 = vmatprep.subr.msk.mxu0 %vm12793_vm12, %v12792_v52  ;;  %vm12798_vm12 = vmmov %vm12797_vm5 }
0x1096   : > { %v4775_v35 = vpop.f32.mrb[4].mxu0 }
0x1097   : > { %v4777_v7 = vpop.f32.mrb[5].mxu0  ;;  %v4798_v19 = vmul.f32 %v4775_v35, %v4775_v35 }
0x1098   : > { %v4799_v32 = vmul.f32 %v4777_v7, %v4777_v7 }
0x109a   : > { %v4781_v63 = vpop.f32.mrb[6].mxu0  ;;  %7216 = vmatprep.mubr.msk.f32.mxu0 %vm12794_vm9, %v4799_v32  ;;  %vm12799_vm9 = vmmov %vm12797_vm5 }
0x109b   : > { %v4783_v5 = vpop.f32.mrb[7].mxu0  ;;  %4883 = vmatmul.mubr.f32.vlgmr.msra.gmra.mrb[12].mxu0 %v4798_v19  ;;  %v4800_v1 = vmul.f32 %v4781_v63, %v4781_v63 }
0x109c   : > { %v4801_v59 = vmul.f32 %v4783_v5, %v4783_v5  ;;  %7221 = vmatpush1.msk.msra.mxu0 %vm12796_vm2, %v12795_v46 }
0x109e   : > { %v4787_v29 = vpop.f32.mrb[8].mxu0  ;;  %7217 = vmatprep.mubr.msk.f32.mxu0 %vm12797_vm5, %v4801_v59  ;;  %vm12800_vm5 = vcmask 39936  }
0x109f   : > { %v4789_v56 = vpop.f32.mrb[9].mxu0  ;;  %4888 = vmatmul.mubr.f32.gmra.mrb[14].mxu0 %v4800_v1  ;;  %v4802_v36 = vmul.f32 %v4787_v29, %v4787_v29  ;;  %vm12801_vm2 = vmmov %vm12800_vm5 }
0x10a0   : > { %v4803_v54 = vmul.f32 %v4789_v56, %v4789_v56 }
0x10a2   : > { %v4793_v62 = vpop.f32.mrb[10].mxu0  ;;  %7218 = vmatprep.mubr.msk.f32.mxu0 %vm12798_vm12, %v4803_v54  ;;  %vm12802_vm12 = vmmov %vm12801_vm2 }
0x10a3   : > { %v4795_v0 = vpop.f32.mrb[11].mxu0  ;;  %4893 = vmatmul.mubr.f32.gmra.mrb[16].mxu0 %v4802_v36  ;;  %v4804_v21 = vmul.f32 %v4793_v62, %v4793_v62 }
0x10a4   : > { %v4805_v32 = vmul.f32 %v4795_v0, %v4795_v0 }
0x10a6   : > { %7219 = vmatprep.mubr.msk.f32.mxu0 %vm12799_vm9, %v4805_v32  ;;  %vm12803_vm9 = vmmov %vm12801_vm2 }
0x10a7   : > { %4898 = vmatmul.mubr.f32.gmra.mrb[18].mxu0 %v4804_v21 }
0x10a8   : > { %4983 = vmatprep.mubr.f32.mxu0 %v12179_v45 }
0x116e   : > { %v4884_v19 = vpop.f32.mrb[12].mxu0 }
0x116f   : > { %v4885_v12 = vadd.f32 1e-07, %v4884_v19  ;;  %v4886_v43 = vpop.f32.mrb[13].mxu0 }
0x1171   : > { %8173 = vrsqrt.f32 %v4885_v12 }
0x1172   : > { %v4889_v59 = vpop.f32.mrb[14].mxu0 }
0x1173   : > { %v4890_v1 = vadd.f32 1e-07, %v4889_v59  ;;  %v4891_v17 = vpop.f32.mrb[15].mxu0 }
0x1175   : > { %8175 = vrsqrt.f32 %v4890_v1 }
0x1176   : > { %v4894_v50 = vpop.f32.mrb[16].mxu0 }
0x1177   : > { %v4895_v33 = vadd.f32 1e-07, %v4894_v50  ;;  %v4896_v54 = vpop.f32.mrb[17].mxu0 }
0x1179   : > { %8177 = vrsqrt.f32 %v4895_v33 }
0x117a   : > { %v4899_v36 = vpop.f32.mrb[18].mxu0 }
0x117b   : > { %v8174_v40 = vpop.eup %8173  ;;  %v4900_v49 = vadd.f32 1e-07, %v4899_v36  ;;  %v4901_v55 = vpop.f32.mrb[19].mxu0 }
0x117c   : > { %7222 = vmatmul.mubr.msk.f32.vlgmr.msra.gmra.mrb[20].mxu0 %vm12800_vm5, %v8174_v40  ;;  %vm12804_vm5 = vcmask 1044480  }
0x117d   : > { %8179 = vrsqrt.f32 %v4900_v49  ;;  %4989 = vmatprep.mubr.f32.mxu0 %v12179_v45 }
0x117f   : > { %v8176_v21 = vpop.eup %8175 }
0x1180   : > { %7223 = vmatmul.mubr.msk.f32.gmra.mrb[22].mxu0 %vm12801_vm2, %v8176_v21  ;;  %vm12806_vm2 = vcmask 261120  }
0x1181   : > { %4995 = vmatprep.mubr.f32.mxu0 %v12179_v45  ;;  %vm12811_vm6 = vmmov %vm12806_vm2 }
0x1183   : > { %v8178_v12 = vpop.eup %8177 }
0x1184   : > { %7224 = vmatmul.mubr.msk.f32.gmra.mrb[24].mxu0 %vm12802_vm12, %v8178_v12  ;;  %vm12807_vm12 = vmmov %vm12804_vm5 }
0x1185   : > { %5001 = vmatprep.mubr.f32.mxu0 %v12179_v45 }
0x1187   : > { %v8180_v50 = vpop.eup %8179 }
0x1188   : > { %7225 = vmatmul.mubr.msk.f32.gmra.mrb[26].mxu0 %vm12803_vm9, %v8180_v50  ;;  %vm12809_vm9 = vmmov %vm12806_vm2 }
0x1189   : > { %5080 = vmatprep.mubr.f32.mxu0 %v12179_v45 }
0x124f   : > { %v4985_v55 = vpop.f32.mrb[20].mxu0 }
0x1250   : > { %v5008_v40 = vmul.f32 %v4985_v55, %v4775_v35  ;;  %v4987_v49 = vpop.f32.mrb[21].mxu0  ;;  %v12826_v55 = vld [vmem:[#allocation98_spill] sm:$0xff] }
0x1251   : > { %v5009_v33 = vmul.f32 %v4987_v49, %v4777_v7  ;;  %v12805_v7 = vld [vmem:[#allocation87_spill] sm:$0xff]  ;;  %v12830_v49 = vld [vmem:[#allocation100_spill] sm:$0xff] }
0x1253   : > { %v4991_v17 = vpop.f32.mrb[22].mxu0 }
0x1254   : > { %v5010_v43 = vmul.f32 %v4991_v17, %v4781_v63  ;;  %v4993_v32 = vpop.f32.mrb[23].mxu0  ;;  %v12823_v63 = vld [vmem:[#allocation96_spill] sm:$0xff]  ;;  %v12833_v17 = vld [vmem:[#allocation102_spill] sm:$0xff] }
0x1255   : > { %v5011_v19 = vmul.f32 %v4993_v32, %v4783_v5  ;;  %v12824_v5 = vld [vmem:[#allocation97_spill] sm:$0xff]  ;;  %v12837_v32 = vld [vmem:[#allocation104_spill] sm:$0xff] }
0x1256   : > { %v7753_v59 = vpack.c.bf16 %v5010_v43, %v5008_v40  ;;  %v12828_v40 = vld [vmem:[#allocation99_spill] sm:$0xff] }
0x1257   : > { %v7751_v1 = vpack.c.bf16 %v5011_v19, %v5009_v33  ;;  %v4997_v54 = vpop.f32.mrb[24].mxu0  ;;  %v12832_v33 = vld [vmem:[#allocation101_spill] sm:$0xff]  ;;  %v12835_v43 = vld [vmem:[#allocation103_spill] sm:$0xff] }
0x1258   : > { %v5012_v36 = vmul.f32 %v4997_v54, %v4787_v29  ;;  %v4999_v21 = vpop.f32.mrb[25].mxu0  ;;  %v12808_v29 = vld [vmem:[#allocation88_spill] sm:$0xff]  ;;  %v12839_v19 = vld [vmem:[#allocation79_spill] sm:$0xff] }
0x1259   : > { %v5013_v12 = vmul.f32 %v4999_v21, %v4789_v56  ;;  %7752 = vmatprep.subr.bf16.mxu0 %v7751_v1  ;;  %v12815_v56 = vld [vmem:[#allocation92_spill] sm:$0xff]  ;;  %v12842_v1 = vld [vmem:[#allocation106_spill] sm:$0xff]  ;;  %v12844_v54 = vld [vmem:[#allocation107_spill] sm:$0xff] }
0x125a   : > { %7754 = vmatpush1.bf16.msra.mxu0 %v7753_v59  ;;  %v12841_v59 = vld [vmem:[#allocation105_spill] sm:$0xff] }
0x125b   : > { %v5003_v37 = vpop.f32.mrb[26].mxu0  ;;  %v12848_v21 = vld [vmem:[#allocation109_spill] sm:$0xff] }
0x125c   : > { %v5014_v50 = vmul.f32 %v5003_v37, %v4793_v62  ;;  %v5005_v26 = vpop.f32.mrb[27].mxu0  ;;  %v12814_v62 = vld [vmem:[#allocation91_spill] sm:$0xff] }
0x125d   : > { %v5015_v11 = vmul.f32 %v5005_v26, %v4795_v0  ;;  %v12810_v0 = vld [vmem:[#allocation89_spill] sm:$0xff]  ;;  %v12819_v26 = vld [vmem:[#allocation94_spill] sm:$0xff]  ;;  %v12821_v37 = vld [vmem:[#allocation95_spill] sm:$0xff] }
0x125e   : > { %v7757_v38 = vpack.c.bf16 %v5014_v50, %v5012_v36  ;;  %v12846_v36 = vld [vmem:[#allocation108_spill] sm:$0xff]  ;;  %v12851_v50 = vld [vmem:[#allocation111_spill] sm:$0xff] }
0x125f   : > { %v7755_v35 = vpack.c.bf16 %v5015_v11, %v5013_v12  ;;  %v12812_v11 = vld [vmem:[#allocation90_spill] sm:$0xff] }
0x1260   : > { %v12850_v12 = vld [vmem:[#allocation110_spill] sm:$0xff] }
0x1261   : > { %7756 = vmatprep.subr.bf16.mxu0 %v7755_v35  ;;  %v12853_v35 = vld [vmem:[#allocation112_spill] sm:$0xff] }
0x1262   : > { %7758 = vmatpush1.bf16.msra.mxu0 %v7757_v38  ;;  %v12817_v38 = vld [vmem:[#allocation93_spill] sm:$0xff] }
0x1263   : > { %7310 = vmatprep.subr.msk.mxu0 %vm12804_vm5, %v12792_v52  ;;  %vm12813_vm5 = vmmov %vm12806_vm2 }
0x1265   : > { %7226 = vmatmul.mubr.msk.f32.vlgmr.msra.gmra.mrb[28].mxu0 %vm12806_vm2, %v12805_v7  ;;  %v12855_v7 = vld [vmem:[#allocation113_spill] sm:$0xff] }
0x1266   : > { %5086 = vmatprep.mubr.f32.mxu0 %v12179_v45  ;;  %7311 = vmatpush1.msk.msra.mxu0 %vm12807_vm12, %v12795_v46  ;;  %vm12816_vm12 = vmmov %vm12806_vm2 }
0x1269   : > { %7227 = vmatmul.mubr.msk.f32.gmra.mrb[30].mxu0 %vm12809_vm9, %v12808_v29  ;;  %vm12818_vm9 = vmmov %vm12806_vm2  ;;  %v12857_v29 = vld [vmem:[#allocation114_spill] sm:$0xff] }
0x126a   : > { %5092 = vmatprep.mubr.f32.mxu0 %v12179_v45 }
0x126d   : > { %7228 = vmatmul.mubr.msk.f32.gmra.mrb[32].mxu0 %vm12811_vm6, %v12810_v0  ;;  %vm12820_vm6 = vmmov %vm12806_vm2  ;;  %v12859_v0 = vld [vmem:[#allocation115_spill] sm:$0xff] }
0x126e   : > { %5098 = vmatprep.mubr.f32.mxu0 %v12179_v45 }
0x1271   : > { %7229 = vmatmul.mubr.msk.f32.gmra.mrb[34].mxu0 %vm12813_vm5, %v12812_v11  ;;  %vm12822_vm5 = vmmov %vm12806_vm2  ;;  %v12860_v11 = vld [vmem:[#allocation116_spill] sm:$0xff] }
0x1272   : > { %5104 = vmatprep.mubr.f32.mxu0 %v12179_v45 }
0x1275   : > { %7230 = vmatmul.mubr.msk.f32.gmra.mrb[36].mxu0 %vm12806_vm2, %v12814_v62  ;;  %v12862_v62 = vld [vmem:[#allocation117_spill] sm:$0xff] }
0x1276   : > { %5110 = vmatprep.mubr.f32.mxu0 %v12179_v45 }
0x1279   : > { %7231 = vmatmul.mubr.msk.f32.gmra.mrb[38].mxu0 %vm12816_vm12, %v12815_v56  ;;  %vm12825_vm12 = vmmov %vm12806_vm2 }
0x127a   : > { %5116 = vmatprep.mubr.f32.mxu0 %v12179_v45 }
0x127d   : > { %7232 = vmatmul.mubr.msk.f32.gmra.mrb[40].mxu0 %vm12818_vm9, %v12817_v38  ;;  %vm12827_vm9 = vmmov %vm12806_vm2 }
0x127e   : > { %5122 = vmatprep.mubr.f32.mxu0 %v12179_v45 }
0x1281   : > { %7233 = vmatmul.mubr.msk.f32.gmra.mrb[42].mxu0 %vm12820_vm6, %v12819_v26  ;;  %vm12829_vm6 = vmmov %vm12806_vm2 }
0x1282   : > { %5128 = vmatprep.mubr.f32.mxu0 %v12179_v45 }
0x1285   : > { %7234 = vmatmul.mubr.msk.f32.gmra.mrb[44].mxu0 %vm12822_vm5, %v12821_v37  ;;  %vm12831_vm5 = vmmov %vm12806_vm2 }
0x1286   : > { %5134 = vmatprep.mubr.f32.mxu0 %v12179_v45 }
0x1289   : > { %7235 = vmatmul.mubr.msk.f32.gmra.mrb[46].mxu0 %vm12806_vm2, %v12823_v63 }
0x128a   : > { %5140 = vmatprep.mubr.f32.mxu0 %v12179_v45 }
0x128d   : > { %7236 = vmatmul.mubr.msk.f32.gmra.mrb[48].mxu0 %vm12825_vm12, %v12824_v5  ;;  %vm12834_vm12 = vmmov %vm12806_vm2 }
0x128e   : > { %5146 = vmatprep.mubr.f32.mxu0 %v12179_v45 }
0x1291   : > { %7237 = vmatmul.mubr.msk.f32.gmra.mrb[50].mxu0 %vm12827_vm9, %v12826_v55  ;;  %vm12836_vm9 = vmmov %vm12806_vm2 }
0x1292   : > { %5152 = vmatprep.mubr.f32.mxu0 %v12179_v45 }
0x1295   : > { %7238 = vmatmul.mubr.msk.f32.gmra.mrb[52].mxu0 %vm12829_vm6, %v12828_v40  ;;  %vm12838_vm6 = vmmov %vm12806_vm2 }
0x1296   : > { %5158 = vmatprep.mubr.f32.mxu0 %v12179_v45 }
0x1299   : > { %7239 = vmatmul.mubr.msk.f32.gmra.mrb[54].mxu0 %vm12831_vm5, %v12830_v49  ;;  %vm12840_vm5 = vmmov %vm12806_vm2 }
0x129a   : > { %5164 = vmatprep.mubr.f32.mxu0 %v12179_v45 }
0x129d   : > { %7240 = vmatmul.mubr.msk.f32.gmra.mrb[56].mxu0 %vm12806_vm2, %v12832_v33 }
0x129e   : > { %5170 = vmatprep.mubr.f32.mxu0 %v12179_v45 }
0x12a1   : > { %7241 = vmatmul.mubr.msk.f32.gmra.mrb[58].mxu0 %vm12834_vm12, %v12833_v17  ;;  %vm12843_vm12 = vmmov %vm12806_vm2 }
0x12a2   : > { %5176 = vmatprep.mubr.f32.mxu0 %v12179_v45 }
0x12a5   : > { %7242 = vmatmul.mubr.msk.f32.gmra.mrb[60].mxu0 %vm12836_vm9, %v12835_v43  ;;  %vm12845_vm9 = vmmov %vm12806_vm2 }
0x12a6   : > { %5182 = vmatprep.mubr.f32.mxu0 %v12179_v45 }
0x12a9   : > { %7243 = vmatmul.mubr.msk.f32.gmra.mrb[62].mxu0 %vm12838_vm6, %v12837_v32  ;;  %vm12847_vm6 = vmmov %vm12806_vm2 }
0x12aa   : > { %5188 = vmatprep.mubr.f32.mxu0 %v12179_v45 }
0x12ad   : > { %7244 = vmatmul.mubr.msk.f32.gmra.mrb[64].mxu0 %vm12840_vm5, %v12839_v19  ;;  %vm12849_vm5 = vmmov %vm12806_vm2 }
0x12ae   : > { %5194 = vmatprep.mubr.f32.mxu0 %v12179_v45 }
0x12b1   : > { %7245 = vmatmul.mubr.msk.f32.gmra.mrb[66].mxu0 %vm12806_vm2, %v12841_v59 }
0x12b2   : > { %5200 = vmatprep.mubr.f32.mxu0 %v12179_v45 }
0x12b5   : > { %7246 = vmatmul.mubr.msk.f32.gmra.mrb[68].mxu0 %vm12843_vm12, %v12842_v1  ;;  %vm12852_vm12 = vmmov %vm12806_vm2 }
0x12b6   : > { %5206 = vmatprep.mubr.f32.mxu0 %v12179_v45 }
0x12b9   : > { %7247 = vmatmul.mubr.msk.f32.gmra.mrb[70].mxu0 %vm12845_vm9, %v12844_v54  ;;  %vm12854_vm9 = vmmov %vm12806_vm2 }
0x12ba   : > { %5212 = vmatprep.mubr.f32.mxu0 %v12179_v45 }
0x12bd   : > { %7248 = vmatmul.mubr.msk.f32.gmra.mrb[72].mxu0 %vm12847_vm6, %v12846_v36  ;;  %vm12856_vm6 = vmmov %vm12806_vm2 }
0x12be   : > { %5218 = vmatprep.mubr.f32.mxu0 %v12179_v45 }
0x12c1   : > { %7249 = vmatmul.mubr.msk.f32.gmra.mrb[74].mxu0 %vm12849_vm5, %v12848_v21  ;;  %vm12858_vm5 = vmmov %vm12806_vm2 }
0x12c2   : > { %5224 = vmatprep.mubr.f32.mxu0 %v12179_v45 }
0x12c5   : > { %7250 = vmatmul.mubr.msk.f32.gmra.mrb[76].mxu0 %vm12806_vm2, %v12850_v12 }
0x12c6   : > { %5230 = vmatprep.mubr.f32.mxu0 %v12179_v45 }
0x12c9   : > { %7251 = vmatmul.mubr.msk.f32.gmra.mrb[78].mxu0 %vm12852_vm12, %v12851_v50  ;;  %vm12861_vm12 = vmmov %vm12806_vm2 }
0x12ca   : > { %5236 = vmatprep.mubr.f32.mxu0 %v12179_v45 }
0x12cd   : > { %7252 = vmatmul.mubr.msk.f32.gmra.mrb[80].mxu0 %vm12854_vm9, %v12853_v35  ;;  %vm12863_vm9 = vmmov %vm12806_vm2 }
0x12ce   : > { %5242 = vmatprep.mubr.f32.mxu0 %v12179_v45 }
0x12d1   : > { %7253 = vmatmul.mubr.msk.f32.gmra.mrb[82].mxu0 %vm12856_vm6, %v12855_v7  ;;  %vm12864_vm6 = vmmov %vm12806_vm2 }
0x12d2   : > { %5248 = vmatprep.mubr.f32.mxu0 %v12179_v45 }
0x12d5   : > { %7254 = vmatmul.mubr.msk.f32.gmra.mrb[84].mxu0 %vm12858_vm5, %v12857_v29  ;;  %vm12865_vm5 = vmmov %vm12806_vm2 }
0x12d6   : > { %5254 = vmatprep.mubr.f32.mxu0 %v12179_v45 }
0x12d9   : > { %7255 = vmatmul.mubr.msk.f32.gmra.mrb[86].mxu0 %vm12806_vm2, %v12859_v0 }
0x12da   : > { %5260 = vmatprep.mubr.f32.mxu0 %v12179_v45 }
0x12dd   : > { %7256 = vmatmul.mubr.msk.f32.gmra.mrb[88].mxu0 %vm12861_vm12, %v12860_v11  ;;  %vm12866_vm12 = vmmov %vm12806_vm2 }
0x12de   : > { %5266 = vmatprep.mubr.f32.mxu0 %v12179_v45 }
0x12e1   : > { %7257 = vmatmul.mubr.msk.f32.gmra.mrb[90].mxu0 %vm12863_vm9, %v12862_v62  ;;  %vm12867_vm9 = vmmov %vm12806_vm2 }
0x12e2   : > { %6170 = vmatprep.mubr.f32.mxu0 %v12179_v45 }
0x1338   : > { %v5082_v56 = vpop.f32.mrb[28].mxu0 }
0x1339   : > { %v5273_v38 = vmul.f32 %v5082_v56, %v12258_v28  ;;  %v5084_v26 = vpop.f32.mrb[29].mxu0 }
0x133a   : > { %v5274_v37 = vmul.f32 %v5084_v26, %v12259_v47 }
0x133c   : > { %v5088_v63 = vpop.f32.mrb[30].mxu0  ;;  %7278 = vmatprep.mubr.msk.f32.mxu1 %vm12864_vm6, %v5274_v37  ;;  %vm12868_vm6 = vmmov %vm12806_vm2 }
0x133d   : > { %v5275_v5 = vmul.f32 %v5088_v63, %v12261_v42  ;;  %v5090_v55 = vpop.f32.mrb[31].mxu0  ;;  %5498 = vmatmul.mubr.f32.vlgmr.msra.gmra.mrb[44].mxu1 %v5273_v38 }
0x133e   : > { %v5276_v40 = vmul.f32 %v5090_v55, %v12262_v44 }
0x1340   : > { %v5094_v49 = vpop.f32.mrb[32].mxu0  ;;  %7279 = vmatprep.mubr.msk.f32.mxu1 %vm12865_vm5, %v5276_v40  ;;  %vm12869_vm5 = vmmov %vm12806_vm2 }
0x1341   : > { %v5277_v33 = vmul.f32 %v5094_v49, %v12264_v20  ;;  %v5096_v17 = vpop.f32.mrb[33].mxu0  ;;  %5503 = vmatmul.mubr.f32.gmra.mrb[46].mxu1 %v5275_v5 }
0x1342   : > { %v5278_v43 = vmul.f32 %v5096_v17, %v12434_v4 }
0x1344   : > { %v5100_v32 = vpop.f32.mrb[34].mxu0  ;;  %7280 = vmatprep.mubr.msk.f32.mxu1 %vm12806_vm2, %v5278_v43 }
0x1345   : > { %v5279_v19 = vmul.f32 %v5100_v32, %v12435_v53  ;;  %v5102_v59 = vpop.f32.mrb[35].mxu0  ;;  %5508 = vmatmul.mubr.f32.gmra.mrb[48].mxu1 %v5277_v33 }
0x1346   : > { %v5280_v1 = vmul.f32 %v5102_v59, %v12436_v3 }
0x1348   : > { %v5106_v54 = vpop.f32.mrb[36].mxu0  ;;  %7281 = vmatprep.mubr.msk.f32.mxu1 %vm12866_vm12, %v5280_v1  ;;  %vm12870_vm12 = vmmov %vm12806_vm2 }
0x1349   : > { %v5281_v36 = vmul.f32 %v5106_v54, %v12437_v23  ;;  %v5108_v21 = vpop.f32.mrb[37].mxu0  ;;  %5513 = vmatmul.mubr.f32.gmra.mrb[50].mxu1 %v5279_v19 }
0x134a   : > { %v5282_v12 = vmul.f32 %v5108_v21, %v12438_v10 }
0x134c   : > { %v5112_v50 = vpop.f32.mrb[38].mxu0  ;;  %7282 = vmatprep.mubr.msk.f32.mxu1 %vm12867_vm9, %v5282_v12  ;;  %vm12871_vm9 = vmmov %vm12806_vm2 }
0x134d   : > { %v5283_v35 = vmul.f32 %v5112_v50, %v12439_v31  ;;  %v5114_v7 = vpop.f32.mrb[39].mxu0  ;;  %5518 = vmatmul.mubr.f32.gmra.mrb[52].mxu1 %v5281_v36 }
0x134e   : > { %v5284_v29 = vmul.f32 %v5114_v7, %v12440_v22 }
0x1350   : > { %v5118_v0 = vpop.f32.mrb[40].mxu0  ;;  %7283 = vmatprep.mubr.msk.f32.mxu1 %vm12868_vm6, %v5284_v29  ;;  %vm12872_vm6 = vmmov %vm12806_vm2 }
0x1351   : > { %v5285_v11 = vmul.f32 %v5118_v0, %v12441_v41  ;;  %v5120_v62 = vpop.f32.mrb[41].mxu0  ;;  %5523 = vmatmul.mubr.f32.gmra.mrb[54].mxu1 %v5283_v35 }
0x1352   : > { %v5286_v56 = vmul.f32 %v5120_v62, %v12442_v30 }
0x1354   : > { %v5124_v38 = vpop.f32.mrb[42].mxu0  ;;  %7284 = vmatprep.mubr.msk.f32.mxu1 %vm12869_vm5, %v5286_v56  ;;  %vm12873_vm5 = vmmov %vm12806_vm2 }
0x1355   : > { %v5287_v26 = vmul.f32 %v5124_v38, %v12443_v27  ;;  %v5126_v37 = vpop.f32.mrb[43].mxu0  ;;  %5528 = vmatmul.mubr.f32.gmra.mrb[56].mxu1 %v5285_v11 }
0x1356   : > { %v5288_v63 = vmul.f32 %v5126_v37, %v12444_v15  ;;  %v12875_v37 = vld [vmem:[#allocation37_spill] sm:$0xff] }
0x1358   : > { %v5130_v5 = vpop.f32.mrb[44].mxu0  ;;  %7285 = vmatprep.mubr.msk.f32.mxu1 %vm12806_vm2, %v5288_v63 }
0x1359   : > { %v5289_v55 = vmul.f32 %v5130_v5, %v12729_v13  ;;  %v5132_v40 = vpop.f32.mrb[45].mxu0  ;;  %5533 = vmatmul.mubr.f32.gmra.mrb[58].mxu1 %v5287_v26 }
0x135a   : > { %v5290_v49 = vmul.f32 %v5132_v40, %v12730_v24 }
0x135c   : > { %v5136_v33 = vpop.f32.mrb[46].mxu0  ;;  %7286 = vmatprep.mubr.msk.f32.mxu1 %vm12870_vm12, %v5290_v49  ;;  %vm12874_vm12 = vmmov %vm12806_vm2 }
0x135d   : > { %v5291_v17 = vmul.f32 %v5136_v33, %v12731_v61  ;;  %v5138_v43 = vpop.f32.mrb[47].mxu0  ;;  %5538 = vmatmul.mubr.f32.gmra.mrb[60].mxu1 %v5289_v55  ;;  %v12876_v55 = vld [vmem:[#allocation38_spill] sm:$0xff]  ;;  %v12878_v33 = vld [vmem:[#allocation39_spill] sm:$0xff] }
0x135e   : > { %v5292_v32 = vmul.f32 %v5138_v43, %v12732_v6 }
0x1360   : > { %v5142_v19 = vpop.f32.mrb[48].mxu0  ;;  %7287 = vmatprep.mubr.msk.f32.mxu1 %vm12871_vm9, %v5292_v32  ;;  %vm12877_vm9 = vmmov %vm12806_vm2  ;;  %v12879_v32 = vld [vmem:[#allocation40_spill] sm:$0xff] }
0x1361   : > { %v5293_v59 = vmul.f32 %v5142_v19, %v12733_v51  ;;  %v5144_v1 = vpop.f32.mrb[49].mxu0  ;;  %5543 = vmatmul.mubr.f32.gmra.mrb[62].mxu1 %v5291_v17 }
0x1362   : > { %v5294_v54 = vmul.f32 %v5144_v1, %v12734_v57  ;;  %v12881_v1 = vld [vmem:[#allocation41_spill] sm:$0xff] }
0x1364   : > { %v5148_v36 = vpop.f32.mrb[50].mxu0  ;;  %7288 = vmatprep.mubr.msk.f32.mxu1 %vm12872_vm6, %v5294_v54  ;;  %vm12880_vm6 = vmmov %vm12806_vm2 }
0x1365   : > { %v5295_v21 = vmul.f32 %v5148_v36, %v12735_v9  ;;  %v5150_v12 = vpop.f32.mrb[51].mxu0  ;;  %5548 = vmatmul.mubr.f32.gmra.mrb[64].mxu1 %v5293_v59 }
0x1366   : > { %v5296_v50 = vmul.f32 %v5150_v12, %v12736_v39 }
0x1368   : > { %v5154_v35 = vpop.f32.mrb[52].mxu0  ;;  %7289 = vmatprep.mubr.msk.f32.mxu1 %vm12873_vm5, %v5296_v50  ;;  %vm12883_vm5 = vmmov %vm12806_vm2 }
0x1369   : > { %v5297_v7 = vmul.f32 %v5154_v35, %v12737_v60  ;;  %v5156_v29 = vpop.f32.mrb[53].mxu0  ;;  %5553 = vmatmul.mubr.f32.gmra.mrb[66].mxu1 %v5295_v21  ;;  %v12882_v21 = vld [vmem:[#allocation42_spill] sm:$0xff]  ;;  %v12884_v35 = vld [vmem:[#allocation43_spill] sm:$0xff] }
0x136a   : > { %v5298_v0 = vmul.f32 %v5156_v29, %v12738_v48 }
0x136c   : > { %v5160_v11 = vpop.f32.mrb[54].mxu0  ;;  %7290 = vmatprep.mubr.msk.f32.mxu1 %vm12806_vm2, %v5298_v0  ;;  %v12885_v0 = vld [vmem:[#allocation44_spill] sm:$0xff] }
0x136d   : > { %v5299_v62 = vmul.f32 %v5160_v11, %v12739_v25  ;;  %v5162_v56 = vpop.f32.mrb[55].mxu0  ;;  %5558 = vmatmul.mubr.f32.gmra.mrb[68].mxu1 %v5297_v7 }
0x136e   : > { %v5300_v38 = vmul.f32 %v5162_v56, %v12740_v34  ;;  %v12886_v56 = vld [vmem:[#allocation45_spill] sm:$0xff] }
0x1370   : > { %v5166_v26 = vpop.f32.mrb[56].mxu0  ;;  %7291 = vmatprep.mubr.msk.f32.mxu1 %vm12874_vm12, %v5300_v38  ;;  %vm12888_vm12 = vmmov %vm12806_vm2 }
0x1371   : > { %v5301_v63 = vmul.f32 %v5166_v26, %v12875_v37  ;;  %v5168_v5 = vpop.f32.mrb[57].mxu0  ;;  %5563 = vmatmul.mubr.f32.gmra.mrb[70].mxu1 %v5299_v62 }
0x1372   : > { %v5302_v40 = vmul.f32 %v5168_v5, %v12876_v55 }
0x1374   : > { %v5172_v49 = vpop.f32.mrb[58].mxu0  ;;  %7292 = vmatprep.mubr.msk.f32.mxu1 %vm12877_vm9, %v5302_v40  ;;  %vm12891_vm9 = vmmov %vm12806_vm2 }
0x1375   : > { %v5303_v17 = vmul.f32 %v5172_v49, %v12878_v33  ;;  %v5174_v43 = vpop.f32.mrb[59].mxu0  ;;  %5568 = vmatmul.mubr.f32.gmra.mrb[72].mxu1 %v5301_v63  ;;  %v12887_v63 = vld [vmem:[#allocation46_spill] sm:$0xff]  ;;  %v12889_v49 = vld [vmem:[#allocation47_spill] sm:$0xff] }
0x1376   : > { %v5304_v19 = vmul.f32 %v5174_v43, %v12879_v32 }
0x1378   : > { %v5178_v59 = vpop.f32.mrb[60].mxu0  ;;  %7293 = vmatprep.mubr.msk.f32.mxu1 %vm12880_vm6, %v5304_v19  ;;  %v12890_v19 = vld [vmem:[#allocation48_spill] sm:$0xff]  ;;  %vm12894_vm6 = vmmov %vm12806_vm2 }
0x1379   : > { %v5305_v54 = vmul.f32 %v5178_v59, %v12881_v1  ;;  %v5180_v36 = vpop.f32.mrb[61].mxu0  ;;  %5573 = vmatmul.mubr.f32.gmra.mrb[74].mxu1 %v5303_v17 }
0x137a   : > { %v5306_v12 = vmul.f32 %v5180_v36, %v12882_v21  ;;  %v12892_v36 = vld [vmem:[#allocation49_spill] sm:$0xff] }
0x137c   : > { %v5184_v50 = vpop.f32.mrb[62].mxu0  ;;  %7294 = vmatprep.mubr.msk.f32.mxu1 %vm12883_vm5, %v5306_v12  ;;  %vm12897_vm5 = vmmov %vm12806_vm2 }
0x137d   : > { %v5307_v7 = vmul.f32 %v5184_v50, %v12884_v35  ;;  %v5186_v29 = vpop.f32.mrb[63].mxu0  ;;  %5578 = vmatmul.mubr.f32.gmra.mrb[76].mxu1 %v5305_v54 }
0x137e   : > { %v5308_v11 = vmul.f32 %v5186_v29, %v12885_v0  ;;  %v12893_v29 = vld [vmem:[#allocation50_spill] sm:$0xff] }
0x1380   : > { %v5190_v62 = vpop.f32.mrb[64].mxu0  ;;  %7295 = vmatprep.mubr.msk.f32.mxu1 %vm12806_vm2, %v5308_v11 }
0x1381   : > { %v5309_v38 = vmul.f32 %v5190_v62, %v12886_v56  ;;  %v5192_v26 = vpop.f32.mrb[65].mxu0  ;;  %5583 = vmatmul.mubr.f32.gmra.mrb[78].mxu1 %v5307_v7  ;;  %v12895_v62 = vld [vmem:[#allocation51_spill] sm:$0xff] }
0x1382   : > { %v5310_v5 = vmul.f32 %v5192_v26, %v12887_v63 }
0x1384   : > { %v5196_v40 = vpop.f32.mrb[66].mxu0  ;;  %7296 = vmatprep.mubr.msk.f32.mxu1 %vm12888_vm12, %v5310_v5  ;;  %vm12902_vm12 = vmmov %vm12806_vm2 }
0x1385   : > { %v5311_v17 = vmul.f32 %v5196_v40, %v12889_v49  ;;  %v5198_v43 = vpop.f32.mrb[67].mxu0  ;;  %5588 = vmatmul.mubr.f32.gmra.mrb[80].mxu1 %v5309_v38  ;;  %v12896_v40 = vld [vmem:[#allocation52_spill] sm:$0xff] }
0x1386   : > { %v5312_v59 = vmul.f32 %v5198_v43, %v12890_v19  ;;  %v12898_v43 = vld [vmem:[#allocation53_spill] sm:$0xff] }
0x1388   : > { %v5202_v54 = vpop.f32.mrb[68].mxu0  ;;  %7297 = vmatprep.mubr.msk.f32.mxu1 %vm12891_vm9, %v5312_v59  ;;  %vm12905_vm9 = vmmov %vm12806_vm2 }
0x1389   : > { %v5313_v12 = vmul.f32 %v5202_v54, %v12892_v36  ;;  %v5204_v50 = vpop.f32.mrb[69].mxu0  ;;  %5593 = vmatmul.mubr.f32.gmra.mrb[82].mxu1 %v5311_v17  ;;  %v12899_v54 = vld [vmem:[#allocation54_spill] sm:$0xff] }
0x138a   : > { %v5314_v7 = vmul.f32 %v5204_v50, %v12893_v29  ;;  %v12900_v50 = vld [vmem:[#allocation55_spill] sm:$0xff] }
0x138c   : > { %v5208_v11 = vpop.f32.mrb[70].mxu0  ;;  %7298 = vmatprep.mubr.msk.f32.mxu1 %vm12894_vm6, %v5314_v7  ;;  %vm12908_vm6 = vmmov %vm12806_vm2 }
0x138d   : > { %v5315_v26 = vmul.f32 %v5208_v11, %v12895_v62  ;;  %v5210_v5 = vpop.f32.mrb[71].mxu0  ;;  %5598 = vmatmul.mubr.f32.gmra.mrb[84].mxu1 %v5313_v12  ;;  %v12901_v11 = vld [vmem:[#allocation56_spill] sm:$0xff] }
0x138e   : > { %v5316_v38 = vmul.f32 %v5210_v5, %v12896_v40  ;;  %v12903_v5 = vld [vmem:[#allocation57_spill] sm:$0xff] }
0x1390   : > { %v5214_v46 = vpop.f32.mrb[72].mxu0  ;;  %7299 = vmatprep.mubr.msk.f32.mxu1 %vm12897_vm5, %v5316_v38  ;;  %vm12911_vm5 = vmmov %vm12806_vm2 }
0x1391   : > { %v5317_v59 = vmul.f32 %v5214_v46, %v12898_v43  ;;  %v5216_v52 = vpop.f32.mrb[73].mxu0  ;;  %5603 = vmatmul.mubr.f32.gmra.mrb[86].mxu1 %v5315_v26  ;;  %v12904_v46 = vld [vmem:[#allocation58_spill] sm:$0xff] }
0x1392   : > { %v5318_v17 = vmul.f32 %v5216_v52, %v12899_v54  ;;  %v12906_v52 = vld [vmem:[#allocation59_spill] sm:$0xff] }
0x1394   : > { %v5220_v36 = vpop.f32.mrb[74].mxu0  ;;  %7300 = vmatprep.mubr.msk.f32.mxu1 %vm12806_vm2, %v5318_v17 }
0x1395   : > { %v5319_v7 = vmul.f32 %v5220_v36, %v12900_v50  ;;  %v5222_v29 = vpop.f32.mrb[75].mxu0  ;;  %5608 = vmatmul.mubr.f32.gmra.mrb[88].mxu1 %v5317_v59  ;;  %v12907_v36 = vld [vmem:[#allocation60_spill] sm:$0xff] }
0x1396   : > { %v5320_v12 = vmul.f32 %v5222_v29, %v12901_v11  ;;  %v12909_v29 = vld [vmem:[#allocation61_spill] sm:$0xff] }
0x1398   : > { %v5226_v62 = vpop.f32.mrb[76].mxu0  ;;  %7301 = vmatprep.mubr.msk.f32.mxu1 %vm12902_vm12, %v5320_v12  ;;  %vm12915_vm12 = vmmov %vm12806_vm2 }
0x1399   : > { %v5321_v38 = vmul.f32 %v5226_v62, %v12903_v5  ;;  %v5228_v40 = vpop.f32.mrb[77].mxu0  ;;  %5613 = vmatmul.mubr.f32.gmra.mrb[90].mxu1 %v5319_v7  ;;  %v12910_v62 = vld [vmem:[#allocation62_spill] sm:$0xff] }
0x139a   : > { %v5322_v26 = vmul.f32 %v5228_v40, %v12904_v46  ;;  %v12912_v40 = vld [vmem:[#allocation63_spill] sm:$0xff] }
0x139c   : > { %v5232_v43 = vpop.f32.mrb[78].mxu0  ;;  %7302 = vmatprep.mubr.msk.f32.mxu1 %vm12905_vm9, %v5322_v26  ;;  %vm12917_vm9 = vmmov %vm12806_vm2 }
0x139d   : > { %v5323_v17 = vmul.f32 %v5232_v43, %v12906_v52  ;;  %v5234_v54 = vpop.f32.mrb[79].mxu0  ;;  %5618 = vmatmul.mubr.f32.gmra.mrb[92].mxu1 %v5321_v38 }
0x139e   : > { %v5324_v59 = vmul.f32 %v5234_v54, %v12907_v36  ;;  %v12913_v54 = vld [vmem:[#allocation65_spill] sm:$0xff] }
0x13a0   : > { %v5238_v50 = vpop.f32.mrb[80].mxu0  ;;  %7303 = vmatprep.mubr.msk.f32.mxu1 %vm12908_vm6, %v5324_v59  ;;  %vm12918_vm6 = vmmov %vm12806_vm2 }
0x13a1   : > { %v5325_v12 = vmul.f32 %v5238_v50, %v12909_v29  ;;  %v5240_v11 = vpop.f32.mrb[81].mxu0  ;;  %5623 = vmatmul.mubr.f32.gmra.mrb[94].mxu1 %v5323_v17  ;;  %v12914_v50 = vld [vmem:[#allocation66_spill] sm:$0xff] }
0x13a2   : > { %v5326_v7 = vmul.f32 %v5240_v11, %v12910_v62  ;;  %v12916_v11 = vld [vmem:[#allocation67_spill] sm:$0xff] }
0x13a4   : > { %v5244_v5 = vpop.f32.mrb[82].mxu0  ;;  %7304 = vmatprep.mubr.msk.f32.mxu1 %vm12911_vm5, %v5326_v7  ;;  %vm12919_vm5 = vmmov %vm12806_vm2 }
0x13a5   : > { %v5327_v26 = vmul.f32 %v5244_v5, %v12912_v40  ;;  %v5246_v46 = vpop.f32.mrb[83].mxu0  ;;  %5628 = vmatmul.mubr.f32.gmra.mrb[96].mxu1 %v5325_v12 }
0x13a6   : > { %v5328_v43 = vmul.f32 %v5246_v46, %v12768_v16 }
0x13a8   : > { %v5250_v38 = vpop.f32.mrb[84].mxu0  ;;  %7305 = vmatprep.mubr.msk.f32.mxu1 %vm12806_vm2, %v5328_v43  ;;  %vm12922_vm2 = vcmask 39936  }
0x13a9   : > { %v5329_v59 = vmul.f32 %v5250_v38, %v12913_v54  ;;  %v5252_v36 = vpop.f32.mrb[85].mxu0  ;;  %5633 = vmatmul.mubr.f32.gmra.mrb[98].mxu1 %v5327_v26 }
0x13aa   : > { %v5330_v17 = vmul.f32 %v5252_v36, %v12914_v50 }
0x13ac   : > { %v5256_v29 = vpop.f32.mrb[86].mxu0  ;;  %7306 = vmatprep.mubr.msk.f32.mxu1 %vm12915_vm12, %v5330_v17  ;;  %vm12923_vm12 = vmmov %vm12922_vm2 }
0x13ad   : > { %v5331_v7 = vmul.f32 %v5256_v29, %v12916_v11  ;;  %v5258_v62 = vpop.f32.mrb[87].mxu0  ;;  %5638 = vmatmul.mubr.f32.gmra.mrb[100].mxu1 %v5329_v59 }
0x13ae   : > { %v5332_v5 = vmul.f32 %v5258_v62, %v12772_v58  ;;  %v12920_v62 = vmov 1.0  }
0x13b0   : > { %v5262_v12 = vpop.f32.mrb[88].mxu0  ;;  %7307 = vmatprep.mubr.msk.f32.mxu1 %vm12917_vm9, %v5332_v5  ;;  %vm12924_vm9 = vmmov %vm12922_vm2 }
0x13b1   : > { %v5333_v46 = vmul.f32 %v5262_v12, %v12773_v18  ;;  %v5264_v43 = vpop.f32.mrb[89].mxu0  ;;  %5643 = vmatmul.mubr.f32.gmra.mrb[102].mxu1 %v5331_v7 }
0x13b2   : > { %v5334_v26 = vmul.f32 %v5264_v43, %v12774_v14 }
0x13b4   : > { %v5268_v38 = vpop.f32.mrb[90].mxu0  ;;  %7308 = vmatprep.mubr.msk.f32.mxu1 %vm12918_vm6, %v5334_v26  ;;  %vm12926_vm6 = vmmov %vm12922_vm2 }
0x13b5   : > { %v5335_v36 = vmul.f32 %v5268_v38, %v12775_v2  ;;  %v5270_v17 = vpop.f32.mrb[91].mxu0  ;;  %5648 = vmatmul.mubr.f32.gmra.mrb[104].mxu1 %v5333_v46 }
0x13b6   : > { %v5336_v29 = vmul.f32 %v5270_v17, %v12776_v8 }
0x13b8   : > { %7309 = vmatprep.mubr.msk.f32.mxu1 %vm12919_vm5, %v5336_v29  ;;  %vm12927_vm5 = vmmov %vm12922_vm2 }
0x13b9   : > { %5653 = vmatmul.mubr.f32.gmra.mrb[106].mxu1 %v5335_v36 }
0x13ba   : > { %7344 = vmatprep.mubr.msk.f32.mxu1 %vm12347_vm7, %v12920_v62  ;;  %vm12925_vm7 = vmmov %vm12922_vm2 }
0x1410   : > { %v11167_v5 = vpop.f32.mrb[44].mxu1 }
0x1411   : > { %v5501_v7 = vpop.f32.mrb[45].mxu1  ;;  %v5658_v12 = vsel %vm12922_vm2, %v11167_v5, -inf }
0x1412   : > { %5659 = vmax.xlane.f32.xlu1 %v5658_v12 }
0x1414   : > { %v11171_v43 = vpop.f32.mrb[46].mxu1 }
0x1415   : > { %v5506_v26 = vpop.f32.mrb[47].mxu1  ;;  %v5661_v46 = vsel %vm12923_vm12, %v11171_v43, -inf  ;;  %vm12928_vm12 = vmmov %vm12922_vm2 }
0x1416   : > { %5662 = vmax.xlane.f32.xlu0 %v5661_v46 }
0x1418   : > { %v11175_v38 = vpop.f32.mrb[48].mxu1 }
0x1419   : > { %v5511_v36 = vpop.f32.mrb[49].mxu1  ;;  %v5664_v17 = vsel %vm12924_vm9, %v11175_v38, -inf  ;;  %vm12929_vm9 = vmmov %vm12922_vm2 }
0x141a   : > { %5665 = vmax.xlane.f32.xlu1 %v5664_v17 }
0x141c   : > { %v11179_v29 = vpop.f32.mrb[50].mxu1 }
0x141d   : > { %v5516_v59 = vpop.f32.mrb[51].mxu1  ;;  %v5667_v7 = vsel %vm12925_vm7, %v11179_v29, -inf  ;;  %vm12930_vm7 = vmmov %vm12922_vm2 }
0x141e   : > { %5668 = vmax.xlane.f32.xlu0 %v5667_v7 }
0x1420   : > { %v11183_v12 = vpop.f32.mrb[52].mxu1 }
0x1421   : > { %v5521_v26 = vpop.f32.mrb[53].mxu1  ;;  %v5670_v46 = vsel %vm12926_vm6, %v11183_v12, -inf  ;;  %vm12931_vm6 = vmmov %vm12922_vm2 }
0x1422   : > { %5671 = vmax.xlane.f32.xlu1 %v5670_v46 }
0x1424   : > { %v11187_v62 = vpop.f32.mrb[54].mxu1 }
0x1425   : > { %v5526_v36 = vpop.f32.mrb[55].mxu1  ;;  %v5673_v17 = vsel %vm12927_vm5, %v11187_v62, -inf  ;;  %vm12932_vm5 = vmmov %vm12922_vm2 }
0x1426   : > { %5674 = vmax.xlane.f32.xlu0 %v5673_v17 }
0x1428   : > { %v11191_v8 = vpop.f32.mrb[56].mxu1 }
0x1429   : > { %v5531_v59 = vpop.f32.mrb[57].mxu1  ;;  %v5676_v7 = vsel %vm12922_vm2, %v11191_v8, -inf }
0x142a   : > { %5677 = vmax.xlane.f32.xlu1 %v5676_v7 }
0x142c   : > { %v11195_v2 = vpop.f32.mrb[58].mxu1 }
0x142d   : > { %v5536_v26 = vpop.f32.mrb[59].mxu1  ;;  %v5679_v46 = vsel %vm12928_vm12, %v11195_v2, -inf  ;;  %vm12933_vm12 = vmmov %vm12922_vm2 }
0x142e   : > { %5680 = vmax.xlane.f32.xlu0 %v5679_v46 }
0x1430   : > { %v11199_v14 = vpop.f32.mrb[60].mxu1 }
0x1431   : > { %v5541_v36 = vpop.f32.mrb[61].mxu1  ;;  %v5682_v17 = vsel %vm12929_vm9, %v11199_v14, -inf  ;;  %vm12934_vm9 = vmmov %vm12922_vm2 }
0x1432   : > { %5683 = vmax.xlane.f32.xlu1 %v5682_v17 }
0x1434   : > { %v11203_v18 = vpop.f32.mrb[62].mxu1 }
0x1435   : > { %v5546_v59 = vpop.f32.mrb[63].mxu1  ;;  %v5685_v7 = vsel %vm12930_vm7, %v11203_v18, -inf  ;;  %vm12935_vm7 = vmmov %vm12922_vm2 }
0x1436   : > { %5686 = vmax.xlane.f32.xlu0 %v5685_v7 }
0x1438   : > { %v11207_v58 = vpop.f32.mrb[64].mxu1 }
0x1439   : > { %v5551_v26 = vpop.f32.mrb[65].mxu1  ;;  %v5688_v46 = vsel %vm12931_vm6, %v11207_v58, -inf  ;;  %vm12936_vm6 = vmmov %vm12922_vm2 }
0x143a   : > { %5689 = vmax.xlane.f32.xlu1 %v5688_v46 }
0x143c   : > { %v11211_v11 = vpop.f32.mrb[66].mxu1 }
0x143d   : > { %v5556_v36 = vpop.f32.mrb[67].mxu1  ;;  %v5691_v17 = vsel %vm12932_vm5, %v11211_v11, -inf  ;;  %vm12937_vm5 = vmmov %vm12922_vm2 }
0x143e   : > { %5692 = vmax.xlane.f32.xlu0 %v5691_v17 }
0x1440   : > { %v11215_v50 = vpop.f32.mrb[68].mxu1 }
0x1441   : > { %v5561_v59 = vpop.f32.mrb[69].mxu1  ;;  %v5694_v7 = vsel %vm12922_vm2, %v11215_v50, -inf }
0x1442   : > { %5695 = vmax.xlane.f32.xlu1 %v5694_v7 }
0x1444   : > { %v11219_v54 = vpop.f32.mrb[70].mxu1 }
0x1445   : > { %v5566_v26 = vpop.f32.mrb[71].mxu1  ;;  %v5697_v46 = vsel %vm12933_vm12, %v11219_v54, -inf  ;;  %vm12938_vm12 = vmmov %vm12922_vm2 }
0x1446   : > { %5698 = vmax.xlane.f32.xlu0 %v5697_v46 }
0x1448   : > { %v11223_v16 = vpop.f32.mrb[72].mxu1 }
0x1449   : > { %v5571_v36 = vpop.f32.mrb[73].mxu1  ;;  %v5700_v17 = vsel %vm12934_vm9, %v11223_v16, -inf  ;;  %vm12939_vm9 = vmmov %vm12922_vm2 }
0x144a   : > { %5701 = vmax.xlane.f32.xlu1 %v5700_v17 }
0x144c   : > { %v11227_v40 = vpop.f32.mrb[74].mxu1 }
0x144d   : > { %v5576_v59 = vpop.f32.mrb[75].mxu1  ;;  %v5703_v7 = vsel %vm12935_vm7, %v11227_v40, -inf  ;;  %vm12940_vm7 = vmmov %vm12922_vm2 }
0x144e   : > { %5704 = vmax.xlane.f32.xlu0 %v5703_v7 }
0x1450   : > { %v11231_v52 = vpop.f32.mrb[76].mxu1 }
0x1451   : > { %v5581_v26 = vpop.f32.mrb[77].mxu1  ;;  %v5706_v46 = vsel %vm12936_vm6, %v11231_v52, -inf  ;;  %vm12941_vm6 = vmmov %vm12922_vm2 }
0x1452   : > { %5707 = vmax.xlane.f32.xlu1 %v5706_v46 }
0x1454   : > { %v11235_v19 = vpop.f32.mrb[78].mxu1 }
0x1455   : > { %v5586_v36 = vpop.f32.mrb[79].mxu1  ;;  %v5709_v17 = vsel %vm12937_vm5, %v11235_v19, -inf  ;;  %vm12942_vm5 = vmmov %vm12922_vm2 }
0x1456   : > { %5710 = vmax.xlane.f32.xlu0 %v5709_v17 }
0x1458   : > { %v11239_v49 = vpop.f32.mrb[80].mxu1 }
0x1459   : > { %v5591_v59 = vpop.f32.mrb[81].mxu1  ;;  %v5712_v7 = vsel %vm12922_vm2, %v11239_v49, -inf }
0x145a   : > { %5713 = vmax.xlane.f32.xlu1 %v5712_v7 }
0x145c   : > { %v11243_v63 = vpop.f32.mrb[82].mxu1 }
0x145d   : > { %v5596_v26 = vpop.f32.mrb[83].mxu1  ;;  %v5715_v46 = vsel %vm12938_vm12, %v11243_v63, -inf  ;;  %vm12943_vm12 = vmmov %vm12922_vm2 }
0x145e   : > { %5716 = vmax.xlane.f32.xlu0 %v5715_v46 }
0x1460   : > { %v11247_v56 = vpop.f32.mrb[84].mxu1 }
0x1461   : > { %v5601_v36 = vpop.f32.mrb[85].mxu1  ;;  %v5718_v17 = vsel %vm12939_vm9, %v11247_v56, -inf  ;;  %vm12944_vm9 = vmmov %vm12922_vm2 }
0x1462   : > { %5719 = vmax.xlane.f32.xlu1 %v5718_v17 }
0x1464   : > { %v11251_v0 = vpop.f32.mrb[86].mxu1 }
0x1465   : > { %v5606_v59 = vpop.f32.mrb[87].mxu1  ;;  %v5721_v7 = vsel %vm12940_vm7, %v11251_v0, -inf  ;;  %vm12945_vm7 = vmmov %vm12922_vm2 }
0x1466   : > { %5722 = vmax.xlane.f32.xlu0 %v5721_v7 }
0x1468   : > { %v11255_v35 = vpop.f32.mrb[88].mxu1 }
0x1469   : > { %v5611_v26 = vpop.f32.mrb[89].mxu1  ;;  %v5724_v46 = vsel %vm12941_vm6, %v11255_v35, -inf  ;;  %vm12946_vm6 = vmmov %vm12922_vm2 }
0x146a   : > { %5725 = vmax.xlane.f32.xlu1 %v5724_v46 }
0x146c   : > { %v11259_v21 = vpop.f32.mrb[90].mxu1 }
0x146d   : > { %v5616_v36 = vpop.f32.mrb[91].mxu1  ;;  %v5727_v17 = vsel %vm12942_vm5, %v11259_v21, -inf  ;;  %vm12947_vm5 = vmmov %vm12922_vm2 }
0x146e   : > { %5728 = vmax.xlane.f32.xlu1 %v5727_v17 }
0x1470   : > { %v11263_v1 = vpop.f32.mrb[92].mxu1 }
0x1471   : > { %v5621_v59 = vpop.f32.mrb[93].mxu1  ;;  %v5730_v7 = vsel %vm12922_vm2, %v11263_v1, -inf }
0x1472   : > { %5731 = vmax.xlane.f32.xlu1 %v5730_v7 }
0x1474   : > { %v11267_v32 = vpop.f32.mrb[94].mxu1 }
0x1475   : > { %v5626_v26 = vpop.f32.mrb[95].mxu1  ;;  %v5733_v46 = vsel %vm12943_vm12, %v11267_v32, -inf  ;;  %vm12948_vm12 = vmmov %vm12922_vm2 }
0x1476   : > { %5734 = vmax.xlane.f32.xlu1 %v5733_v46 }
0x1478   : > { %v11271_v33 = vpop.f32.mrb[96].mxu1 }
0x1479   : > { %v5631_v36 = vpop.f32.mrb[97].mxu1  ;;  %v5736_v17 = vsel %vm12944_vm9, %v11271_v33, -inf  ;;  %vm12949_vm9 = vmmov %vm12922_vm2 }
0x147a   : > { %5737 = vmax.xlane.f32.xlu1 %v5736_v17 }
0x147c   : > { %v11275_v55 = vpop.f32.mrb[98].mxu1 }
0x147d   : > { %v5636_v59 = vpop.f32.mrb[99].mxu1  ;;  %v5739_v7 = vsel %vm12945_vm7, %v11275_v55, -inf  ;;  %vm12950_vm7 = vmmov %vm12922_vm2 }
0x147e   : > { %5740 = vmax.xlane.f32.xlu1 %v5739_v7 }
0x1480   : > { %v11279_v37 = vpop.f32.mrb[100].mxu1 }
0x1481   : > { %v5641_v26 = vpop.f32.mrb[101].mxu1  ;;  %v5742_v46 = vsel %vm12946_vm6, %v11279_v37, -inf  ;;  %vm12951_vm6 = vmmov %vm12922_vm2 }
0x1482   : > { %5743 = vmax.xlane.f32.xlu1 %v5742_v46 }
0x1484   : > { %v11283_v34 = vpop.f32.mrb[102].mxu1 }
0x1485   : > { %v5646_v36 = vpop.f32.mrb[103].mxu1  ;;  %v5745_v17 = vsel %vm12947_vm5, %v11283_v34, -inf  ;;  %vm12952_vm5 = vmmov %vm12922_vm2 }
0x1486   : > { %5746 = vmax.xlane.f32.xlu1 %v5745_v17 }
0x1488   : > { %v11287_v25 = vpop.f32.mrb[104].mxu1 }
0x1489   : > { %v5651_v59 = vpop.f32.mrb[105].mxu1  ;;  %v5748_v7 = vsel %vm12922_vm2, %v11287_v25, -inf }
0x148a   : > { %5749 = vmax.xlane.f32.xlu1 %v5748_v7 }
0x148c   : > { %v11291_v48 = vpop.f32.mrb[106].mxu1 }
0x148d   : > { %v5656_v26 = vpop.f32.mrb[107].mxu1  ;;  %v5751_v46 = vsel %vm12948_vm12, %v11291_v48, -inf  ;;  %vm12953_vm12 = vmmov %vm12922_vm2 }
0x148e   : > { %5752 = vmax.xlane.f32.xlu1 %v5751_v46 }
0x149f   : > { %v5660_v60 = vpop.xlane.xlu1 %5659 }
0x14a0   : > { %v5754_v36 = vsub.f32 %v11167_v5, %v5660_v60 }
0x14a2   : > { %v5786_v39 = vmul.f32 1.442695, %v5754_v36 }
0x14a3   : > { %v5663_v9 = vpop.xlane.xlu0 %5662 }
0x14a4   : > { %8181 = vpow2.f32 %v5786_v39  ;;  %v5755_v17 = vsub.f32 %v11171_v43, %v5663_v9 }
0x14a6   : > { %v5788_v59 = vmul.f32 1.442695, %v5755_v17 }
0x14a7   : > { %v5666_v57 = vpop.xlane.xlu1 %5665 }
0x14a8   : > { %8183 = vpow2.f32 %v5788_v59  ;;  %v5756_v7 = vsub.f32 %v11175_v38, %v5666_v57 }
0x14aa   : > { %v5790_v51 = vmul.f32 1.442695, %v5756_v7 }
0x14ab   : > { %v5669_v6 = vpop.xlane.xlu0 %5668 }
0x14ac   : > { %8185 = vpow2.f32 %v5790_v51  ;;  %v5757_v26 = vsub.f32 %v11179_v29, %v5669_v6 }
0x14ae   : > { %v11299_v61 = vpop.eup %8181  ;;  %v5792_v46 = vmul.f32 1.442695, %v5757_v26 }
0x14af   : > { %v5672_v24 = vpop.xlane.xlu1 %5671  ;;  %v5850_v60 = vsel %vm12949_vm9, %v11299_v61, 0.0  ;;  %vm12954_vm9 = vmmov %vm12922_vm2 }
0x14b0   : > { %8187 = vpow2.f32 %v5792_v46  ;;  %v5758_v9 = vsub.f32 %v11183_v12, %v5672_v24  ;;  %5851 = vadd.xlane.f32.xlu0 %v5850_v60 }
0x14b2   : > { %v11304_v39 = vpop.eup %8183  ;;  %v5794_v5 = vmul.f32 1.442695, %v5758_v9 }
0x14b3   : > { %v5675_v57 = vpop.xlane.xlu0 %5674  ;;  %v5853_v51 = vsel %vm12950_vm7, %v11304_v39, 0.0  ;;  %vm12955_vm7 = vmmov %vm12922_vm2 }
0x14b4   : > { %8189 = vpow2.f32 %v5794_v5  ;;  %v5759_v6 = vsub.f32 %v11187_v62, %v5675_v57  ;;  %5854 = vadd.xlane.f32.xlu0 %v5853_v51 }
0x14b6   : > { %v11309_v43 = vpop.eup %8185  ;;  %v5796_v38 = vmul.f32 1.442695, %v5759_v6 }
0x14b7   : > { %v5678_v29 = vpop.xlane.xlu1 %5677  ;;  %v5856_v36 = vsel %vm12951_vm6, %v11309_v43, 0.0  ;;  %vm12956_vm6 = vmmov %vm12922_vm2 }
0x14b8   : > { %8191 = vpow2.f32 %v5796_v38  ;;  %v5760_v24 = vsub.f32 %v11191_v8, %v5678_v29  ;;  %5857 = vadd.xlane.f32.xlu0 %v5856_v36 }
0x14ba   : > { %v11314_v12 = vpop.eup %8187  ;;  %v5798_v17 = vmul.f32 1.442695, %v5760_v24 }
0x14bb   : > { %v5681_v59 = vpop.xlane.xlu0 %5680  ;;  %v5859_v7 = vsel %vm12952_vm5, %v11314_v12, 0.0  ;;  %vm12957_vm5 = vmmov %vm12922_vm2 }
0x14bc   : > { %8193 = vpow2.f32 %v5798_v17  ;;  %v5761_v62 = vsub.f32 %v11195_v2, %v5681_v59  ;;  %5860 = vadd.xlane.f32.xlu0 %v5859_v7 }
0x14be   : > { %v11319_v26 = vpop.eup %8189  ;;  %v5800_v46 = vmul.f32 1.442695, %v5761_v62 }
0x14bf   : > { %v5684_v60 = vpop.xlane.xlu1 %5683  ;;  %v5862_v9 = vsel %vm12922_vm2, %v11319_v26, 0.0 }
0x14c0   : > { %8195 = vpow2.f32 %v5800_v46  ;;  %v5762_v8 = vsub.f32 %v11199_v14, %v5684_v60  ;;  %5863 = vadd.xlane.f32.xlu0 %v5862_v9 }
0x14c2   : > { %v11324_v5 = vpop.eup %8191  ;;  %v5802_v57 = vmul.f32 1.442695, %v5762_v8 }
0x14c3   : > { %v5687_v51 = vpop.xlane.xlu0 %5686  ;;  %v5865_v6 = vsel %vm12953_vm12, %v11324_v5, 0.0  ;;  %vm12958_vm12 = vmmov %vm12922_vm2 }
0x14c4   : > { %8197 = vpow2.f32 %v5802_v57  ;;  %v5763_v2 = vsub.f32 %v11203_v18, %v5687_v51  ;;  %5866 = vadd.xlane.f32.xlu0 %v5865_v6 }
0x14c6   : > { %v11329_v38 = vpop.eup %8193  ;;  %v5804_v29 = vmul.f32 1.442695, %v5763_v2 }
0x14c7   : > { %v5690_v36 = vpop.xlane.xlu1 %5689  ;;  %v5868_v24 = vsel %vm12954_vm9, %v11329_v38, 0.0  ;;  %vm12959_vm9 = vmmov %vm12922_vm2 }
0x14c8   : > { %8199 = vpow2.f32 %v5804_v29  ;;  %v5764_v14 = vsub.f32 %v11207_v58, %v5690_v36  ;;  %5869 = vadd.xlane.f32.xlu0 %v5868_v24 }
0x14ca   : > { %v11334_v17 = vpop.eup %8195  ;;  %v5806_v59 = vmul.f32 1.442695, %v5764_v14 }
0x14cb   : > { %v5693_v7 = vpop.xlane.xlu0 %5692  ;;  %v5871_v62 = vsel %vm12955_vm7, %v11334_v17, 0.0  ;;  %vm12960_vm7 = vmmov %vm12922_vm2 }
0x14cc   : > { %8201 = vpow2.f32 %v5806_v59  ;;  %v5765_v18 = vsub.f32 %v11211_v11, %v5693_v7  ;;  %5872 = vadd.xlane.f32.xlu0 %v5871_v62 }
0x14ce   : > { %v11339_v46 = vpop.eup %8197  ;;  %v5808_v60 = vmul.f32 1.442695, %v5765_v18 }
0x14cf   : > { %v5696_v9 = vpop.xlane.xlu1 %5695  ;;  %v5874_v8 = vsel %vm12956_vm6, %v11339_v46, 0.0  ;;  %vm12961_vm6 = vmmov %vm12922_vm2 }
0x14d0   : > { %8203 = vpow2.f32 %v5808_v60  ;;  %v5766_v58 = vsub.f32 %v11215_v50, %v5696_v9  ;;  %5875 = vadd.xlane.f32.xlu0 %v5874_v8 }
0x14d2   : > { %v11344_v57 = vpop.eup %8199  ;;  %v5810_v51 = vmul.f32 1.442695, %v5766_v58 }
0x14d3   : > { %v5699_v6 = vpop.xlane.xlu0 %5698  ;;  %v5877_v2 = vsel %vm12957_vm5, %v11344_v57, 0.0  ;;  %vm12962_vm5 = vmmov %vm12922_vm2 }
0x14d4   : > { %8205 = vpow2.f32 %v5810_v51  ;;  %v5767_v11 = vsub.f32 %v11219_v54, %v5699_v6  ;;  %5878 = vadd.xlane.f32.xlu0 %v5877_v2 }
0x14d6   : > { %v11349_v29 = vpop.eup %8201  ;;  %v5812_v36 = vmul.f32 1.442695, %v5767_v11 }
0x14d7   : > { %v5702_v24 = vpop.xlane.xlu1 %5701  ;;  %v5880_v14 = vsel %vm12922_vm2, %v11349_v29, 0.0 }
0x14d8   : > { %8207 = vpow2.f32 %v5812_v36  ;;  %v5768_v50 = vsub.f32 %v11223_v16, %v5702_v24  ;;  %5881 = vadd.xlane.f32.xlu1 %v5880_v14 }
0x14da   : > { %v11354_v59 = vpop.eup %8203  ;;  %v5814_v7 = vmul.f32 1.442695, %v5768_v50 }
0x14db   : > { %v5705_v62 = vpop.xlane.xlu0 %5704  ;;  %v5883_v18 = vsel %vm12958_vm12, %v11354_v59, 0.0  ;;  %vm12963_vm12 = vmmov %vm12922_vm2 }
0x14dc   : > { %8209 = vpow2.f32 %v5814_v7  ;;  %v5769_v54 = vsub.f32 %v11227_v40, %v5705_v62  ;;  %5884 = vadd.xlane.f32.xlu0 %v5883_v18 }
0x14de   : > { %v11359_v60 = vpop.eup %8205  ;;  %v5816_v9 = vmul.f32 1.442695, %v5769_v54 }
0x14df   : > { %v5708_v8 = vpop.xlane.xlu1 %5707  ;;  %v5886_v58 = vsel %vm12959_vm9, %v11359_v60, 0.0  ;;  %vm12964_vm9 = vmmov %vm12922_vm2 }
0x14e0   : > { %8211 = vpow2.f32 %v5816_v9  ;;  %v5770_v16 = vsub.f32 %v11231_v52, %v5708_v8  ;;  %5887 = vadd.xlane.f32.xlu1 %v5886_v58 }
0x14e2   : > { %v11364_v51 = vpop.eup %8207  ;;  %v5818_v6 = vmul.f32 1.442695, %v5770_v16 }
0x14e3   : > { %v5711_v2 = vpop.xlane.xlu0 %5710  ;;  %v5889_v11 = vsel %vm12960_vm7, %v11364_v51, 0.0  ;;  %vm12965_vm7 = vmmov %vm12922_vm2 }
0x14e4   : > { %8213 = vpow2.f32 %v5818_v6  ;;  %v5771_v40 = vsub.f32 %v11235_v19, %v5711_v2  ;;  %5890 = vadd.xlane.f32.xlu0 %v5889_v11 }
0x14e6   : > { %v11369_v36 = vpop.eup %8209  ;;  %v5820_v24 = vmul.f32 1.442695, %v5771_v40 }
0x14e7   : > { %v5714_v14 = vpop.xlane.xlu1 %5713  ;;  %v5892_v50 = vsel %vm12961_vm6, %v11369_v36, 0.0  ;;  %vm12966_vm6 = vmmov %vm12922_vm2 }
0x14e8   : > { %8215 = vpow2.f32 %v5820_v24  ;;  %v5772_v52 = vsub.f32 %v11239_v49, %v5714_v14  ;;  %5893 = vadd.xlane.f32.xlu1 %v5892_v50 }
0x14ea   : > { %v11374_v7 = vpop.eup %8211  ;;  %v5822_v62 = vmul.f32 1.442695, %v5772_v52 }
0x14eb   : > { %v5717_v18 = vpop.xlane.xlu0 %5716  ;;  %v5895_v54 = vsel %vm12962_vm5, %v11374_v7, 0.0  ;;  %vm12967_vm5 = vmmov %vm12922_vm2 }
0x14ec   : > { %8217 = vpow2.f32 %v5822_v62  ;;  %v5773_v19 = vsub.f32 %v11243_v63, %v5717_v18  ;;  %5896 = vadd.xlane.f32.xlu0 %v5895_v54 }
0x14ee   : > { %v11379_v9 = vpop.eup %8213  ;;  %v5824_v8 = vmul.f32 1.442695, %v5773_v19 }
0x14ef   : > { %v5720_v58 = vpop.xlane.xlu1 %5719  ;;  %v5898_v16 = vsel %vm12922_vm2, %v11379_v9, 0.0 }
0x14f0   : > { %8219 = vpow2.f32 %v5824_v8  ;;  %v5774_v49 = vsub.f32 %v11247_v56, %v5720_v58  ;;  %5899 = vadd.xlane.f32.xlu1 %v5898_v16 }
0x14f2   : > { %v11384_v6 = vpop.eup %8215  ;;  %v5826_v2 = vmul.f32 1.442695, %v5774_v49 }
0x14f3   : > { %v5723_v11 = vpop.xlane.xlu0 %5722  ;;  %v5901_v40 = vsel %vm12963_vm12, %v11384_v6, 0.0  ;;  %vm12968_vm12 = vmmov %vm12922_vm2 }
0x14f4   : > { %8221 = vpow2.f32 %v5826_v2  ;;  %v5775_v63 = vsub.f32 %v11251_v0, %v5723_v11  ;;  %5902 = vadd.xlane.f32.xlu0 %v5901_v40 }
0x14f6   : > { %v11389_v24 = vpop.eup %8217  ;;  %v5828_v14 = vmul.f32 1.442695, %v5775_v63 }
0x14f7   : > { %v5726_v50 = vpop.xlane.xlu1 %5725  ;;  %v5904_v52 = vsel %vm12964_vm9, %v11389_v24, 0.0  ;;  %vm12969_vm9 = vmmov %vm12922_vm2 }
0x14f8   : > { %8223 = vpow2.f32 %v5828_v14  ;;  %v5776_v56 = vsub.f32 %v11255_v35, %v5726_v50  ;;  %5905 = vadd.xlane.f32.xlu1 %v5904_v52 }
0x14fa   : > { %v11394_v62 = vpop.eup %8219  ;;  %v5830_v18 = vmul.f32 1.442695, %v5776_v56 }
0x14fb   : > { %v5729_v54 = vpop.xlane.xlu1 %5728  ;;  %v5907_v19 = vsel %vm12965_vm7, %v11394_v62, 0.0  ;;  %vm12970_vm7 = vmmov %vm12922_vm2 }
0x14fc   : > { %8225 = vpow2.f32 %v5830_v18  ;;  %v5777_v0 = vsub.f32 %v11259_v21, %v5729_v54  ;;  %5908 = vadd.xlane.f32.xlu0 %v5907_v19 }
0x14fe   : > { %v11399_v8 = vpop.eup %8221  ;;  %v5832_v58 = vmul.f32 1.442695, %v5777_v0 }
0x14ff   : > { %v5732_v16 = vpop.xlane.xlu1 %5731  ;;  %v5910_v49 = vsel %vm12966_vm6, %v11399_v8, 0.0  ;;  %vm12971_vm6 = vmmov %vm12922_vm2 }
0x1500   : > { %8227 = vpow2.f32 %v5832_v58  ;;  %v5778_v35 = vsub.f32 %v11263_v1, %v5732_v16  ;;  %5911 = vadd.xlane.f32.xlu1 %v5910_v49 }
0x1502   : > { %v11404_v2 = vpop.eup %8223  ;;  %v5834_v11 = vmul.f32 1.442695, %v5778_v35 }
0x1503   : > { %v5735_v40 = vpop.xlane.xlu1 %5734  ;;  %v5913_v63 = vsel %vm12967_vm5, %v11404_v2, 0.0  ;;  %vm12972_vm5 = vmmov %vm12922_vm2 }
0x1504   : > { %8229 = vpow2.f32 %v5834_v11  ;;  %v5779_v21 = vsub.f32 %v11267_v32, %v5735_v40  ;;  %5914 = vadd.xlane.f32.xlu0 %v5913_v63 }
0x1506   : > { %v11409_v14 = vpop.eup %8225  ;;  %v5836_v50 = vmul.f32 1.442695, %v5779_v21 }
0x1507   : > { %v5738_v52 = vpop.xlane.xlu1 %5737  ;;  %v5916_v56 = vsel %vm12922_vm2, %v11409_v14, 0.0 }
0x1508   : > { %8231 = vpow2.f32 %v5836_v50  ;;  %v5780_v1 = vsub.f32 %v11271_v33, %v5738_v52  ;;  %5917 = vadd.xlane.f32.xlu1 %v5916_v56 }
0x150a   : > { %v11414_v18 = vpop.eup %8227  ;;  %v5838_v54 = vmul.f32 1.442695, %v5780_v1 }
0x150b   : > { %v5741_v19 = vpop.xlane.xlu1 %5740  ;;  %v5919_v0 = vsel %vm12968_vm12, %v11414_v18, 0.0  ;;  %vm12973_vm12 = vmmov %vm12922_vm2 }
0x150c   : > { %8233 = vpow2.f32 %v5838_v54  ;;  %v5781_v32 = vsub.f32 %v11275_v55, %v5741_v19  ;;  %5920 = vadd.xlane.f32.xlu0 %v5919_v0 }
0x150e   : > { %v11419_v58 = vpop.eup %8229  ;;  %v5840_v16 = vmul.f32 1.442695, %v5781_v32 }
0x150f   : > { %v5744_v49 = vpop.xlane.xlu1 %5743  ;;  %v5922_v35 = vsel %vm12969_vm9, %v11419_v58, 0.0  ;;  %vm12974_vm9 = vmmov %vm12922_vm2 }
0x1510   : > { %8235 = vpow2.f32 %v5840_v16  ;;  %v5782_v33 = vsub.f32 %v11279_v37, %v5744_v49  ;;  %5923 = vadd.xlane.f32.xlu1 %v5922_v35 }
0x1512   : > { %v11424_v11 = vpop.eup %8231  ;;  %v5842_v40 = vmul.f32 1.442695, %v5782_v33 }
0x1513   : > { %v5747_v63 = vpop.xlane.xlu1 %5746  ;;  %v5925_v21 = vsel %vm12970_vm7, %v11424_v11, 0.0  ;;  %vm12975_vm7 = vmmov %vm12922_vm2 }
0x1514   : > { %8237 = vpow2.f32 %v5842_v40  ;;  %v5783_v55 = vsub.f32 %v11283_v34, %v5747_v63  ;;  %5926 = vadd.xlane.f32.xlu0 %v5925_v21 }
0x1516   : > { %v11429_v50 = vpop.eup %8233  ;;  %v5844_v52 = vmul.f32 1.442695, %v5783_v55 }
0x1517   : > { %v5750_v56 = vpop.xlane.xlu1 %5749  ;;  %v5928_v1 = vsel %vm12971_vm6, %v11429_v50, 0.0  ;;  %vm12976_vm6 = vmmov %vm12922_vm2 }
0x1518   : > { %8239 = vpow2.f32 %v5844_v52  ;;  %v5784_v37 = vsub.f32 %v11287_v25, %v5750_v56  ;;  %5929 = vadd.xlane.f32.xlu1 %v5928_v1 }
0x151a   : > { %v11434_v54 = vpop.eup %8235  ;;  %v5846_v19 = vmul.f32 1.442695, %v5784_v37 }
0x151b   : > { %v5753_v0 = vpop.xlane.xlu1 %5752  ;;  %v5931_v32 = vsel %vm12972_vm5, %v11434_v54, 0.0  ;;  %vm12977_vm5 = vmmov %vm12922_vm2 }
0x151c   : > { %8241 = vpow2.f32 %v5846_v19  ;;  %v5785_v34 = vsub.f32 %v11291_v48, %v5753_v0  ;;  %5932 = vadd.xlane.f32.xlu0 %v5931_v32 }
0x151e   : > { %v11439_v16 = vpop.eup %8237  ;;  %v5848_v49 = vmul.f32 1.442695, %v5785_v34 }
0x151f   : > { %v5934_v35 = vsel %vm12922_vm2, %v11439_v16, 0.0 }
0x1520   : > { %8243 = vpow2.f32 %v5848_v49  ;;  %5935 = vadd.xlane.f32.xlu1 %v5934_v35 }
0x1522   : > { %v11443_v25 = vpop.eup %8239 }
0x1523   : > { %v5937_v33 = vsel %vm12973_vm12, %v11443_v25, 0.0  ;;  %vm12978_vm12 = vmmov %vm12922_vm2 }
0x1524   : > { %5938 = vadd.xlane.f32.xlu0 %v5937_v33 }
0x1526   : > { %v11447_v40 = vpop.eup %8241 }
0x1527   : > { %v5940_v48 = vsel %vm12974_vm9, %v11447_v40, 0.0  ;;  %vm12979_vm9 = vmmov %vm12922_vm2 }
0x1528   : > { %5941 = vadd.xlane.f32.xlu1 %v5940_v48 }
0x152a   : > { %v11451_v63 = vpop.eup %8243 }
0x152b   : > { %v5943_v21 = vsel %vm12975_vm7, %v11451_v63, 0.0  ;;  %vm12980_vm7 = vmmov %vm12922_vm2 }
0x152c   : > { %5944 = vadd.xlane.f32.xlu0 %v5943_v21 }
0x153d   : > { %v5852_v55 = vpop.xlane.xlu0 %5851 }
0x153e   : > { %8245 = vrcp.f32 %v5852_v55 }
0x1541   : > { %v5855_v52 = vpop.xlane.xlu0 %5854 }
0x1542   : > { %8247 = vrcp.f32 %v5855_v52 }
0x1545   : > { %v5858_v56 = vpop.xlane.xlu0 %5857 }
0x1546   : > { %8249 = vrcp.f32 %v5858_v56 }
0x1548   : > { %v8246_v1 = vpop.eup %8245 }
0x1549   : > { %v5978_v37 = vmul.f32 %v8246_v1, %v11299_v61  ;;  %v5861_v19 = vpop.xlane.xlu0 %5860 }
0x154a   : > { %8251 = vrcp.f32 %v5861_v19 }
0x154b   : > { %7312 = vmatmul.mubr.msk.f32.vlgmr.msra.gmra.mrb[92].mxu0 %vm12976_vm6, %v5978_v37  ;;  %vm12981_vm6 = vmmov %vm12922_vm2 }
0x154c   : > { %v8248_v0 = vpop.eup %8247  ;;  %6176 = vmatprep.mubr.f32.mxu0 %v12179_v45 }
0x154d   : > { %v5979_v32 = vmul.f32 %v8248_v0, %v11304_v39  ;;  %v5864_v34 = vpop.xlane.xlu0 %5863 }
0x154e   : > { %8253 = vrcp.f32 %v5864_v34 }
0x154f   : > { %7313 = vmatmul.mubr.msk.f32.gmra.mrb[94].mxu0 %vm12977_vm5, %v5979_v32  ;;  %vm12982_vm5 = vmmov %vm12922_vm2 }
0x1550   : > { %v8250_v49 = vpop.eup %8249  ;;  %6182 = vmatprep.mubr.f32.mxu0 %v12179_v45 }
0x1551   : > { %v5980_v35 = vmul.f32 %v8250_v49, %v11309_v43  ;;  %v5867_v33 = vpop.xlane.xlu0 %5866 }
0x1552   : > { %8255 = vrcp.f32 %v5867_v33 }
0x1553   : > { %7314 = vmatmul.mubr.msk.f32.gmra.mrb[96].mxu0 %vm12922_vm2, %v5980_v35 }
0x1554   : > { %v8252_v61 = vpop.eup %8251  ;;  %6188 = vmatprep.mubr.f32.mxu0 %v12179_v45 }
0x1555   : > { %v5981_v48 = vmul.f32 %v8252_v61, %v11314_v12  ;;  %v5870_v21 = vpop.xlane.xlu0 %5869 }
0x1556   : > { %8257 = vrcp.f32 %v5870_v21 }
0x1557   : > { %7315 = vmatmul.mubr.msk.f32.gmra.mrb[98].mxu0 %vm12978_vm12, %v5981_v48  ;;  %vm12983_vm12 = vmmov %vm12922_vm2 }
0x1558   : > { %v8254_v39 = vpop.eup %8253  ;;  %6194 = vmatprep.mubr.f32.mxu0 %v12179_v45 }
0x1559   : > { %v5982_v55 = vmul.f32 %v8254_v39, %v11319_v26  ;;  %v5873_v52 = vpop.xlane.xlu0 %5872 }
0x155a   : > { %8259 = vrcp.f32 %v5873_v52 }
0x155b   : > { %7316 = vmatmul.mubr.msk.f32.gmra.mrb[100].mxu0 %vm12979_vm9, %v5982_v55  ;;  %vm12984_vm9 = vmmov %vm12922_vm2 }
0x155c   : > { %v8256_v43 = vpop.eup %8255  ;;  %6200 = vmatprep.mubr.f32.mxu0 %v12179_v45 }
0x155d   : > { %v5983_v56 = vmul.f32 %v8256_v43, %v11324_v5  ;;  %v5876_v1 = vpop.xlane.xlu0 %5875 }
0x155e   : > { %8261 = vrcp.f32 %v5876_v1 }
0x155f   : > { %7317 = vmatmul.mubr.msk.f32.gmra.mrb[102].mxu0 %vm12980_vm7, %v5983_v56  ;;  %vm12985_vm7 = vmmov %vm12922_vm2 }
0x1560   : > { %v8258_v12 = vpop.eup %8257  ;;  %6206 = vmatprep.mubr.f32.mxu0 %v12179_v45 }
0x1561   : > { %v5984_v37 = vmul.f32 %v8258_v12, %v11329_v38  ;;  %v5879_v19 = vpop.xlane.xlu0 %5878 }
0x1562   : > { %8263 = vrcp.f32 %v5879_v19 }
0x1563   : > { %7318 = vmatmul.mubr.msk.f32.gmra.mrb[104].mxu0 %vm12981_vm6, %v5984_v37  ;;  %vm12986_vm6 = vmmov %vm12922_vm2 }
0x1564   : > { %v8260_v26 = vpop.eup %8259  ;;  %6212 = vmatprep.mubr.f32.mxu0 %v12179_v45 }
0x1565   : > { %v5985_v0 = vmul.f32 %v8260_v26, %v11334_v17  ;;  %v5882_v32 = vpop.xlane.xlu1 %5881 }
0x1566   : > { %8265 = vrcp.f32 %v5882_v32 }
0x1567   : > { %7319 = vmatmul.mubr.msk.f32.gmra.mrb[106].mxu0 %vm12982_vm5, %v5985_v0  ;;  %vm12987_vm5 = vmmov %vm12922_vm2 }
0x1568   : > { %v8262_v5 = vpop.eup %8261  ;;  %6218 = vmatprep.mubr.f32.mxu0 %v12179_v45 }
0x1569   : > { %v5986_v34 = vmul.f32 %v8262_v5, %v11339_v46  ;;  %v5885_v49 = vpop.xlane.xlu0 %5884 }
0x156a   : > { %8267 = vrcp.f32 %v5885_v49 }
0x156b   : > { %7320 = vmatmul.mubr.msk.f32.gmra.mrb[108].mxu0 %vm12922_vm2, %v5986_v34 }
0x156c   : > { %v8264_v38 = vpop.eup %8263  ;;  %6224 = vmatprep.mubr.f32.mxu0 %v12179_v45 }
0x156d   : > { %v5987_v35 = vmul.f32 %v8264_v38, %v11344_v57  ;;  %v5888_v33 = vpop.xlane.xlu1 %5887 }
0x156e   : > { %8269 = vrcp.f32 %v5888_v33 }
0x156f   : > { %7321 = vmatmul.mubr.msk.f32.gmra.mrb[110].mxu0 %vm12983_vm12, %v5987_v35  ;;  %vm12988_vm12 = vmmov %vm12922_vm2 }
0x1570   : > { %v8266_v17 = vpop.eup %8265  ;;  %6230 = vmatprep.mubr.f32.mxu0 %v12179_v45 }
0x1571   : > { %v5988_v61 = vmul.f32 %v8266_v17, %v11349_v29  ;;  %v5891_v48 = vpop.xlane.xlu0 %5890 }
0x1572   : > { %8271 = vrcp.f32 %v5891_v48 }
0x1573   : > { %7322 = vmatmul.mubr.msk.f32.gmra.mrb[112].mxu0 %vm12984_vm9, %v5988_v61  ;;  %vm12989_vm9 = vmmov %vm12922_vm2 }
0x1574   : > { %v8268_v46 = vpop.eup %8267  ;;  %6236 = vmatprep.mubr.f32.mxu0 %v12179_v45 }
0x1575   : > { %v5989_v21 = vmul.f32 %v8268_v46, %v11354_v59  ;;  %v5894_v39 = vpop.xlane.xlu1 %5893 }
0x1576   : > { %8273 = vrcp.f32 %v5894_v39 }
0x1577   : > { %7323 = vmatmul.mubr.msk.f32.gmra.mrb[114].mxu0 %vm12985_vm7, %v5989_v21  ;;  %vm12990_vm7 = vmmov %vm12922_vm2 }
0x1578   : > { %v8270_v57 = vpop.eup %8269  ;;  %6242 = vmatprep.mubr.f32.mxu0 %v12179_v45 }
0x1579   : > { %v5990_v55 = vmul.f32 %v8270_v57, %v11359_v60  ;;  %v5897_v52 = vpop.xlane.xlu0 %5896 }
0x157a   : > { %8275 = vrcp.f32 %v5897_v52 }
0x157b   : > { %7324 = vmatmul.mubr.msk.f32.gmra.mrb[116].mxu0 %vm12986_vm6, %v5990_v55  ;;  %vm12991_vm6 = vmmov %vm12922_vm2 }
0x157c   : > { %v8272_v29 = vpop.eup %8271  ;;  %6248 = vmatprep.mubr.f32.mxu0 %v12179_v45 }
0x157d   : > { %v5991_v43 = vmul.f32 %v8272_v29, %v11364_v51  ;;  %v5900_v56 = vpop.xlane.xlu1 %5899 }
0x157e   : > { %8277 = vrcp.f32 %v5900_v56 }
0x157f   : > { %7325 = vmatmul.mubr.msk.f32.gmra.mrb[118].mxu0 %vm12987_vm5, %v5991_v43  ;;  %vm12992_vm5 = vmmov %vm12922_vm2 }
0x1580   : > { %v8274_v59 = vpop.eup %8273  ;;  %6254 = vmatprep.mubr.f32.mxu0 %v12179_v45 }
0x1581   : > { %v5992_v1 = vmul.f32 %v8274_v59, %v11369_v36  ;;  %v5903_v12 = vpop.xlane.xlu0 %5902 }
0x1582   : > { %8279 = vrcp.f32 %v5903_v12 }
0x1583   : > { %7326 = vmatmul.mubr.msk.f32.gmra.mrb[120].mxu0 %vm12922_vm2, %v5992_v1 }
0x1584   : > { %v8276_v60 = vpop.eup %8275  ;;  %6260 = vmatprep.mubr.f32.mxu0 %v12179_v45 }
0x1585   : > { %v5993_v37 = vmul.f32 %v8276_v60, %v11374_v7  ;;  %v5906_v19 = vpop.xlane.xlu1 %5905 }
0x1586   : > { %8281 = vrcp.f32 %v5906_v19 }
0x1587   : > { %7327 = vmatmul.mubr.msk.f32.gmra.mrb[122].mxu0 %vm12988_vm12, %v5993_v37  ;;  %vm12993_vm12 = vmmov %vm12922_vm2 }
0x1588   : > { %v8278_v51 = vpop.eup %8277  ;;  %6266 = vmatprep.mubr.f32.mxu0 %v12179_v45 }
0x1589   : > { %v5994_v26 = vmul.f32 %v8278_v51, %v11379_v9  ;;  %v5909_v0 = vpop.xlane.xlu0 %5908 }
0x158a   : > { %8283 = vrcp.f32 %v5909_v0 }
0x158b   : > { %7328 = vmatmul.mubr.msk.f32.gmra.mrb[124].mxu0 %vm12989_vm9, %v5994_v26  ;;  %vm12994_vm9 = vmmov %vm12922_vm2 }
0x158c   : > { %v8280_v36 = vpop.eup %8279  ;;  %6272 = vmatprep.mubr.f32.mxu0 %v12179_v45 }
0x158d   : > { %v5995_v32 = vmul.f32 %v8280_v36, %v11384_v6  ;;  %v5912_v5 = vpop.xlane.xlu1 %5911 }
0x158e   : > { %8285 = vrcp.f32 %v5912_v5 }
0x158f   : > { %7329 = vmatmul.mubr.msk.f32.gmra.mrb[126].mxu0 %vm12990_vm7, %v5995_v32  ;;  %vm12995_vm7 = vmmov %vm12922_vm2 }
0x1590   : > { %v8282_v7 = vpop.eup %8281  ;;  %6278 = vmatprep.mubr.f32.mxu0 %v12179_v45 }
0x1591   : > { %v5996_v34 = vmul.f32 %v8282_v7, %v11389_v24  ;;  %v5915_v49 = vpop.xlane.xlu0 %5914 }
0x1592   : > { %8287 = vrcp.f32 %v5915_v49 }
0x1593   : > { %7330 = vmatmul.mubr.msk.f32.gmra.mrb[128].mxu0 %vm12991_vm6, %v5996_v34  ;;  %vm12996_vm6 = vmmov %vm12922_vm2 }
0x1594   : > { %v8284_v9 = vpop.eup %8283  ;;  %6284 = vmatprep.mubr.f32.mxu0 %v12179_v45 }
0x1595   : > { %v5997_v38 = vmul.f32 %v8284_v9, %v11394_v62  ;;  %v5918_v35 = vpop.xlane.xlu1 %5917 }
0x1596   : > { %8289 = vrcp.f32 %v5918_v35 }
0x1597   : > { %7331 = vmatmul.mubr.msk.f32.gmra.mrb[130].mxu0 %vm12992_vm5, %v5997_v38  ;;  %vm12997_vm5 = vmmov %vm12922_vm2 }
0x1598   : > { %v8286_v6 = vpop.eup %8285  ;;  %6290 = vmatprep.mubr.f32.mxu0 %v12179_v45 }
0x1599   : > { %v5998_v33 = vmul.f32 %v8286_v6, %v11399_v8  ;;  %v5921_v17 = vpop.xlane.xlu0 %5920 }
0x159a   : > { %8291 = vrcp.f32 %v5921_v17 }
0x159b   : > { %7332 = vmatmul.mubr.msk.f32.gmra.mrb[132].mxu0 %vm12922_vm2, %v5998_v33 }
0x159c   : > { %v8288_v24 = vpop.eup %8287  ;;  %6296 = vmatprep.mubr.f32.mxu0 %v12179_v45 }
0x159d   : > { %v5999_v61 = vmul.f32 %v8288_v24, %v11404_v2  ;;  %v5924_v48 = vpop.xlane.xlu1 %5923 }
0x159e   : > { %8293 = vrcp.f32 %v5924_v48 }
0x159f   : > { %7333 = vmatmul.mubr.msk.f32.gmra.mrb[134].mxu0 %vm12993_vm12, %v5999_v61  ;;  %vm12998_vm12 = vmmov %vm12922_vm2 }
0x15a0   : > { %v8290_v62 = vpop.eup %8289  ;;  %6302 = vmatprep.mubr.f32.mxu0 %v12179_v45 }
0x15a1   : > { %v6000_v46 = vmul.f32 %v8290_v62, %v11409_v14  ;;  %v5927_v21 = vpop.xlane.xlu0 %5926 }
0x15a2   : > { %8295 = vrcp.f32 %v5927_v21 }
0x15a3   : > { %7334 = vmatmul.mubr.msk.f32.gmra.mrb[136].mxu0 %vm12994_vm9, %v6000_v46  ;;  %vm12999_vm9 = vmmov %vm12922_vm2 }
0x15a4   : > { %v8292_v8 = vpop.eup %8291  ;;  %6308 = vmatprep.mubr.f32.mxu0 %v12179_v45 }
0x15a5   : > { %v6001_v39 = vmul.f32 %v8292_v8, %v11414_v18  ;;  %v5930_v57 = vpop.xlane.xlu1 %5929 }
0x15a6   : > { %8297 = vrcp.f32 %v5930_v57 }
0x15a7   : > { %7335 = vmatmul.mubr.msk.f32.gmra.mrb[138].mxu0 %vm12995_vm7, %v6001_v39  ;;  %vm13000_vm7 = vmmov %vm12922_vm2 }
0x15a8   : > { %v8294_v2 = vpop.eup %8293  ;;  %6314 = vmatprep.mubr.f32.mxu0 %v12179_v45 }
0x15a9   : > { %v6002_v55 = vmul.f32 %v8294_v2, %v11419_v58  ;;  %v5933_v52 = vpop.xlane.xlu0 %5932 }
0x15aa   : > { %8299 = vrcp.f32 %v5933_v52 }
0x15ab   : > { %7336 = vmatmul.mubr.msk.f32.gmra.mrb[140].mxu0 %vm12996_vm6, %v6002_v55  ;;  %vm13001_vm6 = vmmov %vm12922_vm2 }
0x15ac   : > { %v8296_v14 = vpop.eup %8295  ;;  %6320 = vmatprep.mubr.f32.mxu0 %v12179_v45 }
0x15ad   : > { %v6003_v29 = vmul.f32 %v8296_v14, %v11424_v11  ;;  %v5936_v43 = vpop.xlane.xlu1 %5935 }
0x15ae   : > { %8301 = vrcp.f32 %v5936_v43 }
0x15af   : > { %7337 = vmatmul.mubr.msk.f32.gmra.mrb[142].mxu0 %vm12997_vm5, %v6003_v29  ;;  %vm13002_vm5 = vmmov %vm12922_vm2 }
0x15b0   : > { %v8298_v18 = vpop.eup %8297  ;;  %6326 = vmatprep.mubr.f32.mxu0 %v12179_v45 }
0x15b1   : > { %v6004_v56 = vmul.f32 %v8298_v18, %v11429_v50  ;;  %v5939_v59 = vpop.xlane.xlu0 %5938  ;;  %v13003_v18 = vld [vmem:[#allocation26_spill] sm:$0xff] }
0x15b2   : > { %8303 = vrcp.f32 %v5939_v59 }
0x15b3   : > { %7338 = vmatmul.mubr.msk.f32.gmra.mrb[144].mxu0 %vm12922_vm2, %v6004_v56 }
0x15b4   : > { %v8300_v58 = vpop.eup %8299  ;;  %6332 = vmatprep.mubr.f32.mxu0 %v12179_v45 }
0x15b5   : > { %v6005_v1 = vmul.f32 %v8300_v58, %v11434_v54  ;;  %v5942_v12 = vpop.xlane.xlu1 %5941 }
0x15b6   : > { %8305 = vrcp.f32 %v5942_v12 }
0x15b7   : > { %7339 = vmatmul.mubr.msk.f32.gmra.mrb[146].mxu0 %vm12998_vm12, %v6005_v1  ;;  %v13005_v1 = vld [vmem:[#allocation28_spill] sm:$0xff] }
0x15b8   : > { %v8302_v11 = vpop.eup %8301  ;;  %6338 = vmatprep.mubr.f32.mxu0 %v12179_v45 }
0x15b9   : > { %v6006_v60 = vmul.f32 %v8302_v11, %v11439_v16  ;;  %v5945_v37 = vpop.xlane.xlu0 %5944 }
0x15ba   : > { %8307 = vrcp.f32 %v5945_v37 }
0x15bb   : > { %7340 = vmatmul.mubr.msk.f32.gmra.mrb[148].mxu0 %vm12999_vm9, %v6006_v60 }
0x15bc   : > { %v8304_v50 = vpop.eup %8303  ;;  %6344 = vmatprep.mubr.f32.mxu0 %v12179_v45 }
0x15bd   : > { %v6007_v19 = vmul.f32 %v8304_v50, %v11443_v25 }
0x15bf   : > { %7341 = vmatmul.mubr.msk.f32.gmra.mrb[150].mxu0 %vm13000_vm7, %v6007_v19  ;;  %v13007_v19 = vld [vmem:[#allocation30_spill] sm:$0xff]  ;;  %vm13085_vm7 = vmmov %vm13002_vm5 }
0x15c0   : > { %v8306_v54 = vpop.eup %8305  ;;  %6350 = vmatprep.mubr.f32.mxu0 %v12179_v45 }
0x15c1   : > { %v6008_v51 = vmul.f32 %v8306_v54, %v11447_v40 }
0x15c3   : > { %7342 = vmatmul.mubr.msk.f32.gmra.mrb[152].mxu0 %vm13001_vm6, %v6008_v51  ;;  %v13008_v51 = vld [vmem:[#allocation31_spill] sm:$0xff]  ;;  %vm13086_vm6 = vmmov %vm13002_vm5 }
0x15c4   : > { %v8308_v26 = vpop.eup %8307  ;;  %6356 = vmatprep.mubr.f32.mxu0 %v12179_v45 }
0x15c5   : > { %v6009_v16 = vmul.f32 %v8308_v26, %v11451_v63 }
0x15c7   : > { %7343 = vmatmul.mubr.msk.f32.gmra.mrb[154].mxu0 %vm13002_vm5, %v6009_v16 }
0x161e   : > { %v6172_v0 = vpop.f32.mrb[92].mxu0 }
0x161f   : > { %v6363_v36 = vmul.f32 %v6172_v0, %v12258_v28  ;;  %v6174_v25 = vpop.f32.mrb[93].mxu0  ;;  %v13009_v0 = vld [vmem:[#allocation32_spill] sm:$0xff] }
0x1620   : > { %v6364_v32 = vmul.f32 %v6174_v25, %v12259_v47 }
0x1622   : > { %v6178_v5 = vpop.f32.mrb[94].mxu0 }
0x1623   : > { %v6365_v7 = vmul.f32 %v6178_v5, %v12261_v42  ;;  %v6180_v34 = vpop.f32.mrb[95].mxu0 }
0x1624   : > { %v6366_v40 = vmul.f32 %v6180_v34, %v12262_v44 }
0x1625   : > { %v7791_v49 = vpack.c.bf16 %v6365_v7, %v6363_v36  ;;  %v13010_v7 = vld [vmem:[#allocation33_spill] sm:$0xff] }
0x1626   : > { %v7789_v9 = vpack.c.bf16 %v6366_v40, %v6364_v32  ;;  %v6184_v38 = vpop.f32.mrb[96].mxu0 }
0x1627   : > { %v6367_v35 = vmul.f32 %v6184_v38, %v12264_v20  ;;  %v6186_v63 = vpop.f32.mrb[97].mxu0 }
0x1628   : > { %v6368_v6 = vmul.f32 %v6186_v63, %v12434_v4  ;;  %7790 = vmatprep.subr.bf16.mxu1 %v7789_v9 }
0x1629   : > { %7792 = vmatpush1.bf16.msra.mxu1 %v7791_v49  ;;  %v13011_v49 = vld [vmem:[#allocation34_spill] sm:$0xff] }
0x162a   : > { %v6190_v28 = vpop.f32.mrb[98].mxu0 }
0x162b   : > { %v6369_v33 = vmul.f32 %v6190_v28, %v12435_v53  ;;  %v6192_v47 = vpop.f32.mrb[99].mxu0  ;;  %v13013_v28 = vld [vmem:[#allocation36_spill] sm:$0xff] }
0x162c   : > { %v6370_v17 = vmul.f32 %v6192_v47, %v12436_v3 }
0x162d   : > { %v7795_v42 = vpack.c.bf16 %v6369_v33, %v6367_v35  ;;  %v13012_v35 = vld [vmem:[#allocation35_spill] sm:$0xff] }
0x162e   : > { %v7793_v24 = vpack.c.bf16 %v6370_v17, %v6368_v6  ;;  %v6196_v61 = vpop.f32.mrb[100].mxu0 }
0x162f   : > { %v6371_v44 = vmul.f32 %v6196_v61, %v12437_v23  ;;  %v6198_v48 = vpop.f32.mrb[101].mxu0 }
0x1630   : > { %v6372_v62 = vmul.f32 %v6198_v48, %v12438_v10  ;;  %7794 = vmatprep.subr.bf16.mxu1 %v7793_v24  ;;  %v13014_v24 = vld [vmem:[#allocation37_spill] sm:$0xff]  ;;  %v13015_v48 = vld [vmem:[#allocation38_spill] sm:$0xff] }
0x1631   : > { %7796 = vmatpush1.bf16.msra.mxu1 %v7795_v42 }
0x1632   : > { %v6202_v20 = vpop.f32.mrb[102].mxu0 }
0x1633   : > { %v6373_v4 = vmul.f32 %v6202_v20, %v12439_v31  ;;  %v6204_v46 = vpop.f32.mrb[103].mxu0 }
0x1634   : > { %v6374_v21 = vmul.f32 %v6204_v46, %v12440_v22 }
0x1635   : > { %v7799_v53 = vpack.c.bf16 %v6373_v4, %v6371_v44  ;;  %v13016_v4 = vld [vmem:[#allocation39_spill] sm:$0xff] }
0x1636   : > { %v7797_v8 = vpack.c.bf16 %v6374_v21, %v6372_v62  ;;  %v6208_v39 = vpop.f32.mrb[104].mxu0 }
0x1637   : > { %v6375_v3 = vmul.f32 %v6208_v39, %v12441_v41  ;;  %v6210_v57 = vpop.f32.mrb[105].mxu0 }
0x1638   : > { %v6376_v2 = vmul.f32 %v6210_v57, %v12442_v30  ;;  %7798 = vmatprep.subr.bf16.mxu1 %v7797_v8  ;;  %v13004_v30 = vld [vmem:[#allocation27_spill] sm:$0xff] }
0x1639   : > { %7800 = vmatpush1.bf16.msra.mxu1 %v7799_v53  ;;  %v13017_v53 = vld [vmem:[#allocation40_spill] sm:$0xff] }
0x163a   : > { %v6214_v23 = vpop.f32.mrb[106].mxu0 }
0x163b   : > { %v6377_v10 = vmul.f32 %v6214_v23, %v12443_v27  ;;  %v6216_v55 = vpop.f32.mrb[107].mxu0 }
0x163c   : > { %v6378_v52 = vmul.f32 %v6216_v55, %v12444_v15  ;;  %v13006_v15 = vld [vmem:[#allocation29_spill] sm:$0xff]  ;;  %v13019_v55 = vld [vmem:[#allocation42_spill] sm:$0xff] }
0x163d   : > { %v7803_v31 = vpack.c.bf16 %v6377_v10, %v6375_v3 }
0x163e   : > { %v7801_v14 = vpack.c.bf16 %v6378_v52, %v6376_v2  ;;  %v6220_v29 = vpop.f32.mrb[108].mxu0  ;;  %v13018_v2 = vld [vmem:[#allocation41_spill] sm:$0xff] }
0x163f   : > { %v6379_v22 = vmul.f32 %v6220_v29, %v12729_v13  ;;  %v6222_v43 = vpop.f32.mrb[109].mxu0 }
0x1640   : > { %v6380_v56 = vmul.f32 %v6222_v43, %v13003_v18  ;;  %7802 = vmatprep.subr.bf16.mxu1 %v7801_v14  ;;  %v13020_v14 = vld [vmem:[#allocation43_spill] sm:$0xff]  ;;  %v13021_v43 = vld [vmem:[#allocation44_spill] sm:$0xff] }
0x1641   : > { %7804 = vmatpush1.bf16.msra.mxu1 %v7803_v31 }
0x1642   : > { %v6226_v41 = vpop.f32.mrb[110].mxu0 }
0x1643   : > { %v6381_v59 = vmul.f32 %v6226_v41, %v13004_v30  ;;  %v6228_v58 = vpop.f32.mrb[111].mxu0 }
0x1644   : > { %v6382_v12 = vmul.f32 %v6228_v58, %v13005_v1 }
0x1645   : > { %v7807_v27 = vpack.c.bf16 %v6381_v59, %v6379_v22  ;;  %v13022_v59 = vld [vmem:[#allocation45_spill] sm:$0xff] }
0x1646   : > { %v7805_v11 = vpack.c.bf16 %v6382_v12, %v6380_v56  ;;  %v6232_v60 = vpop.f32.mrb[112].mxu0  ;;  %v13023_v12 = vld [vmem:[#allocation46_spill] sm:$0xff] }
0x1647   : > { %v6383_v37 = vmul.f32 %v6232_v60, %v13006_v15  ;;  %v6234_v50 = vpop.f32.mrb[113].mxu0  ;;  %v13024_v60 = vld [vmem:[#allocation47_spill] sm:$0xff] }
0x1648   : > { %v6384_v54 = vmul.f32 %v6234_v50, %v13007_v19  ;;  %7806 = vmatprep.subr.bf16.mxu1 %v7805_v11  ;;  %v13025_v50 = vld [vmem:[#allocation48_spill] sm:$0xff] }
0x1649   : > { %7808 = vmatpush1.bf16.msra.mxu1 %v7807_v27 }
0x164a   : > { %v6238_v13 = vpop.f32.mrb[114].mxu0 }
0x164b   : > { %v6385_v26 = vmul.f32 %v6238_v13, %v13008_v51  ;;  %v6240_v16 = vpop.f32.mrb[115].mxu0 }
0x164c   : > { %v6386_v36 = vmul.f32 %v6240_v16, %v13009_v0 }
0x164d   : > { %v7811_v25 = vpack.c.bf16 %v6385_v26, %v6383_v37  ;;  %v13026_v26 = vld [vmem:[#allocation49_spill] sm:$0xff] }
0x164e   : > { %v7809_v32 = vpack.c.bf16 %v6386_v36, %v6384_v54  ;;  %v6244_v5 = vpop.f32.mrb[116].mxu0  ;;  %v13027_v36 = vld [vmem:[#allocation50_spill] sm:$0xff] }
0x164f   : > { %v6387_v34 = vmul.f32 %v6244_v5, %v13010_v7  ;;  %v6246_v40 = vpop.f32.mrb[117].mxu0  ;;  %v13028_v5 = vld [vmem:[#allocation51_spill] sm:$0xff] }
0x1650   : > { %v6388_v9 = vmul.f32 %v6246_v40, %v13011_v49  ;;  %7810 = vmatprep.subr.bf16.mxu1 %v7809_v32  ;;  %v13029_v40 = vld [vmem:[#allocation52_spill] sm:$0xff] }
0x1651   : > { %7812 = vmatpush1.bf16.msra.mxu1 %v7811_v25 }
0x1652   : > { %v6250_v38 = vpop.f32.mrb[118].mxu0 }
0x1653   : > { %v6389_v63 = vmul.f32 %v6250_v38, %v13012_v35  ;;  %v6252_v6 = vpop.f32.mrb[119].mxu0 }
0x1654   : > { %v6390_v33 = vmul.f32 %v6252_v6, %v13013_v28 }
0x1655   : > { %v7815_v47 = vpack.c.bf16 %v6389_v63, %v6387_v34  ;;  %v13030_v63 = vld [vmem:[#allocation53_spill] sm:$0xff] }
0x1656   : > { %v7813_v17 = vpack.c.bf16 %v6390_v33, %v6388_v9  ;;  %v6256_v42 = vpop.f32.mrb[120].mxu0  ;;  %v13031_v33 = vld [vmem:[#allocation54_spill] sm:$0xff] }
0x1657   : > { %v6391_v61 = vmul.f32 %v6256_v42, %v13014_v24  ;;  %v6258_v44 = vpop.f32.mrb[121].mxu0  ;;  %v13032_v42 = vld [vmem:[#allocation55_spill] sm:$0xff] }
0x1658   : > { %v6392_v62 = vmul.f32 %v6258_v44, %v13015_v48  ;;  %7814 = vmatprep.subr.bf16.mxu1 %v7813_v17  ;;  %v13033_v44 = vld [vmem:[#allocation56_spill] sm:$0xff] }
0x1659   : > { %7816 = vmatpush1.bf16.msra.mxu1 %v7815_v47 }
0x165a   : > { %v6262_v20 = vpop.f32.mrb[122].mxu0 }
0x165b   : > { %v6393_v46 = vmul.f32 %v6262_v20, %v13016_v4  ;;  %v6264_v21 = vpop.f32.mrb[123].mxu0 }
0x165c   : > { %v6394_v8 = vmul.f32 %v6264_v21, %v13017_v53 }
0x165d   : > { %v7819_v39 = vpack.c.bf16 %v6393_v46, %v6391_v61  ;;  %v13034_v46 = vld [vmem:[#allocation57_spill] sm:$0xff] }
0x165e   : > { %v7817_v3 = vpack.c.bf16 %v6394_v8, %v6392_v62  ;;  %v6268_v57 = vpop.f32.mrb[124].mxu0  ;;  %v13035_v8 = vld [vmem:[#allocation58_spill] sm:$0xff] }
0x165f   : > { %v6395_v23 = vmul.f32 %v6268_v57, %v13018_v2  ;;  %v6270_v10 = vpop.f32.mrb[125].mxu0  ;;  %v13036_v57 = vld [vmem:[#allocation59_spill] sm:$0xff] }
0x1660   : > { %v6396_v52 = vmul.f32 %v6270_v10, %v13019_v55  ;;  %7818 = vmatprep.subr.bf16.mxu1 %v7817_v3  ;;  %v13037_v10 = vld [vmem:[#allocation60_spill] sm:$0xff] }
0x1661   : > { %7820 = vmatpush1.bf16.msra.mxu1 %v7819_v39 }
0x1662   : > { %v6274_v31 = vpop.f32.mrb[126].mxu0 }
0x1663   : > { %v6397_v29 = vmul.f32 %v6274_v31, %v13020_v14  ;;  %v6276_v22 = vpop.f32.mrb[127].mxu0 }
0x1664   : > { %v6398_v18 = vmul.f32 %v6276_v22, %v13021_v43 }
0x1665   : > { %v7823_v56 = vpack.c.bf16 %v6397_v29, %v6395_v23  ;;  %v13038_v29 = vld [vmem:[#allocation61_spill] sm:$0xff] }
0x1666   : > { %v7821_v41 = vpack.c.bf16 %v6398_v18, %v6396_v52  ;;  %v6280_v30 = vpop.f32.mrb[128].mxu0  ;;  %v13039_v18 = vld [vmem:[#allocation62_spill] sm:$0xff] }
0x1667   : > { %v6399_v58 = vmul.f32 %v6280_v30, %v13022_v59  ;;  %v6282_v1 = vpop.f32.mrb[129].mxu0  ;;  %v13040_v30 = vld [vmem:[#allocation63_spill] sm:$0xff] }
0x1668   : > { %v6400_v27 = vmul.f32 %v6282_v1, %v13023_v12  ;;  %7822 = vmatprep.subr.bf16.mxu1 %v7821_v41  ;;  %v13041_v1 = vld [vmem:[#allocation64_spill] sm:$0xff] }
0x1669   : > { %7824 = vmatpush1.bf16.msra.mxu1 %v7823_v56 }
0x166a   : > { %v6286_v11 = vpop.f32.mrb[130].mxu0 }
0x166b   : > { %v6401_v15 = vmul.f32 %v6286_v11, %v13024_v60  ;;  %v6288_v37 = vpop.f32.mrb[131].mxu0 }
0x166c   : > { %v6402_v19 = vmul.f32 %v6288_v37, %v13025_v50 }
0x166d   : > { %v7827_v54 = vpack.c.bf16 %v6401_v15, %v6399_v58  ;;  %v13042_v15 = vld [vmem:[#allocation65_spill] sm:$0xff] }
0x166e   : > { %v7825_v13 = vpack.c.bf16 %v6402_v19, %v6400_v27  ;;  %v6292_v51 = vpop.f32.mrb[132].mxu0  ;;  %v13043_v19 = vld [vmem:[#allocation66_spill] sm:$0xff] }
0x166f   : > { %v6403_v16 = vmul.f32 %v6292_v51, %v13026_v26  ;;  %v6294_v0 = vpop.f32.mrb[133].mxu0  ;;  %v13044_v51 = vld [vmem:[#allocation67_spill] sm:$0xff] }
0x1670   : > { %v6404_v25 = vmul.f32 %v6294_v0, %v13027_v36  ;;  %7826 = vmatprep.subr.bf16.mxu1 %v7825_v13  ;;  %v13045_v0 = vld [vmem:[#allocation68_spill] sm:$0xff] }
0x1671   : > { %7828 = vmatpush1.bf16.msra.mxu1 %v7827_v54 }
0x1672   : > { %v6298_v32 = vpop.f32.mrb[134].mxu0 }
0x1673   : > { %v6405_v7 = vmul.f32 %v6298_v32, %v13028_v5  ;;  %v6300_v34 = vpop.f32.mrb[135].mxu0 }
0x1674   : > { %v6406_v49 = vmul.f32 %v6300_v34, %v13029_v40 }
0x1675   : > { %v7831_v9 = vpack.c.bf16 %v6405_v7, %v6403_v16  ;;  %v13046_v7 = vld [vmem:[#allocation5_spill] sm:$0xff] }
0x1676   : > { %v7829_v38 = vpack.c.bf16 %v6406_v49, %v6404_v25  ;;  %v6304_v35 = vpop.f32.mrb[136].mxu0  ;;  %v13047_v49 = vld [vmem:[#allocation7_spill] sm:$0xff] }
0x1677   : > { %v6407_v6 = vmul.f32 %v6304_v35, %v13030_v63  ;;  %v6306_v28 = vpop.f32.mrb[137].mxu0  ;;  %v13048_v35 = vld [vmem:[#allocation9_spill] sm:$0xff] }
0x1678   : > { %v6408_v47 = vmul.f32 %v6306_v28, %v13031_v33  ;;  %7830 = vmatprep.subr.bf16.mxu1 %v7829_v38  ;;  %v13049_v28 = vld [vmem:[#allocation10_spill] sm:$0xff] }
0x1679   : > { %7832 = vmatpush1.bf16.msra.mxu1 %v7831_v9 }
0x167a   : > { %v6310_v17 = vpop.f32.mrb[138].mxu0 }
0x167b   : > { %v6409_v24 = vmul.f32 %v6310_v17, %v13032_v42  ;;  %v6312_v61 = vpop.f32.mrb[139].mxu0  ;;  %v13050_v42 = vmov 0.0|0.0  }
0x167c   : > { %v6410_v48 = vmul.f32 %v6312_v61, %v13033_v44 }
0x167d   : > { %v7835_v62 = vpack.c.bf16 %v6409_v24, %v6407_v6  ;;  %v13051_v24 = vmov 1.0  }
0x167e   : > { %v7833_v20 = vpack.c.bf16 %v6410_v48, %v6408_v47  ;;  %v6316_v4 = vpop.f32.mrb[140].mxu0  ;;  %v13054_v48 = vmov 1.0|1.0  }
0x167f   : > { %v6411_v21 = vmul.f32 %v6316_v4, %v13034_v46  ;;  %v6318_v53 = vpop.f32.mrb[141].mxu0  ;;  %v13058_v4 = vld [vmem:[#allocation83_spill] sm:$0xff] }
0x1680   : > { %v6412_v39 = vmul.f32 %v6318_v53, %v13035_v8  ;;  %7834 = vmatprep.subr.bf16.mxu1 %v7833_v20  ;;  %vm13059_vm12 = vnez %v13058_v4 }
0x1681   : > { %7836 = vmatpush1.bf16.msra.mxu1 %v7835_v62  ;;  %v13055_v62 = vld [vmem:[#allocation71_spill] sm:$0xff] }
0x1682   : > { %v6322_v3 = vpop.f32.mrb[142].mxu0  ;;  %vm13056_vm2 = vnez %v13055_v62 }
0x1683   : > { %v6413_v2 = vmul.f32 %v6322_v3, %v13036_v57  ;;  %v6324_v23 = vpop.f32.mrb[143].mxu0 }
0x1684   : > { %v6414_v55 = vmul.f32 %v6324_v23, %v13037_v10  ;;  %v13069_v23 = vld [vmem:[#allocation77_spill] sm:$0xff]  ;;  %v13071_v10 = vld [vmem:[#allocation78_spill] sm:$0xff] }
0x1685   : > { %v7839_v52 = vpack.c.bf16 %v6413_v2, %v6411_v21  ;;  %v13067_v2 = vld [vmem:[#allocation76_spill] sm:$0xff] }
0x1686   : > { %v7837_v31 = vpack.c.bf16 %v6414_v55, %v6412_v39  ;;  %v6328_v14 = vpop.f32.mrb[144].mxu0  ;;  %v13073_v55 = vld [vmem:[#allocation80_spill] sm:$0xff] }
0x1687   : > { %v6415_v22 = vmul.f32 %v6328_v14, %v13038_v29  ;;  %v6330_v43 = vpop.f32.mrb[145].mxu0 }
0x1688   : > { %v6416_v56 = vmul.f32 %v6330_v43, %v13039_v18  ;;  %7838 = vmatprep.subr.bf16.mxu1 %v7837_v31  ;;  %v13077_v31 = vld [vmem:[#allocation3_spill] sm:$0xff] }
0x1689   : > { %7840 = vmatpush1.bf16.msra.mxu1 %v7839_v52  ;;  %v13075_v52 = vld [vmem:[#allocation81_spill] sm:$0xff] }
0x168a   : > { %v6334_v41 = vpop.f32.mrb[146].mxu0 }
0x168b   : > { %v6417_v59 = vmul.f32 %v6334_v41, %v13040_v30  ;;  %v6336_v58 = vpop.f32.mrb[147].mxu0  ;;  %v13080_v30 = vld [vmem:[#allocation4_spill] sm:$0xff] }
0x168c   : > { %v6418_v12 = vmul.f32 %v6336_v58, %v13041_v1 }
0x168d   : > { %v7843_v27 = vpack.c.bf16 %v6417_v59, %v6415_v22 }
0x168e   : > { %v7841_v11 = vpack.c.bf16 %v6418_v12, %v6416_v56  ;;  %v6340_v60 = vpop.f32.mrb[148].mxu0 }
0x168f   : > { %v6419_v37 = vmul.f32 %v6340_v60, %v13042_v15  ;;  %v6342_v50 = vpop.f32.mrb[149].mxu0 }
0x1690   : > { %v6420_v54 = vmul.f32 %v6342_v50, %v13043_v19  ;;  %7842 = vmatprep.subr.bf16.mxu1 %v7841_v11 }
0x1691   : > { %7844 = vmatpush1.bf16.msra.mxu1 %v7843_v27 }
0x1692   : > { %v6346_v13 = vpop.f32.mrb[150].mxu0 }
0x1693   : > { %v6421_v26 = vmul.f32 %v6346_v13, %v13044_v51  ;;  %v6348_v16 = vpop.f32.mrb[151].mxu0 }
0x1694   : > { %v6422_v36 = vmul.f32 %v6348_v16, %v13045_v0 }
0x1695   : > { %v7847_v25 = vpack.c.bf16 %v6421_v26, %v6419_v37 }
0x1696   : > { %v7845_v32 = vpack.c.bf16 %v6422_v36, %v6420_v54  ;;  %v6352_v5 = vpop.f32.mrb[152].mxu0 }
0x1697   : > { %v6423_v34 = vmul.f32 %v6352_v5, %v13046_v7  ;;  %v6354_v40 = vpop.f32.mrb[153].mxu0 }
0x1698   : > { %v6424_v9 = vmul.f32 %v6354_v40, %v13047_v49  ;;  %7846 = vmatprep.subr.bf16.mxu1 %v7845_v32 }
0x1699   : > { %7848 = vmatpush1.bf16.msra.mxu1 %v7847_v25 }
0x169a   : > { %v6358_v38 = vpop.f32.mrb[154].mxu0 }
0x169b   : > { %v6425_v63 = vmul.f32 %v6358_v38, %v13048_v35  ;;  %v6360_v6 = vpop.f32.mrb[155].mxu0 }
0x169c   : > { %v6426_v33 = vmul.f32 %v6360_v6, %v13049_v28 }
0x169d   : > { %v7851_v47 = vpack.c.bf16 %v6425_v63, %v6423_v34 }
0x169e   : > { %v7849_v17 = vpack.c.bf16 %v6426_v33, %v6424_v9 }
0x16a0   : > { %7850 = vmatprep.subr.bf16.mxu1 %v7849_v17 }
0x16a1   : > { %7852 = vmatpush1.bf16.msra.mxu1 %v7851_v47 }
0x16a2   : > { %7853 = vmatprep.subr.bf16.mxu1 %v13050_v42 }
0x16a4   : > { %7345 = vmatmul.mubr.msk.f32.vlgmr.msra.gmra.mrb[108].mxu1 %vm12779_vm0, %v13051_v24  ;;  %vm13078_vm0 = vcmask 1044480  }
0x16a5   : > { %7346 = vmatprep.mubr.msk.f32.mxu1 %vm12781_vm4, %v13051_v24  ;;  %7855 = vmatpush1.bf16.msk.msra.mxu1 %vm13056_vm2, %v13054_v48  ;;  %vm13079_vm4 = vcmask 261120   ;;  %vm13087_vm2 = vmmov %vm13002_vm5 }
0x16a6   : > { %7856 = vmatprep.subr.bf16.mxu1 %v13050_v42  ;;  %vm13084_vm9 = vmmov %vm13079_vm4 }
0x16a8   : > { %7347 = vmatmul.mubr.msk.f32.gmra.mrb[110].mxu1 %vm12783_vm11, %v13051_v24  ;;  %vm13081_vm11 = vmmov %vm13078_vm0 }
0x16a9   : > { %7348 = vmatprep.mubr.msk.f32.mxu1 %vm13059_vm12, %v13051_v24  ;;  %7858 = vmatpush1.bf16.msk.msra.mxu1 %vm8831_vm8, %v13054_v48  ;;  %vm13070_vm8 = vnez %v13069_v23  ;;  %vm13088_vm12 = vmmov %vm13079_vm4 }
0x16aa   : > { %7859 = vmatprep.subr.bf16.mxu1 %v13050_v42 }
0x16ac   : > { %7349 = vmatmul.mubr.msk.f32.gmra.mrb[112].mxu1 %vm12787_vm15, %v13051_v24  ;;  %vm13083_vm15 = vmmov %vm13079_vm4 }
0x16ad   : > { %7350 = vmatprep.mubr.msk.f32.mxu1 %vm12789_vm13, %v13051_v24  ;;  %7861 = vmatpush1.bf16.msk.msra.mxu1 %vm8855_vm3, %v13054_v48  ;;  %vm13068_vm13 = vnez %v13067_v2  ;;  %vm13072_vm3 = vnez %v13071_v10 }
0x16ae   : > { %7862 = vmatprep.subr.bf16.mxu1 %v13050_v42 }
0x16b0   : > { %7351 = vmatmul.mubr.msk.f32.gmra.mrb[114].mxu1 %vm12791_vm14, %v13051_v24  ;;  %vm13082_vm14 = vmmov %vm13079_vm4 }
0x16b1   : > { %7864 = vmatpush1.bf16.msk.msra.mxu1 %vm8878_vm10, %v13054_v48  ;;  %vm13074_vm10 = vnez %v13073_v55 }
0x16b2   : > { %7865 = vmatprep.subr.bf16.mxu1 %v13050_v42 }
0x16b5   : > { %7867 = vmatpush1.bf16.msk.msra.mxu1 %vm12188_vm1, %v13054_v48  ;;  %vm13076_vm1 = vnez %v13075_v52 }
0x16b6   : > { %7868 = vmatprep.subr.bf16.mxu1 %v13050_v42 }
0x16b9   : > { %7870 = vmatpush1.bf16.msk.msra.mxu1 %vm13068_vm13, %v13054_v48  ;;  %vm13089_vm13 = vmmov %vm13079_vm4 }
0x16ba   : > { %7871 = vmatprep.subr.bf16.mxu1 %v13050_v42 }
0x16bd   : > { %7873 = vmatpush1.bf16.msk.msra.mxu1 %vm13070_vm8, %v13054_v48  ;;  %vm13090_vm8 = vmmov %vm13079_vm4 }
0x16be   : > { %7874 = vmatprep.subr.bf16.mxu1 %v13050_v42 }
0x16c1   : > { %7876 = vmatpush1.bf16.msk.msra.mxu1 %vm13072_vm3, %v13054_v48  ;;  %vm13091_vm3 = vmmov %vm13079_vm4 }
0x16c2   : > { %7877 = vmatprep.subr.bf16.mxu1 %v13050_v42 }
0x16c5   : > { %7879 = vmatpush1.bf16.msk.msra.mxu1 %vm13074_vm10, %v13054_v48 }
0x16c6   : > { %7880 = vmatprep.subr.bf16.mxu1 %v13050_v42 }
0x16c9   : > { %7882 = vmatpush1.bf16.msk.msra.mxu1 %vm13076_vm1, %v13054_v48 }
0x16ca   : > { %7376 = vmatprep.subr.msk.mxu1 %vm13078_vm0, %v13077_v31 }
0x1777   : > { %v6493_v14 = vpop.f32.mrb[108].mxu1 }
0x1778   : > { %v6495_v29 = vpop.f32.mrb[109].mxu1  ;;  %v6516_v43 = vmul.f32 %v6493_v14, %v6493_v14 }
0x1779   : > { %v6517_v22 = vmul.f32 %v6495_v29, %v6495_v29 }
0x177b   : > { %v6499_v18 = vpop.f32.mrb[110].mxu1  ;;  %7372 = vmatprep.mubr.msk.f32.mxu1 %vm13079_vm4, %v6517_v22 }
0x177c   : > { %v6501_v56 = vpop.f32.mrb[111].mxu1  ;;  %6601 = vmatmul.mubr.f32.vlgmr.msra.gmra.mrb[116].mxu1 %v6516_v43  ;;  %v6518_v59 = vmul.f32 %v6499_v18, %v6499_v18 }
0x177d   : > { %v6519_v41 = vmul.f32 %v6501_v56, %v6501_v56  ;;  %7377 = vmatpush1.msk.msra.mxu1 %vm13081_vm11, %v13080_v30 }
0x177f   : > { %v6505_v58 = vpop.f32.mrb[112].mxu1  ;;  %7373 = vmatprep.mubr.msk.f32.mxu1 %vm13082_vm14, %v6519_v41 }
0x1780   : > { %v6507_v1 = vpop.f32.mrb[113].mxu1  ;;  %6606 = vmatmul.mubr.f32.gmra.mrb[118].mxu1 %v6518_v59  ;;  %v6520_v27 = vmul.f32 %v6505_v58, %v6505_v58 }
0x1781   : > { %v6521_v12 = vmul.f32 %v6507_v1, %v6507_v1 }
0x1783   : > { %v6511_v11 = vpop.f32.mrb[114].mxu1  ;;  %7374 = vmatprep.mubr.msk.f32.mxu1 %vm13083_vm15, %v6521_v12 }
0x1784   : > { %v6513_v60 = vpop.f32.mrb[115].mxu1  ;;  %6611 = vmatmul.mubr.f32.gmra.mrb[120].mxu1 %v6520_v27  ;;  %v6522_v37 = vmul.f32 %v6511_v11, %v6511_v11 }
0x1785   : > { %v6523_v15 = vmul.f32 %v6513_v60, %v6513_v60 }
0x1787   : > { %7375 = vmatprep.mubr.msk.f32.mxu1 %vm13084_vm9, %v6523_v15 }
0x1788   : > { %6616 = vmatmul.mubr.f32.gmra.mrb[122].mxu1 %v6522_v37 }
0x1789   : > { %6701 = vmatprep.mubr.f32.mxu1 %v12179_v45 }
0x184f   : > { %v6602_v50 = vpop.f32.mrb[116].mxu1 }
0x1850   : > { %v6603_v19 = vadd.f32 1e-07, %v6602_v50  ;;  %v6604_v54 = vpop.f32.mrb[117].mxu1 }
0x1852   : > { %8309 = vrsqrt.f32 %v6603_v19 }
0x1853   : > { %v6607_v13 = vpop.f32.mrb[118].mxu1 }
0x1854   : > { %v6608_v51 = vadd.f32 1e-07, %v6607_v13  ;;  %v6609_v26 = vpop.f32.mrb[119].mxu1 }
0x1856   : > { %8311 = vrsqrt.f32 %v6608_v51 }
0x1857   : > { %v6612_v16 = vpop.f32.mrb[120].mxu1 }
0x1858   : > { %v6613_v0 = vadd.f32 1e-07, %v6612_v16  ;;  %v6614_v36 = vpop.f32.mrb[121].mxu1 }
0x185a   : > { %8313 = vrsqrt.f32 %v6613_v0 }
0x185b   : > { %v6617_v25 = vpop.f32.mrb[122].mxu1 }
0x185c   : > { %v8310_v32 = vpop.eup %8309  ;;  %v6618_v5 = vadd.f32 1e-07, %v6617_v25  ;;  %v6619_v7 = vpop.f32.mrb[123].mxu1 }
0x185d   : > { %7378 = vmatmul.mubr.msk.f32.vlgmr.msra.gmra.mrb[124].mxu1 %vm13085_vm7, %v8310_v32 }
0x185e   : > { %8315 = vrsqrt.f32 %v6618_v5  ;;  %6707 = vmatprep.mubr.f32.mxu1 %v12179_v45 }
0x1860   : > { %v8312_v34 = vpop.eup %8311 }
0x1861   : > { %7379 = vmatmul.mubr.msk.f32.gmra.mrb[126].mxu1 %vm13086_vm6, %v8312_v34 }
0x1862   : > { %6713 = vmatprep.mubr.f32.mxu1 %v12179_v45 }
0x1864   : > { %v8314_v40 = vpop.eup %8313 }
0x1865   : > { %7380 = vmatmul.mubr.msk.f32.gmra.mrb[128].mxu1 %vm13002_vm5, %v8314_v40 }
0x1866   : > { %6719 = vmatprep.mubr.f32.mxu1 %v12179_v45 }
0x1868   : > { %v8316_v49 = vpop.eup %8315 }
0x1869   : > { %7381 = vmatmul.mubr.msk.f32.gmra.mrb[130].mxu1 %vm13087_vm2, %v8316_v49 }
0x1930   : > { %v6703_v9 = vpop.f32.mrb[124].mxu1 }
0x1931   : > { %v6726_v38 = vmul.f32 %v6703_v9, %v6493_v14  ;;  %v6705_v35 = vpop.f32.mrb[125].mxu1 }
0x1932   : > { %v6727_v63 = vmul.f32 %v6705_v35, %v6495_v29 }
0x1933   : > { %6734 = vst [vmem:[%s147_s8] sm:$0xff] %v6726_v38 }
0x1934   : > { %6735 = vst.msk [vmem:[%s147_s8 + $0x8] sm:$0xff] %vm13088_vm12, %v6727_v63  ;;  %v6709_v45 = vpop.f32.mrb[126].mxu1 }
0x1935   : > { %v6728_v6 = vmul.f32 %v6709_v45, %v6499_v18  ;;  %v6711_v28 = vpop.f32.mrb[127].mxu1 }
0x1936   : > { %v6729_v33 = vmul.f32 %v6711_v28, %v6501_v56 }
0x1937   : > { %6736 = vst [vmem:[%s147_s8 + $0x10] sm:$0xff] %v6728_v6 }
0x1938   : > { %6737 = vst.msk [vmem:[%s147_s8 + $0x18] sm:$0xff] %vm13089_vm13, %v6729_v33  ;;  %v6715_v47 = vpop.f32.mrb[128].mxu1 }
0x1939   : > { %v6730_v17 = vmul.f32 %v6715_v47, %v6505_v58  ;;  %v6717_v42 = vpop.f32.mrb[129].mxu1 }
0x193a   : > { %v6731_v24 = vmul.f32 %v6717_v42, %v6507_v1 }
0x193b   : > { %6738 = vst [vmem:[%s147_s8 + $0x20] sm:$0xff] %v6730_v17 }
0x193c   : > { %6739 = vst.msk [vmem:[%s147_s8 + $0x28] sm:$0xff] %vm13090_vm8, %v6731_v24  ;;  %v6721_v61 = vpop.f32.mrb[130].mxu1 }
0x193d   : > { %v6732_v44 = vmul.f32 %v6721_v61, %v6511_v11  ;;  %v6723_v48 = vpop.f32.mrb[131].mxu1 }
0x193e   : > { %v6733_v62 = vmul.f32 %v6723_v48, %v6513_v60 }
0x193f   : > { %6740 = vst [vmem:[%s147_s8 + $0x30] sm:$0xff] %v6732_v44 }
0x1940   : > { %6741 = vst.msk [vmem:[%s147_s8 + $0x38] sm:$0xff] %vm13091_vm3, %v6733_v62 }
0x1941 PF: > { %s12_s9 = sadd.s32 1, %s8323_s9  }
0x1942   : > { %p9_p5 = scmp.ge.s32.totalorder %s12_s9, 4  }
0x1944   :  { %11 = sbr.rel (!%p9_p5) target bundleno = 1 (0x1), region = 58 }

</bundles_post_ra>
